<compile_context>
chip_gen: v5e
topology: v5e:2x2
jax: 0.10.0
libtpu: 0.0.40
codegen_flags: <defaults>
</compile_context>

<pallas_src>
import functools

import jax
import jax.numpy as jnp
from jax import lax
from jax.experimental import pallas as pl
from jax.experimental.pallas import tpu as pltpu


def _round_up(x, m):
    return ((x + m - 1) // m) * m


# ----------------------------------------------------------------------------
# Fused conv kernel: [pre-GN+ReLU] -> pad -> conv(+bias) -> [post-GN] -> [ReLU]
#                    -> [+skip] -> store
# ----------------------------------------------------------------------------

def fused_conv_kernel(*refs, kh, kw, padk, Hin, Win, Wp, Ho, Wo, Cout,
                      pre_gn, post_gn, relu_out, skip,
                      inv_n_in, inv_n_out, eps):
    it = iter(refs)
    x_ref = next(it)
    w_ref = next(it)
    b_ref = next(it)
    if pre_gn:
        gin_ref, bin_ref, Gin_ref, GinT_ref = next(it), next(it), next(it), next(it)
    if post_gn:
        gout_ref, bout_ref, Gout_ref, GoutT_ref = next(it), next(it), next(it), next(it)
    if skip:
        skip_ref = next(it)
    o_ref = next(it)
    xs_ref = next(it)          # VMEM scratch: flat zero-padded input slab (f32)

    # ---- stage 1: optional GroupNorm+ReLU on the (unpadded) input ----------
    xf = x_ref[0].astype(jnp.float32)                       # (Hin, Win, Cin)
    if pre_gn:
        s1 = jnp.sum(jnp.sum(xf, axis=0), axis=0, keepdims=True)        # (1,Cin)
        mean_g = jnp.dot(s1, Gin_ref[...],
                         preferred_element_type=jnp.float32) * inv_n_in
        mean_c = jnp.dot(mean_g, GinT_ref[...],
                         preferred_element_type=jnp.float32)            # (1,Cin)
        dx = xf - mean_c
        s2 = jnp.sum(jnp.sum(dx * dx, axis=0), axis=0, keepdims=True)
        var_g = jnp.dot(s2, Gin_ref[...],
                        preferred_element_type=jnp.float32) * inv_n_in
        inv_c = jnp.dot(lax.rsqrt(var_g + eps), GinT_ref[...],
                        preferred_element_type=jnp.float32)
        xf = jnp.maximum(dx * inv_c * gin_ref[...] + bin_ref[...], 0.0)

    # ---- stage 2: pack into zero-padded flat scratch (rows = spatial) ------
    xs_ref[...] = jnp.zeros(xs_ref.shape, xs_ref.dtype)
    for h in range(Hin):
        r0 = (h + padk) * Wp + padk
        xs_ref[r0:r0 + Win, :] = xf[h]

    # ---- stage 3: conv as accumulated shifted matmuls (bf16 MXU, f32 acc) --
    Mo = Ho * Wp
    acc = jnp.zeros((Mo, Cout), jnp.float32)
    for i in range(kh):
        for j in range(kw):
            t0 = i * Wp + j
            a_bf = xs_ref[t0:t0 + Mo, :].astype(jnp.bfloat16)
            acc = acc + jnp.dot(a_bf, w_ref[i * kw + j],
                                preferred_element_type=jnp.float32)
    acc = acc + b_ref[...]                                  # (1, Cout) bcast

    # ---- stage 4: optional post-GroupNorm (stats over valid columns only) --
    if post_gn:
        # column within its output row; valid iff < Wo (single masked reduce
        # instead of Ho unrolled slice-sums).
        colw = lax.broadcasted_iota(jnp.int32, (Mo, 1), 0) % Wp
        vmask = (colw < Wo).astype(jnp.float32)             # (Mo, 1)
        s1 = jnp.sum(acc * vmask, axis=0, keepdims=True)    # (1, Cout)
        mean_g = jnp.dot(s1, Gout_ref[...],
                         preferred_element_type=jnp.float32) * inv_n_out
        mean_c = jnp.dot(mean_g, GoutT_ref[...],
                         preferred_element_type=jnp.float32)
        dcc = acc - mean_c
        s2 = jnp.sum(dcc * dcc * vmask, axis=0, keepdims=True)
        var_g = jnp.dot(s2, Gout_ref[...],
                        preferred_element_type=jnp.float32) * inv_n_out
        inv_c = jnp.dot(lax.rsqrt(var_g + eps), GoutT_ref[...],
                        preferred_element_type=jnp.float32)
        acc = dcc * inv_c * gout_ref[...] + bout_ref[...]
    if relu_out:
        acc = jnp.maximum(acc, 0.0)

    # ---- stage 5: write valid columns (+ optional residual) ----------------
    for ho in range(Ho):
        y = acc[ho * Wp:ho * Wp + Wo, :]
        if skip:
            y = y + skip_ref[0, ho, :, :].astype(jnp.float32)
        o_ref[0, ho, :, :] = y.astype(o_ref.dtype)


def fused_conv(x, w_taps, b, *, kh, kw, padk, relu_out=False,
               pre_gn=None, post_gn=None, skip=None):
    """x: (B,Hin,Win,Cin) f32, w_taps: (kh*kw,Cin,Cout), b: (Cout,)."""
    B, Hin, Win, Cin = x.shape
    Cout = w_taps.shape[-1]
    Hp, Wp = Hin + 2 * padk, Win + 2 * padk
    Ho, Wo = Hp - kh + 1, Wp - kw + 1

    in_specs = [
        pl.BlockSpec((1, Hin, Win, Cin), lambda bi: (bi, 0, 0, 0)),
        pl.BlockSpec((kh * kw, Cin, Cout), lambda bi: (0, 0, 0)),
        pl.BlockSpec((1, Cout), lambda bi: (0, 0)),
    ]
    args = [x, w_taps.astype(jnp.bfloat16), b.reshape(1, Cout).astype(jnp.float32)]

    def add_gn(gn, C):
        ng = gn['G'].shape[1]
        in_specs.extend([pl.BlockSpec((1, C), lambda bi: (0, 0)),
                         pl.BlockSpec((1, C), lambda bi: (0, 0)),
                         pl.BlockSpec((C, ng), lambda bi: (0, 0)),
                         pl.BlockSpec((ng, C), lambda bi: (0, 0))])
        args.extend([gn['gamma'].reshape(1, C).astype(jnp.float32),
                     gn['beta'].reshape(1, C).astype(jnp.float32),
                     gn['G'], gn['G'].T])

    if pre_gn is not None:
        add_gn(pre_gn, Cin)
    if post_gn is not None:
        add_gn(post_gn, Cout)
    if skip is not None:
        in_specs.append(pl.BlockSpec((1, Ho, Wo, Cout), lambda bi: (bi, 0, 0, 0)))
        args.append(skip)

    kernel = functools.partial(
        fused_conv_kernel, kh=kh, kw=kw, padk=padk, Hin=Hin, Win=Win,
        Wp=Wp, Ho=Ho, Wo=Wo, Cout=Cout,
        pre_gn=pre_gn is not None, post_gn=post_gn is not None,
        relu_out=relu_out, skip=skip is not None,
        inv_n_in=pre_gn['inv_n'] if pre_gn is not None else 1.0,
        inv_n_out=post_gn['inv_n'] if post_gn is not None else 1.0,
        eps=1e-5)

    cost = pl.CostEstimate(
        flops=2 * B * Ho * Wp * Cin * Cout * kh * kw,
        transcendentals=0,
        bytes_accessed=int(4 * (x.size + B * Ho * Wo * Cout) + 2 * w_taps.size))

    return pl.pallas_call(
        kernel,
        out_shape=jax.ShapeDtypeStruct((B, Ho, Wo, Cout), jnp.float32),
        grid=(B,),
        in_specs=in_specs,
        out_specs=pl.BlockSpec((1, Ho, Wo, Cout), lambda bi: (bi, 0, 0, 0)),
        scratch_shapes=[pltpu.VMEM((_round_up(Hp * Wp + kw, 8), Cin),
                                   jnp.float32)],
        compiler_params=pltpu.CompilerParams(
            dimension_semantics=("parallel",),
            vmem_limit_bytes=32 * 1024 * 1024),
        cost_estimate=cost,
    )(*args)


# ----------------------------------------------------------------------------
# GroupNorm descriptor (one-hot group matrix + affine params + 1/count)
# ----------------------------------------------------------------------------

def make_gn(gamma, beta, groups, n_spatial, tile=1):
    C = gamma.shape[0]
    cg = C // groups
    G = (jnp.arange(C)[:, None] // cg ==
         jnp.arange(groups)[None, :]).astype(jnp.float32)
    if tile > 1:      # sub-pixel layout: channels repeated `tile` times
        G = jnp.tile(G, (tile, 1))
        gamma = jnp.tile(gamma, (tile,))
        beta = jnp.tile(beta, (tile,))
    return dict(gamma=gamma, beta=beta, G=G,
                inv_n=1.0 / float(n_spatial * cg * tile))


# ----------------------------------------------------------------------------
# Layer wrappers (stride handling / sub-pixel decomposition in plain JAX,
# everything heavy inside the fused Pallas kernel)
# ----------------------------------------------------------------------------

def conv_stride1(x, w, b, *, relu_out=False, pre_gn=None, post_gn=None, skip=None):
    kh, kw, cin, cout = w.shape
    return fused_conv(x, w.reshape(kh * kw, cin, cout), b, kh=kh, kw=kw,
                      padk=(kh - 1) // 2, relu_out=relu_out,
                      pre_gn=pre_gn, post_gn=post_gn, skip=skip)


def conv_down4x4_s2(x, w, b, gamma, beta, groups):
    """Conv2d(4,4,s=2,p=1) + GroupNorm + ReLU via space-to-depth + fused 2x2 conv."""
    B, H, W, C = x.shape
    cout = w.shape[-1]
    xp = jnp.pad(x, ((0, 0), (1, 1), (1, 1), (0, 0)))
    H2, W2 = (H + 2) // 2, (W + 2) // 2
    xs = xp.reshape(B, H2, 2, W2, 2, C).transpose(0, 1, 3, 2, 4, 5)
    xs = xs.reshape(B, H2, W2, 4 * C)
    # (i,j,ci,co) -> (di,dj,(pi,pj,ci),co), i = 2*di+pi, j = 2*dj+pj
    w2 = w.reshape(2, 2, 2, 2, C, cout).transpose(0, 2, 1, 3, 4, 5)
    w2 = w2.reshape(4, 4 * C, cout)
    Ho, Wo = H // 2, W // 2
    gn = make_gn(gamma, beta, groups, Ho * Wo)
    return fused_conv(xs, w2, b, kh=2, kw=2, padk=0, relu_out=True, post_gn=gn)


def conv_transpose4x4_s2(x, w, b, gamma=None, beta=None, groups=None,
                         relu_out=False):
    """ConvTranspose2d(4,4,s=2,p=1) (+GN+ReLU) via sub-pixel 3x3 conv + d2s."""
    B, H, W, cin = x.shape
    cout = w.shape[-1]
    wp = jnp.pad(w, ((1, 1), (1, 1), (0, 0), (0, 0)))
    subs = [wp[1 - r::2, 1 - c::2, :, :]            # (3,3,cin,cout) per (r,c)
            for r in range(2) for c in range(2)]
    w3 = jnp.concatenate(subs, axis=-1).reshape(9, cin, 4 * cout)
    post = None
    if gamma is not None:
        post = make_gn(gamma, beta, groups, H * W, tile=4)
    y = fused_conv(x, w3, jnp.tile(b, (4,)), kh=3, kw=3, padk=1,
                   relu_out=relu_out, post_gn=post)          # (B,H,W,4*cout)
    y = y.reshape(B, H, W, 2, 2, cout).transpose(0, 1, 3, 2, 4, 5)
    return y.reshape(B, 2 * H, 2 * W, cout)


def resblock(x, p, groups):
    B, H, W, C = x.shape
    gn1 = make_gn(p['g1'], p['be1'], groups, H * W)
    gn2 = make_gn(p['g2'], p['be2'], groups, H * W)
    h = conv_stride1(x, p['w1'], p['b1'], pre_gn=gn1)            # GN+ReLU+conv
    return conv_stride1(h, p['w2'], p['b2'], pre_gn=gn2, skip=x)  # +residual


# ----------------------------------------------------------------------------
# Vector quantizer kernel (tiled over M, resident lane-padded codebook,
# cached |e|^2, loss / code-count accumulators across the grid)
# ----------------------------------------------------------------------------

def vq_kernel(z_ref, emb_ref, q_ref, idx_ref, loss_ref, cnt_ref, esq_ref,
              *, K, Kp, M, tm):
    pid = pl.program_id(0)

    @pl.when(pid == 0)
    def _init():
        loss_ref[...] = jnp.zeros_like(loss_ref)
        cnt_ref[...] = jnp.zeros_like(cnt_ref)
        e0 = emb_ref[...]
        esq_ref[...] = lax.dot_general(                      # |e_k|^2, (1, Kp)
            jnp.ones((1, e0.shape[1]), jnp.float32), e0 * e0,
            (((1,), (1,)), ((), ())), preferred_element_type=jnp.float32)

    z = z_ref[...].astype(jnp.float32)                      # (tm, D)
    e = emb_ref[...]                                        # (Kp, D) f32
    cross = lax.dot_general(z.astype(jnp.bfloat16), e.astype(jnp.bfloat16),
                            (((1,), (1,)), ((), ())),
                            preferred_element_type=jnp.float32)       # (tm,Kp)
    z_sq = jnp.sum(z * z, axis=1, keepdims=True)                      # (tm,1)
    d = z_sq - 2.0 * cross + esq_ref[...]
    col = lax.broadcasted_iota(jnp.int32, d.shape, 1)
    d = jnp.where(col < K, d, jnp.inf)                      # mask padded codes
    d_min = jnp.min(d, axis=1, keepdims=True)
    idx = jnp.min(jnp.where(d <= d_min, col, Kp), axis=1, keepdims=True)
    onehot = (col == idx).astype(jnp.float32)               # (tm, Kp)
    q = jnp.dot(onehot, e, preferred_element_type=jnp.float32)  # exact gather
    q_ref[...] = q
    idx_ref[...] = idx

    row = lax.broadcasted_iota(jnp.int32, (tm, 1), 0) + pid * tm
    valid = (row < M).astype(jnp.float32)
    diff = (q - z) * valid
    loss_ref[...] += jnp.sum(diff * diff).reshape(1, 1)
    cnt_ref[...] += jnp.sum(onehot * valid, axis=0, keepdims=True)


def run_vq(z_flat, emb):
    M, D = z_flat.shape
    K = emb.shape[0]
    Kp = _round_up(max(K, 128), 128)
    emb_p = jnp.pad(emb.astype(jnp.float32), ((0, Kp - K), (0, 0)))
    tm = min(512, _round_up(max(M // 2, 8), 8))
    Mp = _round_up(M, tm)
    zp = jnp.pad(z_flat, ((0, Mp - M), (0, 0)))
    n_tiles = Mp // tm

    q, idx, loss_sum, counts = pl.pallas_call(
        functools.partial(vq_kernel, K=K, Kp=Kp, M=M, tm=tm),
        out_shape=(jax.ShapeDtypeStruct((Mp, D), jnp.float32),
                   jax.ShapeDtypeStruct((Mp, 1), jnp.int32),
                   jax.ShapeDtypeStruct((1, 1), jnp.float32),
                   jax.ShapeDtypeStruct((1, Kp), jnp.float32)),
        grid=(n_tiles,),
        in_specs=[pl.BlockSpec((tm, D), lambda i: (i, 0)),
                  pl.BlockSpec((Kp, D), lambda i: (0, 0))],
        out_specs=(pl.BlockSpec((tm, D), lambda i: (i, 0)),
                   pl.BlockSpec((tm, 1), lambda i: (i, 0)),
                   pl.BlockSpec((1, 1), lambda i: (0, 0)),
                   pl.BlockSpec((1, Kp), lambda i: (0, 0))),
        scratch_shapes=[pltpu.VMEM((1, Kp), jnp.float32)],
        compiler_params=pltpu.CompilerParams(
            dimension_semantics=("arbitrary",),
            vmem_limit_bytes=32 * 1024 * 1024),
        cost_estimate=pl.CostEstimate(
            flops=4 * Mp * Kp * D,
            transcendentals=0,
            bytes_accessed=int(4 * (zp.size + emb_p.size + Mp * D + Mp + Kp))),
    )(zp, emb_p)
    return q[:M], idx[:M], loss_sum[0, 0], counts[0, :K]


# ----------------------------------------------------------------------------
# VQ-VAE forward
# ----------------------------------------------------------------------------

def vqvae_forward(params, x_nchw, *, groups, beta):
    x = jnp.transpose(x_nchw, (0, 2, 3, 1)).astype(jnp.float32)   # NCHW -> NHWC
    # ---- encoder ----
    h = x
    for lyr in params['enc']['down']:
        h = conv_down4x4_s2(h, lyr['w'], lyr['b'], lyr['gamma'], lyr['beta'],
                            groups)
    for rb in params['enc']['res']:
        h = resblock(h, rb, groups)
    z = conv_stride1(h, params['enc']['w_out'], params['enc']['b_out'])
    B, Hl, Wl, D = z.shape
    # ---- vector quantizer (EMA variant, forward semantics) ----
    z_flat = z.reshape(B * Hl * Wl, D)
    q_flat, idx, loss_sum, counts = run_vq(z_flat, params['emb'])
    M = B * Hl * Wl
    e_latent_loss = loss_sum / (M * D)                 # mse(sg(q), z)
    loss = beta * e_latent_loss
    avg_probs = counts / M
    perplexity = jnp.exp(-jnp.sum(avg_probs * jnp.log(avg_probs + 1e-10)))
    q = z + lax.stop_gradient(q_flat.reshape(z.shape) - z)   # straight-through
    encoding_indices = idx.reshape(B, Hl, Wl)
    # ---- decoder ----
    d = conv_stride1(q, params['dec']['w_in'], params['dec']['b_in'])
    for rb in params['dec']['res']:
        d = resblock(d, rb, groups)
    for lyr in params['dec']['up']:
        d = conv_transpose4x4_s2(d, lyr['w'], lyr['b'], lyr['gamma'],
                                 lyr['beta'], groups, relu_out=True)
    x_rec = conv_transpose4x4_s2(d, params['dec']['w_out'],
                                 params['dec']['b_out'])
    x_rec = jnp.transpose(x_rec, (0, 3, 1, 2))          # NHWC -> NCHW
    return loss, x_rec, encoding_indices, perplexity


# ----------------------------------------------------------------------------
# Deterministic synthetic parameter init
# ----------------------------------------------------------------------------

def init_params(key, input_channels, output_channels, channels, num_resblock,
                num_emb, emb_dim):
    kit = iter(jax.random.split(key, 128))

    def conv_w(kh, kw, cin, cout):
        fan = float(kh * kw * cin)
        return (jax.random.normal(next(kit), (kh, kw, cin, cout), jnp.float32)
                / jnp.sqrt(fan))

    def gn(c):
        return jnp.ones((c,), jnp.float32), jnp.zeros((c,), jnp.float32)

    def res(c):
        g1, be1 = gn(c)
        g2, be2 = gn(c)
        return dict(g1=g1, be1=be1, w1=conv_w(3, 3, c, c),
                    b1=jnp.zeros((c,), jnp.float32),
                    g2=g2, be2=be2, w2=conv_w(3, 3, c, c),
                    b2=jnp.zeros((c,), jnp.float32))

    enc_down = []
    cin = input_channels
    for c in channels:
        gamma, beta = gn(c)
        enc_down.append(dict(w=conv_w(4, 4, cin, c),
                             b=jnp.zeros((c,), jnp.float32),
                             gamma=gamma, beta=beta))
        cin = c
    enc = dict(down=enc_down,
               res=[res(channels[-1]) for _ in range(num_resblock)],
               w_out=conv_w(1, 1, channels[-1], emb_dim),
               b_out=jnp.zeros((emb_dim,), jnp.float32))

    rev = channels[::-1]
    dec_up = []
    cin = rev[0]
    for c in rev[1:]:
        gamma, beta = gn(c)
        dec_up.append(dict(w=conv_w(4, 4, cin, c),
                           b=jnp.zeros((c,), jnp.float32),
                           gamma=gamma, beta=beta))
        cin = c
    dec = dict(w_in=conv_w(1, 1, emb_dim, rev[0]),
               b_in=jnp.zeros((rev[0],), jnp.float32),
               res=[res(rev[0]) for _ in range(num_resblock)],
               up=dec_up,
               w_out=conv_w(4, 4, cin, output_channels),
               b_out=jnp.zeros((output_channels,), jnp.float32))

    emb = (jax.random.uniform(next(kit), (num_emb, emb_dim), jnp.float32,
                              minval=-1.0, maxval=1.0) / num_emb)
    return dict(enc=enc, dec=dec, emb=emb)


# ----------------------------------------------------------------------------

if __name__ == "__main__":
    key = jax.random.PRNGKey(0)
    kp, kx = jax.random.split(key)

    input_channels, output_channels = 3, 3
    channels = [8, 16]
    num_resblock = 1
    num_emb = 32
    emb_dim = 16
    beta = 0.25
    groups = 4

    params = init_params(kp, input_channels, output_channels, channels,
                         num_resblock, num_emb, emb_dim)
    x = jax.random.normal(kx, (2, input_channels, 16, 16), jnp.float32)  # NCHW

    fwd = jax.jit(functools.partial(vqvae_forward, groups=groups, beta=beta))
    loss, x_rec, encoding_indices, perplexity = fwd(params, x)
    jax.block_until_ready((loss, x_rec, encoding_indices, perplexity))

    assert x_rec.shape == (2, output_channels, 16, 16)
    assert encoding_indices.shape == (2, 4, 4)
    assert bool(jnp.isfinite(loss)) and bool(jnp.isfinite(perplexity))
    print("KERNEL_OK")
</pallas_src>

<mosaic_0001>
module attributes {stable_mosaic.version = 11 : i64} {
  func.func @fused_conv_kernel(%arg0: i32, %arg1: memref<1x9x9x12xf32, #tpu.memory_space<vmem>>, %arg2: memref<4x12x8xbf16, #tpu.memory_space<vmem>>, %arg3: memref<1x8xf32, #tpu.memory_space<vmem>>, %arg4: memref<1x8xf32, #tpu.memory_space<vmem>>, %arg5: memref<1x8xf32, #tpu.memory_space<vmem>>, %arg6: memref<8x4xf32, #tpu.memory_space<vmem>>, %arg7: memref<4x8xf32, #tpu.memory_space<vmem>>, %arg8: memref<1x8x8x8xf32, #tpu.memory_space<vmem>>, %arg9: memref<88x12xf32, #tpu.memory_space<vmem>>) attributes {dimension_semantics = [#tpu.dimension_semantics<parallel>], iteration_bounds = array<i64: 2>, scalar_prefetch = 0 : i64, scratch_operands = 1 : i64, tpu.core_type = #tpu.core_type<tc>, window_params = [{transform_indices = @transform_0, window_bounds = array<i64: 1, 9, 9, 12>}, {pipeline_mode = #tpu.pipeline_mode<synchronous>, transform_indices = @transform_1, window_bounds = array<i64: 4, 12, 8>}, {pipeline_mode = #tpu.pipeline_mode<synchronous>, transform_indices = @transform_2, window_bounds = array<i64: 1, 8>}, {pipeline_mode = #tpu.pipeline_mode<synchronous>, transform_indices = @transform_3, window_bounds = array<i64: 1, 8>}, {pipeline_mode = #tpu.pipeline_mode<synchronous>, transform_indices = @transform_4, window_bounds = array<i64: 1, 8>}, {pipeline_mode = #tpu.pipeline_mode<synchronous>, transform_indices = @transform_5, window_bounds = array<i64: 8, 4>}, {pipeline_mode = #tpu.pipeline_mode<synchronous>, transform_indices = @transform_6, window_bounds = array<i64: 4, 8>}, {transform_indices = @transform_7, window_bounds = array<i64: 1, 8, 8, 8>}]} {
    %c0 = arith.constant 0 : index
    %c0_0 = arith.constant 0 : index
    %c0_1 = arith.constant 0 : index
    %c0_2 = arith.constant 0 : index
    %0 = vector.load %arg1[%c0, %c0_0, %c0_1, %c0_2] : memref<1x9x9x12xf32, #tpu.memory_space<vmem>>, vector<1x9x9x12xf32>
    %1 = vector.shape_cast %0 : vector<1x9x9x12xf32> to vector<9x9x12xf32>
    %cst = arith.constant 0.000000e+00 : f32
    %2 = vector.broadcast %cst : f32 to vector<88x12xf32>
    %c0_3 = arith.constant 0 : index
    %c0_4 = arith.constant 0 : index
    %3 = vector.load %arg9[%c0_3, %c0_4] : memref<88x12xf32, #tpu.memory_space<vmem>>, vector<88x12xf32>
    tpu.vector_store %arg9[%c0_3, %c0_4], %2 {strides = array<i32>} : memref<88x12xf32, #tpu.memory_space<vmem>>, vector<88x12xf32>,
    %4 = vector.extract_strided_slice %1 {offsets = [0, 0, 0], sizes = [1, 9, 12], strides = [1, 1, 1]} : vector<9x9x12xf32> to vector<1x9x12xf32>
    %5 = vector.shape_cast %4 : vector<1x9x12xf32> to vector<9x12xf32>
    %c0_5 = arith.constant 0 : index
    %c0_6 = arith.constant 0 : index
    %6 = vector.load %arg9[%c0_5, %c0_6] : memref<88x12xf32, #tpu.memory_space<vmem>>, vector<9x12xf32>
    tpu.vector_store %arg9[%c0_5, %c0_6], %5 {strides = array<i32>} : memref<88x12xf32, #tpu.memory_space<vmem>>, vector<9x12xf32>,
    %7 = vector.extract_strided_slice %1 {offsets = [1, 0, 0], sizes = [1, 9, 12], strides = [1, 1, 1]} : vector<9x9x12xf32> to vector<1x9x12xf32>
    %8 = vector.shape_cast %7 : vector<1x9x12xf32> to vector<9x12xf32>
    %c9 = arith.constant 9 : index
    %c0_7 = arith.constant 0 : index
    %9 = vector.load %arg9[%c9, %c0_7] : memref<88x12xf32, #tpu.memory_space<vmem>>, vector<9x12xf32>
    tpu.vector_store %arg9[%c9, %c0_7], %8 {strides = array<i32>} : memref<88x12xf32, #tpu.memory_space<vmem>>, vector<9x12xf32>,
    %10 = vector.extract_strided_slice %1 {offsets = [2, 0, 0], sizes = [1, 9, 12], strides = [1, 1, 1]} : vector<9x9x12xf32> to vector<1x9x12xf32>
    %11 = vector.shape_cast %10 : vector<1x9x12xf32> to vector<9x12xf32>
    %c18 = arith.constant 18 : index
    %c0_8 = arith.constant 0 : index
    %12 = vector.load %arg9[%c18, %c0_8] : memref<88x12xf32, #tpu.memory_space<vmem>>, vector<9x12xf32>
    tpu.vector_store %arg9[%c18, %c0_8], %11 {strides = array<i32>} : memref<88x12xf32, #tpu.memory_space<vmem>>, vector<9x12xf32>,
    %13 = vector.extract_strided_slice %1 {offsets = [3, 0, 0], sizes = [1, 9, 12], strides = [1, 1, 1]} : vector<9x9x12xf32> to vector<1x9x12xf32>
    %14 = vector.shape_cast %13 : vector<1x9x12xf32> to vector<9x12xf32>
    %c27 = arith.constant 27 : index
    %c0_9 = arith.constant 0 : index
    %15 = vector.load %arg9[%c27, %c0_9] : memref<88x12xf32, #tpu.memory_space<vmem>>, vector<9x12xf32>
    tpu.vector_store %arg9[%c27, %c0_9], %14 {strides = array<i32>} : memref<88x12xf32, #tpu.memory_space<vmem>>, vector<9x12xf32>,
    %16 = vector.extract_strided_slice %1 {offsets = [4, 0, 0], sizes = [1, 9, 12], strides = [1, 1, 1]} : vector<9x9x12xf32> to vector<1x9x12xf32>
    %17 = vector.shape_cast %16 : vector<1x9x12xf32> to vector<9x12xf32>
    %c36 = arith.constant 36 : index
    %c0_10 = arith.constant 0 : index
    %18 = vector.load %arg9[%c36, %c0_10] : memref<88x12xf32, #tpu.memory_space<vmem>>, vector<9x12xf32>
    tpu.vector_store %arg9[%c36, %c0_10], %17 {strides = array<i32>} : memref<88x12xf32, #tpu.memory_space<vmem>>, vector<9x12xf32>,
    %19 = vector.extract_strided_slice %1 {offsets = [5, 0, 0], sizes = [1, 9, 12], strides = [1, 1, 1]} : vector<9x9x12xf32> to vector<1x9x12xf32>
    %20 = vector.shape_cast %19 : vector<1x9x12xf32> to vector<9x12xf32>
    %c45 = arith.constant 45 : index
    %c0_11 = arith.constant 0 : index
    %21 = vector.load %arg9[%c45, %c0_11] : memref<88x12xf32, #tpu.memory_space<vmem>>, vector<9x12xf32>
    tpu.vector_store %arg9[%c45, %c0_11], %20 {strides = array<i32>} : memref<88x12xf32, #tpu.memory_space<vmem>>, vector<9x12xf32>,
    %22 = vector.extract_strided_slice %1 {offsets = [6, 0, 0], sizes = [1, 9, 12], strides = [1, 1, 1]} : vector<9x9x12xf32> to vector<1x9x12xf32>
    %23 = vector.shape_cast %22 : vector<1x9x12xf32> to vector<9x12xf32>
    %c54 = arith.constant 54 : index
    %c0_12 = arith.constant 0 : index
    %24 = vector.load %arg9[%c54, %c0_12] : memref<88x12xf32, #tpu.memory_space<vmem>>, vector<9x12xf32>
    tpu.vector_store %arg9[%c54, %c0_12], %23 {strides = array<i32>} : memref<88x12xf32, #tpu.memory_space<vmem>>, vector<9x12xf32>,
    %25 = vector.extract_strided_slice %1 {offsets = [7, 0, 0], sizes = [1, 9, 12], strides = [1, 1, 1]} : vector<9x9x12xf32> to vector<1x9x12xf32>
    %26 = vector.shape_cast %25 : vector<1x9x12xf32> to vector<9x12xf32>
    %c63 = arith.constant 63 : index
    %c0_13 = arith.constant 0 : index
    %27 = vector.load %arg9[%c63, %c0_13] : memref<88x12xf32, #tpu.memory_space<vmem>>, vector<9x12xf32>
    tpu.vector_store %arg9[%c63, %c0_13], %26 {strides = array<i32>} : memref<88x12xf32, #tpu.memory_space<vmem>>, vector<9x12xf32>,
    %28 = vector.extract_strided_slice %1 {offsets = [8, 0, 0], sizes = [1, 9, 12], strides = [1, 1, 1]} : vector<9x9x12xf32> to vector<1x9x12xf32>
    %29 = vector.shape_cast %28 : vector<1x9x12xf32> to vector<9x12xf32>
    %c72 = arith.constant 72 : index
    %c0_14 = arith.constant 0 : index
    %30 = vector.load %arg9[%c72, %c0_14] : memref<88x12xf32, #tpu.memory_space<vmem>>, vector<9x12xf32>
    tpu.vector_store %arg9[%c72, %c0_14], %29 {strides = array<i32>} : memref<88x12xf32, #tpu.memory_space<vmem>>, vector<9x12xf32>,
    %cst_15 = arith.constant 0.000000e+00 : f32
    %31 = vector.broadcast %cst_15 : f32 to vector<72x8xf32>
    %c0_16 = arith.constant 0 : index
    %c0_17 = arith.constant 0 : index
    %32 = vector.load %arg9[%c0_16, %c0_17] : memref<88x12xf32, #tpu.memory_space<vmem>>, vector<72x12xf32>
    %33 = arith.truncf %32 : vector<72x12xf32> to vector<72x12xbf16>
    %c0_18 = arith.constant 0 : index
    %c0_19 = arith.constant 0 : index
    %c0_20 = arith.constant 0 : index
    %34 = vector.load %arg2[%c0_18, %c0_19, %c0_20] : memref<4x12x8xbf16, #tpu.memory_space<vmem>>, vector<1x12x8xbf16>
    %35 = vector.shape_cast %34 : vector<1x12x8xbf16> to vector<12x8xbf16>
    %cst_21 = arith.constant dense<0.000000e+00> : vector<72x8xf32>
    %36 = tpu.matmul %33, %35, %cst_21 {dimension_numbers = #tpu.dot_dimension_numbers<[1], [0], [0], [1], [0, 0, 1, 1], [], []>} : vector<72x12xbf16>, vector<12x8xbf16>, vector<72x8xf32> -> vector<72x8xf32>
    %37 = arith.addf %31, %36 : vector<72x8xf32>
    %c1 = arith.constant 1 : index
    %c0_22 = arith.constant 0 : index
    %38 = vector.load %arg9[%c1, %c0_22] : memref<88x12xf32, #tpu.memory_space<vmem>>, vector<72x12xf32>
    %39 = arith.truncf %38 : vector<72x12xf32> to vector<72x12xbf16>
    %c1_23 = arith.constant 1 : index
    %c0_24 = arith.constant 0 : index
    %c0_25 = arith.constant 0 : index
    %40 = vector.load %arg2[%c1_23, %c0_24, %c0_25] : memref<4x12x8xbf16, #tpu.memory_space<vmem>>, vector<1x12x8xbf16>
    %41 = vector.shape_cast %40 : vector<1x12x8xbf16> to vector<12x8xbf16>
    %cst_26 = arith.constant dense<0.000000e+00> : vector<72x8xf32>
    %42 = tpu.matmul %39, %41, %cst_26 {dimension_numbers = #tpu.dot_dimension_numbers<[1], [0], [0], [1], [0, 0, 1, 1], [], []>} : vector<72x12xbf16>, vector<12x8xbf16>, vector<72x8xf32> -> vector<72x8xf32>
    %43 = arith.addf %37, %42 : vector<72x8xf32>
    %c9_27 = arith.constant 9 : index
    %c0_28 = arith.constant 0 : index
    %44 = vector.load %arg9[%c9_27, %c0_28] : memref<88x12xf32, #tpu.memory_space<vmem>>, vector<72x12xf32>
    %45 = arith.truncf %44 : vector<72x12xf32> to vector<72x12xbf16>
    %c2 = arith.constant 2 : index
    %c0_29 = arith.constant 0 : index
    %c0_30 = arith.constant 0 : index
    %46 = vector.load %arg2[%c2, %c0_29, %c0_30] : memref<4x12x8xbf16, #tpu.memory_space<vmem>>, vector<1x12x8xbf16>
    %47 = vector.shape_cast %46 : vector<1x12x8xbf16> to vector<12x8xbf16>
    %cst_31 = arith.constant dense<0.000000e+00> : vector<72x8xf32>
    %48 = tpu.matmul %45, %47, %cst_31 {dimension_numbers = #tpu.dot_dimension_numbers<[1], [0], [0], [1], [0, 0, 1, 1], [], []>} : vector<72x12xbf16>, vector<12x8xbf16>, vector<72x8xf32> -> vector<72x8xf32>
    %49 = arith.addf %43, %48 : vector<72x8xf32>
    %c10 = arith.constant 10 : index
    %c0_32 = arith.constant 0 : index
    %50 = vector.load %arg9[%c10, %c0_32] : memref<88x12xf32, #tpu.memory_space<vmem>>, vector<72x12xf32>
    %51 = arith.truncf %50 : vector<72x12xf32> to vector<72x12xbf16>
    %c3 = arith.constant 3 : index
    %c0_33 = arith.constant 0 : index
    %c0_34 = arith.constant 0 : index
    %52 = vector.load %arg2[%c3, %c0_33, %c0_34] : memref<4x12x8xbf16, #tpu.memory_space<vmem>>, vector<1x12x8xbf16>
    %53 = vector.shape_cast %52 : vector<1x12x8xbf16> to vector<12x8xbf16>
    %cst_35 = arith.constant dense<0.000000e+00> : vector<72x8xf32>
    %54 = tpu.matmul %51, %53, %cst_35 {dimension_numbers = #tpu.dot_dimension_numbers<[1], [0], [0], [1], [0, 0, 1, 1], [], []>} : vector<72x12xbf16>, vector<12x8xbf16>, vector<72x8xf32> -> vector<72x8xf32>
    %55 = arith.addf %49, %54 : vector<72x8xf32>
    %c0_36 = arith.constant 0 : index
    %c0_37 = arith.constant 0 : index
    %56 = vector.load %arg3[%c0_36, %c0_37] : memref<1x8xf32, #tpu.memory_space<vmem>>, vector<1x8xf32>
    %57 = vector.broadcast %56 : vector<1x8xf32> to vector<72x8xf32>
    %58 = arith.addf %55, %57 : vector<72x8xf32>
    %59 = tpu.iota {dimensions = array<i32: 0>} : vector<72x1xi32>
    %c9_i32 = arith.constant 9 : i32
    %c0_i32 = arith.constant 0 : i32
    %60 = arith.cmpi eq, %c9_i32, %c0_i32 : i32
    %c1_i32 = arith.constant 1 : i32
    %61 = arith.select %60, %c1_i32, %c9_i32 : i32
    %62 = vector.broadcast %61 : i32 to vector<72x1xi32>
    %63 = arith.remsi %59, %62 : vector<72x1xi32>
    %c0_i32_38 = arith.constant 0 : i32
    %64 = vector.broadcast %c0_i32_38 : i32 to vector<72x1xi32>
    %65 = arith.cmpi ne, %63, %64 : vector<72x1xi32>
    %c0_i32_39 = arith.constant 0 : i32
    %66 = vector.broadcast %c0_i32_39 : i32 to vector<72x1xi32>
    %67 = arith.cmpi slt, %63, %66 : vector<72x1xi32>
    %c0_i32_40 = arith.constant 0 : i32
    %68 = arith.cmpi slt, %61, %c0_i32_40 : i32
    %69 = vector.broadcast %68 : i1 to vector<72x1xi1>
    %70 = vector.broadcast %69 : vector<72x1xi1> to vector<72x1xi1>
    %71 = arith.xori %67, %70 : vector<72x1xi1>
    %72 = arith.andi %71, %65 : vector<72x1xi1>
    %73 = vector.broadcast %61 : i32 to vector<72x1xi32>
    %74 = arith.addi %63, %73 : vector<72x1xi32>
    %75 = arith.select %72, %74, %63 : vector<72x1xi1>, vector<72x1xi32>
    %c8_i32 = arith.constant 8 : i32
    %76 = vector.broadcast %c8_i32 : i32 to vector<72x1xi32>
    %77 = arith.cmpi slt, %75, %76 : vector<72x1xi32>
    %78 = arith.extui %77 : vector<72x1xi1> to vector<72x1xi32>
    %79 = arith.sitofp %78 : vector<72x1xi32> to vector<72x1xf32>
    %80 = vector.broadcast %79 : vector<72x1xf32> to vector<72x8xf32>
    %81 = arith.mulf %58, %80 : vector<72x8xf32>
    %cst_41 = arith.constant dense<0.000000e+00> : vector<8xf32>
    %82 = vector.multi_reduction <add>, %81, %cst_41 [0] : vector<72x8xf32> to vector<8xf32>
    %83 = vector.shape_cast %82 : vector<8xf32> to vector<1x8xf32>
    %c0_42 = arith.constant 0 : index
    %c0_43 = arith.constant 0 : index
    %84 = vector.load %arg6[%c0_42, %c0_43] : memref<8x4xf32, #tpu.memory_space<vmem>>, vector<8x4xf32>
    %cst_44 = arith.constant dense<0.000000e+00> : vector<1x4xf32>
    %85 = tpu.matmul %83, %84, %cst_44 {dimension_numbers = #tpu.dot_dimension_numbers<[1], [0], [0], [1], [0, 0, 1, 1], [], []>} : vector<1x8xf32>, vector<8x4xf32>, vector<1x4xf32> -> vector<1x4xf32>
    %cst_45 = arith.constant 7.812500e-03 : f32
    %86 = vector.broadcast %cst_45 : f32 to vector<1x4xf32>
    %87 = arith.mulf %85, %86 : vector<1x4xf32>
    %c0_46 = arith.constant 0 : index
    %c0_47 = arith.constant 0 : index
    %88 = vector.load %arg7[%c0_46, %c0_47] : memref<4x8xf32, #tpu.memory_space<vmem>>, vector<4x8xf32>
    %cst_48 = arith.constant dense<0.000000e+00> : vector<1x8xf32>
    %89 = tpu.matmul %87, %88, %cst_48 {dimension_numbers = #tpu.dot_dimension_numbers<[1], [0], [0], [1], [0, 0, 1, 1], [], []>} : vector<1x4xf32>, vector<4x8xf32>, vector<1x8xf32> -> vector<1x8xf32>
    %90 = vector.broadcast %89 : vector<1x8xf32> to vector<72x8xf32>
    %91 = arith.subf %58, %90 : vector<72x8xf32>
    %92 = arith.mulf %91, %91 : vector<72x8xf32>
    %93 = vector.broadcast %79 : vector<72x1xf32> to vector<72x8xf32>
    %94 = arith.mulf %92, %93 : vector<72x8xf32>
    %cst_49 = arith.constant dense<0.000000e+00> : vector<8xf32>
    %95 = vector.multi_reduction <add>, %94, %cst_49 [0] : vector<72x8xf32> to vector<8xf32>
    %96 = vector.shape_cast %95 : vector<8xf32> to vector<1x8xf32>
    %c0_50 = arith.constant 0 : index
    %c0_51 = arith.constant 0 : index
    %97 = vector.load %arg6[%c0_50, %c0_51] : memref<8x4xf32, #tpu.memory_space<vmem>>, vector<8x4xf32>
    %cst_52 = arith.constant dense<0.000000e+00> : vector<1x4xf32>
    %98 = tpu.matmul %96, %97, %cst_52 {dimension_numbers = #tpu.dot_dimension_numbers<[1], [0], [0], [1], [0, 0, 1, 1], [], []>} : vector<1x8xf32>, vector<8x4xf32>, vector<1x4xf32> -> vector<1x4xf32>
    %cst_53 = arith.constant 7.812500e-03 : f32
    %99 = vector.broadcast %cst_53 : f32 to vector<1x4xf32>
    %100 = arith.mulf %98, %99 : vector<1x4xf32>
    %cst_54 = arith.constant 9.99999974E-6 : f32
    %101 = vector.broadcast %cst_54 : f32 to vector<1x4xf32>
    %102 = arith.addf %100, %101 : vector<1x4xf32>
    %103 = math.rsqrt %102 : vector<1x4xf32>
    %c0_55 = arith.constant 0 : index
    %c0_56 = arith.constant 0 : index
    %104 = vector.load %arg7[%c0_55, %c0_56] : memref<4x8xf32, #tpu.memory_space<vmem>>, vector<4x8xf32>
    %cst_57 = arith.constant dense<0.000000e+00> : vector<1x8xf32>
    %105 = tpu.matmul %103, %104, %cst_57 {dimension_numbers = #tpu.dot_dimension_numbers<[1], [0], [0], [1], [0, 0, 1, 1], [], []>} : vector<1x4xf32>, vector<4x8xf32>, vector<1x8xf32> -> vector<1x8xf32>
    %106 = vector.broadcast %105 : vector<1x8xf32> to vector<72x8xf32>
    %107 = arith.mulf %91, %106 : vector<72x8xf32>
    %c0_58 = arith.constant 0 : index
    %c0_59 = arith.constant 0 : index
    %108 = vector.load %arg4[%c0_58, %c0_59] : memref<1x8xf32, #tpu.memory_space<vmem>>, vector<1x8xf32>
    %109 = vector.broadcast %108 : vector<1x8xf32> to vector<72x8xf32>
    %110 = arith.mulf %107, %109 : vector<72x8xf32>
    %c0_60 = arith.constant 0 : index
    %c0_61 = arith.constant 0 : index
    %111 = vector.load %arg5[%c0_60, %c0_61] : memref<1x8xf32, #tpu.memory_space<vmem>>, vector<1x8xf32>
    %112 = vector.broadcast %111 : vector<1x8xf32> to vector<72x8xf32>
    %113 = arith.addf %110, %112 : vector<72x8xf32>
    %cst_62 = arith.constant 0.000000e+00 : f32
    %114 = vector.broadcast %cst_62 : f32 to vector<72x8xf32>
    %115 = arith.maximumf %113, %114 : vector<72x8xf32>
    %116 = vector.extract_strided_slice %115 {offsets = [0, 0], sizes = [8, 8], strides = [1, 1]} : vector<72x8xf32> to vector<8x8xf32>
    %c0_63 = arith.constant 0 : index
    %c0_64 = arith.constant 0 : index
    %c0_65 = arith.constant 0 : index
    %c0_66 = arith.constant 0 : index
    %117 = vector.load %arg8[%c0_63, %c0_64, %c0_65, %c0_66] : memref<1x8x8x8xf32, #tpu.memory_space<vmem>>, vector<1x1x8x8xf32>
    %118 = vector.shape_cast %117 : vector<1x1x8x8xf32> to vector<8x8xf32>
    %119 = vector.shape_cast %116 : vector<8x8xf32> to vector<1x1x8x8xf32>
    tpu.vector_store %arg8[%c0_63, %c0_64, %c0_65, %c0_66], %119 {strides = array<i32>} : memref<1x8x8x8xf32, #tpu.memory_space<vmem>>, vector<1x1x8x8xf32>,
    %120 = vector.extract_strided_slice %115 {offsets = [9, 0], sizes = [8, 8], strides = [1, 1]} : vector<72x8xf32> to vector<8x8xf32>
    %c0_67 = arith.constant 0 : index
    %c1_68 = arith.constant 1 : index
    %c0_69 = arith.constant 0 : index
    %c0_70 = arith.constant 0 : index
    %121 = vector.load %arg8[%c0_67, %c1_68, %c0_69, %c0_70] : memref<1x8x8x8xf32, #tpu.memory_space<vmem>>, vector<1x1x8x8xf32>
    %122 = vector.shape_cast %121 : vector<1x1x8x8xf32> to vector<8x8xf32>
    %123 = vector.shape_cast %120 : vector<8x8xf32> to vector<1x1x8x8xf32>
    tpu.vector_store %arg8[%c0_67, %c1_68, %c0_69, %c0_70], %123 {strides = array<i32>} : memref<1x8x8x8xf32, #tpu.memory_space<vmem>>, vector<1x1x8x8xf32>,
    %124 = vector.extract_strided_slice %115 {offsets = [18, 0], sizes = [8, 8], strides = [1, 1]} : vector<72x8xf32> to vector<8x8xf32>
    %c0_71 = arith.constant 0 : index
    %c2_72 = arith.constant 2 : index
    %c0_73 = arith.constant 0 : index
    %c0_74 = arith.constant 0 : index
    %125 = vector.load %arg8[%c0_71, %c2_72, %c0_73, %c0_74] : memref<1x8x8x8xf32, #tpu.memory_space<vmem>>, vector<1x1x8x8xf32>
    %126 = vector.shape_cast %125 : vector<1x1x8x8xf32> to vector<8x8xf32>
    %127 = vector.shape_cast %124 : vector<8x8xf32> to vector<1x1x8x8xf32>
    tpu.vector_store %arg8[%c0_71, %c2_72, %c0_73, %c0_74], %127 {strides = array<i32>} : memref<1x8x8x8xf32, #tpu.memory_space<vmem>>, vector<1x1x8x8xf32>,
    %128 = vector.extract_strided_slice %115 {offsets = [27, 0], sizes = [8, 8], strides = [1, 1]} : vector<72x8xf32> to vector<8x8xf32>
    %c0_75 = arith.constant 0 : index
    %c3_76 = arith.constant 3 : index
    %c0_77 = arith.constant 0 : index
    %c0_78 = arith.constant 0 : index
    %129 = vector.load %arg8[%c0_75, %c3_76, %c0_77, %c0_78] : memref<1x8x8x8xf32, #tpu.memory_space<vmem>>, vector<1x1x8x8xf32>
    %130 = vector.shape_cast %129 : vector<1x1x8x8xf32> to vector<8x8xf32>
    %131 = vector.shape_cast %128 : vector<8x8xf32> to vector<1x1x8x8xf32>
    tpu.vector_store %arg8[%c0_75, %c3_76, %c0_77, %c0_78], %131 {strides = array<i32>} : memref<1x8x8x8xf32, #tpu.memory_space<vmem>>, vector<1x1x8x8xf32>,
    %132 = vector.extract_strided_slice %115 {offsets = [36, 0], sizes = [8, 8], strides = [1, 1]} : vector<72x8xf32> to vector<8x8xf32>
    %c0_79 = arith.constant 0 : index
    %c4 = arith.constant 4 : index
    %c0_80 = arith.constant 0 : index
    %c0_81 = arith.constant 0 : index
    %133 = vector.load %arg8[%c0_79, %c4, %c0_80, %c0_81] : memref<1x8x8x8xf32, #tpu.memory_space<vmem>>, vector<1x1x8x8xf32>
    %134 = vector.shape_cast %133 : vector<1x1x8x8xf32> to vector<8x8xf32>
    %135 = vector.shape_cast %132 : vector<8x8xf32> to vector<1x1x8x8xf32>
    tpu.vector_store %arg8[%c0_79, %c4, %c0_80, %c0_81], %135 {strides = array<i32>} : memref<1x8x8x8xf32, #tpu.memory_space<vmem>>, vector<1x1x8x8xf32>,
    %136 = vector.extract_strided_slice %115 {offsets = [45, 0], sizes = [8, 8], strides = [1, 1]} : vector<72x8xf32> to vector<8x8xf32>
    %c0_82 = arith.constant 0 : index
    %c5 = arith.constant 5 : index
    %c0_83 = arith.constant 0 : index
    %c0_84 = arith.constant 0 : index
    %137 = vector.load %arg8[%c0_82, %c5, %c0_83, %c0_84] : memref<1x8x8x8xf32, #tpu.memory_space<vmem>>, vector<1x1x8x8xf32>
    %138 = vector.shape_cast %137 : vector<1x1x8x8xf32> to vector<8x8xf32>
    %139 = vector.shape_cast %136 : vector<8x8xf32> to vector<1x1x8x8xf32>
    tpu.vector_store %arg8[%c0_82, %c5, %c0_83, %c0_84], %139 {strides = array<i32>} : memref<1x8x8x8xf32, #tpu.memory_space<vmem>>, vector<1x1x8x8xf32>,
    %140 = vector.extract_strided_slice %115 {offsets = [54, 0], sizes = [8, 8], strides = [1, 1]} : vector<72x8xf32> to vector<8x8xf32>
    %c0_85 = arith.constant 0 : index
    %c6 = arith.constant 6 : index
    %c0_86 = arith.constant 0 : index
    %c0_87 = arith.constant 0 : index
    %141 = vector.load %arg8[%c0_85, %c6, %c0_86, %c0_87] : memref<1x8x8x8xf32, #tpu.memory_space<vmem>>, vector<1x1x8x8xf32>
    %142 = vector.shape_cast %141 : vector<1x1x8x8xf32> to vector<8x8xf32>
    %143 = vector.shape_cast %140 : vector<8x8xf32> to vector<1x1x8x8xf32>
    tpu.vector_store %arg8[%c0_85, %c6, %c0_86, %c0_87], %143 {strides = array<i32>} : memref<1x8x8x8xf32, #tpu.memory_space<vmem>>, vector<1x1x8x8xf32>,
    %144 = vector.extract_strided_slice %115 {offsets = [63, 0], sizes = [8, 8], strides = [1, 1]} : vector<72x8xf32> to vector<8x8xf32>
    %c0_88 = arith.constant 0 : index
    %c7 = arith.constant 7 : index
    %c0_89 = arith.constant 0 : index
    %c0_90 = arith.constant 0 : index
    %145 = vector.load %arg8[%c0_88, %c7, %c0_89, %c0_90] : memref<1x8x8x8xf32, #tpu.memory_space<vmem>>, vector<1x1x8x8xf32>
    %146 = vector.shape_cast %145 : vector<1x1x8x8xf32> to vector<8x8xf32>
    %147 = vector.shape_cast %144 : vector<8x8xf32> to vector<1x1x8x8xf32>
    tpu.vector_store %arg8[%c0_88, %c7, %c0_89, %c0_90], %147 {strides = array<i32>} : memref<1x8x8x8xf32, #tpu.memory_space<vmem>>, vector<1x1x8x8xf32>,
    return
  }
  func.func @transform_0(%arg0: i32) -> (i32, i32, i32, i32) {
    %c0_i32 = arith.constant 0 : i32
    %c0_i32_0 = arith.constant 0 : i32
    %c0_i32_1 = arith.constant 0 : i32
    %c0_i32_2 = arith.constant 0 : i32
    return %arg0, %c0_i32, %c0_i32_0, %c0_i32_1 : i32, i32, i32, i32
  }
  func.func @transform_1(%arg0: i32) -> (i32, i32, i32) {
    %c0_i32 = arith.constant 0 : i32
    %c0_i32_0 = arith.constant 0 : i32
    %c0_i32_1 = arith.constant 0 : i32
    %c0_i32_2 = arith.constant 0 : i32
    return %c0_i32, %c0_i32_0, %c0_i32_1 : i32, i32, i32
  }
  func.func @transform_2(%arg0: i32) -> (i32, i32) {
    %c0_i32 = arith.constant 0 : i32
    %c0_i32_0 = arith.constant 0 : i32
    %c0_i32_1 = arith.constant 0 : i32
    return %c0_i32, %c0_i32_0 : i32, i32
  }
  func.func @transform_3(%arg0: i32) -> (i32, i32) {
    %c0_i32 = arith.constant 0 : i32
    %c0_i32_0 = arith.constant 0 : i32
    %c0_i32_1 = arith.constant 0 : i32
    return %c0_i32, %c0_i32_0 : i32, i32
  }
  func.func @transform_4(%arg0: i32) -> (i32, i32) {
    %c0_i32 = arith.constant 0 : i32
    %c0_i32_0 = arith.constant 0 : i32
    %c0_i32_1 = arith.constant 0 : i32
    return %c0_i32, %c0_i32_0 : i32, i32
  }
  func.func @transform_5(%arg0: i32) -> (i32, i32) {
    %c0_i32 = arith.constant 0 : i32
    %c0_i32_0 = arith.constant 0 : i32
    %c0_i32_1 = arith.constant 0 : i32
    return %c0_i32, %c0_i32_0 : i32, i32
  }
  func.func @transform_6(%arg0: i32) -> (i32, i32) {
    %c0_i32 = arith.constant 0 : i32
    %c0_i32_0 = arith.constant 0 : i32
    %c0_i32_1 = arith.constant 0 : i32
    return %c0_i32, %c0_i32_0 : i32, i32
  }
  func.func @transform_7(%arg0: i32) -> (i32, i32, i32, i32) {
    %c0_i32 = arith.constant 0 : i32
    %c0_i32_0 = arith.constant 0 : i32
    %c0_i32_1 = arith.constant 0 : i32
    %c0_i32_2 = arith.constant 0 : i32
    return %arg0, %c0_i32, %c0_i32_0, %c0_i32_1 : i32, i32, i32, i32
  }
}

module attributes {stable_mosaic.version = 11 : i64} {
  func.func @fused_conv_kernel(%arg0: i32, %arg1: memref<1x5x5x32xf32, #tpu.memory_space<vmem>>, %arg2: memref<4x32x16xbf16, #tpu.memory_space<vmem>>, %arg3: memref<1x16xf32, #tpu.memory_space<vmem>>, %arg4: memref<1x16xf32, #tpu.memory_space<vmem>>, %arg5: memref<1x16xf32, #tpu.memory_space<vmem>>, %arg6: memref<16x4xf32, #tpu.memory_space<vmem>>, %arg7: memref<4x16xf32, #tpu.memory_space<vmem>>, %arg8: memref<1x4x4x16xf32, #tpu.memory_space<vmem>>, %arg9: memref<32x32xf32, #tpu.memory_space<vmem>>) attributes {dimension_semantics = [#tpu.dimension_semantics<parallel>], iteration_bounds = array<i64: 2>, scalar_prefetch = 0 : i64, scratch_operands = 1 : i64, tpu.core_type = #tpu.core_type<tc>, window_params = [{transform_indices = @transform_0, window_bounds = array<i64: 1, 5, 5, 32>}, {pipeline_mode = #tpu.pipeline_mode<synchronous>, transform_indices = @transform_1, window_bounds = array<i64: 4, 32, 16>}, {pipeline_mode = #tpu.pipeline_mode<synchronous>, transform_indices = @transform_2, window_bounds = array<i64: 1, 16>}, {pipeline_mode = #tpu.pipeline_mode<synchronous>, transform_indices = @transform_3, window_bounds = array<i64: 1, 16>}, {pipeline_mode = #tpu.pipeline_mode<synchronous>, transform_indices = @transform_4, window_bounds = array<i64: 1, 16>}, {pipeline_mode = #tpu.pipeline_mode<synchronous>, transform_indices = @transform_5, window_bounds = array<i64: 16, 4>}, {pipeline_mode = #tpu.pipeline_mode<synchronous>, transform_indices = @transform_6, window_bounds = array<i64: 4, 16>}, {transform_indices = @transform_7, window_bounds = array<i64: 1, 4, 4, 16>}]} {
    %c0 = arith.constant 0 : index
    %c0_0 = arith.constant 0 : index
    %c0_1 = arith.constant 0 : index
    %c0_2 = arith.constant 0 : index
    %0 = vector.load %arg1[%c0, %c0_0, %c0_1, %c0_2] : memref<1x5x5x32xf32, #tpu.memory_space<vmem>>, vector<1x5x5x32xf32>
    %1 = vector.shape_cast %0 : vector<1x5x5x32xf32> to vector<5x5x32xf32>
    %cst = arith.constant 0.000000e+00 : f32
    %2 = vector.broadcast %cst : f32 to vector<32x32xf32>
    %c0_3 = arith.constant 0 : index
    %c0_4 = arith.constant 0 : index
    %3 = vector.load %arg9[%c0_3, %c0_4] : memref<32x32xf32, #tpu.memory_space<vmem>>, vector<32x32xf32>
    tpu.vector_store %arg9[%c0_3, %c0_4], %2 {strides = array<i32>} : memref<32x32xf32, #tpu.memory_space<vmem>>, vector<32x32xf32>,
    %4 = vector.extract_strided_slice %1 {offsets = [0, 0, 0], sizes = [1, 5, 32], strides = [1, 1, 1]} : vector<5x5x32xf32> to vector<1x5x32xf32>
    %5 = vector.shape_cast %4 : vector<1x5x32xf32> to vector<5x32xf32>
    %c0_5 = arith.constant 0 : index
    %c0_6 = arith.constant 0 : index
    %6 = vector.load %arg9[%c0_5, %c0_6] : memref<32x32xf32, #tpu.memory_space<vmem>>, vector<5x32xf32>
    tpu.vector_store %arg9[%c0_5, %c0_6], %5 {strides = array<i32>} : memref<32x32xf32, #tpu.memory_space<vmem>>, vector<5x32xf32>,
    %7 = vector.extract_strided_slice %1 {offsets = [1, 0, 0], sizes = [1, 5, 32], strides = [1, 1, 1]} : vector<5x5x32xf32> to vector<1x5x32xf32>
    %8 = vector.shape_cast %7 : vector<1x5x32xf32> to vector<5x32xf32>
    %c5 = arith.constant 5 : index
    %c0_7 = arith.constant 0 : index
    %9 = vector.load %arg9[%c5, %c0_7] : memref<32x32xf32, #tpu.memory_space<vmem>>, vector<5x32xf32>
    tpu.vector_store %arg9[%c5, %c0_7], %8 {strides = array<i32>} : memref<32x32xf32, #tpu.memory_space<vmem>>, vector<5x32xf32>,
    %10 = vector.extract_strided_slice %1 {offsets = [2, 0, 0], sizes = [1, 5, 32], strides = [1, 1, 1]} : vector<5x5x32xf32> to vector<1x5x32xf32>
    %11 = vector.shape_cast %10 : vector<1x5x32xf32> to vector<5x32xf32>
    %c10 = arith.constant 10 : index
    %c0_8 = arith.constant 0 : index
    %12 = vector.load %arg9[%c10, %c0_8] : memref<32x32xf32, #tpu.memory_space<vmem>>, vector<5x32xf32>
    tpu.vector_store %arg9[%c10, %c0_8], %11 {strides = array<i32>} : memref<32x32xf32, #tpu.memory_space<vmem>>, vector<5x32xf32>,
    %13 = vector.extract_strided_slice %1 {offsets = [3, 0, 0], sizes = [1, 5, 32], strides = [1, 1, 1]} : vector<5x5x32xf32> to vector<1x5x32xf32>
    %14 = vector.shape_cast %13 : vector<1x5x32xf32> to vector<5x32xf32>
    %c15 = arith.constant 15 : index
    %c0_9 = arith.constant 0 : index
    %15 = vector.load %arg9[%c15, %c0_9] : memref<32x32xf32, #tpu.memory_space<vmem>>, vector<5x32xf32>
    tpu.vector_store %arg9[%c15, %c0_9], %14 {strides = array<i32>} : memref<32x32xf32, #tpu.memory_space<vmem>>, vector<5x32xf32>,
    %16 = vector.extract_strided_slice %1 {offsets = [4, 0, 0], sizes = [1, 5, 32], strides = [1, 1, 1]} : vector<5x5x32xf32> to vector<1x5x32xf32>
    %17 = vector.shape_cast %16 : vector<1x5x32xf32> to vector<5x32xf32>
    %c20 = arith.constant 20 : index
    %c0_10 = arith.constant 0 : index
    %18 = vector.load %arg9[%c20, %c0_10] : memref<32x32xf32, #tpu.memory_space<vmem>>, vector<5x32xf32>
    tpu.vector_store %arg9[%c20, %c0_10], %17 {strides = array<i32>} : memref<32x32xf32, #tpu.memory_space<vmem>>, vector<5x32xf32>,
    %cst_11 = arith.constant 0.000000e+00 : f32
    %19 = vector.broadcast %cst_11 : f32 to vector<20x16xf32>
    %c0_12 = arith.constant 0 : index
    %c0_13 = arith.constant 0 : index
    %20 = vector.load %arg9[%c0_12, %c0_13] : memref<32x32xf32, #tpu.memory_space<vmem>>, vector<20x32xf32>
    %21 = arith.truncf %20 : vector<20x32xf32> to vector<20x32xbf16>
    %c0_14 = arith.constant 0 : index
    %c0_15 = arith.constant 0 : index
    %c0_16 = arith.constant 0 : index
    %22 = vector.load %arg2[%c0_14, %c0_15, %c0_16] : memref<4x32x16xbf16, #tpu.memory_space<vmem>>, vector<1x32x16xbf16>
    %23 = vector.shape_cast %22 : vector<1x32x16xbf16> to vector<32x16xbf16>
    %cst_17 = arith.constant dense<0.000000e+00> : vector<20x16xf32>
    %24 = tpu.matmul %21, %23, %cst_17 {dimension_numbers = #tpu.dot_dimension_numbers<[1], [0], [0], [1], [0, 0, 1, 1], [], []>} : vector<20x32xbf16>, vector<32x16xbf16>, vector<20x16xf32> -> vector<20x16xf32>
    %25 = arith.addf %19, %24 : vector<20x16xf32>
    %c1 = arith.constant 1 : index
    %c0_18 = arith.constant 0 : index
    %26 = vector.load %arg9[%c1, %c0_18] : memref<32x32xf32, #tpu.memory_space<vmem>>, vector<20x32xf32>
    %27 = arith.truncf %26 : vector<20x32xf32> to vector<20x32xbf16>
    %c1_19 = arith.constant 1 : index
    %c0_20 = arith.constant 0 : index
    %c0_21 = arith.constant 0 : index
    %28 = vector.load %arg2[%c1_19, %c0_20, %c0_21] : memref<4x32x16xbf16, #tpu.memory_space<vmem>>, vector<1x32x16xbf16>
    %29 = vector.shape_cast %28 : vector<1x32x16xbf16> to vector<32x16xbf16>
    %cst_22 = arith.constant dense<0.000000e+00> : vector<20x16xf32>
    %30 = tpu.matmul %27, %29, %cst_22 {dimension_numbers = #tpu.dot_dimension_numbers<[1], [0], [0], [1], [0, 0, 1, 1], [], []>} : vector<20x32xbf16>, vector<32x16xbf16>, vector<20x16xf32> -> vector<20x16xf32>
    %31 = arith.addf %25, %30 : vector<20x16xf32>
    %c5_23 = arith.constant 5 : index
    %c0_24 = arith.constant 0 : index
    %32 = vector.load %arg9[%c5_23, %c0_24] : memref<32x32xf32, #tpu.memory_space<vmem>>, vector<20x32xf32>
    %33 = arith.truncf %32 : vector<20x32xf32> to vector<20x32xbf16>
    %c2 = arith.constant 2 : index
    %c0_25 = arith.constant 0 : index
    %c0_26 = arith.constant 0 : index
    %34 = vector.load %arg2[%c2, %c0_25, %c0_26] : memref<4x32x16xbf16, #tpu.memory_space<vmem>>, vector<1x32x16xbf16>
    %35 = vector.shape_cast %34 : vector<1x32x16xbf16> to vector<32x16xbf16>
    %cst_27 = arith.constant dense<0.000000e+00> : vector<20x16xf32>
    %36 = tpu.matmul %33, %35, %cst_27 {dimension_numbers = #tpu.dot_dimension_numbers<[1], [0], [0], [1], [0, 0, 1, 1], [], []>} : vector<20x32xbf16>, vector<32x16xbf16>, vector<20x16xf32> -> vector<20x16xf32>
    %37 = arith.addf %31, %36 : vector<20x16xf32>
    %c6 = arith.constant 6 : index
    %c0_28 = arith.constant 0 : index
    %38 = vector.load %arg9[%c6, %c0_28] : memref<32x32xf32, #tpu.memory_space<vmem>>, vector<20x32xf32>
    %39 = arith.truncf %38 : vector<20x32xf32> to vector<20x32xbf16>
    %c3 = arith.constant 3 : index
    %c0_29 = arith.constant 0 : index
    %c0_30 = arith.constant 0 : index
    %40 = vector.load %arg2[%c3, %c0_29, %c0_30] : memref<4x32x16xbf16, #tpu.memory_space<vmem>>, vector<1x32x16xbf16>
    %41 = vector.shape_cast %40 : vector<1x32x16xbf16> to vector<32x16xbf16>
    %cst_31 = arith.constant dense<0.000000e+00> : vector<20x16xf32>
    %42 = tpu.matmul %39, %41, %cst_31 {dimension_numbers = #tpu.dot_dimension_numbers<[1], [0], [0], [1], [0, 0, 1, 1], [], []>} : vector<20x32xbf16>, vector<32x16xbf16>, vector<20x16xf32> -> vector<20x16xf32>
    %43 = arith.addf %37, %42 : vector<20x16xf32>
    %c0_32 = arith.constant 0 : index
    %c0_33 = arith.constant 0 : index
    %44 = vector.load %arg3[%c0_32, %c0_33] : memref<1x16xf32, #tpu.memory_space<vmem>>, vector<1x16xf32>
    %45 = vector.broadcast %44 : vector<1x16xf32> to vector<20x16xf32>
    %46 = arith.addf %43, %45 : vector<20x16xf32>
    %47 = tpu.iota {dimensions = array<i32: 0>} : vector<20x1xi32>
    %c5_i32 = arith.constant 5 : i32
    %c0_i32 = arith.constant 0 : i32
    %48 = arith.cmpi eq, %c5_i32, %c0_i32 : i32
    %c1_i32 = arith.constant 1 : i32
    %49 = arith.select %48, %c1_i32, %c5_i32 : i32
    %50 = vector.broadcast %49 : i32 to vector<20x1xi32>
    %51 = arith.remsi %47, %50 : vector<20x1xi32>
    %c0_i32_34 = arith.constant 0 : i32
    %52 = vector.broadcast %c0_i32_34 : i32 to vector<20x1xi32>
    %53 = arith.cmpi ne, %51, %52 : vector<20x1xi32>
    %c0_i32_35 = arith.constant 0 : i32
    %54 = vector.broadcast %c0_i32_35 : i32 to vector<20x1xi32>
    %55 = arith.cmpi slt, %51, %54 : vector<20x1xi32>
    %c0_i32_36 = arith.constant 0 : i32
    %56 = arith.cmpi slt, %49, %c0_i32_36 : i32
    %57 = vector.broadcast %56 : i1 to vector<20x1xi1>
    %58 = vector.broadcast %57 : vector<20x1xi1> to vector<20x1xi1>
    %59 = arith.xori %55, %58 : vector<20x1xi1>
    %60 = arith.andi %59, %53 : vector<20x1xi1>
    %61 = vector.broadcast %49 : i32 to vector<20x1xi32>
    %62 = arith.addi %51, %61 : vector<20x1xi32>
    %63 = arith.select %60, %62, %51 : vector<20x1xi1>, vector<20x1xi32>
    %c4_i32 = arith.constant 4 : i32
    %64 = vector.broadcast %c4_i32 : i32 to vector<20x1xi32>
    %65 = arith.cmpi slt, %63, %64 : vector<20x1xi32>
    %66 = arith.extui %65 : vector<20x1xi1> to vector<20x1xi32>
    %67 = arith.sitofp %66 : vector<20x1xi32> to vector<20x1xf32>
    %68 = vector.broadcast %67 : vector<20x1xf32> to vector<20x16xf32>
    %69 = arith.mulf %46, %68 : vector<20x16xf32>
    %cst_37 = arith.constant dense<0.000000e+00> : vector<16xf32>
    %70 = vector.multi_reduction <add>, %69, %cst_37 [0] : vector<20x16xf32> to vector<16xf32>
    %71 = vector.shape_cast %70 : vector<16xf32> to vector<1x16xf32>
    %c0_38 = arith.constant 0 : index
    %c0_39 = arith.constant 0 : index
    %72 = vector.load %arg6[%c0_38, %c0_39] : memref<16x4xf32, #tpu.memory_space<vmem>>, vector<16x4xf32>
    %cst_40 = arith.constant dense<0.000000e+00> : vector<1x4xf32>
    %73 = tpu.matmul %71, %72, %cst_40 {dimension_numbers = #tpu.dot_dimension_numbers<[1], [0], [0], [1], [0, 0, 1, 1], [], []>} : vector<1x16xf32>, vector<16x4xf32>, vector<1x4xf32> -> vector<1x4xf32>
    %cst_41 = arith.constant 1.562500e-02 : f32
    %74 = vector.broadcast %cst_41 : f32 to vector<1x4xf32>
    %75 = arith.mulf %73, %74 : vector<1x4xf32>
    %c0_42 = arith.constant 0 : index
    %c0_43 = arith.constant 0 : index
    %76 = vector.load %arg7[%c0_42, %c0_43] : memref<4x16xf32, #tpu.memory_space<vmem>>, vector<4x16xf32>
    %cst_44 = arith.constant dense<0.000000e+00> : vector<1x16xf32>
    %77 = tpu.matmul %75, %76, %cst_44 {dimension_numbers = #tpu.dot_dimension_numbers<[1], [0], [0], [1], [0, 0, 1, 1], [], []>} : vector<1x4xf32>, vector<4x16xf32>, vector<1x16xf32> -> vector<1x16xf32>
    %78 = vector.broadcast %77 : vector<1x16xf32> to vector<20x16xf32>
    %79 = arith.subf %46, %78 : vector<20x16xf32>
    %80 = arith.mulf %79, %79 : vector<20x16xf32>
    %81 = vector.broadcast %67 : vector<20x1xf32> to vector<20x16xf32>
    %82 = arith.mulf %80, %81 : vector<20x16xf32>
    %cst_45 = arith.constant dense<0.000000e+00> : vector<16xf32>
    %83 = vector.multi_reduction <add>, %82, %cst_45 [0] : vector<20x16xf32> to vector<16xf32>
    %84 = vector.shape_cast %83 : vector<16xf32> to vector<1x16xf32>
    %c0_46 = arith.constant 0 : index
    %c0_47 = arith.constant 0 : index
    %85 = vector.load %arg6[%c0_46, %c0_47] : memref<16x4xf32, #tpu.memory_space<vmem>>, vector<16x4xf32>
    %cst_48 = arith.constant dense<0.000000e+00> : vector<1x4xf32>
    %86 = tpu.matmul %84, %85, %cst_48 {dimension_numbers = #tpu.dot_dimension_numbers<[1], [0], [0], [1], [0, 0, 1, 1], [], []>} : vector<1x16xf32>, vector<16x4xf32>, vector<1x4xf32> -> vector<1x4xf32>
    %cst_49 = arith.constant 1.562500e-02 : f32
    %87 = vector.broadcast %cst_49 : f32 to vector<1x4xf32>
    %88 = arith.mulf %86, %87 : vector<1x4xf32>
    %cst_50 = arith.constant 9.99999974E-6 : f32
    %89 = vector.broadcast %cst_50 : f32 to vector<1x4xf32>
    %90 = arith.addf %88, %89 : vector<1x4xf32>
    %91 = math.rsqrt %90 : vector<1x4xf32>
    %c0_51 = arith.constant 0 : index
    %c0_52 = arith.constant 0 : index
    %92 = vector.load %arg7[%c0_51, %c0_52] : memref<4x16xf32, #tpu.memory_space<vmem>>, vector<4x16xf32>
    %cst_53 = arith.constant dense<0.000000e+00> : vector<1x16xf32>
    %93 = tpu.matmul %91, %92, %cst_53 {dimension_numbers = #tpu.dot_dimension_numbers<[1], [0], [0], [1], [0, 0, 1, 1], [], []>} : vector<1x4xf32>, vector<4x16xf32>, vector<1x16xf32> -> vector<1x16xf32>
    %94 = vector.broadcast %93 : vector<1x16xf32> to vector<20x16xf32>
    %95 = arith.mulf %79, %94 : vector<20x16xf32>
    %c0_54 = arith.constant 0 : index
    %c0_55 = arith.constant 0 : index
    %96 = vector.load %arg4[%c0_54, %c0_55] : memref<1x16xf32, #tpu.memory_space<vmem>>, vector<1x16xf32>
    %97 = vector.broadcast %96 : vector<1x16xf32> to vector<20x16xf32>
    %98 = arith.mulf %95, %97 : vector<20x16xf32>
    %c0_56 = arith.constant 0 : index
    %c0_57 = arith.constant 0 : index
    %99 = vector.load %arg5[%c0_56, %c0_57] : memref<1x16xf32, #tpu.memory_space<vmem>>, vector<1x16xf32>
    %100 = vector.broadcast %99 : vector<1x16xf32> to vector<20x16xf32>
    %101 = arith.addf %98, %100 : vector<20x16xf32>
    %cst_58 = arith.constant 0.000000e+00 : f32
    %102 = vector.broadcast %cst_58 : f32 to vector<20x16xf32>
    %103 = arith.maximumf %101, %102 : vector<20x16xf32>
    %104 = vector.extract_strided_slice %103 {offsets = [0, 0], sizes = [4, 16], strides = [1, 1]} : vector<20x16xf32> to vector<4x16xf32>
    %c0_59 = arith.constant 0 : index
    %c0_60 = arith.constant 0 : index
    %c0_61 = arith.constant 0 : index
    %c0_62 = arith.constant 0 : index
    %105 = vector.load %arg8[%c0_59, %c0_60, %c0_61, %c0_62] : memref<1x4x4x16xf32, #tpu.memory_space<vmem>>, vector<1x1x4x16xf32>
    %106 = vector.shape_cast %105 : vector<1x1x4x16xf32> to vector<4x16xf32>
    %107 = vector.shape_cast %104 : vector<4x16xf32> to vector<1x1x4x16xf32>
    tpu.vector_store %arg8[%c0_59, %c0_60, %c0_61, %c0_62], %107 {strides = array<i32>} : memref<1x4x4x16xf32, #tpu.memory_space<vmem>>, vector<1x1x4x16xf32>,
    %108 = vector.extract_strided_slice %103 {offsets = [5, 0], sizes = [4, 16], strides = [1, 1]} : vector<20x16xf32> to vector<4x16xf32>
    %c0_63 = arith.constant 0 : index
    %c1_64 = arith.constant 1 : index
    %c0_65 = arith.constant 0 : index
    %c0_66 = arith.constant 0 : index
    %109 = vector.load %arg8[%c0_63, %c1_64, %c0_65, %c0_66] : memref<1x4x4x16xf32, #tpu.memory_space<vmem>>, vector<1x1x4x16xf32>
    %110 = vector.shape_cast %109 : vector<1x1x4x16xf32> to vector<4x16xf32>
    %111 = vector.shape_cast %108 : vector<4x16xf32> to vector<1x1x4x16xf32>
    tpu.vector_store %arg8[%c0_63, %c1_64, %c0_65, %c0_66], %111 {strides = array<i32>} : memref<1x4x4x16xf32, #tpu.memory_space<vmem>>, vector<1x1x4x16xf32>,
    %112 = vector.extract_strided_slice %103 {offsets = [10, 0], sizes = [4, 16], strides = [1, 1]} : vector<20x16xf32> to vector<4x16xf32>
    %c0_67 = arith.constant 0 : index
    %c2_68 = arith.constant 2 : index
    %c0_69 = arith.constant 0 : index
    %c0_70 = arith.constant 0 : index
    %113 = vector.load %arg8[%c0_67, %c2_68, %c0_69, %c0_70] : memref<1x4x4x16xf32, #tpu.memory_space<vmem>>, vector<1x1x4x16xf32>
    %114 = vector.shape_cast %113 : vector<1x1x4x16xf32> to vector<4x16xf32>
    %115 = vector.shape_cast %112 : vector<4x16xf32> to vector<1x1x4x16xf32>
    tpu.vector_store %arg8[%c0_67, %c2_68, %c0_69, %c0_70], %115 {strides = array<i32>} : memref<1x4x4x16xf32, #tpu.memory_space<vmem>>, vector<1x1x4x16xf32>,
    %116 = vector.extract_strided_slice %103 {offsets = [15, 0], sizes = [4, 16], strides = [1, 1]} : vector<20x16xf32> to vector<4x16xf32>
    %c0_71 = arith.constant 0 : index
    %c3_72 = arith.constant 3 : index
    %c0_73 = arith.constant 0 : index
    %c0_74 = arith.constant 0 : index
    %117 = vector.load %arg8[%c0_71, %c3_72, %c0_73, %c0_74] : memref<1x4x4x16xf32, #tpu.memory_space<vmem>>, vector<1x1x4x16xf32>
    %118 = vector.shape_cast %117 : vector<1x1x4x16xf32> to vector<4x16xf32>
    %119 = vector.shape_cast %116 : vector<4x16xf32> to vector<1x1x4x16xf32>
    tpu.vector_store %arg8[%c0_71, %c3_72, %c0_73, %c0_74], %119 {strides = array<i32>} : memref<1x4x4x16xf32, #tpu.memory_space<vmem>>, vector<1x1x4x16xf32>,
    return
  }
  func.func @transform_0(%arg0: i32) -> (i32, i32, i32, i32) {
    %c0_i32 = arith.constant 0 : i32
    %c0_i32_0 = arith.constant 0 : i32
    %c0_i32_1 = arith.constant 0 : i32
    %c0_i32_2 = arith.constant 0 : i32
    return %arg0, %c0_i32, %c0_i32_0, %c0_i32_1 : i32, i32, i32, i32
  }
  func.func @transform_1(%arg0: i32) -> (i32, i32, i32) {
    %c0_i32 = arith.constant 0 : i32
    %c0_i32_0 = arith.constant 0 : i32
    %c0_i32_1 = arith.constant 0 : i32
    %c0_i32_2 = arith.constant 0 : i32
    return %c0_i32, %c0_i32_0, %c0_i32_1 : i32, i32, i32
  }
  func.func @transform_2(%arg0: i32) -> (i32, i32) {
    %c0_i32 = arith.constant 0 : i32
    %c0_i32_0 = arith.constant 0 : i32
    %c0_i32_1 = arith.constant 0 : i32
    return %c0_i32, %c0_i32_0 : i32, i32
  }
  func.func @transform_3(%arg0: i32) -> (i32, i32) {
    %c0_i32 = arith.constant 0 : i32
    %c0_i32_0 = arith.constant 0 : i32
    %c0_i32_1 = arith.constant 0 : i32
    return %c0_i32, %c0_i32_0 : i32, i32
  }
  func.func @transform_4(%arg0: i32) -> (i32, i32) {
    %c0_i32 = arith.constant 0 : i32
    %c0_i32_0 = arith.constant 0 : i32
    %c0_i32_1 = arith.constant 0 : i32
    return %c0_i32, %c0_i32_0 : i32, i32
  }
  func.func @transform_5(%arg0: i32) -> (i32, i32) {
    %c0_i32 = arith.constant 0 : i32
    %c0_i32_0 = arith.constant 0 : i32
    %c0_i32_1 = arith.constant 0 : i32
    return %c0_i32, %c0_i32_0 : i32, i32
  }
  func.func @transform_6(%arg0: i32) -> (i32, i32) {
    %c0_i32 = arith.constant 0 : i32
    %c0_i32_0 = arith.constant 0 : i32
    %c0_i32_1 = arith.constant 0 : i32
    return %c0_i32, %c0_i32_0 : i32, i32
  }
  func.func @transform_7(%arg0: i32) -> (i32, i32, i32, i32) {
    %c0_i32 = arith.constant 0 : i32
    %c0_i32_0 = arith.constant 0 : i32
    %c0_i32_1 = arith.constant 0 : i32
    %c0_i32_2 = arith.constant 0 : i32
    return %arg0, %c0_i32, %c0_i32_0, %c0_i32_1 : i32, i32, i32, i32
  }
}

module attributes {stable_mosaic.version = 11 : i64} {
  func.func @fused_conv_kernel(%arg0: i32, %arg1: memref<1x4x4x16xf32, #tpu.memory_space<vmem>>, %arg2: memref<9x16x16xbf16, #tpu.memory_space<vmem>>, %arg3: memref<1x16xf32, #tpu.memory_space<vmem>>, %arg4: memref<1x16xf32, #tpu.memory_space<vmem>>, %arg5: memref<1x16xf32, #tpu.memory_space<vmem>>, %arg6: memref<16x4xf32, #tpu.memory_space<vmem>>, %arg7: memref<4x16xf32, #tpu.memory_space<vmem>>, %arg8: memref<1x4x4x16xf32, #tpu.memory_space<vmem>>, %arg9: memref<1x4x4x16xf32, #tpu.memory_space<vmem>>, %arg10: memref<40x16xf32, #tpu.memory_space<vmem>>) attributes {dimension_semantics = [#tpu.dimension_semantics<parallel>], iteration_bounds = array<i64: 2>, scalar_prefetch = 0 : i64, scratch_operands = 1 : i64, tpu.core_type = #tpu.core_type<tc>, window_params = [{transform_indices = @transform_0, window_bounds = array<i64: 1, 4, 4, 16>}, {pipeline_mode = #tpu.pipeline_mode<synchronous>, transform_indices = @transform_1, window_bounds = array<i64: 9, 16, 16>}, {pipeline_mode = #tpu.pipeline_mode<synchronous>, transform_indices = @transform_2, window_bounds = array<i64: 1, 16>}, {pipeline_mode = #tpu.pipeline_mode<synchronous>, transform_indices = @transform_3, window_bounds = array<i64: 1, 16>}, {pipeline_mode = #tpu.pipeline_mode<synchronous>, transform_indices = @transform_4, window_bounds = array<i64: 1, 16>}, {pipeline_mode = #tpu.pipeline_mode<synchronous>, transform_indices = @transform_5, window_bounds = array<i64: 16, 4>}, {pipeline_mode = #tpu.pipeline_mode<synchronous>, transform_indices = @transform_6, window_bounds = array<i64: 4, 16>}, {transform_indices = @transform_7, window_bounds = array<i64: 1, 4, 4, 16>}, {transform_indices = @transform_8, window_bounds = array<i64: 1, 4, 4, 16>}]} {
    %c0 = arith.constant 0 : index
    %c0_0 = arith.constant 0 : index
    %c0_1 = arith.constant 0 : index
    %c0_2 = arith.constant 0 : index
    %0 = vector.load %arg1[%c0, %c0_0, %c0_1, %c0_2] : memref<1x4x4x16xf32, #tpu.memory_space<vmem>>, vector<1x4x4x16xf32>
    %1 = vector.shape_cast %0 : vector<1x4x4x16xf32> to vector<4x4x16xf32>
    %cst = arith.constant dense<0.000000e+00> : vector<4x16xf32>
    %2 = vector.multi_reduction <add>, %1, %cst [0] : vector<4x4x16xf32> to vector<4x16xf32>
    %cst_3 = arith.constant dense<0.000000e+00> : vector<16xf32>
    %3 = vector.multi_reduction <add>, %2, %cst_3 [0] : vector<4x16xf32> to vector<16xf32>
    %4 = vector.shape_cast %3 : vector<16xf32> to vector<1x16xf32>
    %c0_4 = arith.constant 0 : index
    %c0_5 = arith.constant 0 : index
    %5 = vector.load %arg6[%c0_4, %c0_5] : memref<16x4xf32, #tpu.memory_space<vmem>>, vector<16x4xf32>
    %cst_6 = arith.constant dense<0.000000e+00> : vector<1x4xf32>
    %6 = tpu.matmul %4, %5, %cst_6 {dimension_numbers = #tpu.dot_dimension_numbers<[1], [0], [0], [1], [0, 0, 1, 1], [], []>} : vector<1x16xf32>, vector<16x4xf32>, vector<1x4xf32> -> vector<1x4xf32>
    %cst_7 = arith.constant 1.562500e-02 : f32
    %7 = vector.broadcast %cst_7 : f32 to vector<1x4xf32>
    %8 = arith.mulf %6, %7 : vector<1x4xf32>
    %c0_8 = arith.constant 0 : index
    %c0_9 = arith.constant 0 : index
    %9 = vector.load %arg7[%c0_8, %c0_9] : memref<4x16xf32, #tpu.memory_space<vmem>>, vector<4x16xf32>
    %cst_10 = arith.constant dense<0.000000e+00> : vector<1x16xf32>
    %10 = tpu.matmul %8, %9, %cst_10 {dimension_numbers = #tpu.dot_dimension_numbers<[1], [0], [0], [1], [0, 0, 1, 1], [], []>} : vector<1x4xf32>, vector<4x16xf32>, vector<1x16xf32> -> vector<1x16xf32>
    %11 = vector.shape_cast %10 : vector<1x16xf32> to vector<1x1x16xf32>
    %12 = vector.broadcast %11 : vector<1x1x16xf32> to vector<4x4x16xf32>
    %13 = arith.subf %1, %12 : vector<4x4x16xf32>
    %14 = arith.mulf %13, %13 : vector<4x4x16xf32>
    %cst_11 = arith.constant dense<0.000000e+00> : vector<4x16xf32>
    %15 = vector.multi_reduction <add>, %14, %cst_11 [0] : vector<4x4x16xf32> to vector<4x16xf32>
    %cst_12 = arith.constant dense<0.000000e+00> : vector<16xf32>
    %16 = vector.multi_reduction <add>, %15, %cst_12 [0] : vector<4x16xf32> to vector<16xf32>
    %17 = vector.shape_cast %16 : vector<16xf32> to vector<1x16xf32>
    %c0_13 = arith.constant 0 : index
    %c0_14 = arith.constant 0 : index
    %18 = vector.load %arg6[%c0_13, %c0_14] : memref<16x4xf32, #tpu.memory_space<vmem>>, vector<16x4xf32>
    %cst_15 = arith.constant dense<0.000000e+00> : vector<1x4xf32>
    %19 = tpu.matmul %17, %18, %cst_15 {dimension_numbers = #tpu.dot_dimension_numbers<[1], [0], [0], [1], [0, 0, 1, 1], [], []>} : vector<1x16xf32>, vector<16x4xf32>, vector<1x4xf32> -> vector<1x4xf32>
    %cst_16 = arith.constant 1.562500e-02 : f32
    %20 = vector.broadcast %cst_16 : f32 to vector<1x4xf32>
    %21 = arith.mulf %19, %20 : vector<1x4xf32>
    %cst_17 = arith.constant 9.99999974E-6 : f32
    %22 = vector.broadcast %cst_17 : f32 to vector<1x4xf32>
    %23 = arith.addf %21, %22 : vector<1x4xf32>
    %24 = math.rsqrt %23 : vector<1x4xf32>
    %c0_18 = arith.constant 0 : index
    %c0_19 = arith.constant 0 : index
    %25 = vector.load %arg7[%c0_18, %c0_19] : memref<4x16xf32, #tpu.memory_space<vmem>>, vector<4x16xf32>
    %cst_20 = arith.constant dense<0.000000e+00> : vector<1x16xf32>
    %26 = tpu.matmul %24, %25, %cst_20 {dimension_numbers = #tpu.dot_dimension_numbers<[1], [0], [0], [1], [0, 0, 1, 1], [], []>} : vector<1x4xf32>, vector<4x16xf32>, vector<1x16xf32> -> vector<1x16xf32>
    %27 = vector.shape_cast %26 : vector<1x16xf32> to vector<1x1x16xf32>
    %28 = vector.broadcast %27 : vector<1x1x16xf32> to vector<4x4x16xf32>
    %29 = arith.mulf %13, %28 : vector<4x4x16xf32>
    %c0_21 = arith.constant 0 : index
    %c0_22 = arith.constant 0 : index
    %30 = vector.load %arg4[%c0_21, %c0_22] : memref<1x16xf32, #tpu.memory_space<vmem>>, vector<1x16xf32>
    %31 = vector.shape_cast %30 : vector<1x16xf32> to vector<1x1x16xf32>
    %32 = vector.broadcast %31 : vector<1x1x16xf32> to vector<4x4x16xf32>
    %33 = arith.mulf %29, %32 : vector<4x4x16xf32>
    %c0_23 = arith.constant 0 : index
    %c0_24 = arith.constant 0 : index
    %34 = vector.load %arg5[%c0_23, %c0_24] : memref<1x16xf32, #tpu.memory_space<vmem>>, vector<1x16xf32>
    %35 = vector.shape_cast %34 : vector<1x16xf32> to vector<1x1x16xf32>
    %36 = vector.broadcast %35 : vector<1x1x16xf32> to vector<4x4x16xf32>
    %37 = arith.addf %33, %36 : vector<4x4x16xf32>
    %cst_25 = arith.constant 0.000000e+00 : f32
    %38 = vector.broadcast %cst_25 : f32 to vector<4x4x16xf32>
    %39 = arith.maximumf %37, %38 : vector<4x4x16xf32>
    %cst_26 = arith.constant 0.000000e+00 : f32
    %40 = vector.broadcast %cst_26 : f32 to vector<40x16xf32>
    %c0_27 = arith.constant 0 : index
    %c0_28 = arith.constant 0 : index
    %41 = vector.load %arg10[%c0_27, %c0_28] : memref<40x16xf32, #tpu.memory_space<vmem>>, vector<40x16xf32>
    tpu.vector_store %arg10[%c0_27, %c0_28], %40 {strides = array<i32>} : memref<40x16xf32, #tpu.memory_space<vmem>>, vector<40x16xf32>,
    %42 = vector.extract_strided_slice %39 {offsets = [0, 0, 0], sizes = [1, 4, 16], strides = [1, 1, 1]} : vector<4x4x16xf32> to vector<1x4x16xf32>
    %43 = vector.shape_cast %42 : vector<1x4x16xf32> to vector<4x16xf32>
    %c7 = arith.constant 7 : index
    %c0_29 = arith.constant 0 : index
    %44 = vector.load %arg10[%c7, %c0_29] : memref<40x16xf32, #tpu.memory_space<vmem>>, vector<4x16xf32>
    tpu.vector_store %arg10[%c7, %c0_29], %43 {strides = array<i32>} : memref<40x16xf32, #tpu.memory_space<vmem>>, vector<4x16xf32>,
    %45 = vector.extract_strided_slice %39 {offsets = [1, 0, 0], sizes = [1, 4, 16], strides = [1, 1, 1]} : vector<4x4x16xf32> to vector<1x4x16xf32>
    %46 = vector.shape_cast %45 : vector<1x4x16xf32> to vector<4x16xf32>
    %c13 = arith.constant 13 : index
    %c0_30 = arith.constant 0 : index
    %47 = vector.load %arg10[%c13, %c0_30] : memref<40x16xf32, #tpu.memory_space<vmem>>, vector<4x16xf32>
    tpu.vector_store %arg10[%c13, %c0_30], %46 {strides = array<i32>} : memref<40x16xf32, #tpu.memory_space<vmem>>, vector<4x16xf32>,
    %48 = vector.extract_strided_slice %39 {offsets = [2, 0, 0], sizes = [1, 4, 16], strides = [1, 1, 1]} : vector<4x4x16xf32> to vector<1x4x16xf32>
    %49 = vector.shape_cast %48 : vector<1x4x16xf32> to vector<4x16xf32>
    %c19 = arith.constant 19 : index
    %c0_31 = arith.constant 0 : index
    %50 = vector.load %arg10[%c19, %c0_31] : memref<40x16xf32, #tpu.memory_space<vmem>>, vector<4x16xf32>
    tpu.vector_store %arg10[%c19, %c0_31], %49 {strides = array<i32>} : memref<40x16xf32, #tpu.memory_space<vmem>>, vector<4x16xf32>,
    %51 = vector.extract_strided_slice %39 {offsets = [3, 0, 0], sizes = [1, 4, 16], strides = [1, 1, 1]} : vector<4x4x16xf32> to vector<1x4x16xf32>
    %52 = vector.shape_cast %51 : vector<1x4x16xf32> to vector<4x16xf32>
    %c25 = arith.constant 25 : index
    %c0_32 = arith.constant 0 : index
    %53 = vector.load %arg10[%c25, %c0_32] : memref<40x16xf32, #tpu.memory_space<vmem>>, vector<4x16xf32>
    tpu.vector_store %arg10[%c25, %c0_32], %52 {strides = array<i32>} : memref<40x16xf32, #tpu.memory_space<vmem>>, vector<4x16xf32>,
    %cst_33 = arith.constant 0.000000e+00 : f32
    %54 = vector.broadcast %cst_33 : f32 to vector<24x16xf32>
    %c0_34 = arith.constant 0 : index
    %c0_35 = arith.constant 0 : index
    %55 = vector.load %arg10[%c0_34, %c0_35] : memref<40x16xf32, #tpu.memory_space<vmem>>, vector<24x16xf32>
    %56 = arith.truncf %55 : vector<24x16xf32> to vector<24x16xbf16>
    %c0_36 = arith.constant 0 : index
    %c0_37 = arith.constant 0 : index
    %c0_38 = arith.constant 0 : index
    %57 = vector.load %arg2[%c0_36, %c0_37, %c0_38] : memref<9x16x16xbf16, #tpu.memory_space<vmem>>, vector<1x16x16xbf16>
    %58 = vector.shape_cast %57 : vector<1x16x16xbf16> to vector<16x16xbf16>
    %cst_39 = arith.constant dense<0.000000e+00> : vector<24x16xf32>
    %59 = tpu.matmul %56, %58, %cst_39 {dimension_numbers = #tpu.dot_dimension_numbers<[1], [0], [0], [1], [0, 0, 1, 1], [], []>} : vector<24x16xbf16>, vector<16x16xbf16>, vector<24x16xf32> -> vector<24x16xf32>
    %60 = arith.addf %54, %59 : vector<24x16xf32>
    %c1 = arith.constant 1 : index
    %c0_40 = arith.constant 0 : index
    %61 = vector.load %arg10[%c1, %c0_40] : memref<40x16xf32, #tpu.memory_space<vmem>>, vector<24x16xf32>
    %62 = arith.truncf %61 : vector<24x16xf32> to vector<24x16xbf16>
    %c1_41 = arith.constant 1 : index
    %c0_42 = arith.constant 0 : index
    %c0_43 = arith.constant 0 : index
    %63 = vector.load %arg2[%c1_41, %c0_42, %c0_43] : memref<9x16x16xbf16, #tpu.memory_space<vmem>>, vector<1x16x16xbf16>
    %64 = vector.shape_cast %63 : vector<1x16x16xbf16> to vector<16x16xbf16>
    %cst_44 = arith.constant dense<0.000000e+00> : vector<24x16xf32>
    %65 = tpu.matmul %62, %64, %cst_44 {dimension_numbers = #tpu.dot_dimension_numbers<[1], [0], [0], [1], [0, 0, 1, 1], [], []>} : vector<24x16xbf16>, vector<16x16xbf16>, vector<24x16xf32> -> vector<24x16xf32>
    %66 = arith.addf %60, %65 : vector<24x16xf32>
    %c2 = arith.constant 2 : index
    %c0_45 = arith.constant 0 : index
    %67 = vector.load %arg10[%c2, %c0_45] : memref<40x16xf32, #tpu.memory_space<vmem>>, vector<24x16xf32>
    %68 = arith.truncf %67 : vector<24x16xf32> to vector<24x16xbf16>
    %c2_46 = arith.constant 2 : index
    %c0_47 = arith.constant 0 : index
    %c0_48 = arith.constant 0 : index
    %69 = vector.load %arg2[%c2_46, %c0_47, %c0_48] : memref<9x16x16xbf16, #tpu.memory_space<vmem>>, vector<1x16x16xbf16>
    %70 = vector.shape_cast %69 : vector<1x16x16xbf16> to vector<16x16xbf16>
    %cst_49 = arith.constant dense<0.000000e+00> : vector<24x16xf32>
    %71 = tpu.matmul %68, %70, %cst_49 {dimension_numbers = #tpu.dot_dimension_numbers<[1], [0], [0], [1], [0, 0, 1, 1], [], []>} : vector<24x16xbf16>, vector<16x16xbf16>, vector<24x16xf32> -> vector<24x16xf32>
    %72 = arith.addf %66, %71 : vector<24x16xf32>
    %c6 = arith.constant 6 : index
    %c0_50 = arith.constant 0 : index
    %73 = vector.load %arg10[%c6, %c0_50] : memref<40x16xf32, #tpu.memory_space<vmem>>, vector<24x16xf32>
    %74 = arith.truncf %73 : vector<24x16xf32> to vector<24x16xbf16>
    %c3 = arith.constant 3 : index
    %c0_51 = arith.constant 0 : index
    %c0_52 = arith.constant 0 : index
    %75 = vector.load %arg2[%c3, %c0_51, %c0_52] : memref<9x16x16xbf16, #tpu.memory_space<vmem>>, vector<1x16x16xbf16>
    %76 = vector.shape_cast %75 : vector<1x16x16xbf16> to vector<16x16xbf16>
    %cst_53 = arith.constant dense<0.000000e+00> : vector<24x16xf32>
    %77 = tpu.matmul %74, %76, %cst_53 {dimension_numbers = #tpu.dot_dimension_numbers<[1], [0], [0], [1], [0, 0, 1, 1], [], []>} : vector<24x16xbf16>, vector<16x16xbf16>, vector<24x16xf32> -> vector<24x16xf32>
    %78 = arith.addf %72, %77 : vector<24x16xf32>
    %c7_54 = arith.constant 7 : index
    %c0_55 = arith.constant 0 : index
    %79 = vector.load %arg10[%c7_54, %c0_55] : memref<40x16xf32, #tpu.memory_space<vmem>>, vector<24x16xf32>
    %80 = arith.truncf %79 : vector<24x16xf32> to vector<24x16xbf16>
    %c4 = arith.constant 4 : index
    %c0_56 = arith.constant 0 : index
    %c0_57 = arith.constant 0 : index
    %81 = vector.load %arg2[%c4, %c0_56, %c0_57] : memref<9x16x16xbf16, #tpu.memory_space<vmem>>, vector<1x16x16xbf16>
    %82 = vector.shape_cast %81 : vector<1x16x16xbf16> to vector<16x16xbf16>
    %cst_58 = arith.constant dense<0.000000e+00> : vector<24x16xf32>
    %83 = tpu.matmul %80, %82, %cst_58 {dimension_numbers = #tpu.dot_dimension_numbers<[1], [0], [0], [1], [0, 0, 1, 1], [], []>} : vector<24x16xbf16>, vector<16x16xbf16>, vector<24x16xf32> -> vector<24x16xf32>
    %84 = arith.addf %78, %83 : vector<24x16xf32>
    %c8 = arith.constant 8 : index
    %c0_59 = arith.constant 0 : index
    %85 = vector.load %arg10[%c8, %c0_59] : memref<40x16xf32, #tpu.memory_space<vmem>>, vector<24x16xf32>
    %86 = arith.truncf %85 : vector<24x16xf32> to vector<24x16xbf16>
    %c5 = arith.constant 5 : index
    %c0_60 = arith.constant 0 : index
    %c0_61 = arith.constant 0 : index
    %87 = vector.load %arg2[%c5, %c0_60, %c0_61] : memref<9x16x16xbf16, #tpu.memory_space<vmem>>, vector<1x16x16xbf16>
    %88 = vector.shape_cast %87 : vector<1x16x16xbf16> to vector<16x16xbf16>
    %cst_62 = arith.constant dense<0.000000e+00> : vector<24x16xf32>
    %89 = tpu.matmul %86, %88, %cst_62 {dimension_numbers = #tpu.dot_dimension_numbers<[1], [0], [0], [1], [0, 0, 1, 1], [], []>} : vector<24x16xbf16>, vector<16x16xbf16>, vector<24x16xf32> -> vector<24x16xf32>
    %90 = arith.addf %84, %89 : vector<24x16xf32>
    %c12 = arith.constant 12 : index
    %c0_63 = arith.constant 0 : index
    %91 = vector.load %arg10[%c12, %c0_63] : memref<40x16xf32, #tpu.memory_space<vmem>>, vector<24x16xf32>
    %92 = arith.truncf %91 : vector<24x16xf32> to vector<24x16xbf16>
    %c6_64 = arith.constant 6 : index
    %c0_65 = arith.constant 0 : index
    %c0_66 = arith.constant 0 : index
    %93 = vector.load %arg2[%c6_64, %c0_65, %c0_66] : memref<9x16x16xbf16, #tpu.memory_space<vmem>>, vector<1x16x16xbf16>
    %94 = vector.shape_cast %93 : vector<1x16x16xbf16> to vector<16x16xbf16>
    %cst_67 = arith.constant dense<0.000000e+00> : vector<24x16xf32>
    %95 = tpu.matmul %92, %94, %cst_67 {dimension_numbers = #tpu.dot_dimension_numbers<[1], [0], [0], [1], [0, 0, 1, 1], [], []>} : vector<24x16xbf16>, vector<16x16xbf16>, vector<24x16xf32> -> vector<24x16xf32>
    %96 = arith.addf %90, %95 : vector<24x16xf32>
    %c13_68 = arith.constant 13 : index
    %c0_69 = arith.constant 0 : index
    %97 = vector.load %arg10[%c13_68, %c0_69] : memref<40x16xf32, #tpu.memory_space<vmem>>, vector<24x16xf32>
    %98 = arith.truncf %97 : vector<24x16xf32> to vector<24x16xbf16>
    %c7_70 = arith.constant 7 : index
    %c0_71 = arith.constant 0 : index
    %c0_72 = arith.constant 0 : index
    %99 = vector.load %arg2[%c7_70, %c0_71, %c0_72] : memref<9x16x16xbf16, #tpu.memory_space<vmem>>, vector<1x16x16xbf16>
    %100 = vector.shape_cast %99 : vector<1x16x16xbf16> to vector<16x16xbf16>
    %cst_73 = arith.constant dense<0.000000e+00> : vector<24x16xf32>
    %101 = tpu.matmul %98, %100, %cst_73 {dimension_numbers = #tpu.dot_dimension_numbers<[1], [0], [0], [1], [0, 0, 1, 1], [], []>} : vector<24x16xbf16>, vector<16x16xbf16>, vector<24x16xf32> -> vector<24x16xf32>
    %102 = arith.addf %96, %101 : vector<24x16xf32>
    %c14 = arith.constant 14 : index
    %c0_74 = arith.constant 0 : index
    %103 = vector.load %arg10[%c14, %c0_74] : memref<40x16xf32, #tpu.memory_space<vmem>>, vector<24x16xf32>
    %104 = arith.truncf %103 : vector<24x16xf32> to vector<24x16xbf16>
    %c8_75 = arith.constant 8 : index
    %c0_76 = arith.constant 0 : index
    %c0_77 = arith.constant 0 : index
    %105 = vector.load %arg2[%c8_75, %c0_76, %c0_77] : memref<9x16x16xbf16, #tpu.memory_space<vmem>>, vector<1x16x16xbf16>
    %106 = vector.shape_cast %105 : vector<1x16x16xbf16> to vector<16x16xbf16>
    %cst_78 = arith.constant dense<0.000000e+00> : vector<24x16xf32>
    %107 = tpu.matmul %104, %106, %cst_78 {dimension_numbers = #tpu.dot_dimension_numbers<[1], [0], [0], [1], [0, 0, 1, 1], [], []>} : vector<24x16xbf16>, vector<16x16xbf16>, vector<24x16xf32> -> vector<24x16xf32>
    %108 = arith.addf %102, %107 : vector<24x16xf32>
    %c0_79 = arith.constant 0 : index
    %c0_80 = arith.constant 0 : index
    %109 = vector.load %arg3[%c0_79, %c0_80] : memref<1x16xf32, #tpu.memory_space<vmem>>, vector<1x16xf32>
    %110 = vector.broadcast %109 : vector<1x16xf32> to vector<24x16xf32>
    %111 = arith.addf %108, %110 : vector<24x16xf32>
    %112 = vector.extract_strided_slice %111 {offsets = [0, 0], sizes = [4, 16], strides = [1, 1]} : vector<24x16xf32> to vector<4x16xf32>
    %c0_81 = arith.constant 0 : index
    %c0_82 = arith.constant 0 : index
    %c0_83 = arith.constant 0 : index
    %c0_84 = arith.constant 0 : index
    %113 = vector.load %arg8[%c0_81, %c0_82, %c0_83, %c0_84] : memref<1x4x4x16xf32, #tpu.memory_space<vmem>>, vector<1x1x4x16xf32>
    %114 = vector.shape_cast %113 : vector<1x1x4x16xf32> to vector<4x16xf32>
    %115 = arith.addf %112, %114 : vector<4x16xf32>
    %c0_85 = arith.constant 0 : index
    %c0_86 = arith.constant 0 : index
    %c0_87 = arith.constant 0 : index
    %c0_88 = arith.constant 0 : index
    %116 = vector.load %arg9[%c0_85, %c0_86, %c0_87, %c0_88] : memref<1x4x4x16xf32, #tpu.memory_space<vmem>>, vector<1x1x4x16xf32>
    %117 = vector.shape_cast %116 : vector<1x1x4x16xf32> to vector<4x16xf32>
    %118 = vector.shape_cast %115 : vector<4x16xf32> to vector<1x1x4x16xf32>
    tpu.vector_store %arg9[%c0_85, %c0_86, %c0_87, %c0_88], %118 {strides = array<i32>} : memref<1x4x4x16xf32, #tpu.memory_space<vmem>>, vector<1x1x4x16xf32>,
    %119 = vector.extract_strided_slice %111 {offsets = [6, 0], sizes = [4, 16], strides = [1, 1]} : vector<24x16xf32> to vector<4x16xf32>
    %c0_89 = arith.constant 0 : index
    %c1_90 = arith.constant 1 : index
    %c0_91 = arith.constant 0 : index
    %c0_92 = arith.constant 0 : index
    %120 = vector.load %arg8[%c0_89, %c1_90, %c0_91, %c0_92] : memref<1x4x4x16xf32, #tpu.memory_space<vmem>>, vector<1x1x4x16xf32>
    %121 = vector.shape_cast %120 : vector<1x1x4x16xf32> to vector<4x16xf32>
    %122 = arith.addf %119, %121 : vector<4x16xf32>
    %c0_93 = arith.constant 0 : index
    %c1_94 = arith.constant 1 : index
    %c0_95 = arith.constant 0 : index
    %c0_96 = arith.constant 0 : index
    %123 = vector.load %arg9[%c0_93, %c1_94, %c0_95, %c0_96] : memref<1x4x4x16xf32, #tpu.memory_space<vmem>>, vector<1x1x4x16xf32>
    %124 = vector.shape_cast %123 : vector<1x1x4x16xf32> to vector<4x16xf32>
    %125 = vector.shape_cast %122 : vector<4x16xf32> to vector<1x1x4x16xf32>
    tpu.vector_store %arg9[%c0_93, %c1_94, %c0_95, %c0_96], %125 {strides = array<i32>} : memref<1x4x4x16xf32, #tpu.memory_space<vmem>>, vector<1x1x4x16xf32>,
    %126 = vector.extract_strided_slice %111 {offsets = [12, 0], sizes = [4, 16], strides = [1, 1]} : vector<24x16xf32> to vector<4x16xf32>
    %c0_97 = arith.constant 0 : index
    %c2_98 = arith.constant 2 : index
    %c0_99 = arith.constant 0 : index
    %c0_100 = arith.constant 0 : index
    %127 = vector.load %arg8[%c0_97, %c2_98, %c0_99, %c0_100] : memref<1x4x4x16xf32, #tpu.memory_space<vmem>>, vector<1x1x4x16xf32>
    %128 = vector.shape_cast %127 : vector<1x1x4x16xf32> to vector<4x16xf32>
    %129 = arith.addf %126, %128 : vector<4x16xf32>
    %c0_101 = arith.constant 0 : index
    %c2_102 = arith.constant 2 : index
    %c0_103 = arith.constant 0 : index
    %c0_104 = arith.constant 0 : index
    %130 = vector.load %arg9[%c0_101, %c2_102, %c0_103, %c0_104] : memref<1x4x4x16xf32, #tpu.memory_space<vmem>>, vector<1x1x4x16xf32>
    %131 = vector.shape_cast %130 : vector<1x1x4x16xf32> to vector<4x16xf32>
    %132 = vector.shape_cast %129 : vector<4x16xf32> to vector<1x1x4x16xf32>
    tpu.vector_store %arg9[%c0_101, %c2_102, %c0_103, %c0_104], %132 {strides = array<i32>} : memref<1x4x4x16xf32, #tpu.memory_space<vmem>>, vector<1x1x4x16xf32>,
    %133 = vector.extract_strided_slice %111 {offsets = [18, 0], sizes = [4, 16], strides = [1, 1]} : vector<24x16xf32> to vector<4x16xf32>
    %c0_105 = arith.constant 0 : index
    %c3_106 = arith.constant 3 : index
    %c0_107 = arith.constant 0 : index
    %c0_108 = arith.constant 0 : index
    %134 = vector.load %arg8[%c0_105, %c3_106, %c0_107, %c0_108] : memref<1x4x4x16xf32, #tpu.memory_space<vmem>>, vector<1x1x4x16xf32>
    %135 = vector.shape_cast %134 : vector<1x1x4x16xf32> to vector<4x16xf32>
    %136 = arith.addf %133, %135 : vector<4x16xf32>
    %c0_109 = arith.constant 0 : index
    %c3_110 = arith.constant 3 : index
    %c0_111 = arith.constant 0 : index
    %c0_112 = arith.constant 0 : index
    %137 = vector.load %arg9[%c0_109, %c3_110, %c0_111, %c0_112] : memref<1x4x4x16xf32, #tpu.memory_space<vmem>>, vector<1x1x4x16xf32>
    %138 = vector.shape_cast %137 : vector<1x1x4x16xf32> to vector<4x16xf32>
    %139 = vector.shape_cast %136 : vector<4x16xf32> to vector<1x1x4x16xf32>
    tpu.vector_store %arg9[%c0_109, %c3_110, %c0_111, %c0_112], %139 {strides = array<i32>} : memref<1x4x4x16xf32, #tpu.memory_space<vmem>>, vector<1x1x4x16xf32>,
    return
  }
  func.func @transform_0(%arg0: i32) -> (i32, i32, i32, i32) {
    %c0_i32 = arith.constant 0 : i32
    %c0_i32_0 = arith.constant 0 : i32
    %c0_i32_1 = arith.constant 0 : i32
    %c0_i32_2 = arith.constant 0 : i32
    return %arg0, %c0_i32, %c0_i32_0, %c0_i32_1 : i32, i32, i32, i32
  }
  func.func @transform_1(%arg0: i32) -> (i32, i32, i32) {
    %c0_i32 = arith.constant 0 : i32
    %c0_i32_0 = arith.constant 0 : i32
    %c0_i32_1 = arith.constant 0 : i32
    %c0_i32_2 = arith.constant 0 : i32
    return %c0_i32, %c0_i32_0, %c0_i32_1 : i32, i32, i32
  }
  func.func @transform_2(%arg0: i32) -> (i32, i32) {
    %c0_i32 = arith.constant 0 : i32
    %c0_i32_0 = arith.constant 0 : i32
    %c0_i32_1 = arith.constant 0 : i32
    return %c0_i32, %c0_i32_0 : i32, i32
  }
  func.func @transform_3(%arg0: i32) -> (i32, i32) {
    %c0_i32 = arith.constant 0 : i32
    %c0_i32_0 = arith.constant 0 : i32
    %c0_i32_1 = arith.constant 0 : i32
    return %c0_i32, %c0_i32_0 : i32, i32
  }
  func.func @transform_4(%arg0: i32) -> (i32, i32) {
    %c0_i32 = arith.constant 0 : i32
    %c0_i32_0 = arith.constant 0 : i32
    %c0_i32_1 = arith.constant 0 : i32
    return %c0_i32, %c0_i32_0 : i32, i32
  }
  func.func @transform_5(%arg0: i32) -> (i32, i32) {
    %c0_i32 = arith.constant 0 : i32
    %c0_i32_0 = arith.constant 0 : i32
    %c0_i32_1 = arith.constant 0 : i32
    return %c0_i32, %c0_i32_0 : i32, i32
  }
  func.func @transform_6(%arg0: i32) -> (i32, i32) {
    %c0_i32 = arith.constant 0 : i32
    %c0_i32_0 = arith.constant 0 : i32
    %c0_i32_1 = arith.constant 0 : i32
    return %c0_i32, %c0_i32_0 : i32, i32
  }
  func.func @transform_7(%arg0: i32) -> (i32, i32, i32, i32) {
    %c0_i32 = arith.constant 0 : i32
    %c0_i32_0 = arith.constant 0 : i32
    %c0_i32_1 = arith.constant 0 : i32
    %c0_i32_2 = arith.constant 0 : i32
    return %arg0, %c0_i32, %c0_i32_0, %c0_i32_1 : i32, i32, i32, i32
  }
  func.func @transform_8(%arg0: i32) -> (i32, i32, i32, i32) {
    %c0_i32 = arith.constant 0 : i32
    %c0_i32_0 = arith.constant 0 : i32
    %c0_i32_1 = arith.constant 0 : i32
    %c0_i32_2 = arith.constant 0 : i32
    return %arg0, %c0_i32, %c0_i32_0, %c0_i32_1 : i32, i32, i32, i32
  }
}

module attributes {stable_mosaic.version = 11 : i64} {
  func.func @fused_conv_kernel(%arg0: i32, %arg1: memref<1x4x4x16xf32, #tpu.memory_space<vmem>>, %arg2: memref<9x16x16xbf16, #tpu.memory_space<vmem>>, %arg3: memref<1x16xf32, #tpu.memory_space<vmem>>, %arg4: memref<1x16xf32, #tpu.memory_space<vmem>>, %arg5: memref<1x16xf32, #tpu.memory_space<vmem>>, %arg6: memref<16x4xf32, #tpu.memory_space<vmem>>, %arg7: memref<4x16xf32, #tpu.memory_space<vmem>>, %arg8: memref<1x4x4x16xf32, #tpu.memory_space<vmem>>, %arg9: memref<40x16xf32, #tpu.memory_space<vmem>>) attributes {dimension_semantics = [#tpu.dimension_semantics<parallel>], iteration_bounds = array<i64: 2>, scalar_prefetch = 0 : i64, scratch_operands = 1 : i64, tpu.core_type = #tpu.core_type<tc>, window_params = [{transform_indices = @transform_0, window_bounds = array<i64: 1, 4, 4, 16>}, {pipeline_mode = #tpu.pipeline_mode<synchronous>, transform_indices = @transform_1, window_bounds = array<i64: 9, 16, 16>}, {pipeline_mode = #tpu.pipeline_mode<synchronous>, transform_indices = @transform_2, window_bounds = array<i64: 1, 16>}, {pipeline_mode = #tpu.pipeline_mode<synchronous>, transform_indices = @transform_3, window_bounds = array<i64: 1, 16>}, {pipeline_mode = #tpu.pipeline_mode<synchronous>, transform_indices = @transform_4, window_bounds = array<i64: 1, 16>}, {pipeline_mode = #tpu.pipeline_mode<synchronous>, transform_indices = @transform_5, window_bounds = array<i64: 16, 4>}, {pipeline_mode = #tpu.pipeline_mode<synchronous>, transform_indices = @transform_6, window_bounds = array<i64: 4, 16>}, {transform_indices = @transform_7, window_bounds = array<i64: 1, 4, 4, 16>}]} {
    %c0 = arith.constant 0 : index
    %c0_0 = arith.constant 0 : index
    %c0_1 = arith.constant 0 : index
    %c0_2 = arith.constant 0 : index
    %0 = vector.load %arg1[%c0, %c0_0, %c0_1, %c0_2] : memref<1x4x4x16xf32, #tpu.memory_space<vmem>>, vector<1x4x4x16xf32>
    %1 = vector.shape_cast %0 : vector<1x4x4x16xf32> to vector<4x4x16xf32>
    %cst = arith.constant dense<0.000000e+00> : vector<4x16xf32>
    %2 = vector.multi_reduction <add>, %1, %cst [0] : vector<4x4x16xf32> to vector<4x16xf32>
    %cst_3 = arith.constant dense<0.000000e+00> : vector<16xf32>
    %3 = vector.multi_reduction <add>, %2, %cst_3 [0] : vector<4x16xf32> to vector<16xf32>
    %4 = vector.shape_cast %3 : vector<16xf32> to vector<1x16xf32>
    %c0_4 = arith.constant 0 : index
    %c0_5 = arith.constant 0 : index
    %5 = vector.load %arg6[%c0_4, %c0_5] : memref<16x4xf32, #tpu.memory_space<vmem>>, vector<16x4xf32>
    %cst_6 = arith.constant dense<0.000000e+00> : vector<1x4xf32>
    %6 = tpu.matmul %4, %5, %cst_6 {dimension_numbers = #tpu.dot_dimension_numbers<[1], [0], [0], [1], [0, 0, 1, 1], [], []>} : vector<1x16xf32>, vector<16x4xf32>, vector<1x4xf32> -> vector<1x4xf32>
    %cst_7 = arith.constant 1.562500e-02 : f32
    %7 = vector.broadcast %cst_7 : f32 to vector<1x4xf32>
    %8 = arith.mulf %6, %7 : vector<1x4xf32>
    %c0_8 = arith.constant 0 : index
    %c0_9 = arith.constant 0 : index
    %9 = vector.load %arg7[%c0_8, %c0_9] : memref<4x16xf32, #tpu.memory_space<vmem>>, vector<4x16xf32>
    %cst_10 = arith.constant dense<0.000000e+00> : vector<1x16xf32>
    %10 = tpu.matmul %8, %9, %cst_10 {dimension_numbers = #tpu.dot_dimension_numbers<[1], [0], [0], [1], [0, 0, 1, 1], [], []>} : vector<1x4xf32>, vector<4x16xf32>, vector<1x16xf32> -> vector<1x16xf32>
    %11 = vector.shape_cast %10 : vector<1x16xf32> to vector<1x1x16xf32>
    %12 = vector.broadcast %11 : vector<1x1x16xf32> to vector<4x4x16xf32>
    %13 = arith.subf %1, %12 : vector<4x4x16xf32>
    %14 = arith.mulf %13, %13 : vector<4x4x16xf32>
    %cst_11 = arith.constant dense<0.000000e+00> : vector<4x16xf32>
    %15 = vector.multi_reduction <add>, %14, %cst_11 [0] : vector<4x4x16xf32> to vector<4x16xf32>
    %cst_12 = arith.constant dense<0.000000e+00> : vector<16xf32>
    %16 = vector.multi_reduction <add>, %15, %cst_12 [0] : vector<4x16xf32> to vector<16xf32>
    %17 = vector.shape_cast %16 : vector<16xf32> to vector<1x16xf32>
    %c0_13 = arith.constant 0 : index
    %c0_14 = arith.constant 0 : index
    %18 = vector.load %arg6[%c0_13, %c0_14] : memref<16x4xf32, #tpu.memory_space<vmem>>, vector<16x4xf32>
    %cst_15 = arith.constant dense<0.000000e+00> : vector<1x4xf32>
    %19 = tpu.matmul %17, %18, %cst_15 {dimension_numbers = #tpu.dot_dimension_numbers<[1], [0], [0], [1], [0, 0, 1, 1], [], []>} : vector<1x16xf32>, vector<16x4xf32>, vector<1x4xf32> -> vector<1x4xf32>
    %cst_16 = arith.constant 1.562500e-02 : f32
    %20 = vector.broadcast %cst_16 : f32 to vector<1x4xf32>
    %21 = arith.mulf %19, %20 : vector<1x4xf32>
    %cst_17 = arith.constant 9.99999974E-6 : f32
    %22 = vector.broadcast %cst_17 : f32 to vector<1x4xf32>
    %23 = arith.addf %21, %22 : vector<1x4xf32>
    %24 = math.rsqrt %23 : vector<1x4xf32>
    %c0_18 = arith.constant 0 : index
    %c0_19 = arith.constant 0 : index
    %25 = vector.load %arg7[%c0_18, %c0_19] : memref<4x16xf32, #tpu.memory_space<vmem>>, vector<4x16xf32>
    %cst_20 = arith.constant dense<0.000000e+00> : vector<1x16xf32>
    %26 = tpu.matmul %24, %25, %cst_20 {dimension_numbers = #tpu.dot_dimension_numbers<[1], [0], [0], [1], [0, 0, 1, 1], [], []>} : vector<1x4xf32>, vector<4x16xf32>, vector<1x16xf32> -> vector<1x16xf32>
    %27 = vector.shape_cast %26 : vector<1x16xf32> to vector<1x1x16xf32>
    %28 = vector.broadcast %27 : vector<1x1x16xf32> to vector<4x4x16xf32>
    %29 = arith.mulf %13, %28 : vector<4x4x16xf32>
    %c0_21 = arith.constant 0 : index
    %c0_22 = arith.constant 0 : index
    %30 = vector.load %arg4[%c0_21, %c0_22] : memref<1x16xf32, #tpu.memory_space<vmem>>, vector<1x16xf32>
    %31 = vector.shape_cast %30 : vector<1x16xf32> to vector<1x1x16xf32>
    %32 = vector.broadcast %31 : vector<1x1x16xf32> to vector<4x4x16xf32>
    %33 = arith.mulf %29, %32 : vector<4x4x16xf32>
    %c0_23 = arith.constant 0 : index
    %c0_24 = arith.constant 0 : index
    %34 = vector.load %arg5[%c0_23, %c0_24] : memref<1x16xf32, #tpu.memory_space<vmem>>, vector<1x16xf32>
    %35 = vector.shape_cast %34 : vector<1x16xf32> to vector<1x1x16xf32>
    %36 = vector.broadcast %35 : vector<1x1x16xf32> to vector<4x4x16xf32>
    %37 = arith.addf %33, %36 : vector<4x4x16xf32>
    %cst_25 = arith.constant 0.000000e+00 : f32
    %38 = vector.broadcast %cst_25 : f32 to vector<4x4x16xf32>
    %39 = arith.maximumf %37, %38 : vector<4x4x16xf32>
    %cst_26 = arith.constant 0.000000e+00 : f32
    %40 = vector.broadcast %cst_26 : f32 to vector<40x16xf32>
    %c0_27 = arith.constant 0 : index
    %c0_28 = arith.constant 0 : index
    %41 = vector.load %arg9[%c0_27, %c0_28] : memref<40x16xf32, #tpu.memory_space<vmem>>, vector<40x16xf32>
    tpu.vector_store %arg9[%c0_27, %c0_28], %40 {strides = array<i32>} : memref<40x16xf32, #tpu.memory_space<vmem>>, vector<40x16xf32>,
    %42 = vector.extract_strided_slice %39 {offsets = [0, 0, 0], sizes = [1, 4, 16], strides = [1, 1, 1]} : vector<4x4x16xf32> to vector<1x4x16xf32>
    %43 = vector.shape_cast %42 : vector<1x4x16xf32> to vector<4x16xf32>
    %c7 = arith.constant 7 : index
    %c0_29 = arith.constant 0 : index
    %44 = vector.load %arg9[%c7, %c0_29] : memref<40x16xf32, #tpu.memory_space<vmem>>, vector<4x16xf32>
    tpu.vector_store %arg9[%c7, %c0_29], %43 {strides = array<i32>} : memref<40x16xf32, #tpu.memory_space<vmem>>, vector<4x16xf32>,
    %45 = vector.extract_strided_slice %39 {offsets = [1, 0, 0], sizes = [1, 4, 16], strides = [1, 1, 1]} : vector<4x4x16xf32> to vector<1x4x16xf32>
    %46 = vector.shape_cast %45 : vector<1x4x16xf32> to vector<4x16xf32>
    %c13 = arith.constant 13 : index
    %c0_30 = arith.constant 0 : index
    %47 = vector.load %arg9[%c13, %c0_30] : memref<40x16xf32, #tpu.memory_space<vmem>>, vector<4x16xf32>
    tpu.vector_store %arg9[%c13, %c0_30], %46 {strides = array<i32>} : memref<40x16xf32, #tpu.memory_space<vmem>>, vector<4x16xf32>,
    %48 = vector.extract_strided_slice %39 {offsets = [2, 0, 0], sizes = [1, 4, 16], strides = [1, 1, 1]} : vector<4x4x16xf32> to vector<1x4x16xf32>
    %49 = vector.shape_cast %48 : vector<1x4x16xf32> to vector<4x16xf32>
    %c19 = arith.constant 19 : index
    %c0_31 = arith.constant 0 : index
    %50 = vector.load %arg9[%c19, %c0_31] : memref<40x16xf32, #tpu.memory_space<vmem>>, vector<4x16xf32>
    tpu.vector_store %arg9[%c19, %c0_31], %49 {strides = array<i32>} : memref<40x16xf32, #tpu.memory_space<vmem>>, vector<4x16xf32>,
    %51 = vector.extract_strided_slice %39 {offsets = [3, 0, 0], sizes = [1, 4, 16], strides = [1, 1, 1]} : vector<4x4x16xf32> to vector<1x4x16xf32>
    %52 = vector.shape_cast %51 : vector<1x4x16xf32> to vector<4x16xf32>
    %c25 = arith.constant 25 : index
    %c0_32 = arith.constant 0 : index
    %53 = vector.load %arg9[%c25, %c0_32] : memref<40x16xf32, #tpu.memory_space<vmem>>, vector<4x16xf32>
    tpu.vector_store %arg9[%c25, %c0_32], %52 {strides = array<i32>} : memref<40x16xf32, #tpu.memory_space<vmem>>, vector<4x16xf32>,
    %cst_33 = arith.constant 0.000000e+00 : f32
    %54 = vector.broadcast %cst_33 : f32 to vector<24x16xf32>
    %c0_34 = arith.constant 0 : index
    %c0_35 = arith.constant 0 : index
    %55 = vector.load %arg9[%c0_34, %c0_35] : memref<40x16xf32, #tpu.memory_space<vmem>>, vector<24x16xf32>
    %56 = arith.truncf %55 : vector<24x16xf32> to vector<24x16xbf16>
    %c0_36 = arith.constant 0 : index
    %c0_37 = arith.constant 0 : index
    %c0_38 = arith.constant 0 : index
    %57 = vector.load %arg2[%c0_36, %c0_37, %c0_38] : memref<9x16x16xbf16, #tpu.memory_space<vmem>>, vector<1x16x16xbf16>
    %58 = vector.shape_cast %57 : vector<1x16x16xbf16> to vector<16x16xbf16>
    %cst_39 = arith.constant dense<0.000000e+00> : vector<24x16xf32>
    %59 = tpu.matmul %56, %58, %cst_39 {dimension_numbers = #tpu.dot_dimension_numbers<[1], [0], [0], [1], [0, 0, 1, 1], [], []>} : vector<24x16xbf16>, vector<16x16xbf16>, vector<24x16xf32> -> vector<24x16xf32>
    %60 = arith.addf %54, %59 : vector<24x16xf32>
    %c1 = arith.constant 1 : index
    %c0_40 = arith.constant 0 : index
    %61 = vector.load %arg9[%c1, %c0_40] : memref<40x16xf32, #tpu.memory_space<vmem>>, vector<24x16xf32>
    %62 = arith.truncf %61 : vector<24x16xf32> to vector<24x16xbf16>
    %c1_41 = arith.constant 1 : index
    %c0_42 = arith.constant 0 : index
    %c0_43 = arith.constant 0 : index
    %63 = vector.load %arg2[%c1_41, %c0_42, %c0_43] : memref<9x16x16xbf16, #tpu.memory_space<vmem>>, vector<1x16x16xbf16>
    %64 = vector.shape_cast %63 : vector<1x16x16xbf16> to vector<16x16xbf16>
    %cst_44 = arith.constant dense<0.000000e+00> : vector<24x16xf32>
    %65 = tpu.matmul %62, %64, %cst_44 {dimension_numbers = #tpu.dot_dimension_numbers<[1], [0], [0], [1], [0, 0, 1, 1], [], []>} : vector<24x16xbf16>, vector<16x16xbf16>, vector<24x16xf32> -> vector<24x16xf32>
    %66 = arith.addf %60, %65 : vector<24x16xf32>
    %c2 = arith.constant 2 : index
    %c0_45 = arith.constant 0 : index
    %67 = vector.load %arg9[%c2, %c0_45] : memref<40x16xf32, #tpu.memory_space<vmem>>, vector<24x16xf32>
    %68 = arith.truncf %67 : vector<24x16xf32> to vector<24x16xbf16>
    %c2_46 = arith.constant 2 : index
    %c0_47 = arith.constant 0 : index
    %c0_48 = arith.constant 0 : index
    %69 = vector.load %arg2[%c2_46, %c0_47, %c0_48] : memref<9x16x16xbf16, #tpu.memory_space<vmem>>, vector<1x16x16xbf16>
    %70 = vector.shape_cast %69 : vector<1x16x16xbf16> to vector<16x16xbf16>
    %cst_49 = arith.constant dense<0.000000e+00> : vector<24x16xf32>
    %71 = tpu.matmul %68, %70, %cst_49 {dimension_numbers = #tpu.dot_dimension_numbers<[1], [0], [0], [1], [0, 0, 1, 1], [], []>} : vector<24x16xbf16>, vector<16x16xbf16>, vector<24x16xf32> -> vector<24x16xf32>
    %72 = arith.addf %66, %71 : vector<24x16xf32>
    %c6 = arith.constant 6 : index
    %c0_50 = arith.constant 0 : index
    %73 = vector.load %arg9[%c6, %c0_50] : memref<40x16xf32, #tpu.memory_space<vmem>>, vector<24x16xf32>
    %74 = arith.truncf %73 : vector<24x16xf32> to vector<24x16xbf16>
    %c3 = arith.constant 3 : index
    %c0_51 = arith.constant 0 : index
    %c0_52 = arith.constant 0 : index
    %75 = vector.load %arg2[%c3, %c0_51, %c0_52] : memref<9x16x16xbf16, #tpu.memory_space<vmem>>, vector<1x16x16xbf16>
    %76 = vector.shape_cast %75 : vector<1x16x16xbf16> to vector<16x16xbf16>
    %cst_53 = arith.constant dense<0.000000e+00> : vector<24x16xf32>
    %77 = tpu.matmul %74, %76, %cst_53 {dimension_numbers = #tpu.dot_dimension_numbers<[1], [0], [0], [1], [0, 0, 1, 1], [], []>} : vector<24x16xbf16>, vector<16x16xbf16>, vector<24x16xf32> -> vector<24x16xf32>
    %78 = arith.addf %72, %77 : vector<24x16xf32>
    %c7_54 = arith.constant 7 : index
    %c0_55 = arith.constant 0 : index
    %79 = vector.load %arg9[%c7_54, %c0_55] : memref<40x16xf32, #tpu.memory_space<vmem>>, vector<24x16xf32>
    %80 = arith.truncf %79 : vector<24x16xf32> to vector<24x16xbf16>
    %c4 = arith.constant 4 : index
    %c0_56 = arith.constant 0 : index
    %c0_57 = arith.constant 0 : index
    %81 = vector.load %arg2[%c4, %c0_56, %c0_57] : memref<9x16x16xbf16, #tpu.memory_space<vmem>>, vector<1x16x16xbf16>
    %82 = vector.shape_cast %81 : vector<1x16x16xbf16> to vector<16x16xbf16>
    %cst_58 = arith.constant dense<0.000000e+00> : vector<24x16xf32>
    %83 = tpu.matmul %80, %82, %cst_58 {dimension_numbers = #tpu.dot_dimension_numbers<[1], [0], [0], [1], [0, 0, 1, 1], [], []>} : vector<24x16xbf16>, vector<16x16xbf16>, vector<24x16xf32> -> vector<24x16xf32>
    %84 = arith.addf %78, %83 : vector<24x16xf32>
    %c8 = arith.constant 8 : index
    %c0_59 = arith.constant 0 : index
    %85 = vector.load %arg9[%c8, %c0_59] : memref<40x16xf32, #tpu.memory_space<vmem>>, vector<24x16xf32>
    %86 = arith.truncf %85 : vector<24x16xf32> to vector<24x16xbf16>
    %c5 = arith.constant 5 : index
    %c0_60 = arith.constant 0 : index
    %c0_61 = arith.constant 0 : index
    %87 = vector.load %arg2[%c5, %c0_60, %c0_61] : memref<9x16x16xbf16, #tpu.memory_space<vmem>>, vector<1x16x16xbf16>
    %88 = vector.shape_cast %87 : vector<1x16x16xbf16> to vector<16x16xbf16>
    %cst_62 = arith.constant dense<0.000000e+00> : vector<24x16xf32>
    %89 = tpu.matmul %86, %88, %cst_62 {dimension_numbers = #tpu.dot_dimension_numbers<[1], [0], [0], [1], [0, 0, 1, 1], [], []>} : vector<24x16xbf16>, vector<16x16xbf16>, vector<24x16xf32> -> vector<24x16xf32>
    %90 = arith.addf %84, %89 : vector<24x16xf32>
    %c12 = arith.constant 12 : index
    %c0_63 = arith.constant 0 : index
    %91 = vector.load %arg9[%c12, %c0_63] : memref<40x16xf32, #tpu.memory_space<vmem>>, vector<24x16xf32>
    %92 = arith.truncf %91 : vector<24x16xf32> to vector<24x16xbf16>
    %c6_64 = arith.constant 6 : index
    %c0_65 = arith.constant 0 : index
    %c0_66 = arith.constant 0 : index
    %93 = vector.load %arg2[%c6_64, %c0_65, %c0_66] : memref<9x16x16xbf16, #tpu.memory_space<vmem>>, vector<1x16x16xbf16>
    %94 = vector.shape_cast %93 : vector<1x16x16xbf16> to vector<16x16xbf16>
    %cst_67 = arith.constant dense<0.000000e+00> : vector<24x16xf32>
    %95 = tpu.matmul %92, %94, %cst_67 {dimension_numbers = #tpu.dot_dimension_numbers<[1], [0], [0], [1], [0, 0, 1, 1], [], []>} : vector<24x16xbf16>, vector<16x16xbf16>, vector<24x16xf32> -> vector<24x16xf32>
    %96 = arith.addf %90, %95 : vector<24x16xf32>
    %c13_68 = arith.constant 13 : index
    %c0_69 = arith.constant 0 : index
    %97 = vector.load %arg9[%c13_68, %c0_69] : memref<40x16xf32, #tpu.memory_space<vmem>>, vector<24x16xf32>
    %98 = arith.truncf %97 : vector<24x16xf32> to vector<24x16xbf16>
    %c7_70 = arith.constant 7 : index
    %c0_71 = arith.constant 0 : index
    %c0_72 = arith.constant 0 : index
    %99 = vector.load %arg2[%c7_70, %c0_71, %c0_72] : memref<9x16x16xbf16, #tpu.memory_space<vmem>>, vector<1x16x16xbf16>
    %100 = vector.shape_cast %99 : vector<1x16x16xbf16> to vector<16x16xbf16>
    %cst_73 = arith.constant dense<0.000000e+00> : vector<24x16xf32>
    %101 = tpu.matmul %98, %100, %cst_73 {dimension_numbers = #tpu.dot_dimension_numbers<[1], [0], [0], [1], [0, 0, 1, 1], [], []>} : vector<24x16xbf16>, vector<16x16xbf16>, vector<24x16xf32> -> vector<24x16xf32>
    %102 = arith.addf %96, %101 : vector<24x16xf32>
    %c14 = arith.constant 14 : index
    %c0_74 = arith.constant 0 : index
    %103 = vector.load %arg9[%c14, %c0_74] : memref<40x16xf32, #tpu.memory_space<vmem>>, vector<24x16xf32>
    %104 = arith.truncf %103 : vector<24x16xf32> to vector<24x16xbf16>
    %c8_75 = arith.constant 8 : index
    %c0_76 = arith.constant 0 : index
    %c0_77 = arith.constant 0 : index
    %105 = vector.load %arg2[%c8_75, %c0_76, %c0_77] : memref<9x16x16xbf16, #tpu.memory_space<vmem>>, vector<1x16x16xbf16>
    %106 = vector.shape_cast %105 : vector<1x16x16xbf16> to vector<16x16xbf16>
    %cst_78 = arith.constant dense<0.000000e+00> : vector<24x16xf32>
    %107 = tpu.matmul %104, %106, %cst_78 {dimension_numbers = #tpu.dot_dimension_numbers<[1], [0], [0], [1], [0, 0, 1, 1], [], []>} : vector<24x16xbf16>, vector<16x16xbf16>, vector<24x16xf32> -> vector<24x16xf32>
    %108 = arith.addf %102, %107 : vector<24x16xf32>
    %c0_79 = arith.constant 0 : index
    %c0_80 = arith.constant 0 : index
    %109 = vector.load %arg3[%c0_79, %c0_80] : memref<1x16xf32, #tpu.memory_space<vmem>>, vector<1x16xf32>
    %110 = vector.broadcast %109 : vector<1x16xf32> to vector<24x16xf32>
    %111 = arith.addf %108, %110 : vector<24x16xf32>
    %112 = vector.extract_strided_slice %111 {offsets = [0, 0], sizes = [4, 16], strides = [1, 1]} : vector<24x16xf32> to vector<4x16xf32>
    %c0_81 = arith.constant 0 : index
    %c0_82 = arith.constant 0 : index
    %c0_83 = arith.constant 0 : index
    %c0_84 = arith.constant 0 : index
    %113 = vector.load %arg8[%c0_81, %c0_82, %c0_83, %c0_84] : memref<1x4x4x16xf32, #tpu.memory_space<vmem>>, vector<1x1x4x16xf32>
    %114 = vector.shape_cast %113 : vector<1x1x4x16xf32> to vector<4x16xf32>
    %115 = vector.shape_cast %112 : vector<4x16xf32> to vector<1x1x4x16xf32>
    tpu.vector_store %arg8[%c0_81, %c0_82, %c0_83, %c0_84], %115 {strides = array<i32>} : memref<1x4x4x16xf32, #tpu.memory_space<vmem>>, vector<1x1x4x16xf32>,
    %116 = vector.extract_strided_slice %111 {offsets = [6, 0], sizes = [4, 16], strides = [1, 1]} : vector<24x16xf32> to vector<4x16xf32>
    %c0_85 = arith.constant 0 : index
    %c1_86 = arith.constant 1 : index
    %c0_87 = arith.constant 0 : index
    %c0_88 = arith.constant 0 : index
    %117 = vector.load %arg8[%c0_85, %c1_86, %c0_87, %c0_88] : memref<1x4x4x16xf32, #tpu.memory_space<vmem>>, vector<1x1x4x16xf32>
    %118 = vector.shape_cast %117 : vector<1x1x4x16xf32> to vector<4x16xf32>
    %119 = vector.shape_cast %116 : vector<4x16xf32> to vector<1x1x4x16xf32>
    tpu.vector_store %arg8[%c0_85, %c1_86, %c0_87, %c0_88], %119 {strides = array<i32>} : memref<1x4x4x16xf32, #tpu.memory_space<vmem>>, vector<1x1x4x16xf32>,
    %120 = vector.extract_strided_slice %111 {offsets = [12, 0], sizes = [4, 16], strides = [1, 1]} : vector<24x16xf32> to vector<4x16xf32>
    %c0_89 = arith.constant 0 : index
    %c2_90 = arith.constant 2 : index
    %c0_91 = arith.constant 0 : index
    %c0_92 = arith.constant 0 : index
    %121 = vector.load %arg8[%c0_89, %c2_90, %c0_91, %c0_92] : memref<1x4x4x16xf32, #tpu.memory_space<vmem>>, vector<1x1x4x16xf32>
    %122 = vector.shape_cast %121 : vector<1x1x4x16xf32> to vector<4x16xf32>
    %123 = vector.shape_cast %120 : vector<4x16xf32> to vector<1x1x4x16xf32>
    tpu.vector_store %arg8[%c0_89, %c2_90, %c0_91, %c0_92], %123 {strides = array<i32>} : memref<1x4x4x16xf32, #tpu.memory_space<vmem>>, vector<1x1x4x16xf32>,
    %124 = vector.extract_strided_slice %111 {offsets = [18, 0], sizes = [4, 16], strides = [1, 1]} : vector<24x16xf32> to vector<4x16xf32>
    %c0_93 = arith.constant 0 : index
    %c3_94 = arith.constant 3 : index
    %c0_95 = arith.constant 0 : index
    %c0_96 = arith.constant 0 : index
    %125 = vector.load %arg8[%c0_93, %c3_94, %c0_95, %c0_96] : memref<1x4x4x16xf32, #tpu.memory_space<vmem>>, vector<1x1x4x16xf32>
    %126 = vector.shape_cast %125 : vector<1x1x4x16xf32> to vector<4x16xf32>
    %127 = vector.shape_cast %124 : vector<4x16xf32> to vector<1x1x4x16xf32>
    tpu.vector_store %arg8[%c0_93, %c3_94, %c0_95, %c0_96], %127 {strides = array<i32>} : memref<1x4x4x16xf32, #tpu.memory_space<vmem>>, vector<1x1x4x16xf32>,
    return
  }
  func.func @transform_0(%arg0: i32) -> (i32, i32, i32, i32) {
    %c0_i32 = arith.constant 0 : i32
    %c0_i32_0 = arith.constant 0 : i32
    %c0_i32_1 = arith.constant 0 : i32
    %c0_i32_2 = arith.constant 0 : i32
    return %arg0, %c0_i32, %c0_i32_0, %c0_i32_1 : i32, i32, i32, i32
  }
  func.func @transform_1(%arg0: i32) -> (i32, i32, i32) {
    %c0_i32 = arith.constant 0 : i32
    %c0_i32_0 = arith.constant 0 : i32
    %c0_i32_1 = arith.constant 0 : i32
    %c0_i32_2 = arith.constant 0 : i32
    return %c0_i32, %c0_i32_0, %c0_i32_1 : i32, i32, i32
  }
  func.func @transform_2(%arg0: i32) -> (i32, i32) {
    %c0_i32 = arith.constant 0 : i32
    %c0_i32_0 = arith.constant 0 : i32
    %c0_i32_1 = arith.constant 0 : i32
    return %c0_i32, %c0_i32_0 : i32, i32
  }
  func.func @transform_3(%arg0: i32) -> (i32, i32) {
    %c0_i32 = arith.constant 0 : i32
    %c0_i32_0 = arith.constant 0 : i32
    %c0_i32_1 = arith.constant 0 : i32
    return %c0_i32, %c0_i32_0 : i32, i32
  }
  func.func @transform_4(%arg0: i32) -> (i32, i32) {
    %c0_i32 = arith.constant 0 : i32
    %c0_i32_0 = arith.constant 0 : i32
    %c0_i32_1 = arith.constant 0 : i32
    return %c0_i32, %c0_i32_0 : i32, i32
  }
  func.func @transform_5(%arg0: i32) -> (i32, i32) {
    %c0_i32 = arith.constant 0 : i32
    %c0_i32_0 = arith.constant 0 : i32
    %c0_i32_1 = arith.constant 0 : i32
    return %c0_i32, %c0_i32_0 : i32, i32
  }
  func.func @transform_6(%arg0: i32) -> (i32, i32) {
    %c0_i32 = arith.constant 0 : i32
    %c0_i32_0 = arith.constant 0 : i32
    %c0_i32_1 = arith.constant 0 : i32
    return %c0_i32, %c0_i32_0 : i32, i32
  }
  func.func @transform_7(%arg0: i32) -> (i32, i32, i32, i32) {
    %c0_i32 = arith.constant 0 : i32
    %c0_i32_0 = arith.constant 0 : i32
    %c0_i32_1 = arith.constant 0 : i32
    %c0_i32_2 = arith.constant 0 : i32
    return %arg0, %c0_i32, %c0_i32_0, %c0_i32_1 : i32, i32, i32, i32
  }
}

module attributes {stable_mosaic.version = 11 : i64} {
  func.func @fused_conv_kernel(%arg0: i32, %arg1: memref<1x4x4x16xf32, #tpu.memory_space<vmem>>, %arg2: memref<1x16x16xbf16, #tpu.memory_space<vmem>>, %arg3: memref<1x16xf32, #tpu.memory_space<vmem>>, %arg4: memref<1x4x4x16xf32, #tpu.memory_space<vmem>>, %arg5: memref<24x16xf32, #tpu.memory_space<vmem>>) attributes {dimension_semantics = [#tpu.dimension_semantics<parallel>], iteration_bounds = array<i64: 2>, scalar_prefetch = 0 : i64, scratch_operands = 1 : i64, tpu.core_type = #tpu.core_type<tc>, window_params = [{transform_indices = @transform_0, window_bounds = array<i64: 1, 4, 4, 16>}, {pipeline_mode = #tpu.pipeline_mode<synchronous>, transform_indices = @transform_1, window_bounds = array<i64: 1, 16, 16>}, {pipeline_mode = #tpu.pipeline_mode<synchronous>, transform_indices = @transform_2, window_bounds = array<i64: 1, 16>}, {transform_indices = @transform_3, window_bounds = array<i64: 1, 4, 4, 16>}]} {
    %c0 = arith.constant 0 : index
    %c0_0 = arith.constant 0 : index
    %c0_1 = arith.constant 0 : index
    %c0_2 = arith.constant 0 : index
    %0 = vector.load %arg1[%c0, %c0_0, %c0_1, %c0_2] : memref<1x4x4x16xf32, #tpu.memory_space<vmem>>, vector<1x4x4x16xf32>
    %1 = vector.shape_cast %0 : vector<1x4x4x16xf32> to vector<4x4x16xf32>
    %cst = arith.constant 0.000000e+00 : f32
    %2 = vector.broadcast %cst : f32 to vector<24x16xf32>
    %c0_3 = arith.constant 0 : index
    %c0_4 = arith.constant 0 : index
    %3 = vector.load %arg5[%c0_3, %c0_4] : memref<24x16xf32, #tpu.memory_space<vmem>>, vector<24x16xf32>
    tpu.vector_store %arg5[%c0_3, %c0_4], %2 {strides = array<i32>} : memref<24x16xf32, #tpu.memory_space<vmem>>, vector<24x16xf32>,
    %4 = vector.extract_strided_slice %1 {offsets = [0, 0, 0], sizes = [1, 4, 16], strides = [1, 1, 1]} : vector<4x4x16xf32> to vector<1x4x16xf32>
    %5 = vector.shape_cast %4 : vector<1x4x16xf32> to vector<4x16xf32>
    %c0_5 = arith.constant 0 : index
    %c0_6 = arith.constant 0 : index
    %6 = vector.load %arg5[%c0_5, %c0_6] : memref<24x16xf32, #tpu.memory_space<vmem>>, vector<4x16xf32>
    tpu.vector_store %arg5[%c0_5, %c0_6], %5 {strides = array<i32>} : memref<24x16xf32, #tpu.memory_space<vmem>>, vector<4x16xf32>,
    %7 = vector.extract_strided_slice %1 {offsets = [1, 0, 0], sizes = [1, 4, 16], strides = [1, 1, 1]} : vector<4x4x16xf32> to vector<1x4x16xf32>
    %8 = vector.shape_cast %7 : vector<1x4x16xf32> to vector<4x16xf32>
    %c4 = arith.constant 4 : index
    %c0_7 = arith.constant 0 : index
    %9 = vector.load %arg5[%c4, %c0_7] : memref<24x16xf32, #tpu.memory_space<vmem>>, vector<4x16xf32>
    tpu.vector_store %arg5[%c4, %c0_7], %8 {strides = array<i32>} : memref<24x16xf32, #tpu.memory_space<vmem>>, vector<4x16xf32>,
    %10 = vector.extract_strided_slice %1 {offsets = [2, 0, 0], sizes = [1, 4, 16], strides = [1, 1, 1]} : vector<4x4x16xf32> to vector<1x4x16xf32>
    %11 = vector.shape_cast %10 : vector<1x4x16xf32> to vector<4x16xf32>
    %c8 = arith.constant 8 : index
    %c0_8 = arith.constant 0 : index
    %12 = vector.load %arg5[%c8, %c0_8] : memref<24x16xf32, #tpu.memory_space<vmem>>, vector<4x16xf32>
    tpu.vector_store %arg5[%c8, %c0_8], %11 {strides = array<i32>} : memref<24x16xf32, #tpu.memory_space<vmem>>, vector<4x16xf32>,
    %13 = vector.extract_strided_slice %1 {offsets = [3, 0, 0], sizes = [1, 4, 16], strides = [1, 1, 1]} : vector<4x4x16xf32> to vector<1x4x16xf32>
    %14 = vector.shape_cast %13 : vector<1x4x16xf32> to vector<4x16xf32>
    %c12 = arith.constant 12 : index
    %c0_9 = arith.constant 0 : index
    %15 = vector.load %arg5[%c12, %c0_9] : memref<24x16xf32, #tpu.memory_space<vmem>>, vector<4x16xf32>
    tpu.vector_store %arg5[%c12, %c0_9], %14 {strides = array<i32>} : memref<24x16xf32, #tpu.memory_space<vmem>>, vector<4x16xf32>,
    %cst_10 = arith.constant 0.000000e+00 : f32
    %16 = vector.broadcast %cst_10 : f32 to vector<16x16xf32>
    %c0_11 = arith.constant 0 : index
    %c0_12 = arith.constant 0 : index
    %17 = vector.load %arg5[%c0_11, %c0_12] : memref<24x16xf32, #tpu.memory_space<vmem>>, vector<16x16xf32>
    %18 = arith.truncf %17 : vector<16x16xf32> to vector<16x16xbf16>
    %c0_13 = arith.constant 0 : index
    %c0_14 = arith.constant 0 : index
    %c0_15 = arith.constant 0 : index
    %19 = vector.load %arg2[%c0_13, %c0_14, %c0_15] : memref<1x16x16xbf16, #tpu.memory_space<vmem>>, vector<1x16x16xbf16>
    %20 = vector.shape_cast %19 : vector<1x16x16xbf16> to vector<16x16xbf16>
    %cst_16 = arith.constant dense<0.000000e+00> : vector<16x16xf32>
    %21 = tpu.matmul %18, %20, %cst_16 {dimension_numbers = #tpu.dot_dimension_numbers<[1], [0], [0], [1], [0, 0, 1, 1], [], []>} : vector<16x16xbf16>, vector<16x16xbf16>, vector<16x16xf32> -> vector<16x16xf32>
    %22 = arith.addf %16, %21 : vector<16x16xf32>
    %c0_17 = arith.constant 0 : index
    %c0_18 = arith.constant 0 : index
    %23 = vector.load %arg3[%c0_17, %c0_18] : memref<1x16xf32, #tpu.memory_space<vmem>>, vector<1x16xf32>
    %24 = vector.broadcast %23 : vector<1x16xf32> to vector<16x16xf32>
    %25 = arith.addf %22, %24 : vector<16x16xf32>
    %26 = vector.extract_strided_slice %25 {offsets = [0, 0], sizes = [4, 16], strides = [1, 1]} : vector<16x16xf32> to vector<4x16xf32>
    %c0_19 = arith.constant 0 : index
    %c0_20 = arith.constant 0 : index
    %c0_21 = arith.constant 0 : index
    %c0_22 = arith.constant 0 : index
    %27 = vector.load %arg4[%c0_19, %c0_20, %c0_21, %c0_22] : memref<1x4x4x16xf32, #tpu.memory_space<vmem>>, vector<1x1x4x16xf32>
    %28 = vector.shape_cast %27 : vector<1x1x4x16xf32> to vector<4x16xf32>
    %29 = vector.shape_cast %26 : vector<4x16xf32> to vector<1x1x4x16xf32>
    tpu.vector_store %arg4[%c0_19, %c0_20, %c0_21, %c0_22], %29 {strides = array<i32>} : memref<1x4x4x16xf32, #tpu.memory_space<vmem>>, vector<1x1x4x16xf32>,
    %30 = vector.extract_strided_slice %25 {offsets = [4, 0], sizes = [4, 16], strides = [1, 1]} : vector<16x16xf32> to vector<4x16xf32>
    %c0_23 = arith.constant 0 : index
    %c1 = arith.constant 1 : index
    %c0_24 = arith.constant 0 : index
    %c0_25 = arith.constant 0 : index
    %31 = vector.load %arg4[%c0_23, %c1, %c0_24, %c0_25] : memref<1x4x4x16xf32, #tpu.memory_space<vmem>>, vector<1x1x4x16xf32>
    %32 = vector.shape_cast %31 : vector<1x1x4x16xf32> to vector<4x16xf32>
    %33 = vector.shape_cast %30 : vector<4x16xf32> to vector<1x1x4x16xf32>
    tpu.vector_store %arg4[%c0_23, %c1, %c0_24, %c0_25], %33 {strides = array<i32>} : memref<1x4x4x16xf32, #tpu.memory_space<vmem>>, vector<1x1x4x16xf32>,
    %34 = vector.extract_strided_slice %25 {offsets = [8, 0], sizes = [4, 16], strides = [1, 1]} : vector<16x16xf32> to vector<4x16xf32>
    %c0_26 = arith.constant 0 : index
    %c2 = arith.constant 2 : index
    %c0_27 = arith.constant 0 : index
    %c0_28 = arith.constant 0 : index
    %35 = vector.load %arg4[%c0_26, %c2, %c0_27, %c0_28] : memref<1x4x4x16xf32, #tpu.memory_space<vmem>>, vector<1x1x4x16xf32>
    %36 = vector.shape_cast %35 : vector<1x1x4x16xf32> to vector<4x16xf32>
    %37 = vector.shape_cast %34 : vector<4x16xf32> to vector<1x1x4x16xf32>
    tpu.vector_store %arg4[%c0_26, %c2, %c0_27, %c0_28], %37 {strides = array<i32>} : memref<1x4x4x16xf32, #tpu.memory_space<vmem>>, vector<1x1x4x16xf32>,
    %38 = vector.extract_strided_slice %25 {offsets = [12, 0], sizes = [4, 16], strides = [1, 1]} : vector<16x16xf32> to vector<4x16xf32>
    %c0_29 = arith.constant 0 : index
    %c3 = arith.constant 3 : index
    %c0_30 = arith.constant 0 : index
    %c0_31 = arith.constant 0 : index
    %39 = vector.load %arg4[%c0_29, %c3, %c0_30, %c0_31] : memref<1x4x4x16xf32, #tpu.memory_space<vmem>>, vector<1x1x4x16xf32>
    %40 = vector.shape_cast %39 : vector<1x1x4x16xf32> to vector<4x16xf32>
    %41 = vector.shape_cast %38 : vector<4x16xf32> to vector<1x1x4x16xf32>
    tpu.vector_store %arg4[%c0_29, %c3, %c0_30, %c0_31], %41 {strides = array<i32>} : memref<1x4x4x16xf32, #tpu.memory_space<vmem>>, vector<1x1x4x16xf32>,
    return
  }
  func.func @transform_0(%arg0: i32) -> (i32, i32, i32, i32) {
    %c0_i32 = arith.constant 0 : i32
    %c0_i32_0 = arith.constant 0 : i32
    %c0_i32_1 = arith.constant 0 : i32
    %c0_i32_2 = arith.constant 0 : i32
    return %arg0, %c0_i32, %c0_i32_0, %c0_i32_1 : i32, i32, i32, i32
  }
  func.func @transform_1(%arg0: i32) -> (i32, i32, i32) {
    %c0_i32 = arith.constant 0 : i32
    %c0_i32_0 = arith.constant 0 : i32
    %c0_i32_1 = arith.constant 0 : i32
    %c0_i32_2 = arith.constant 0 : i32
    return %c0_i32, %c0_i32_0, %c0_i32_1 : i32, i32, i32
  }
  func.func @transform_2(%arg0: i32) -> (i32, i32) {
    %c0_i32 = arith.constant 0 : i32
    %c0_i32_0 = arith.constant 0 : i32
    %c0_i32_1 = arith.constant 0 : i32
    return %c0_i32, %c0_i32_0 : i32, i32
  }
  func.func @transform_3(%arg0: i32) -> (i32, i32, i32, i32) {
    %c0_i32 = arith.constant 0 : i32
    %c0_i32_0 = arith.constant 0 : i32
    %c0_i32_1 = arith.constant 0 : i32
    %c0_i32_2 = arith.constant 0 : i32
    return %arg0, %c0_i32, %c0_i32_0, %c0_i32_1 : i32, i32, i32, i32
  }
}

module attributes {stable_mosaic.version = 11 : i64} {
  func.func @vq_kernel(%arg0: i32, %arg1: memref<16x16xf32, #tpu.memory_space<vmem>>, %arg2: memref<128x16xf32, #tpu.memory_space<vmem>>, %arg3: memref<16x16xf32, #tpu.memory_space<vmem>>, %arg4: memref<16x1xi32, #tpu.memory_space<vmem>>, %arg5: memref<1x1xf32, #tpu.memory_space<vmem>>, %arg6: memref<1x128xf32, #tpu.memory_space<vmem>>, %arg7: memref<1x128xf32, #tpu.memory_space<vmem>>) attributes {dimension_semantics = [#tpu.dimension_semantics<arbitrary>], iteration_bounds = array<i64: 2>, scalar_prefetch = 0 : i64, scratch_operands = 1 : i64, tpu.core_type = #tpu.core_type<tc>, window_params = [{transform_indices = @transform_0, window_bounds = array<i64: 16, 16>}, {pipeline_mode = #tpu.pipeline_mode<synchronous>, transform_indices = @transform_1, window_bounds = array<i64: 128, 16>}, {transform_indices = @transform_2, window_bounds = array<i64: 16, 16>}, {transform_indices = @transform_3, window_bounds = array<i64: 16, 1>}, {pipeline_mode = #tpu.pipeline_mode<synchronous>, transform_indices = @transform_4, window_bounds = array<i64: 1, 1>}, {pipeline_mode = #tpu.pipeline_mode<synchronous>, transform_indices = @transform_5, window_bounds = array<i64: 1, 128>}]} {
    %c0_i32 = arith.constant 0 : i32
    %0 = arith.cmpi eq, %arg0, %c0_i32 : i32
    %1 = arith.extui %0 : i1 to i32
    %c0_i32_0 = arith.constant 0 : i32
    %2 = arith.cmpi ne, %1, %c0_i32_0 : i32
    scf.if %2 {
      %cst_27 = arith.constant 0.000000e+00 : f32
      %65 = vector.broadcast %cst_27 : f32 to vector<1x1xf32>
      %c0_28 = arith.constant 0 : index
      %c0_29 = arith.constant 0 : index
      %66 = vector.load %arg5[%c0_28, %c0_29] : memref<1x1xf32, #tpu.memory_space<vmem>>, vector<1x1xf32>
      tpu.vector_store %arg5[%c0_28, %c0_29], %65 {strides = array<i32>} : memref<1x1xf32, #tpu.memory_space<vmem>>, vector<1x1xf32>,
      %cst_30 = arith.constant 0.000000e+00 : f32
      %67 = vector.broadcast %cst_30 : f32 to vector<1x128xf32>
      %c0_31 = arith.constant 0 : index
      %c0_32 = arith.constant 0 : index
      %68 = vector.load %arg6[%c0_31, %c0_32] : memref<1x128xf32, #tpu.memory_space<vmem>>, vector<1x128xf32>
      tpu.vector_store %arg6[%c0_31, %c0_32], %67 {strides = array<i32>} : memref<1x128xf32, #tpu.memory_space<vmem>>, vector<1x128xf32>,
      %c0_33 = arith.constant 0 : index
      %c0_34 = arith.constant 0 : index
      %69 = vector.load %arg2[%c0_33, %c0_34] : memref<128x16xf32, #tpu.memory_space<vmem>>, vector<128x16xf32>
      %cst_35 = arith.constant 1.000000e+00 : f32
      %70 = vector.broadcast %cst_35 : f32 to vector<1x16xf32>
      %71 = arith.mulf %69, %69 : vector<128x16xf32>
      %cst_36 = arith.constant dense<0.000000e+00> : vector<1x128xf32>
      %72 = tpu.matmul %70, %71, %cst_36 {dimension_numbers = #tpu.dot_dimension_numbers<[1], [1], [0], [0], [0, 0, 1, 0], [], []>} : vector<1x16xf32>, vector<128x16xf32>, vector<1x128xf32> -> vector<1x128xf32>
      %c0_37 = arith.constant 0 : index
      %c0_38 = arith.constant 0 : index
      %73 = vector.load %arg7[%c0_37, %c0_38] : memref<1x128xf32, #tpu.memory_space<vmem>>, vector<1x128xf32>
      tpu.vector_store %arg7[%c0_37, %c0_38], %72 {strides = array<i32>} : memref<1x128xf32, #tpu.memory_space<vmem>>, vector<1x128xf32>,
    } else {
    }
    %c0 = arith.constant 0 : index
    %c0_1 = arith.constant 0 : index
    %3 = vector.load %arg1[%c0, %c0_1] : memref<16x16xf32, #tpu.memory_space<vmem>>, vector<16x16xf32>
    %c0_2 = arith.constant 0 : index
    %c0_3 = arith.constant 0 : index
    %4 = vector.load %arg2[%c0_2, %c0_3] : memref<128x16xf32, #tpu.memory_space<vmem>>, vector<128x16xf32>
    %5 = arith.truncf %3 : vector<16x16xf32> to vector<16x16xbf16>
    %6 = arith.truncf %4 : vector<128x16xf32> to vector<128x16xbf16>
    %cst = arith.constant dense<0.000000e+00> : vector<16x128xf32>
    %7 = tpu.matmul %5, %6, %cst {dimension_numbers = #tpu.dot_dimension_numbers<[1], [1], [0], [0], [0, 0, 1, 0], [], []>} : vector<16x16xbf16>, vector<128x16xbf16>, vector<16x128xf32> -> vector<16x128xf32>
    %8 = arith.mulf %3, %3 : vector<16x16xf32>
    %cst_4 = arith.constant dense<0.000000e+00> : vector<16xf32>
    %9 = vector.multi_reduction <add>, %8, %cst_4 [1] : vector<16x16xf32> to vector<16xf32>
    %10 = vector.shape_cast %9 : vector<16xf32> to vector<16x1xf32>
    %cst_5 = arith.constant 2.000000e+00 : f32
    %11 = vector.broadcast %cst_5 : f32 to vector<16x128xf32>
    %12 = arith.mulf %11, %7 : vector<16x128xf32>
    %13 = vector.broadcast %10 : vector<16x1xf32> to vector<16x128xf32>
    %14 = arith.subf %13, %12 : vector<16x128xf32>
    %c0_6 = arith.constant 0 : index
    %c0_7 = arith.constant 0 : index
    %15 = vector.load %arg7[%c0_6, %c0_7] : memref<1x128xf32, #tpu.memory_space<vmem>>, vector<1x128xf32>
    %16 = vector.broadcast %15 : vector<1x128xf32> to vector<16x128xf32>
    %17 = arith.addf %14, %16 : vector<16x128xf32>
    %18 = tpu.iota {dimensions = array<i32: 1>} : vector<16x128xi32>
    %c32_i32 = arith.constant 32 : i32
    %19 = vector.broadcast %c32_i32 : i32 to vector<16x128xi32>
    %20 = arith.cmpi slt, %18, %19 : vector<16x128xi32>
    %cst_8 = arith.constant 0x7F800000 : f32
    %21 = vector.broadcast %cst_8 : f32 to vector<16x128xf32>
    %22 = arith.select %20, %17, %21 : vector<16x128xi1>, vector<16x128xf32>
    %cst_9 = arith.constant dense<0x7F800000> : vector<16xf32>
    %23 = vector.multi_reduction <minimumf>, %22, %cst_9 [1] : vector<16x128xf32> to vector<16xf32>
    %24 = vector.shape_cast %23 : vector<16xf32> to vector<16x1xf32>
    %25 = vector.broadcast %24 : vector<16x1xf32> to vector<16x128xf32>
    %26 = arith.cmpf ole, %22, %25 : vector<16x128xf32>
    %c128_i32 = arith.constant 128 : i32
    %27 = vector.broadcast %c128_i32 : i32 to vector<16x128xi32>
    %28 = arith.select %26, %18, %27 : vector<16x128xi1>, vector<16x128xi32>
    %cst_10 = arith.constant dense<2147483647> : vector<16xi32>
    %29 = vector.multi_reduction <minsi>, %28, %cst_10 [1] : vector<16x128xi32> to vector<16xi32>
    %30 = vector.shape_cast %29 : vector<16xi32> to vector<16x1xi32>
    %31 = vector.broadcast %30 : vector<16x1xi32> to vector<16x128xi32>
    %32 = arith.cmpi eq, %18, %31 : vector<16x128xi32>
    %33 = arith.extui %32 : vector<16x128xi1> to vector<16x128xi32>
    %34 = arith.sitofp %33 : vector<16x128xi32> to vector<16x128xf32>
    %cst_11 = arith.constant dense<0.000000e+00> : vector<16x16xf32>
    %35 = tpu.matmul %34, %4, %cst_11 {dimension_numbers = #tpu.dot_dimension_numbers<[1], [0], [0], [1], [0, 0, 1, 1], [], []>} : vector<16x128xf32>, vector<128x16xf32>, vector<16x16xf32> -> vector<16x16xf32>
    %c0_12 = arith.constant 0 : index
    %c0_13 = arith.constant 0 : index
    %36 = vector.load %arg3[%c0_12, %c0_13] : memref<16x16xf32, #tpu.memory_space<vmem>>, vector<16x16xf32>
    tpu.vector_store %arg3[%c0_12, %c0_13], %35 {strides = array<i32>} : memref<16x16xf32, #tpu.memory_space<vmem>>, vector<16x16xf32>,
    %c0_14 = arith.constant 0 : index
    %c0_15 = arith.constant 0 : index
    %37 = vector.load %arg4[%c0_14, %c0_15] : memref<16x1xi32, #tpu.memory_space<vmem>>, vector<16x1xi32>
    tpu.vector_store %arg4[%c0_14, %c0_15], %30 {strides = array<i32>} : memref<16x1xi32, #tpu.memory_space<vmem>>, vector<16x1xi32>,
    %38 = tpu.iota {dimensions = array<i32: 0>} : vector<16x1xi32>
    %c16_i32 = arith.constant 16 : i32
    %39 = arith.muli %arg0, %c16_i32 : i32
    %40 = vector.broadcast %39 : i32 to vector<16x1xi32>
    %41 = arith.addi %38, %40 : vector<16x1xi32>
    %c32_i32_16 = arith.constant 32 : i32
    %42 = vector.broadcast %c32_i32_16 : i32 to vector<16x1xi32>
    %43 = arith.cmpi slt, %41, %42 : vector<16x1xi32>
    %44 = arith.extui %43 : vector<16x1xi1> to vector<16x1xi32>
    %45 = arith.sitofp %44 : vector<16x1xi32> to vector<16x1xf32>
    %46 = arith.subf %35, %3 : vector<16x16xf32>
    %47 = vector.broadcast %45 : vector<16x1xf32> to vector<16x16xf32>
    %48 = arith.mulf %46, %47 : vector<16x16xf32>
    %c0_17 = arith.constant 0 : index
    %c0_18 = arith.constant 0 : index
    %49 = vector.load %arg5[%c0_17, %c0_18] : memref<1x1xf32, #tpu.memory_space<vmem>>, vector<1x1xf32>
    %50 = arith.mulf %48, %48 : vector<16x16xf32>
    %51 = vector.shape_cast %50 : vector<16x16xf32> to vector<1x16x16xf32>
    %cst_19 = arith.constant dense<0.000000e+00> : vector<1xf32>
    %52 = vector.multi_reduction <add>, %51, %cst_19 [1, 2] : vector<1x16x16xf32> to vector<1xf32>
    %53 = vector.shape_cast %52 : vector<1xf32> to vector<1x1x1xf32>
    %54 = vector.extract %53[0, 0, 0] : f32 from vector<1x1x1xf32>
    %55 = vector.broadcast %54 : f32 to vector<1x1xf32>
    %56 = arith.addf %49, %55 : vector<1x1xf32>
    %c0_20 = arith.constant 0 : index
    %c0_21 = arith.constant 0 : index
    %57 = vector.load %arg5[%c0_20, %c0_21] : memref<1x1xf32, #tpu.memory_space<vmem>>, vector<1x1xf32>
    tpu.vector_store %arg5[%c0_20, %c0_21], %56 {strides = array<i32>} : memref<1x1xf32, #tpu.memory_space<vmem>>, vector<1x1xf32>,
    %c0_22 = arith.constant 0 : index
    %c0_23 = arith.constant 0 : index
    %58 = vector.load %arg6[%c0_22, %c0_23] : memref<1x128xf32, #tpu.memory_space<vmem>>, vector<1x128xf32>
    %59 = vector.broadcast %45 : vector<16x1xf32> to vector<16x128xf32>
    %60 = arith.mulf %34, %59 : vector<16x128xf32>
    %cst_24 = arith.constant dense<0.000000e+00> : vector<128xf32>
    %61 = vector.multi_reduction <add>, %60, %cst_24 [0] : vector<16x128xf32> to vector<128xf32>
    %62 = vector.shape_cast %61 : vector<128xf32> to vector<1x128xf32>
    %63 = arith.addf %58, %62 : vector<1x128xf32>
    %c0_25 = arith.constant 0 : index
    %c0_26 = arith.constant 0 : index
    %64 = vector.load %arg6[%c0_25, %c0_26] : memref<1x128xf32, #tpu.memory_space<vmem>>, vector<1x128xf32>
    tpu.vector_store %arg6[%c0_25, %c0_26], %63 {strides = array<i32>} : memref<1x128xf32, #tpu.memory_space<vmem>>, vector<1x128xf32>,
    return
  }
  func.func @transform_0(%arg0: i32) -> (i32, i32) {
    %c0_i32 = arith.constant 0 : i32
    %c0_i32_0 = arith.constant 0 : i32
    return %arg0, %c0_i32 : i32, i32
  }
  func.func @transform_1(%arg0: i32) -> (i32, i32) {
    %c0_i32 = arith.constant 0 : i32
    %c0_i32_0 = arith.constant 0 : i32
    %c0_i32_1 = arith.constant 0 : i32
    return %c0_i32, %c0_i32_0 : i32, i32
  }
  func.func @transform_2(%arg0: i32) -> (i32, i32) {
    %c0_i32 = arith.constant 0 : i32
    %c0_i32_0 = arith.constant 0 : i32
    return %arg0, %c0_i32 : i32, i32
  }
  func.func @transform_3(%arg0: i32) -> (i32, i32) {
    %c0_i32 = arith.constant 0 : i32
    %c0_i32_0 = arith.constant 0 : i32
    return %arg0, %c0_i32 : i32, i32
  }
  func.func @transform_4(%arg0: i32) -> (i32, i32) {
    %c0_i32 = arith.constant 0 : i32
    %c0_i32_0 = arith.constant 0 : i32
    %c0_i32_1 = arith.constant 0 : i32
    return %c0_i32, %c0_i32_0 : i32, i32
  }
  func.func @transform_5(%arg0: i32) -> (i32, i32) {
    %c0_i32 = arith.constant 0 : i32
    %c0_i32_0 = arith.constant 0 : i32
    %c0_i32_1 = arith.constant 0 : i32
    return %c0_i32, %c0_i32_0 : i32, i32
  }
}

module attributes {stable_mosaic.version = 11 : i64} {
  func.func @fused_conv_kernel(%arg0: i32, %arg1: memref<1x4x4x16xf32, #tpu.memory_space<vmem>>, %arg2: memref<9x16x32xbf16, #tpu.memory_space<vmem>>, %arg3: memref<1x32xf32, #tpu.memory_space<vmem>>, %arg4: memref<1x32xf32, #tpu.memory_space<vmem>>, %arg5: memref<1x32xf32, #tpu.memory_space<vmem>>, %arg6: memref<32x4xf32, #tpu.memory_space<vmem>>, %arg7: memref<4x32xf32, #tpu.memory_space<vmem>>, %arg8: memref<1x4x4x32xf32, #tpu.memory_space<vmem>>, %arg9: memref<40x16xf32, #tpu.memory_space<vmem>>) attributes {dimension_semantics = [#tpu.dimension_semantics<parallel>], iteration_bounds = array<i64: 2>, scalar_prefetch = 0 : i64, scratch_operands = 1 : i64, tpu.core_type = #tpu.core_type<tc>, window_params = [{transform_indices = @transform_0, window_bounds = array<i64: 1, 4, 4, 16>}, {pipeline_mode = #tpu.pipeline_mode<synchronous>, transform_indices = @transform_1, window_bounds = array<i64: 9, 16, 32>}, {pipeline_mode = #tpu.pipeline_mode<synchronous>, transform_indices = @transform_2, window_bounds = array<i64: 1, 32>}, {pipeline_mode = #tpu.pipeline_mode<synchronous>, transform_indices = @transform_3, window_bounds = array<i64: 1, 32>}, {pipeline_mode = #tpu.pipeline_mode<synchronous>, transform_indices = @transform_4, window_bounds = array<i64: 1, 32>}, {pipeline_mode = #tpu.pipeline_mode<synchronous>, transform_indices = @transform_5, window_bounds = array<i64: 32, 4>}, {pipeline_mode = #tpu.pipeline_mode<synchronous>, transform_indices = @transform_6, window_bounds = array<i64: 4, 32>}, {transform_indices = @transform_7, window_bounds = array<i64: 1, 4, 4, 32>}]} {
    %c0 = arith.constant 0 : index
    %c0_0 = arith.constant 0 : index
    %c0_1 = arith.constant 0 : index
    %c0_2 = arith.constant 0 : index
    %0 = vector.load %arg1[%c0, %c0_0, %c0_1, %c0_2] : memref<1x4x4x16xf32, #tpu.memory_space<vmem>>, vector<1x4x4x16xf32>
    %1 = vector.shape_cast %0 : vector<1x4x4x16xf32> to vector<4x4x16xf32>
    %cst = arith.constant 0.000000e+00 : f32
    %2 = vector.broadcast %cst : f32 to vector<40x16xf32>
    %c0_3 = arith.constant 0 : index
    %c0_4 = arith.constant 0 : index
    %3 = vector.load %arg9[%c0_3, %c0_4] : memref<40x16xf32, #tpu.memory_space<vmem>>, vector<40x16xf32>
    tpu.vector_store %arg9[%c0_3, %c0_4], %2 {strides = array<i32>} : memref<40x16xf32, #tpu.memory_space<vmem>>, vector<40x16xf32>,
    %4 = vector.extract_strided_slice %1 {offsets = [0, 0, 0], sizes = [1, 4, 16], strides = [1, 1, 1]} : vector<4x4x16xf32> to vector<1x4x16xf32>
    %5 = vector.shape_cast %4 : vector<1x4x16xf32> to vector<4x16xf32>
    %c7 = arith.constant 7 : index
    %c0_5 = arith.constant 0 : index
    %6 = vector.load %arg9[%c7, %c0_5] : memref<40x16xf32, #tpu.memory_space<vmem>>, vector<4x16xf32>
    tpu.vector_store %arg9[%c7, %c0_5], %5 {strides = array<i32>} : memref<40x16xf32, #tpu.memory_space<vmem>>, vector<4x16xf32>,
    %7 = vector.extract_strided_slice %1 {offsets = [1, 0, 0], sizes = [1, 4, 16], strides = [1, 1, 1]} : vector<4x4x16xf32> to vector<1x4x16xf32>
    %8 = vector.shape_cast %7 : vector<1x4x16xf32> to vector<4x16xf32>
    %c13 = arith.constant 13 : index
    %c0_6 = arith.constant 0 : index
    %9 = vector.load %arg9[%c13, %c0_6] : memref<40x16xf32, #tpu.memory_space<vmem>>, vector<4x16xf32>
    tpu.vector_store %arg9[%c13, %c0_6], %8 {strides = array<i32>} : memref<40x16xf32, #tpu.memory_space<vmem>>, vector<4x16xf32>,
    %10 = vector.extract_strided_slice %1 {offsets = [2, 0, 0], sizes = [1, 4, 16], strides = [1, 1, 1]} : vector<4x4x16xf32> to vector<1x4x16xf32>
    %11 = vector.shape_cast %10 : vector<1x4x16xf32> to vector<4x16xf32>
    %c19 = arith.constant 19 : index
    %c0_7 = arith.constant 0 : index
    %12 = vector.load %arg9[%c19, %c0_7] : memref<40x16xf32, #tpu.memory_space<vmem>>, vector<4x16xf32>
    tpu.vector_store %arg9[%c19, %c0_7], %11 {strides = array<i32>} : memref<40x16xf32, #tpu.memory_space<vmem>>, vector<4x16xf32>,
    %13 = vector.extract_strided_slice %1 {offsets = [3, 0, 0], sizes = [1, 4, 16], strides = [1, 1, 1]} : vector<4x4x16xf32> to vector<1x4x16xf32>
    %14 = vector.shape_cast %13 : vector<1x4x16xf32> to vector<4x16xf32>
    %c25 = arith.constant 25 : index
    %c0_8 = arith.constant 0 : index
    %15 = vector.load %arg9[%c25, %c0_8] : memref<40x16xf32, #tpu.memory_space<vmem>>, vector<4x16xf32>
    tpu.vector_store %arg9[%c25, %c0_8], %14 {strides = array<i32>} : memref<40x16xf32, #tpu.memory_space<vmem>>, vector<4x16xf32>,
    %cst_9 = arith.constant 0.000000e+00 : f32
    %16 = vector.broadcast %cst_9 : f32 to vector<24x32xf32>
    %c0_10 = arith.constant 0 : index
    %c0_11 = arith.constant 0 : index
    %17 = vector.load %arg9[%c0_10, %c0_11] : memref<40x16xf32, #tpu.memory_space<vmem>>, vector<24x16xf32>
    %18 = arith.truncf %17 : vector<24x16xf32> to vector<24x16xbf16>
    %c0_12 = arith.constant 0 : index
    %c0_13 = arith.constant 0 : index
    %c0_14 = arith.constant 0 : index
    %19 = vector.load %arg2[%c0_12, %c0_13, %c0_14] : memref<9x16x32xbf16, #tpu.memory_space<vmem>>, vector<1x16x32xbf16>
    %20 = vector.shape_cast %19 : vector<1x16x32xbf16> to vector<16x32xbf16>
    %cst_15 = arith.constant dense<0.000000e+00> : vector<24x32xf32>
    %21 = tpu.matmul %18, %20, %cst_15 {dimension_numbers = #tpu.dot_dimension_numbers<[1], [0], [0], [1], [0, 0, 1, 1], [], []>} : vector<24x16xbf16>, vector<16x32xbf16>, vector<24x32xf32> -> vector<24x32xf32>
    %22 = arith.addf %16, %21 : vector<24x32xf32>
    %c1 = arith.constant 1 : index
    %c0_16 = arith.constant 0 : index
    %23 = vector.load %arg9[%c1, %c0_16] : memref<40x16xf32, #tpu.memory_space<vmem>>, vector<24x16xf32>
    %24 = arith.truncf %23 : vector<24x16xf32> to vector<24x16xbf16>
    %c1_17 = arith.constant 1 : index
    %c0_18 = arith.constant 0 : index
    %c0_19 = arith.constant 0 : index
    %25 = vector.load %arg2[%c1_17, %c0_18, %c0_19] : memref<9x16x32xbf16, #tpu.memory_space<vmem>>, vector<1x16x32xbf16>
    %26 = vector.shape_cast %25 : vector<1x16x32xbf16> to vector<16x32xbf16>
    %cst_20 = arith.constant dense<0.000000e+00> : vector<24x32xf32>
    %27 = tpu.matmul %24, %26, %cst_20 {dimension_numbers = #tpu.dot_dimension_numbers<[1], [0], [0], [1], [0, 0, 1, 1], [], []>} : vector<24x16xbf16>, vector<16x32xbf16>, vector<24x32xf32> -> vector<24x32xf32>
    %28 = arith.addf %22, %27 : vector<24x32xf32>
    %c2 = arith.constant 2 : index
    %c0_21 = arith.constant 0 : index
    %29 = vector.load %arg9[%c2, %c0_21] : memref<40x16xf32, #tpu.memory_space<vmem>>, vector<24x16xf32>
    %30 = arith.truncf %29 : vector<24x16xf32> to vector<24x16xbf16>
    %c2_22 = arith.constant 2 : index
    %c0_23 = arith.constant 0 : index
    %c0_24 = arith.constant 0 : index
    %31 = vector.load %arg2[%c2_22, %c0_23, %c0_24] : memref<9x16x32xbf16, #tpu.memory_space<vmem>>, vector<1x16x32xbf16>
    %32 = vector.shape_cast %31 : vector<1x16x32xbf16> to vector<16x32xbf16>
    %cst_25 = arith.constant dense<0.000000e+00> : vector<24x32xf32>
    %33 = tpu.matmul %30, %32, %cst_25 {dimension_numbers = #tpu.dot_dimension_numbers<[1], [0], [0], [1], [0, 0, 1, 1], [], []>} : vector<24x16xbf16>, vector<16x32xbf16>, vector<24x32xf32> -> vector<24x32xf32>
    %34 = arith.addf %28, %33 : vector<24x32xf32>
    %c6 = arith.constant 6 : index
    %c0_26 = arith.constant 0 : index
    %35 = vector.load %arg9[%c6, %c0_26] : memref<40x16xf32, #tpu.memory_space<vmem>>, vector<24x16xf32>
    %36 = arith.truncf %35 : vector<24x16xf32> to vector<24x16xbf16>
    %c3 = arith.constant 3 : index
    %c0_27 = arith.constant 0 : index
    %c0_28 = arith.constant 0 : index
    %37 = vector.load %arg2[%c3, %c0_27, %c0_28] : memref<9x16x32xbf16, #tpu.memory_space<vmem>>, vector<1x16x32xbf16>
    %38 = vector.shape_cast %37 : vector<1x16x32xbf16> to vector<16x32xbf16>
    %cst_29 = arith.constant dense<0.000000e+00> : vector<24x32xf32>
    %39 = tpu.matmul %36, %38, %cst_29 {dimension_numbers = #tpu.dot_dimension_numbers<[1], [0], [0], [1], [0, 0, 1, 1], [], []>} : vector<24x16xbf16>, vector<16x32xbf16>, vector<24x32xf32> -> vector<24x32xf32>
    %40 = arith.addf %34, %39 : vector<24x32xf32>
    %c7_30 = arith.constant 7 : index
    %c0_31 = arith.constant 0 : index
    %41 = vector.load %arg9[%c7_30, %c0_31] : memref<40x16xf32, #tpu.memory_space<vmem>>, vector<24x16xf32>
    %42 = arith.truncf %41 : vector<24x16xf32> to vector<24x16xbf16>
    %c4 = arith.constant 4 : index
    %c0_32 = arith.constant 0 : index
    %c0_33 = arith.constant 0 : index
    %43 = vector.load %arg2[%c4, %c0_32, %c0_33] : memref<9x16x32xbf16, #tpu.memory_space<vmem>>, vector<1x16x32xbf16>
    %44 = vector.shape_cast %43 : vector<1x16x32xbf16> to vector<16x32xbf16>
    %cst_34 = arith.constant dense<0.000000e+00> : vector<24x32xf32>
    %45 = tpu.matmul %42, %44, %cst_34 {dimension_numbers = #tpu.dot_dimension_numbers<[1], [0], [0], [1], [0, 0, 1, 1], [], []>} : vector<24x16xbf16>, vector<16x32xbf16>, vector<24x32xf32> -> vector<24x32xf32>
    %46 = arith.addf %40, %45 : vector<24x32xf32>
    %c8 = arith.constant 8 : index
    %c0_35 = arith.constant 0 : index
    %47 = vector.load %arg9[%c8, %c0_35] : memref<40x16xf32, #tpu.memory_space<vmem>>, vector<24x16xf32>
    %48 = arith.truncf %47 : vector<24x16xf32> to vector<24x16xbf16>
    %c5 = arith.constant 5 : index
    %c0_36 = arith.constant 0 : index
    %c0_37 = arith.constant 0 : index
    %49 = vector.load %arg2[%c5, %c0_36, %c0_37] : memref<9x16x32xbf16, #tpu.memory_space<vmem>>, vector<1x16x32xbf16>
    %50 = vector.shape_cast %49 : vector<1x16x32xbf16> to vector<16x32xbf16>
    %cst_38 = arith.constant dense<0.000000e+00> : vector<24x32xf32>
    %51 = tpu.matmul %48, %50, %cst_38 {dimension_numbers = #tpu.dot_dimension_numbers<[1], [0], [0], [1], [0, 0, 1, 1], [], []>} : vector<24x16xbf16>, vector<16x32xbf16>, vector<24x32xf32> -> vector<24x32xf32>
    %52 = arith.addf %46, %51 : vector<24x32xf32>
    %c12 = arith.constant 12 : index
    %c0_39 = arith.constant 0 : index
    %53 = vector.load %arg9[%c12, %c0_39] : memref<40x16xf32, #tpu.memory_space<vmem>>, vector<24x16xf32>
    %54 = arith.truncf %53 : vector<24x16xf32> to vector<24x16xbf16>
    %c6_40 = arith.constant 6 : index
    %c0_41 = arith.constant 0 : index
    %c0_42 = arith.constant 0 : index
    %55 = vector.load %arg2[%c6_40, %c0_41, %c0_42] : memref<9x16x32xbf16, #tpu.memory_space<vmem>>, vector<1x16x32xbf16>
    %56 = vector.shape_cast %55 : vector<1x16x32xbf16> to vector<16x32xbf16>
    %cst_43 = arith.constant dense<0.000000e+00> : vector<24x32xf32>
    %57 = tpu.matmul %54, %56, %cst_43 {dimension_numbers = #tpu.dot_dimension_numbers<[1], [0], [0], [1], [0, 0, 1, 1], [], []>} : vector<24x16xbf16>, vector<16x32xbf16>, vector<24x32xf32> -> vector<24x32xf32>
    %58 = arith.addf %52, %57 : vector<24x32xf32>
    %c13_44 = arith.constant 13 : index
    %c0_45 = arith.constant 0 : index
    %59 = vector.load %arg9[%c13_44, %c0_45] : memref<40x16xf32, #tpu.memory_space<vmem>>, vector<24x16xf32>
    %60 = arith.truncf %59 : vector<24x16xf32> to vector<24x16xbf16>
    %c7_46 = arith.constant 7 : index
    %c0_47 = arith.constant 0 : index
    %c0_48 = arith.constant 0 : index
    %61 = vector.load %arg2[%c7_46, %c0_47, %c0_48] : memref<9x16x32xbf16, #tpu.memory_space<vmem>>, vector<1x16x32xbf16>
    %62 = vector.shape_cast %61 : vector<1x16x32xbf16> to vector<16x32xbf16>
    %cst_49 = arith.constant dense<0.000000e+00> : vector<24x32xf32>
    %63 = tpu.matmul %60, %62, %cst_49 {dimension_numbers = #tpu.dot_dimension_numbers<[1], [0], [0], [1], [0, 0, 1, 1], [], []>} : vector<24x16xbf16>, vector<16x32xbf16>, vector<24x32xf32> -> vector<24x32xf32>
    %64 = arith.addf %58, %63 : vector<24x32xf32>
    %c14 = arith.constant 14 : index
    %c0_50 = arith.constant 0 : index
    %65 = vector.load %arg9[%c14, %c0_50] : memref<40x16xf32, #tpu.memory_space<vmem>>, vector<24x16xf32>
    %66 = arith.truncf %65 : vector<24x16xf32> to vector<24x16xbf16>
    %c8_51 = arith.constant 8 : index
    %c0_52 = arith.constant 0 : index
    %c0_53 = arith.constant 0 : index
    %67 = vector.load %arg2[%c8_51, %c0_52, %c0_53] : memref<9x16x32xbf16, #tpu.memory_space<vmem>>, vector<1x16x32xbf16>
    %68 = vector.shape_cast %67 : vector<1x16x32xbf16> to vector<16x32xbf16>
    %cst_54 = arith.constant dense<0.000000e+00> : vector<24x32xf32>
    %69 = tpu.matmul %66, %68, %cst_54 {dimension_numbers = #tpu.dot_dimension_numbers<[1], [0], [0], [1], [0, 0, 1, 1], [], []>} : vector<24x16xbf16>, vector<16x32xbf16>, vector<24x32xf32> -> vector<24x32xf32>
    %70 = arith.addf %64, %69 : vector<24x32xf32>
    %c0_55 = arith.constant 0 : index
    %c0_56 = arith.constant 0 : index
    %71 = vector.load %arg3[%c0_55, %c0_56] : memref<1x32xf32, #tpu.memory_space<vmem>>, vector<1x32xf32>
    %72 = vector.broadcast %71 : vector<1x32xf32> to vector<24x32xf32>
    %73 = arith.addf %70, %72 : vector<24x32xf32>
    %74 = tpu.iota {dimensions = array<i32: 0>} : vector<24x1xi32>
    %c6_i32 = arith.constant 6 : i32
    %c0_i32 = arith.constant 0 : i32
    %75 = arith.cmpi eq, %c6_i32, %c0_i32 : i32
    %c1_i32 = arith.constant 1 : i32
    %76 = arith.select %75, %c1_i32, %c6_i32 : i32
    %77 = vector.broadcast %76 : i32 to vector<24x1xi32>
    %78 = arith.remsi %74, %77 : vector<24x1xi32>
    %c0_i32_57 = arith.constant 0 : i32
    %79 = vector.broadcast %c0_i32_57 : i32 to vector<24x1xi32>
    %80 = arith.cmpi ne, %78, %79 : vector<24x1xi32>
    %c0_i32_58 = arith.constant 0 : i32
    %81 = vector.broadcast %c0_i32_58 : i32 to vector<24x1xi32>
    %82 = arith.cmpi slt, %78, %81 : vector<24x1xi32>
    %c0_i32_59 = arith.constant 0 : i32
    %83 = arith.cmpi slt, %76, %c0_i32_59 : i32
    %84 = vector.broadcast %83 : i1 to vector<24x1xi1>
    %85 = vector.broadcast %84 : vector<24x1xi1> to vector<24x1xi1>
    %86 = arith.xori %82, %85 : vector<24x1xi1>
    %87 = arith.andi %86, %80 : vector<24x1xi1>
    %88 = vector.broadcast %76 : i32 to vector<24x1xi32>
    %89 = arith.addi %78, %88 : vector<24x1xi32>
    %90 = arith.select %87, %89, %78 : vector<24x1xi1>, vector<24x1xi32>
    %c4_i32 = arith.constant 4 : i32
    %91 = vector.broadcast %c4_i32 : i32 to vector<24x1xi32>
    %92 = arith.cmpi slt, %90, %91 : vector<24x1xi32>
    %93 = arith.extui %92 : vector<24x1xi1> to vector<24x1xi32>
    %94 = arith.sitofp %93 : vector<24x1xi32> to vector<24x1xf32>
    %95 = vector.broadcast %94 : vector<24x1xf32> to vector<24x32xf32>
    %96 = arith.mulf %73, %95 : vector<24x32xf32>
    %cst_60 = arith.constant dense<0.000000e+00> : vector<32xf32>
    %97 = vector.multi_reduction <add>, %96, %cst_60 [0] : vector<24x32xf32> to vector<32xf32>
    %98 = vector.shape_cast %97 : vector<32xf32> to vector<1x32xf32>
    %c0_61 = arith.constant 0 : index
    %c0_62 = arith.constant 0 : index
    %99 = vector.load %arg6[%c0_61, %c0_62] : memref<32x4xf32, #tpu.memory_space<vmem>>, vector<32x4xf32>
    %cst_63 = arith.constant dense<0.000000e+00> : vector<1x4xf32>
    %100 = tpu.matmul %98, %99, %cst_63 {dimension_numbers = #tpu.dot_dimension_numbers<[1], [0], [0], [1], [0, 0, 1, 1], [], []>} : vector<1x32xf32>, vector<32x4xf32>, vector<1x4xf32> -> vector<1x4xf32>
    %cst_64 = arith.constant 7.812500e-03 : f32
    %101 = vector.broadcast %cst_64 : f32 to vector<1x4xf32>
    %102 = arith.mulf %100, %101 : vector<1x4xf32>
    %c0_65 = arith.constant 0 : index
    %c0_66 = arith.constant 0 : index
    %103 = vector.load %arg7[%c0_65, %c0_66] : memref<4x32xf32, #tpu.memory_space<vmem>>, vector<4x32xf32>
    %cst_67 = arith.constant dense<0.000000e+00> : vector<1x32xf32>
    %104 = tpu.matmul %102, %103, %cst_67 {dimension_numbers = #tpu.dot_dimension_numbers<[1], [0], [0], [1], [0, 0, 1, 1], [], []>} : vector<1x4xf32>, vector<4x32xf32>, vector<1x32xf32> -> vector<1x32xf32>
    %105 = vector.broadcast %104 : vector<1x32xf32> to vector<24x32xf32>
    %106 = arith.subf %73, %105 : vector<24x32xf32>
    %107 = arith.mulf %106, %106 : vector<24x32xf32>
    %108 = vector.broadcast %94 : vector<24x1xf32> to vector<24x32xf32>
    %109 = arith.mulf %107, %108 : vector<24x32xf32>
    %cst_68 = arith.constant dense<0.000000e+00> : vector<32xf32>
    %110 = vector.multi_reduction <add>, %109, %cst_68 [0] : vector<24x32xf32> to vector<32xf32>
    %111 = vector.shape_cast %110 : vector<32xf32> to vector<1x32xf32>
    %c0_69 = arith.constant 0 : index
    %c0_70 = arith.constant 0 : index
    %112 = vector.load %arg6[%c0_69, %c0_70] : memref<32x4xf32, #tpu.memory_space<vmem>>, vector<32x4xf32>
    %cst_71 = arith.constant dense<0.000000e+00> : vector<1x4xf32>
    %113 = tpu.matmul %111, %112, %cst_71 {dimension_numbers = #tpu.dot_dimension_numbers<[1], [0], [0], [1], [0, 0, 1, 1], [], []>} : vector<1x32xf32>, vector<32x4xf32>, vector<1x4xf32> -> vector<1x4xf32>
    %cst_72 = arith.constant 7.812500e-03 : f32
    %114 = vector.broadcast %cst_72 : f32 to vector<1x4xf32>
    %115 = arith.mulf %113, %114 : vector<1x4xf32>
    %cst_73 = arith.constant 9.99999974E-6 : f32
    %116 = vector.broadcast %cst_73 : f32 to vector<1x4xf32>
    %117 = arith.addf %115, %116 : vector<1x4xf32>
    %118 = math.rsqrt %117 : vector<1x4xf32>
    %c0_74 = arith.constant 0 : index
    %c0_75 = arith.constant 0 : index
    %119 = vector.load %arg7[%c0_74, %c0_75] : memref<4x32xf32, #tpu.memory_space<vmem>>, vector<4x32xf32>
    %cst_76 = arith.constant dense<0.000000e+00> : vector<1x32xf32>
    %120 = tpu.matmul %118, %119, %cst_76 {dimension_numbers = #tpu.dot_dimension_numbers<[1], [0], [0], [1], [0, 0, 1, 1], [], []>} : vector<1x4xf32>, vector<4x32xf32>, vector<1x32xf32> -> vector<1x32xf32>
    %121 = vector.broadcast %120 : vector<1x32xf32> to vector<24x32xf32>
    %122 = arith.mulf %106, %121 : vector<24x32xf32>
    %c0_77 = arith.constant 0 : index
    %c0_78 = arith.constant 0 : index
    %123 = vector.load %arg4[%c0_77, %c0_78] : memref<1x32xf32, #tpu.memory_space<vmem>>, vector<1x32xf32>
    %124 = vector.broadcast %123 : vector<1x32xf32> to vector<24x32xf32>
    %125 = arith.mulf %122, %124 : vector<24x32xf32>
    %c0_79 = arith.constant 0 : index
    %c0_80 = arith.constant 0 : index
    %126 = vector.load %arg5[%c0_79, %c0_80] : memref<1x32xf32, #tpu.memory_space<vmem>>, vector<1x32xf32>
    %127 = vector.broadcast %126 : vector<1x32xf32> to vector<24x32xf32>
    %128 = arith.addf %125, %127 : vector<24x32xf32>
    %cst_81 = arith.constant 0.000000e+00 : f32
    %129 = vector.broadcast %cst_81 : f32 to vector<24x32xf32>
    %130 = arith.maximumf %128, %129 : vector<24x32xf32>
    %131 = vector.extract_strided_slice %130 {offsets = [0, 0], sizes = [4, 32], strides = [1, 1]} : vector<24x32xf32> to vector<4x32xf32>
    %c0_82 = arith.constant 0 : index
    %c0_83 = arith.constant 0 : index
    %c0_84 = arith.constant 0 : index
    %c0_85 = arith.constant 0 : index
    %132 = vector.load %arg8[%c0_82, %c0_83, %c0_84, %c0_85] : memref<1x4x4x32xf32, #tpu.memory_space<vmem>>, vector<1x1x4x32xf32>
    %133 = vector.shape_cast %132 : vector<1x1x4x32xf32> to vector<4x32xf32>
    %134 = vector.shape_cast %131 : vector<4x32xf32> to vector<1x1x4x32xf32>
    tpu.vector_store %arg8[%c0_82, %c0_83, %c0_84, %c0_85], %134 {strides = array<i32>} : memref<1x4x4x32xf32, #tpu.memory_space<vmem>>, vector<1x1x4x32xf32>,
    %135 = vector.extract_strided_slice %130 {offsets = [6, 0], sizes = [4, 32], strides = [1, 1]} : vector<24x32xf32> to vector<4x32xf32>
    %c0_86 = arith.constant 0 : index
    %c1_87 = arith.constant 1 : index
    %c0_88 = arith.constant 0 : index
    %c0_89 = arith.constant 0 : index
    %136 = vector.load %arg8[%c0_86, %c1_87, %c0_88, %c0_89] : memref<1x4x4x32xf32, #tpu.memory_space<vmem>>, vector<1x1x4x32xf32>
    %137 = vector.shape_cast %136 : vector<1x1x4x32xf32> to vector<4x32xf32>
    %138 = vector.shape_cast %135 : vector<4x32xf32> to vector<1x1x4x32xf32>
    tpu.vector_store %arg8[%c0_86, %c1_87, %c0_88, %c0_89], %138 {strides = array<i32>} : memref<1x4x4x32xf32, #tpu.memory_space<vmem>>, vector<1x1x4x32xf32>,
    %139 = vector.extract_strided_slice %130 {offsets = [12, 0], sizes = [4, 32], strides = [1, 1]} : vector<24x32xf32> to vector<4x32xf32>
    %c0_90 = arith.constant 0 : index
    %c2_91 = arith.constant 2 : index
    %c0_92 = arith.constant 0 : index
    %c0_93 = arith.constant 0 : index
    %140 = vector.load %arg8[%c0_90, %c2_91, %c0_92, %c0_93] : memref<1x4x4x32xf32, #tpu.memory_space<vmem>>, vector<1x1x4x32xf32>
    %141 = vector.shape_cast %140 : vector<1x1x4x32xf32> to vector<4x32xf32>
    %142 = vector.shape_cast %139 : vector<4x32xf32> to vector<1x1x4x32xf32>
    tpu.vector_store %arg8[%c0_90, %c2_91, %c0_92, %c0_93], %142 {strides = array<i32>} : memref<1x4x4x32xf32, #tpu.memory_space<vmem>>, vector<1x1x4x32xf32>,
    %143 = vector.extract_strided_slice %130 {offsets = [18, 0], sizes = [4, 32], strides = [1, 1]} : vector<24x32xf32> to vector<4x32xf32>
    %c0_94 = arith.constant 0 : index
    %c3_95 = arith.constant 3 : index
    %c0_96 = arith.constant 0 : index
    %c0_97 = arith.constant 0 : index
    %144 = vector.load %arg8[%c0_94, %c3_95, %c0_96, %c0_97] : memref<1x4x4x32xf32, #tpu.memory_space<vmem>>, vector<1x1x4x32xf32>
    %145 = vector.shape_cast %144 : vector<1x1x4x32xf32> to vector<4x32xf32>
    %146 = vector.shape_cast %143 : vector<4x32xf32> to vector<1x1x4x32xf32>
    tpu.vector_store %arg8[%c0_94, %c3_95, %c0_96, %c0_97], %146 {strides = array<i32>} : memref<1x4x4x32xf32, #tpu.memory_space<vmem>>, vector<1x1x4x32xf32>,
    return
  }
  func.func @transform_0(%arg0: i32) -> (i32, i32, i32, i32) {
    %c0_i32 = arith.constant 0 : i32
    %c0_i32_0 = arith.constant 0 : i32
    %c0_i32_1 = arith.constant 0 : i32
    %c0_i32_2 = arith.constant 0 : i32
    return %arg0, %c0_i32, %c0_i32_0, %c0_i32_1 : i32, i32, i32, i32
  }
  func.func @transform_1(%arg0: i32) -> (i32, i32, i32) {
    %c0_i32 = arith.constant 0 : i32
    %c0_i32_0 = arith.constant 0 : i32
    %c0_i32_1 = arith.constant 0 : i32
    %c0_i32_2 = arith.constant 0 : i32
    return %c0_i32, %c0_i32_0, %c0_i32_1 : i32, i32, i32
  }
  func.func @transform_2(%arg0: i32) -> (i32, i32) {
    %c0_i32 = arith.constant 0 : i32
    %c0_i32_0 = arith.constant 0 : i32
    %c0_i32_1 = arith.constant 0 : i32
    return %c0_i32, %c0_i32_0 : i32, i32
  }
  func.func @transform_3(%arg0: i32) -> (i32, i32) {
    %c0_i32 = arith.constant 0 : i32
    %c0_i32_0 = arith.constant 0 : i32
    %c0_i32_1 = arith.constant 0 : i32
    return %c0_i32, %c0_i32_0 : i32, i32
  }
  func.func @transform_4(%arg0: i32) -> (i32, i32) {
    %c0_i32 = arith.constant 0 : i32
    %c0_i32_0 = arith.constant 0 : i32
    %c0_i32_1 = arith.constant 0 : i32
    return %c0_i32, %c0_i32_0 : i32, i32
  }
  func.func @transform_5(%arg0: i32) -> (i32, i32) {
    %c0_i32 = arith.constant 0 : i32
    %c0_i32_0 = arith.constant 0 : i32
    %c0_i32_1 = arith.constant 0 : i32
    return %c0_i32, %c0_i32_0 : i32, i32
  }
  func.func @transform_6(%arg0: i32) -> (i32, i32) {
    %c0_i32 = arith.constant 0 : i32
    %c0_i32_0 = arith.constant 0 : i32
    %c0_i32_1 = arith.constant 0 : i32
    return %c0_i32, %c0_i32_0 : i32, i32
  }
  func.func @transform_7(%arg0: i32) -> (i32, i32, i32, i32) {
    %c0_i32 = arith.constant 0 : i32
    %c0_i32_0 = arith.constant 0 : i32
    %c0_i32_1 = arith.constant 0 : i32
    %c0_i32_2 = arith.constant 0 : i32
    return %arg0, %c0_i32, %c0_i32_0, %c0_i32_1 : i32, i32, i32, i32
  }
}

module attributes {stable_mosaic.version = 11 : i64} {
  func.func @fused_conv_kernel(%arg0: i32, %arg1: memref<1x8x8x8xf32, #tpu.memory_space<vmem>>, %arg2: memref<9x8x12xbf16, #tpu.memory_space<vmem>>, %arg3: memref<1x12xf32, #tpu.memory_space<vmem>>, %arg4: memref<1x8x8x12xf32, #tpu.memory_space<vmem>>, %arg5: memref<104x8xf32, #tpu.memory_space<vmem>>) attributes {dimension_semantics = [#tpu.dimension_semantics<parallel>], iteration_bounds = array<i64: 2>, scalar_prefetch = 0 : i64, scratch_operands = 1 : i64, tpu.core_type = #tpu.core_type<tc>, window_params = [{transform_indices = @transform_0, window_bounds = array<i64: 1, 8, 8, 8>}, {pipeline_mode = #tpu.pipeline_mode<synchronous>, transform_indices = @transform_1, window_bounds = array<i64: 9, 8, 12>}, {pipeline_mode = #tpu.pipeline_mode<synchronous>, transform_indices = @transform_2, window_bounds = array<i64: 1, 12>}, {transform_indices = @transform_3, window_bounds = array<i64: 1, 8, 8, 12>}]} {
    %c0 = arith.constant 0 : index
    %c0_0 = arith.constant 0 : index
    %c0_1 = arith.constant 0 : index
    %c0_2 = arith.constant 0 : index
    %0 = vector.load %arg1[%c0, %c0_0, %c0_1, %c0_2] : memref<1x8x8x8xf32, #tpu.memory_space<vmem>>, vector<1x8x8x8xf32>
    %1 = vector.shape_cast %0 : vector<1x8x8x8xf32> to vector<8x8x8xf32>
    %cst = arith.constant 0.000000e+00 : f32
    %2 = vector.broadcast %cst : f32 to vector<104x8xf32>
    %c0_3 = arith.constant 0 : index
    %c0_4 = arith.constant 0 : index
    %3 = vector.load %arg5[%c0_3, %c0_4] : memref<104x8xf32, #tpu.memory_space<vmem>>, vector<104x8xf32>
    tpu.vector_store %arg5[%c0_3, %c0_4], %2 {strides = array<i32>} : memref<104x8xf32, #tpu.memory_space<vmem>>, vector<104x8xf32>,
    %4 = vector.extract_strided_slice %1 {offsets = [0, 0, 0], sizes = [1, 8, 8], strides = [1, 1, 1]} : vector<8x8x8xf32> to vector<1x8x8xf32>
    %5 = vector.shape_cast %4 : vector<1x8x8xf32> to vector<8x8xf32>
    %c11 = arith.constant 11 : index
    %c0_5 = arith.constant 0 : index
    %6 = vector.load %arg5[%c11, %c0_5] : memref<104x8xf32, #tpu.memory_space<vmem>>, vector<8x8xf32>
    tpu.vector_store %arg5[%c11, %c0_5], %5 {strides = array<i32>} : memref<104x8xf32, #tpu.memory_space<vmem>>, vector<8x8xf32>,
    %7 = vector.extract_strided_slice %1 {offsets = [1, 0, 0], sizes = [1, 8, 8], strides = [1, 1, 1]} : vector<8x8x8xf32> to vector<1x8x8xf32>
    %8 = vector.shape_cast %7 : vector<1x8x8xf32> to vector<8x8xf32>
    %c21 = arith.constant 21 : index
    %c0_6 = arith.constant 0 : index
    %9 = vector.load %arg5[%c21, %c0_6] : memref<104x8xf32, #tpu.memory_space<vmem>>, vector<8x8xf32>
    tpu.vector_store %arg5[%c21, %c0_6], %8 {strides = array<i32>} : memref<104x8xf32, #tpu.memory_space<vmem>>, vector<8x8xf32>,
    %10 = vector.extract_strided_slice %1 {offsets = [2, 0, 0], sizes = [1, 8, 8], strides = [1, 1, 1]} : vector<8x8x8xf32> to vector<1x8x8xf32>
    %11 = vector.shape_cast %10 : vector<1x8x8xf32> to vector<8x8xf32>
    %c31 = arith.constant 31 : index
    %c0_7 = arith.constant 0 : index
    %12 = vector.load %arg5[%c31, %c0_7] : memref<104x8xf32, #tpu.memory_space<vmem>>, vector<8x8xf32>
    tpu.vector_store %arg5[%c31, %c0_7], %11 {strides = array<i32>} : memref<104x8xf32, #tpu.memory_space<vmem>>, vector<8x8xf32>,
    %13 = vector.extract_strided_slice %1 {offsets = [3, 0, 0], sizes = [1, 8, 8], strides = [1, 1, 1]} : vector<8x8x8xf32> to vector<1x8x8xf32>
    %14 = vector.shape_cast %13 : vector<1x8x8xf32> to vector<8x8xf32>
    %c41 = arith.constant 41 : index
    %c0_8 = arith.constant 0 : index
    %15 = vector.load %arg5[%c41, %c0_8] : memref<104x8xf32, #tpu.memory_space<vmem>>, vector<8x8xf32>
    tpu.vector_store %arg5[%c41, %c0_8], %14 {strides = array<i32>} : memref<104x8xf32, #tpu.memory_space<vmem>>, vector<8x8xf32>,
    %16 = vector.extract_strided_slice %1 {offsets = [4, 0, 0], sizes = [1, 8, 8], strides = [1, 1, 1]} : vector<8x8x8xf32> to vector<1x8x8xf32>
    %17 = vector.shape_cast %16 : vector<1x8x8xf32> to vector<8x8xf32>
    %c51 = arith.constant 51 : index
    %c0_9 = arith.constant 0 : index
    %18 = vector.load %arg5[%c51, %c0_9] : memref<104x8xf32, #tpu.memory_space<vmem>>, vector<8x8xf32>
    tpu.vector_store %arg5[%c51, %c0_9], %17 {strides = array<i32>} : memref<104x8xf32, #tpu.memory_space<vmem>>, vector<8x8xf32>,
    %19 = vector.extract_strided_slice %1 {offsets = [5, 0, 0], sizes = [1, 8, 8], strides = [1, 1, 1]} : vector<8x8x8xf32> to vector<1x8x8xf32>
    %20 = vector.shape_cast %19 : vector<1x8x8xf32> to vector<8x8xf32>
    %c61 = arith.constant 61 : index
    %c0_10 = arith.constant 0 : index
    %21 = vector.load %arg5[%c61, %c0_10] : memref<104x8xf32, #tpu.memory_space<vmem>>, vector<8x8xf32>
    tpu.vector_store %arg5[%c61, %c0_10], %20 {strides = array<i32>} : memref<104x8xf32, #tpu.memory_space<vmem>>, vector<8x8xf32>,
    %22 = vector.extract_strided_slice %1 {offsets = [6, 0, 0], sizes = [1, 8, 8], strides = [1, 1, 1]} : vector<8x8x8xf32> to vector<1x8x8xf32>
    %23 = vector.shape_cast %22 : vector<1x8x8xf32> to vector<8x8xf32>
    %c71 = arith.constant 71 : index
    %c0_11 = arith.constant 0 : index
    %24 = vector.load %arg5[%c71, %c0_11] : memref<104x8xf32, #tpu.memory_space<vmem>>, vector<8x8xf32>
    tpu.vector_store %arg5[%c71, %c0_11], %23 {strides = array<i32>} : memref<104x8xf32, #tpu.memory_space<vmem>>, vector<8x8xf32>,
    %25 = vector.extract_strided_slice %1 {offsets = [7, 0, 0], sizes = [1, 8, 8], strides = [1, 1, 1]} : vector<8x8x8xf32> to vector<1x8x8xf32>
    %26 = vector.shape_cast %25 : vector<1x8x8xf32> to vector<8x8xf32>
    %c81 = arith.constant 81 : index
    %c0_12 = arith.constant 0 : index
    %27 = vector.load %arg5[%c81, %c0_12] : memref<104x8xf32, #tpu.memory_space<vmem>>, vector<8x8xf32>
    tpu.vector_store %arg5[%c81, %c0_12], %26 {strides = array<i32>} : memref<104x8xf32, #tpu.memory_space<vmem>>, vector<8x8xf32>,
    %cst_13 = arith.constant 0.000000e+00 : f32
    %28 = vector.broadcast %cst_13 : f32 to vector<80x12xf32>
    %c0_14 = arith.constant 0 : index
    %c0_15 = arith.constant 0 : index
    %29 = vector.load %arg5[%c0_14, %c0_15] : memref<104x8xf32, #tpu.memory_space<vmem>>, vector<80x8xf32>
    %30 = arith.truncf %29 : vector<80x8xf32> to vector<80x8xbf16>
    %c0_16 = arith.constant 0 : index
    %c0_17 = arith.constant 0 : index
    %c0_18 = arith.constant 0 : index
    %31 = vector.load %arg2[%c0_16, %c0_17, %c0_18] : memref<9x8x12xbf16, #tpu.memory_space<vmem>>, vector<1x8x12xbf16>
    %32 = vector.shape_cast %31 : vector<1x8x12xbf16> to vector<8x12xbf16>
    %cst_19 = arith.constant dense<0.000000e+00> : vector<80x12xf32>
    %33 = tpu.matmul %30, %32, %cst_19 {dimension_numbers = #tpu.dot_dimension_numbers<[1], [0], [0], [1], [0, 0, 1, 1], [], []>} : vector<80x8xbf16>, vector<8x12xbf16>, vector<80x12xf32> -> vector<80x12xf32>
    %34 = arith.addf %28, %33 : vector<80x12xf32>
    %c1 = arith.constant 1 : index
    %c0_20 = arith.constant 0 : index
    %35 = vector.load %arg5[%c1, %c0_20] : memref<104x8xf32, #tpu.memory_space<vmem>>, vector<80x8xf32>
    %36 = arith.truncf %35 : vector<80x8xf32> to vector<80x8xbf16>
    %c1_21 = arith.constant 1 : index
    %c0_22 = arith.constant 0 : index
    %c0_23 = arith.constant 0 : index
    %37 = vector.load %arg2[%c1_21, %c0_22, %c0_23] : memref<9x8x12xbf16, #tpu.memory_space<vmem>>, vector<1x8x12xbf16>
    %38 = vector.shape_cast %37 : vector<1x8x12xbf16> to vector<8x12xbf16>
    %cst_24 = arith.constant dense<0.000000e+00> : vector<80x12xf32>
    %39 = tpu.matmul %36, %38, %cst_24 {dimension_numbers = #tpu.dot_dimension_numbers<[1], [0], [0], [1], [0, 0, 1, 1], [], []>} : vector<80x8xbf16>, vector<8x12xbf16>, vector<80x12xf32> -> vector<80x12xf32>
    %40 = arith.addf %34, %39 : vector<80x12xf32>
    %c2 = arith.constant 2 : index
    %c0_25 = arith.constant 0 : index
    %41 = vector.load %arg5[%c2, %c0_25] : memref<104x8xf32, #tpu.memory_space<vmem>>, vector<80x8xf32>
    %42 = arith.truncf %41 : vector<80x8xf32> to vector<80x8xbf16>
    %c2_26 = arith.constant 2 : index
    %c0_27 = arith.constant 0 : index
    %c0_28 = arith.constant 0 : index
    %43 = vector.load %arg2[%c2_26, %c0_27, %c0_28] : memref<9x8x12xbf16, #tpu.memory_space<vmem>>, vector<1x8x12xbf16>
    %44 = vector.shape_cast %43 : vector<1x8x12xbf16> to vector<8x12xbf16>
    %cst_29 = arith.constant dense<0.000000e+00> : vector<80x12xf32>
    %45 = tpu.matmul %42, %44, %cst_29 {dimension_numbers = #tpu.dot_dimension_numbers<[1], [0], [0], [1], [0, 0, 1, 1], [], []>} : vector<80x8xbf16>, vector<8x12xbf16>, vector<80x12xf32> -> vector<80x12xf32>
    %46 = arith.addf %40, %45 : vector<80x12xf32>
    %c10 = arith.constant 10 : index
    %c0_30 = arith.constant 0 : index
    %47 = vector.load %arg5[%c10, %c0_30] : memref<104x8xf32, #tpu.memory_space<vmem>>, vector<80x8xf32>
    %48 = arith.truncf %47 : vector<80x8xf32> to vector<80x8xbf16>
    %c3 = arith.constant 3 : index
    %c0_31 = arith.constant 0 : index
    %c0_32 = arith.constant 0 : index
    %49 = vector.load %arg2[%c3, %c0_31, %c0_32] : memref<9x8x12xbf16, #tpu.memory_space<vmem>>, vector<1x8x12xbf16>
    %50 = vector.shape_cast %49 : vector<1x8x12xbf16> to vector<8x12xbf16>
    %cst_33 = arith.constant dense<0.000000e+00> : vector<80x12xf32>
    %51 = tpu.matmul %48, %50, %cst_33 {dimension_numbers = #tpu.dot_dimension_numbers<[1], [0], [0], [1], [0, 0, 1, 1], [], []>} : vector<80x8xbf16>, vector<8x12xbf16>, vector<80x12xf32> -> vector<80x12xf32>
    %52 = arith.addf %46, %51 : vector<80x12xf32>
    %c11_34 = arith.constant 11 : index
    %c0_35 = arith.constant 0 : index
    %53 = vector.load %arg5[%c11_34, %c0_35] : memref<104x8xf32, #tpu.memory_space<vmem>>, vector<80x8xf32>
    %54 = arith.truncf %53 : vector<80x8xf32> to vector<80x8xbf16>
    %c4 = arith.constant 4 : index
    %c0_36 = arith.constant 0 : index
    %c0_37 = arith.constant 0 : index
    %55 = vector.load %arg2[%c4, %c0_36, %c0_37] : memref<9x8x12xbf16, #tpu.memory_space<vmem>>, vector<1x8x12xbf16>
    %56 = vector.shape_cast %55 : vector<1x8x12xbf16> to vector<8x12xbf16>
    %cst_38 = arith.constant dense<0.000000e+00> : vector<80x12xf32>
    %57 = tpu.matmul %54, %56, %cst_38 {dimension_numbers = #tpu.dot_dimension_numbers<[1], [0], [0], [1], [0, 0, 1, 1], [], []>} : vector<80x8xbf16>, vector<8x12xbf16>, vector<80x12xf32> -> vector<80x12xf32>
    %58 = arith.addf %52, %57 : vector<80x12xf32>
    %c12 = arith.constant 12 : index
    %c0_39 = arith.constant 0 : index
    %59 = vector.load %arg5[%c12, %c0_39] : memref<104x8xf32, #tpu.memory_space<vmem>>, vector<80x8xf32>
    %60 = arith.truncf %59 : vector<80x8xf32> to vector<80x8xbf16>
    %c5 = arith.constant 5 : index
    %c0_40 = arith.constant 0 : index
    %c0_41 = arith.constant 0 : index
    %61 = vector.load %arg2[%c5, %c0_40, %c0_41] : memref<9x8x12xbf16, #tpu.memory_space<vmem>>, vector<1x8x12xbf16>
    %62 = vector.shape_cast %61 : vector<1x8x12xbf16> to vector<8x12xbf16>
    %cst_42 = arith.constant dense<0.000000e+00> : vector<80x12xf32>
    %63 = tpu.matmul %60, %62, %cst_42 {dimension_numbers = #tpu.dot_dimension_numbers<[1], [0], [0], [1], [0, 0, 1, 1], [], []>} : vector<80x8xbf16>, vector<8x12xbf16>, vector<80x12xf32> -> vector<80x12xf32>
    %64 = arith.addf %58, %63 : vector<80x12xf32>
    %c20 = arith.constant 20 : index
    %c0_43 = arith.constant 0 : index
    %65 = vector.load %arg5[%c20, %c0_43] : memref<104x8xf32, #tpu.memory_space<vmem>>, vector<80x8xf32>
    %66 = arith.truncf %65 : vector<80x8xf32> to vector<80x8xbf16>
    %c6 = arith.constant 6 : index
    %c0_44 = arith.constant 0 : index
    %c0_45 = arith.constant 0 : index
    %67 = vector.load %arg2[%c6, %c0_44, %c0_45] : memref<9x8x12xbf16, #tpu.memory_space<vmem>>, vector<1x8x12xbf16>
    %68 = vector.shape_cast %67 : vector<1x8x12xbf16> to vector<8x12xbf16>
    %cst_46 = arith.constant dense<0.000000e+00> : vector<80x12xf32>
    %69 = tpu.matmul %66, %68, %cst_46 {dimension_numbers = #tpu.dot_dimension_numbers<[1], [0], [0], [1], [0, 0, 1, 1], [], []>} : vector<80x8xbf16>, vector<8x12xbf16>, vector<80x12xf32> -> vector<80x12xf32>
    %70 = arith.addf %64, %69 : vector<80x12xf32>
    %c21_47 = arith.constant 21 : index
    %c0_48 = arith.constant 0 : index
    %71 = vector.load %arg5[%c21_47, %c0_48] : memref<104x8xf32, #tpu.memory_space<vmem>>, vector<80x8xf32>
    %72 = arith.truncf %71 : vector<80x8xf32> to vector<80x8xbf16>
    %c7 = arith.constant 7 : index
    %c0_49 = arith.constant 0 : index
    %c0_50 = arith.constant 0 : index
    %73 = vector.load %arg2[%c7, %c0_49, %c0_50] : memref<9x8x12xbf16, #tpu.memory_space<vmem>>, vector<1x8x12xbf16>
    %74 = vector.shape_cast %73 : vector<1x8x12xbf16> to vector<8x12xbf16>
    %cst_51 = arith.constant dense<0.000000e+00> : vector<80x12xf32>
    %75 = tpu.matmul %72, %74, %cst_51 {dimension_numbers = #tpu.dot_dimension_numbers<[1], [0], [0], [1], [0, 0, 1, 1], [], []>} : vector<80x8xbf16>, vector<8x12xbf16>, vector<80x12xf32> -> vector<80x12xf32>
    %76 = arith.addf %70, %75 : vector<80x12xf32>
    %c22 = arith.constant 22 : index
    %c0_52 = arith.constant 0 : index
    %77 = vector.load %arg5[%c22, %c0_52] : memref<104x8xf32, #tpu.memory_space<vmem>>, vector<80x8xf32>
    %78 = arith.truncf %77 : vector<80x8xf32> to vector<80x8xbf16>
    %c8 = arith.constant 8 : index
    %c0_53 = arith.constant 0 : index
    %c0_54 = arith.constant 0 : index
    %79 = vector.load %arg2[%c8, %c0_53, %c0_54] : memref<9x8x12xbf16, #tpu.memory_space<vmem>>, vector<1x8x12xbf16>
    %80 = vector.shape_cast %79 : vector<1x8x12xbf16> to vector<8x12xbf16>
    %cst_55 = arith.constant dense<0.000000e+00> : vector<80x12xf32>
    %81 = tpu.matmul %78, %80, %cst_55 {dimension_numbers = #tpu.dot_dimension_numbers<[1], [0], [0], [1], [0, 0, 1, 1], [], []>} : vector<80x8xbf16>, vector<8x12xbf16>, vector<80x12xf32> -> vector<80x12xf32>
    %82 = arith.addf %76, %81 : vector<80x12xf32>
    %c0_56 = arith.constant 0 : index
    %c0_57 = arith.constant 0 : index
    %83 = vector.load %arg3[%c0_56, %c0_57] : memref<1x12xf32, #tpu.memory_space<vmem>>, vector<1x12xf32>
    %84 = vector.broadcast %83 : vector<1x12xf32> to vector<80x12xf32>
    %85 = arith.addf %82, %84 : vector<80x12xf32>
    %86 = vector.extract_strided_slice %85 {offsets = [0, 0], sizes = [8, 12], strides = [1, 1]} : vector<80x12xf32> to vector<8x12xf32>
    %c0_58 = arith.constant 0 : index
    %c0_59 = arith.constant 0 : index
    %c0_60 = arith.constant 0 : index
    %c0_61 = arith.constant 0 : index
    %87 = vector.load %arg4[%c0_58, %c0_59, %c0_60, %c0_61] : memref<1x8x8x12xf32, #tpu.memory_space<vmem>>, vector<1x1x8x12xf32>
    %88 = vector.shape_cast %87 : vector<1x1x8x12xf32> to vector<8x12xf32>
    %89 = vector.shape_cast %86 : vector<8x12xf32> to vector<1x1x8x12xf32>
    tpu.vector_store %arg4[%c0_58, %c0_59, %c0_60, %c0_61], %89 {strides = array<i32>} : memref<1x8x8x12xf32, #tpu.memory_space<vmem>>, vector<1x1x8x12xf32>,
    %90 = vector.extract_strided_slice %85 {offsets = [10, 0], sizes = [8, 12], strides = [1, 1]} : vector<80x12xf32> to vector<8x12xf32>
    %c0_62 = arith.constant 0 : index
    %c1_63 = arith.constant 1 : index
    %c0_64 = arith.constant 0 : index
    %c0_65 = arith.constant 0 : index
    %91 = vector.load %arg4[%c0_62, %c1_63, %c0_64, %c0_65] : memref<1x8x8x12xf32, #tpu.memory_space<vmem>>, vector<1x1x8x12xf32>
    %92 = vector.shape_cast %91 : vector<1x1x8x12xf32> to vector<8x12xf32>
    %93 = vector.shape_cast %90 : vector<8x12xf32> to vector<1x1x8x12xf32>
    tpu.vector_store %arg4[%c0_62, %c1_63, %c0_64, %c0_65], %93 {strides = array<i32>} : memref<1x8x8x12xf32, #tpu.memory_space<vmem>>, vector<1x1x8x12xf32>,
    %94 = vector.extract_strided_slice %85 {offsets = [20, 0], sizes = [8, 12], strides = [1, 1]} : vector<80x12xf32> to vector<8x12xf32>
    %c0_66 = arith.constant 0 : index
    %c2_67 = arith.constant 2 : index
    %c0_68 = arith.constant 0 : index
    %c0_69 = arith.constant 0 : index
    %95 = vector.load %arg4[%c0_66, %c2_67, %c0_68, %c0_69] : memref<1x8x8x12xf32, #tpu.memory_space<vmem>>, vector<1x1x8x12xf32>
    %96 = vector.shape_cast %95 : vector<1x1x8x12xf32> to vector<8x12xf32>
    %97 = vector.shape_cast %94 : vector<8x12xf32> to vector<1x1x8x12xf32>
    tpu.vector_store %arg4[%c0_66, %c2_67, %c0_68, %c0_69], %97 {strides = array<i32>} : memref<1x8x8x12xf32, #tpu.memory_space<vmem>>, vector<1x1x8x12xf32>,
    %98 = vector.extract_strided_slice %85 {offsets = [30, 0], sizes = [8, 12], strides = [1, 1]} : vector<80x12xf32> to vector<8x12xf32>
    %c0_70 = arith.constant 0 : index
    %c3_71 = arith.constant 3 : index
    %c0_72 = arith.constant 0 : index
    %c0_73 = arith.constant 0 : index
    %99 = vector.load %arg4[%c0_70, %c3_71, %c0_72, %c0_73] : memref<1x8x8x12xf32, #tpu.memory_space<vmem>>, vector<1x1x8x12xf32>
    %100 = vector.shape_cast %99 : vector<1x1x8x12xf32> to vector<8x12xf32>
    %101 = vector.shape_cast %98 : vector<8x12xf32> to vector<1x1x8x12xf32>
    tpu.vector_store %arg4[%c0_70, %c3_71, %c0_72, %c0_73], %101 {strides = array<i32>} : memref<1x8x8x12xf32, #tpu.memory_space<vmem>>, vector<1x1x8x12xf32>,
    %102 = vector.extract_strided_slice %85 {offsets = [40, 0], sizes = [8, 12], strides = [1, 1]} : vector<80x12xf32> to vector<8x12xf32>
    %c0_74 = arith.constant 0 : index
    %c4_75 = arith.constant 4 : index
    %c0_76 = arith.constant 0 : index
    %c0_77 = arith.constant 0 : index
    %103 = vector.load %arg4[%c0_74, %c4_75, %c0_76, %c0_77] : memref<1x8x8x12xf32, #tpu.memory_space<vmem>>, vector<1x1x8x12xf32>
    %104 = vector.shape_cast %103 : vector<1x1x8x12xf32> to vector<8x12xf32>
    %105 = vector.shape_cast %102 : vector<8x12xf32> to vector<1x1x8x12xf32>
    tpu.vector_store %arg4[%c0_74, %c4_75, %c0_76, %c0_77], %105 {strides = array<i32>} : memref<1x8x8x12xf32, #tpu.memory_space<vmem>>, vector<1x1x8x12xf32>,
    %106 = vector.extract_strided_slice %85 {offsets = [50, 0], sizes = [8, 12], strides = [1, 1]} : vector<80x12xf32> to vector<8x12xf32>
    %c0_78 = arith.constant 0 : index
    %c5_79 = arith.constant 5 : index
    %c0_80 = arith.constant 0 : index
    %c0_81 = arith.constant 0 : index
    %107 = vector.load %arg4[%c0_78, %c5_79, %c0_80, %c0_81] : memref<1x8x8x12xf32, #tpu.memory_space<vmem>>, vector<1x1x8x12xf32>
    %108 = vector.shape_cast %107 : vector<1x1x8x12xf32> to vector<8x12xf32>
    %109 = vector.shape_cast %106 : vector<8x12xf32> to vector<1x1x8x12xf32>
    tpu.vector_store %arg4[%c0_78, %c5_79, %c0_80, %c0_81], %109 {strides = array<i32>} : memref<1x8x8x12xf32, #tpu.memory_space<vmem>>, vector<1x1x8x12xf32>,
    %110 = vector.extract_strided_slice %85 {offsets = [60, 0], sizes = [8, 12], strides = [1, 1]} : vector<80x12xf32> to vector<8x12xf32>
    %c0_82 = arith.constant 0 : index
    %c6_83 = arith.constant 6 : index
    %c0_84 = arith.constant 0 : index
    %c0_85 = arith.constant 0 : index
    %111 = vector.load %arg4[%c0_82, %c6_83, %c0_84, %c0_85] : memref<1x8x8x12xf32, #tpu.memory_space<vmem>>, vector<1x1x8x12xf32>
    %112 = vector.shape_cast %111 : vector<1x1x8x12xf32> to vector<8x12xf32>
    %113 = vector.shape_cast %110 : vector<8x12xf32> to vector<1x1x8x12xf32>
    tpu.vector_store %arg4[%c0_82, %c6_83, %c0_84, %c0_85], %113 {strides = array<i32>} : memref<1x8x8x12xf32, #tpu.memory_space<vmem>>, vector<1x1x8x12xf32>,
    %114 = vector.extract_strided_slice %85 {offsets = [70, 0], sizes = [8, 12], strides = [1, 1]} : vector<80x12xf32> to vector<8x12xf32>
    %c0_86 = arith.constant 0 : index
    %c7_87 = arith.constant 7 : index
    %c0_88 = arith.constant 0 : index
    %c0_89 = arith.constant 0 : index
    %115 = vector.load %arg4[%c0_86, %c7_87, %c0_88, %c0_89] : memref<1x8x8x12xf32, #tpu.memory_space<vmem>>, vector<1x1x8x12xf32>
    %116 = vector.shape_cast %115 : vector<1x1x8x12xf32> to vector<8x12xf32>
    %117 = vector.shape_cast %114 : vector<8x12xf32> to vector<1x1x8x12xf32>
    tpu.vector_store %arg4[%c0_86, %c7_87, %c0_88, %c0_89], %117 {strides = array<i32>} : memref<1x8x8x12xf32, #tpu.memory_space<vmem>>, vector<1x1x8x12xf32>,
    return
  }
  func.func @transform_0(%arg0: i32) -> (i32, i32, i32, i32) {
    %c0_i32 = arith.constant 0 : i32
    %c0_i32_0 = arith.constant 0 : i32
    %c0_i32_1 = arith.constant 0 : i32
    %c0_i32_2 = arith.constant 0 : i32
    return %arg0, %c0_i32, %c0_i32_0, %c0_i32_1 : i32, i32, i32, i32
  }
  func.func @transform_1(%arg0: i32) -> (i32, i32, i32) {
    %c0_i32 = arith.constant 0 : i32
    %c0_i32_0 = arith.constant 0 : i32
    %c0_i32_1 = arith.constant 0 : i32
    %c0_i32_2 = arith.constant 0 : i32
    return %c0_i32, %c0_i32_0, %c0_i32_1 : i32, i32, i32
  }
  func.func @transform_2(%arg0: i32) -> (i32, i32) {
    %c0_i32 = arith.constant 0 : i32
    %c0_i32_0 = arith.constant 0 : i32
    %c0_i32_1 = arith.constant 0 : i32
    return %c0_i32, %c0_i32_0 : i32, i32
  }
  func.func @transform_3(%arg0: i32) -> (i32, i32, i32, i32) {
    %c0_i32 = arith.constant 0 : i32
    %c0_i32_0 = arith.constant 0 : i32
    %c0_i32_1 = arith.constant 0 : i32
    %c0_i32_2 = arith.constant 0 : i32
    return %arg0, %c0_i32, %c0_i32_0, %c0_i32_1 : i32, i32, i32, i32
  }
}

</mosaic_0001>

<bundles_post_ra>
// kernel: vqvae_forward.11
= control target key start
LH: loop header
LB: loop body
LE: loop exit
PB: predicated region body
PF: predicated region fallthrough
CT: control target
= control target key end

     0   :  { %s1479_s24 = smov 0   ;;  %s2164_s0 = inlined_call_operand.vmem [shape: f32[2,9,9,12], index: 0, kind: input, shape index: {}]   ;;  %s2165_s1 = inlined_call_operand.vmem [shape: bf16[4,12,8], index: 1, kind: input, shape index: {}]   ;;  %s2166_s2 = inlined_call_operand.vmem [shape: f32[1,8], index: 2, kind: input, shape index: {}]   ;;  %s2167_s3 = inlined_call_operand.vmem [shape: f32[1,8], index: 3, kind: input, shape index: {}]   ;;  %s2168_s4 = inlined_call_operand.vmem [shape: f32[1,8], index: 4, kind: input, shape index: {}]   ;;  %s2169_s5 = inlined_call_operand.vmem [shape: f32[8,4], index: 5, kind: input, shape index: {}]   ;;  %s2170_s6 = inlined_call_operand.vmem [shape: f32[4,8], index: 6, kind: input, shape index: {}]   ;;  %s2171_s7 = inlined_call_operand.vmem [shape: f32[2,8,8,8], index: 7, kind: output, shape index: {}]  }
   0x1 LB: > { %s1327_s25 = sadd.s32 4294967295, %s1435_s24   ;;  %p1331_p0 = scmp.ge.s32.totalorder %s1435_s24, 1  ;;  %s1435_s24 = sphi %s1479_s24, %s17_s24  }
   0x2   : > { %p237_p1 = scmp.lt.s32.totalorder %s1435_s24, 3 }
   0x4   : > { %p238_p2 = pnand %p1331_p0, %p237_p1 }
   0x5   : > { %p269_p3 = scmp.lt.s32.totalorder (!%p238_p2), %s1327_s25, 1 }
   0x6   : > { %241 = sbr.rel (%p238_p2) target bundleno = 862 (0x35e), region = 48 }
   0xb   : > { %v1339_v0 = vld [vmem:[%s2165_s1 + $0x8] sm:$0xf]  ;;  %v1410_v1 = vld [vmem:[%s2165_s1 + $0x8] sm:$0x30]  ;;  %vm382_vm0 = vcmask 1045504   ;;  %s2209_s25 = smov (!%p269_p3, %s1327_s25), 1 }
   0xc   : > { %v1340_v2 = vor.u32 %v1410_v1, %v1339_v0  ;;  %v1348_v3 = vld [vmem:[%s2165_s1] sm:$0xf]  ;;  %v1409_v4 = vld [vmem:[%s2165_s1] sm:$0x30]  ;;  %v1359_v5 = vld [vmem:[%s2165_s1 + $0x10] sm:$0xf] }
   0xd   : > { %v1349_v6 = vor.u32 %v1409_v4, %v1348_v3  ;;  %v1411_v7 = vld [vmem:[%s2165_s1 + $0x10] sm:$0x30]  ;;  %v1370_v8 = vld [vmem:[%s2165_s1 + $0x18] sm:$0xf]  ;;  %v1412_v9 = vld [vmem:[%s2165_s1 + $0x18] sm:$0x30] }
   0xe   : > { %v384_v10 = vsel %vm382_vm0, %v1340_v2, 0  ;;  %v1360_v11 = vor.u32 %v1411_v7, %v1359_v5  ;;  %v1371_v12 = vor.u32 %v1412_v9, %v1370_v8  ;;  %vm298_vm1 = vcmask 97280   ;;  %s1413_s19 = smul.u32 144, %s2209_s25  ;;  %s1408_s12 = sshll.u32 %s2209_s25, 6 }
   0xf   : > { %393 = vmatpush.bf16.msra.mxu0 %v384_v10  ;;  %v440_v13 = vsel %vm382_vm0, %v1349_v6, 0  ;;  %v1437_v16 = vmov 0.0   ;;  %vm311_vm2 = vcmask 90112   ;;  %s2142_s15 = scalar_lea.vmem %s2171_s7, %s1408_s12 }
  0x10   : > { %449 = vmatpush.bf16.msra.mxu1 %v440_v13  ;;  %v513_v14 = vsel %vm382_vm0, %v1360_v11, 0  ;;  %v595_v15 = vsel %vm382_vm0, %v1371_v12, 0  ;;  %299 = vst.msk [vmem:[#allocation2] sm:$0xff] %vm298_vm1, %v1437_v16  ;;  %s1525_s22 = scalar_lea.vmem %s2164_s0, %s1413_s19 }
  0x11   : > { %522 = vmatpush.bf16.msra.mxu2 %v513_v14  ;;  %604 = vmatpush.bf16.msra.mxu3 %v595_v15  ;;  %300 = vst.msk [vmem:[#allocation2 + $0x8] sm:$0xff] %vm298_vm1, %v1437_v16  ;;  %v280_v17 = vld [vmem:[%s1525_s22] sm:$0xff]  ;;  %v281_v18 = vld [vmem:[%s1525_s22 + $0x8] sm:$0x1]  ;;  %v282_v19 = vld [vmem:[%s1525_s22 + $0x10] sm:$0xff] }
  0x12   : > { %301 = vst.msk [vmem:[#allocation2 + $0x10] sm:$0xff] %vm298_vm1, %v1437_v16  ;;  %v283_v21 = vld [vmem:[%s1525_s22 + $0x18] sm:$0x1]  ;;  %v284_v23 = vld [vmem:[%s1525_s22 + $0x20] sm:$0xff]  ;;  %v285_v26 = vld [vmem:[%s1525_s22 + $0x28] sm:$0x1] }
  0x13   : > { %302 = vst.msk [vmem:[#allocation2 + $0x18] sm:$0xff] %vm298_vm1, %v1437_v16  ;;  %v286_v29 = vld [vmem:[%s1525_s22 + $0x30] sm:$0xff]  ;;  %v287_v30 = vld [vmem:[%s1525_s22 + $0x38] sm:$0x1]  ;;  %v288_v31 = vld [vmem:[%s1525_s22 + $0x40] sm:$0xff] }
  0x14   : > { %310 = vst.msk [vmem:[#allocation2] sm:$0xff] %vm298_vm1, %v280_v17  ;;  %v289_v32 = vld [vmem:[%s1525_s22 + $0x48] sm:$0x1]  ;;  %v290_v33 = vld [vmem:[%s1525_s22 + $0x50] sm:$0xff]  ;;  %v291_v34 = vld [vmem:[%s1525_s22 + $0x58] sm:$0x1] }
  0x15   : > { %312 = vst.msk [vmem:[#allocation2 + $0x8] sm:$0x1] %vm311_vm2, %v281_v18  ;;  %v292_v35 = vld [vmem:[%s1525_s22 + $0x60] sm:$0xff]  ;;  %v293_v44 = vld [vmem:[%s1525_s22 + $0x68] sm:$0x1]  ;;  %v294_v45 = vld [vmem:[%s1525_s22 + $0x70] sm:$0xff] }
  0x16   : > { %313 = vst.msk [vmem:[#allocation2 + $0x9] sm:$0xff] %vm298_vm1, %v282_v19  ;;  %v295_v48 = vld [vmem:[%s1525_s22 + $0x78] sm:$0x1]  ;;  %v296_v49 = vld [vmem:[%s1525_s22 + $0x80] sm:$0xff]  ;;  %v297_v60 = vld [vmem:[%s1525_s22 + $0x88] sm:$0x1] }
  0x17   : > { %303 = vst.msk [vmem:[#allocation2 + $0x20] sm:$0xff] %vm298_vm1, %v1437_v16 }
  0x18   : > { %304 = vst.msk [vmem:[#allocation2 + $0x28] sm:$0xff] %vm298_vm1, %v1437_v16 }
  0x19   : > { %305 = vst.msk [vmem:[#allocation2 + $0x30] sm:$0xff] %vm298_vm1, %v1437_v16 }
  0x1a   : > { %306 = vst.msk [vmem:[#allocation2 + $0x38] sm:$0xff] %vm298_vm1, %v1437_v16 }
  0x1b   : > { %307 = vst.msk [vmem:[#allocation2 + $0x40] sm:$0xff] %vm298_vm1, %v1437_v16  ;;  %v329_v20 = vld [vmem:[#allocation2] sm:$0xff] }
  0x1c   : > { %v345_v22 = vld [vmem:[#allocation2 + $0x1] sm:$0xff]  ;;  %308 = vst.msk [vmem:[#allocation2 + $0x48] sm:$0xff] %vm298_vm1, %v1437_v16 }
  0x1d   : > { %v346_v24 = vld [vmem:[#allocation2 + $0x9] sm:$0xff]  ;;  %309 = vst.msk [vmem:[#allocation2 + $0x50] sm:$0xff] %vm298_vm1, %v1437_v16 }
  0x1e   : > { %v330_v25 = vld [vmem:[#allocation2 + $0x8] sm:$0xff]  ;;  %v354_v27 = vpack.c.bf16 %v346_v24, %v345_v22  ;;  %314 = vst.msk [vmem:[#allocation2 + $0x11] sm:$0x1] %vm311_vm2, %v283_v21 }
  0x1f   : > { %v338_v28 = vpack.c.bf16 %v330_v25, %v329_v20  ;;  %315 = vst.msk [vmem:[#allocation2 + $0x12] sm:$0xff] %vm298_vm1, %v284_v23  ;;  %v652_v20 = vlaneseq }
  0x20   : > { %1341 = vmatmul.msk.bf16.vlgmr.msra.gmra.mxu0 %vm298_vm1, %v354_v27  ;;  %316 = vst.msk [vmem:[#allocation2 + $0x1a] sm:$0x1] %vm311_vm2, %v285_v26 }
  0x21   : > { %1350 = vmatmul.msk.bf16.vlgmr.msra.gmra.mxu1 %vm298_vm1, %v338_v28  ;;  %317 = vst.msk [vmem:[#allocation2 + $0x1b] sm:$0xff] %vm298_vm1, %v286_v29  ;;  %v1601_v21 = vshrl.u32 %v652_v20, 7 }
  0x22   : > { %318 = vst.msk [vmem:[#allocation2 + $0x23] sm:$0x1] %vm311_vm2, %v287_v30 }
  0x23   : > { %319 = vst.msk [vmem:[#allocation2 + $0x24] sm:$0xff] %vm298_vm1, %v288_v31  ;;  %v665_v22 = vand.u32 65535, %v1601_v21  ;;  %v666_v23 = vshrl.u32 %v1601_v21, 16  ;;  %v1606_v25 = vadd.s32 8, %v1601_v21  ;;  %v1609_v26 = vadd.s32 16, %v1601_v21 }
  0x24   : > { %320 = vst.msk [vmem:[#allocation2 + $0x2c] sm:$0x1] %vm311_vm2, %v289_v32 }
  0x25   : > { %v557_v36 = vld [vmem:[#allocation2 + $0xa] sm:$0xff]  ;;  %321 = vst.msk [vmem:[#allocation2 + $0x2d] sm:$0xff] %vm298_vm1, %v290_v33  ;;  %v668_v27 = vmul.u32 14564, %v665_v22  ;;  %v1611_v28 = vmul.u32 14564, %v666_v23  ;;  %v694_v30 = vand.u32 65535, %v1606_v25  ;;  %v723_v31 = vand.u32 65535, %v1609_v26 }
  0x26   : > { %v476_v37 = vld [vmem:[#allocation2 + $0x11] sm:$0xff]  ;;  %322 = vst.msk [vmem:[#allocation2 + $0x35] sm:$0x1] %vm311_vm2, %v291_v34  ;;  %v695_v34 = vshrl.u32 %v1606_v25, 16 }
  0x27   : > { %v558_v38 = vld [vmem:[#allocation2 + $0x12] sm:$0xff]  ;;  %v484_v39 = vpack.c.bf16 %v476_v37, %v346_v24  ;;  %323 = vst.msk [vmem:[#allocation2 + $0x36] sm:$0xff] %vm298_vm1, %v292_v35  ;;  %v669_v24 = vmul.u32 58254, %v665_v22  ;;  %v674_v32 = vshll.u32 %v1611_v28, 16  ;;  %v1617_v35 = vmul.u32 58254, %v694_v30 }
  0x28   : > { %v566_v40 = vpack.c.bf16 %v558_v38, %v557_v36  ;;  %v348_v41 = vld [vmem:[#allocation2 + $0x19] sm:$0xff]  ;;  %v331_v42 = vld [vmem:[#allocation2 + $0x10] sm:$0xff]  ;;  %324 = vst.msk [vmem:[#allocation2 + $0x3e] sm:$0x1] %vm311_vm2, %v293_v44  ;;  %v724_v36 = vshrl.u32 %v1609_v26, 16  ;;  %v671_v38 = vmul.u32 58254, %v666_v23 }
  0x29   : > { %1361 = vmatmul.msk.bf16.vlgmr.msra.gmra.mxu2 %vm298_vm1, %v484_v39  ;;  %v332_v43 = vld [vmem:[#allocation2 + $0x18] sm:$0xff]  ;;  %325 = vst.msk [vmem:[#allocation2 + $0x3f] sm:$0xff] %vm298_vm1, %v294_v45  ;;  %v355_v46 = vpack.c.bf16 %v348_v41, %v476_v37  ;;  %v672_v29 = vshll.u32 %v669_v24, 16  ;;  %v1620_v37 = vmul.u32 58254, %v723_v31  ;;  %v1623_v39 = vadd.s32 24, %v1601_v21 }
  0x2a   : > { %1372 = vmatmul.msk.bf16.vlgmr.msra.gmra.mxu3 %vm298_vm1, %v566_v40  ;;  %v339_v47 = vpack.c.bf16 %v332_v43, %v331_v42  ;;  %326 = vst.msk [vmem:[#allocation2 + $0x47] sm:$0x1] %vm311_vm2, %v295_v48  ;;  %v478_v50 = vld [vmem:[#allocation2 + $0x21] sm:$0xff]  ;;  %v1438_v40 = vmov 0   ;;  %v697_v44 = vmul.u32 14564, %v694_v30  ;;  %v1630_v45 = vmul.u32 14564, %v695_v34 }
  0x2b   : > { %327 = vst.msk [vmem:[#allocation2 + $0x48] sm:$0xff] %vm298_vm1, %v296_v49  ;;  %v559_v51 = vld [vmem:[#allocation2 + $0x1a] sm:$0xff]  ;;  %v560_v52 = vld [vmem:[#allocation2 + $0x22] sm:$0xff]  ;;  %v485_v53 = vpack.c.bf16 %v478_v50, %v348_v41  ;;  %vm676_vm3 = vc.u32 %v668_v27, %v672_v29  ;;  %v678_v33 = vadd.s32 %v672_v29, %v668_v27  ;;  %v726_v48 = vmul.u32 14564, %v723_v31 }
  0x2c   : > { %v567_v54 = vpack.c.bf16 %v560_v52, %v559_v51  ;;  %v350_v55 = vld [vmem:[#allocation2 + $0x29] sm:$0xff]  ;;  %v333_v56 = vld [vmem:[#allocation2 + $0x20] sm:$0xff]  ;;  %328 = vst.msk [vmem:[#allocation2 + $0x50] sm:$0x1] %vm311_vm2, %v297_v60  ;;  %v677_v41 = vsel %vm676_vm3, 1, %v1438_v40  ;;  %v1636_v49 = vmul.u32 14564, %v724_v36 }
  0x2d   : > { %v334_v57 = vld [vmem:[#allocation2 + $0x28] sm:$0xff]  ;;  %v356_v58 = vpack.c.bf16 %v350_v55, %v478_v50  ;;  %vm680_vm4 = vc.u32 %v678_v33, %v674_v32  ;;  %v730_v50 = vshll.u32 %v1620_v37, 16  ;;  %v679_v51 = vadd.s32 %v677_v41, %v671_v38 }
  0x2e   : > { %v340_v59 = vpack.c.bf16 %v334_v57, %v333_v56  ;;  %v480_v61 = vld [vmem:[#allocation2 + $0x31] sm:$0xff]  ;;  %v752_v52 = vand.u32 65535, %v1623_v39  ;;  %v732_v56 = vshll.u32 %v1636_v49, 16  ;;  %v702_v27 = vshrl.u32 %v1617_v35, 16 }
  0x2f   : > { %v561_v62 = vld [vmem:[#allocation2 + $0x2a] sm:$0xff]  ;;  %v562_v63 = vld [vmem:[#allocation2 + $0x32] sm:$0xff]  ;;  %v486_v0 = vpack.c.bf16 %v480_v61, %v350_v55  ;;  %vm734_vm6 = vc.u32 %v726_v48, %v730_v50  ;;  %v736_v57 = vadd.s32 %v730_v50, %v726_v48  ;;  %v731_v29 = vshrl.u32 %v1620_v37, 16 }
  0x30   : > { %1342 = vmatmul.msk.bf16.gmra.mxu0 %vm298_vm1, %v355_v46  ;;  %v568_v1 = vpack.c.bf16 %v562_v63, %v561_v62  ;;  %v352_v2 = vld [vmem:[#allocation2 + $0x39] sm:$0xff]  ;;  %v335_v3 = vld [vmem:[#allocation2 + $0x30] sm:$0xff]  ;;  %v701_v46 = vshll.u32 %v1617_v35, 16  ;;  %v700_v62 = vmul.u32 58254, %v695_v34  ;;  %v729_v63 = vmul.u32 58254, %v724_v36 }
  0x31   : > { %1351 = vmatmul.msk.bf16.gmra.mxu1 %vm298_vm1, %v339_v47  ;;  %v336_v4 = vld [vmem:[#allocation2 + $0x38] sm:$0xff]  ;;  %v357_v5 = vpack.c.bf16 %v352_v2, %v480_v61  ;;  %v337_v12 = vld [vmem:[#allocation2 + $0x40] sm:$0xff]  ;;  %v1646_v61 = vmul.u32 58254, %v752_v52  ;;  %vm738_vm8 = vc.u32 %v736_v57, %v732_v56  ;;  %v1692_v48 = vadd.s32 56, %v1601_v21 }
  0x32   : > { %v341_v6 = vpack.c.bf16 %v336_v4, %v335_v3  ;;  %v482_v7 = vld [vmem:[#allocation2 + $0x41] sm:$0xff]  ;;  %v342_v14 = vpack.c.bf16 %v337_v12, %v337_v12  ;;  %vm705_vm5 = vc.u32 %v697_v44, %v701_v46  ;;  %v707_v55 = vadd.s32 %v701_v46, %v697_v44 }
  0x33   : > { %v563_v8 = vld [vmem:[#allocation2 + $0x3a] sm:$0xff]  ;;  %v564_v9 = vld [vmem:[#allocation2 + $0x42] sm:$0xff]  ;;  %v487_v10 = vpack.c.bf16 %v482_v7, %v352_v2  ;;  %v358_v13 = vpack.c.bf16 %v482_v7, %v482_v7  ;;  %v565_v17 = vld [vmem:[#allocation2 + $0x4a] sm:$0xff]  ;;  %v706_v2 = vsel %vm705_vm5, 1, %v1438_v40  ;;  %v735_v3 = vsel %vm734_vm6, 1, %v1438_v40 }
  0x34   : > { %v569_v11 = vpack.c.bf16 %v564_v9, %v563_v8  ;;  %v483_v15 = vld [vmem:[#allocation2 + $0x49] sm:$0xff]  ;;  %v570_v19 = vpack.c.bf16 %v565_v17, %v565_v17  ;;  %v1028_v47 = vld [vmem:[%s2169_s5] sm:$0xff]  ;;  %v753_v4 = vshrl.u32 %v1623_v39, 16  ;;  %v755_v8 = vmul.u32 14564, %v752_v52 }
  0x35   : > { %v488_v18 = vpack.c.bf16 %v483_v15, %v483_v15  ;;  %1047 = vmatpush.msrb.mxu0 %v1028_v47  ;;  %1151 = vmatpush.msrb.mxu2 %v1028_v47  ;;  %v759_v9 = vshll.u32 %v1646_v61, 16  ;;  %v737_v12 = vadd.s32 %v735_v3, %v729_v63 }
  0x36   : > { %v1663_v15 = vmul.u32 14564, %v753_v4  ;;  %v758_v33 = vmul.u32 58254, %v753_v4 }
  0x37   : > { %vm763_vm9 = vc.u32 %v755_v8, %v759_v9  ;;  %v765_v36 = vadd.s32 %v759_v9, %v755_v8  ;;  %v869_v8 = vshrl.u32 %v1692_v48, 16 }
  0x38   : > { %v761_v34 = vshll.u32 %v1663_v15, 16  ;;  %v764_v41 = vsel %vm763_vm9, 1, %v1438_v40 }
  0x39   : > { %1362 = vmatmul.msk.bf16.gmra.mxu2 %vm298_vm1, %v485_v53  ;;  %v681_v53 = vsel %vm680_vm4, 1, %v1438_v40 }
  0x3a   : > { %1373 = vmatmul.msk.bf16.gmra.mxu3 %vm298_vm1, %v567_v54  ;;  %v703_v54 = vshll.u32 %v1630_v45, 16  ;;  %v683_v60 = vadd.s32 %v681_v53, %v679_v51  ;;  %v704_v51 = vshrl.u32 %v1630_v45, 16  ;;  %v733_v53 = vshrl.u32 %v1636_v49, 16 }
  0x3b   : > { %vm767_vm10 = vc.u32 %v765_v36, %v761_v34  ;;  %v868_v49 = vand.u32 65535, %v1692_v48 }
  0x3c   : > { %vm709_vm7 = vc.u32 %v707_v55, %v703_v54  ;;  %v766_v55 = vadd.s32 %v764_v41, %v758_v33  ;;  %v762_v41 = vshrl.u32 %v1663_v15, 16 }
  0x3d   : > { %v1732_v34 = vmul.u32 58254, %v868_v49  ;;  %v871_v36 = vmul.u32 14564, %v868_v49 }
  0x40   : > { %1343 = vmatmul.msk.bf16.gmra.mxu0 %vm298_vm1, %v356_v58  ;;  %v1644_v58 = vadd.s32 32, %v1601_v21 }
  0x41   : > { %1352 = vmatmul.msk.bf16.gmra.mxu1 %vm298_vm1, %v340_v59  ;;  %v673_v59 = vshrl.u32 %v669_v24, 16 }
  0x42   : > { %v782_v17 = vshrl.u32 %v1644_v58, 16 }
  0x43   : > { %v684_v7 = vadd.s32 %v683_v60, %v673_v59 }
  0x44   : > { %v1683_v38 = vmul.u32 14564, %v782_v17 }
  0x46   : > { %v790_v56 = vshll.u32 %v1683_v38, 16 }
  0x49   : > { %1363 = vmatmul.msk.bf16.gmra.mxu2 %vm298_vm1, %v486_v0 }
  0x4a   : > { %1374 = vmatmul.msk.bf16.gmra.mxu3 %vm298_vm1, %v568_v1 }
  0x50   : > { %1344 = vmatmul.msk.bf16.gmra.mxu0 %vm298_vm1, %v357_v5  ;;  %v675_v5 = vshrl.u32 %v1611_v28, 16 }
  0x51   : > { %1353 = vmatmul.msk.bf16.gmra.mxu1 %vm298_vm1, %v341_v6  ;;  %v781_v6 = vand.u32 65535, %v1644_v58 }
  0x52   : > { %v685_v20 = vadd.s32 %v684_v7, %v675_v5  ;;  %v768_v7 = vsel %vm767_vm10, 1, %v1438_v40 }
  0x53   : > { %v784_v44 = vmul.u32 14564, %v781_v6 }
  0x54   : > { %v686_v50 = vshrl.u32 %v685_v20, 3 }
  0x56   : > { %v1708_v3 = vmul.u32 9, %v686_v50 }
  0x59   : > { %1364 = vmatmul.msk.bf16.gmra.mxu2 %vm298_vm1, %v487_v10  ;;  %v1659_v10 = vadd.s32 40, %v1601_v21 }
  0x5a   : > { %1375 = vmatmul.msk.bf16.gmra.mxu3 %vm298_vm1, %v569_v11  ;;  %v708_v11 = vadd.s32 %v706_v2, %v700_v62 }
  0x5b   : > { %v810_v22 = vand.u32 65535, %v1659_v10  ;;  %v811_v37 = vshrl.u32 %v1659_v10, 16 }
  0x5d   : > { %v1689_v47 = vmul.u32 58254, %v810_v22  ;;  %v813_v63 = vmul.u32 14564, %v810_v22  ;;  %v1704_v2 = vmul.u32 14564, %v811_v37  ;;  %v816_v50 = vmul.u32 58254, %v811_v37 }
  0x5f   : > { %v817_v45 = vshll.u32 %v1689_v47, 16 }
  0x60   : > { %1345 = vmatmul.msk.bf16.gmra.mxu0 %vm298_vm1, %v358_v13  ;;  %v710_v13 = vsel %vm709_vm7, 1, %v1438_v40 }
  0x61   : > { %1354 = vmatmul.msk.bf16.gmra.mxu1 %vm298_vm1, %v342_v14  ;;  %v739_v14 = vsel %vm738_vm8, 1, %v1438_v40  ;;  %v712_v28 = vadd.s32 %v710_v13, %v708_v11  ;;  %v760_v13 = vshrl.u32 %v1646_v61, 16  ;;  %v823_v33 = vadd.s32 %v817_v45, %v813_v63 }
  0x62   : > { %v741_v30 = vadd.s32 %v739_v14, %v737_v12  ;;  %v787_v14 = vmul.u32 58254, %v782_v17  ;;  %vm821_vm13 = vc.u32 %v813_v63, %v817_v45  ;;  %v1734_v61 = vmul.u32 14564, %v869_v8 }
  0x63   : > { %v713_v52 = vadd.s32 %v712_v28, %v702_v27  ;;  %v1737_v17 = vadd.s32 64, %v1601_v21 }
  0x64   : > { %v742_v54 = vadd.s32 %v741_v30, %v731_v29  ;;  %v770_v29 = vadd.s32 %v768_v7, %v766_v55  ;;  %v819_v30 = vshll.u32 %v1704_v2, 16  ;;  %v822_v55 = vsel %vm821_vm13, 1, %v1438_v40 }
  0x65   : > { %v877_v37 = vshll.u32 %v1734_v61, 16  ;;  %v897_v45 = vand.u32 65535, %v1737_v17 }
  0x66   : > { %v1718_v9 = vadd.s32 %v742_v54, %v733_v53  ;;  %v771_v54 = vadd.s32 %v770_v29, %v760_v13  ;;  %vm1748_vm15 = vc.u32 %v823_v33, %v819_v30  ;;  %v874_v29 = vmul.u32 58254, %v869_v8 }
  0x68   : > { %v772_v30 = vadd.s32 %v771_v54, %v762_v41  ;;  %v818_v41 = vshrl.u32 %v1689_v47, 16  ;;  %v1783_v54 = vsub.s32 %v1601_v21, %v1708_v3 }
  0x69   : > { %1365 = vmatmul.msk.bf16.gmra.mxu2 %vm298_vm1, %v488_v18  ;;  %v1666_v18 = vmul.u32 58254, %v781_v6  ;;  %v1714_v6 = vadd.s32 %v713_v52, %v704_v51 }
  0x6a   : > { %1376 = vmatmul.msk.bf16.gmra.mxu3 %vm298_vm1, %v570_v19  ;;  %v1669_v19 = vadd.s32 48, %v1601_v21  ;;  %vm923_vm4 = vcmp.ne.s32.totalorder %v1783_v54, 0  ;;  %vm932_vm5 = vcmp.lt.s32.totalorder %v1783_v54, 0 }
  0x6b   : > { %v788_v46 = vshll.u32 %v1666_v18, 16  ;;  %v715_v49 = vshrl.u32 %v1714_v6, 3  ;;  %v826_v6 = vsel %vm1748_vm15, 1, %v1438_v40  ;;  %vm1814_vm9 = vmand %vm932_vm5, %vm923_vm4 }
  0x6c   : > { %v839_v35 = vand.u32 65535, %v1669_v19  ;;  %v840_v60 = vshrl.u32 %v1669_v19, 16 }
  0x6d   : > { %vm1697_vm11 = vc.u32 %v784_v44, %v788_v46  ;;  %v794_v59 = vadd.s32 %v788_v46, %v784_v44 }
  0x6e   : > { %v1702_v62 = vmul.u32 58254, %v839_v35  ;;  %v793_v20 = vsel %vm1697_vm11, 1, %v1438_v40  ;;  %v842_v22 = vmul.u32 14564, %v839_v35  ;;  %v1728_v27 = vmul.u32 14564, %v840_v60 }
  0x6f   : > { %vm796_vm12 = vc.u32 %v794_v59, %v790_v56  ;;  %v795_v44 = vadd.s32 %v793_v20, %v787_v14  ;;  %v875_v35 = vshll.u32 %v1732_v34, 16  ;;  %v845_v15 = vmul.u32 58254, %v840_v60 }
  0x70   : > { %v846_v28 = vshll.u32 %v1702_v62, 16  ;;  %v797_v46 = vsel %vm796_vm12, 1, %v1438_v40  ;;  %v848_v51 = vshll.u32 %v1728_v27, 16  ;;  %v789_v14 = vshrl.u32 %v1666_v18, 16 }
  0x71   : > { %vm879_vm0 = vc.u32 %v871_v36, %v875_v35  ;;  %v881_v63 = vadd.s32 %v875_v35, %v871_v36  ;;  %v799_v20 = vadd.s32 %v797_v46, %v795_v44  ;;  %v898_v36 = vshrl.u32 %v1737_v17, 16 }
  0x72   : > { %vm1743_vm14 = vc.u32 %v842_v22, %v846_v28  ;;  %v852_v53 = vadd.s32 %v846_v28, %v842_v22  ;;  %v744_v22 = vshrl.u32 %v1718_v9, 3  ;;  %v824_v28 = vadd.s32 %v822_v55, %v816_v50 }
  0x73   : > { %v851_v60 = vsel %vm1743_vm14, 1, %v1438_v40  ;;  %v880_v33 = vsel %vm879_vm0, 1, %v1438_v40  ;;  %vm883_vm2 = vc.u32 %v881_v63, %v877_v37  ;;  %v900_v44 = vmul.u32 14564, %v897_v45 }
  0x74   : > { %vm854_vm1 = vc.u32 %v852_v53, %v848_v51  ;;  %v853_v18 = vadd.s32 %v851_v60, %v845_v15  ;;  %v1773_v46 = vmul.u32 58254, %v897_v45  ;;  %v791_v35 = vshrl.u32 %v1683_v38, 16 }
  0x75   : > { %v800_v9 = vadd.s32 %v799_v20, %v789_v14  ;;  %v855_v50 = vsel %vm854_vm1, 1, %v1438_v40  ;;  %v1777_v8 = vmul.u32 14564, %v898_v36  ;;  %v828_v51 = vadd.s32 %v826_v6, %v824_v28 }
  0x76   : > { %v882_v52 = vadd.s32 %v880_v33, %v874_v29  ;;  %v904_v53 = vshll.u32 %v1773_v46, 16  ;;  %v716_v55 = vmul.u32 9, %v715_v49  ;;  %v773_v56 = vshrl.u32 %v772_v30, 3 }
  0x77   : > { %v884_v15 = vsel %vm883_vm2, 1, %v1438_v40  ;;  %v847_v63 = vshrl.u32 %v1702_v62, 16  ;;  %v857_v45 = vadd.s32 %v855_v50, %v853_v18  ;;  %v903_v47 = vmul.u32 58254, %v898_v36 }
  0x78   : > { %vm908_vm3 = vc.u32 %v900_v44, %v904_v53  ;;  %v745_v14 = vmul.u32 9, %v744_v22  ;;  %v801_v20 = vadd.s32 %v800_v9, %v791_v35  ;;  %v906_v21 = vshll.u32 %v1777_v8, 16 }
  0x79   : > { %v909_v3 = vsel %vm908_vm3, 1, %v1438_v40  ;;  %v820_v49 = vshrl.u32 %v1704_v2, 16  ;;  %v829_v29 = vadd.s32 %v828_v51, %v818_v41  ;;  %v876_v30 = vshrl.u32 %v1732_v34, 16 }
  0x7a   : > { %v886_v6 = vadd.s32 %v884_v15, %v882_v52  ;;  %v717_v62 = vsub.s32 %v1606_v25, %v716_v55  ;;  %v774_v33 = vmul.u32 9, %v773_v56  ;;  %v910_v36 = vadd.s32 %v904_v53, %v900_v44 }
  0x7b   : > { %v849_v22 = vshrl.u32 %v1728_v27, 16  ;;  %v858_v18 = vadd.s32 %v857_v45, %v847_v63  ;;  %v911_v35 = vadd.s32 %v909_v3, %v903_v47  ;;  %v1804_v9 = vsub.s32 %v1609_v26, %v745_v14 }
  0x7c   : > { %v802_v2 = vshrl.u32 %v801_v20, 3  ;;  %vm912_vm6 = vc.u32 %v910_v36, %v906_v21  ;;  %v830_v50 = vadd.s32 %v829_v29, %v820_v49  ;;  %v878_v34 = vshrl.u32 %v1734_v61, 16 }
  0x7d   : > { %v887_v41 = vadd.s32 %v886_v6, %v876_v30  ;;  %v913_v25 = vsel %vm912_vm6, 1, %v1438_v40  ;;  %v950_v44 = vadd.s32 9, %v1783_v54  ;;  %vm924_vm7 = vcmp.ne.s32.totalorder %v717_v62, 0 }
  0x7e   : > { %vm933_vm8 = vcmp.lt.s32.totalorder %v717_v62, 0  ;;  %v1810_v27 = vsub.s32 %v1623_v39, %v774_v33  ;;  %v859_v61 = vadd.s32 %v858_v18, %v849_v22  ;;  %v905_v40 = vshrl.u32 %v1773_v46, 16 }
  0x7f   : > { %v915_v53 = vadd.s32 %v913_v25, %v911_v35  ;;  %v951_v55 = vadd.s32 9, %v717_v62  ;;  %v803_v56 = vmul.u32 9, %v802_v2  ;;  %vm1825_vm10 = vmand %vm933_vm8, %vm924_vm7  ;;  %vm925_vm11 = vcmp.ne.s32.totalorder %v1804_v9, 0 }
  0x80   : > { %vm934_vm12 = vcmp.lt.s32.totalorder %v1804_v9, 0  ;;  %v831_v45 = vshrl.u32 %v830_v50, 3  ;;  %v888_v47 = vadd.s32 %v887_v41, %v878_v34  ;;  %v959_v46 = vsel %vm1814_vm9, %v950_v44, %v1783_v54 }
  0x81   : > { %v952_v20 = vadd.s32 9, %v1804_v9  ;;  %vm926_vm13 = vcmp.ne.s32.totalorder %v1810_v27, 0  ;;  %vm935_vm14 = vcmp.lt.s32.totalorder %v1810_v27, 0  ;;  %v860_v21 = vshrl.u32 %v859_v61, 3  ;;  %vm1847_vm15 = vmand %vm934_vm12, %vm925_vm11 }
  0x82   : > { %v907_v3 = vshrl.u32 %v1777_v8, 16  ;;  %v916_v49 = vadd.s32 %v915_v53, %v905_v40  ;;  %v960_v54 = vsel %vm1825_vm10, %v951_v55, %v717_v62  ;;  %v953_v6 = vadd.s32 9, %v1810_v27  ;;  %vm1863_vm1 = vmand %vm935_vm14, %vm926_vm13 }
  0x83   : > { %vm1857_vm0 = vcmp.lt.s32.totalorder %v959_v46, 8  ;;  %vm1867_vm2 = vcmp.lt.s32.totalorder %v960_v54, 8  ;;  %v861_v36 = vmul.u32 9, %v860_v21 }
  0x84   : > { %v917_v22 = vadd.s32 %v916_v49, %v907_v3 }
  0x9d   : > { %v1626_v42 = vpop.f32.mrf.mxu0 }
  0x9e   : > { %v1628_v43 = vpop.f32.mrf.mxu1 }
  0x9f   : > { %v452_v29 = vadd.f32 %v1628_v43, %v1626_v42  ;;  %v832_v42 = vmul.u32 9, %v831_v45  ;;  %v889_v43 = vshrl.u32 %v888_v47, 3 }
  0xa1   : > { %v833_v41 = vsub.s32 %v1659_v10, %v832_v42  ;;  %v890_v25 = vmul.u32 9, %v889_v43  ;;  %v1907_v10 = vsel %vm1867_vm2, 1.0, %v1437_v16 }
  0xa3   : > { %vm928_vm8 = vcmp.ne.s32.totalorder %v833_v41, 0  ;;  %vm937_vm9 = vcmp.lt.s32.totalorder %v833_v41, 0  ;;  %v955_v45 = vadd.s32 9, %v833_v41 }
  0xa4   : > { %vm1948_vm12 = vmand %vm937_vm9, %vm928_vm8 }
  0xa5   : > { %v1648_v0 = vpop.f32.mrf.mxu0 }
  0xa6   : > { %v1650_v1 = vpop.f32.mrf.mxu1 }
  0xa7   : > { %v454_v14 = vadd.f32 %v1650_v1, %v1648_v0  ;;  %v1852_v1 = vsub.s32 %v1644_v58, %v803_v56  ;;  %v1931_v56 = vsub.s32 %v1692_v48, %v890_v25 }
  0xa9   : > { %vm927_vm3 = vcmp.ne.s32.totalorder %v1852_v1, 0  ;;  %vm936_vm4 = vcmp.lt.s32.totalorder %v1852_v1, 0  ;;  %vm930_vm13 = vcmp.ne.s32.totalorder %v1931_v56, 0  ;;  %vm939_vm14 = vcmp.lt.s32.totalorder %v1931_v56, 0 }
  0xaa   : > { %vm1915_vm6 = vmand %vm936_vm4, %vm927_vm3  ;;  %v957_v54 = vadd.s32 9, %v1931_v56 }
  0xab   : > { %vm1986_vm2 = vmand %vm939_vm14, %vm930_vm13 }
  0xac   : > { %v1672_v23 = vpop.f32.mrf.mxu2 }
  0xad   : > { %v1674_v24 = vpop.f32.mrf.mxu3  ;;  %v1678_v31 = vpop.f32.mrf.mxu0  ;;  %v548_v18 = vadd.f32 %v1672_v23, %v452_v29  ;;  %v1892_v23 = vld [vmem:[%s2166_s2] ss:$0 sm:$0xff] }
  0xae   : > { %v1680_v32 = vpop.f32.mrf.mxu1 }
  0xaf   : > { %v457_v8 = vadd.f32 %v1680_v32, %v1678_v31  ;;  %v961_v31 = vsel %vm1847_vm15, %v952_v20, %v1804_v9  ;;  %v962_v9 = vsel %vm1863_vm1, %v953_v6, %v1810_v27  ;;  %v954_v27 = vadd.s32 9, %v1852_v1 }
  0xb0   : > { %vm1909_vm5 = vcmp.lt.s32.totalorder %v961_v31, 8  ;;  %vm1925_vm7 = vcmp.lt.s32.totalorder %v962_v9, 8  ;;  %vm1004_vm1 = vcmask 64512  }
  0xb4   : > { %v1710_v4 = vpop.f32.mrf.mxu2 }
  0xb5   : > { %v1712_v5 = vpop.f32.mrf.mxu3  ;;  %v1720_v11 = vpop.f32.mrf.mxu0  ;;  %v549_v30 = vadd.f32 %v1710_v4, %v454_v14 }
  0xb6   : > { %v1722_v12 = vpop.f32.mrf.mxu1 }
  0xb7   : > { %v631_v35 = vadd.f32 %v1712_v5, %v549_v30  ;;  %v1897_v5 = vsel %vm1857_vm0, 1.0, %v1437_v16  ;;  %v964_v30 = vsel %vm1948_vm12, %v955_v45, %v833_v41 }
  0xb8   : > { %vm2001_vm3 = vcmp.lt.s32.totalorder %v964_v30, 8 }
  0xbc   : > { %v1752_v57 = vpop.f32.mrf.mxu2 }
  0xbd   : > { %v1754_v59 = vpop.f32.mrf.mxu3  ;;  %v1759_v7 = vpop.f32.mrf.mxu0  ;;  %v550_v34 = vadd.f32 %v1752_v57, %v457_v8  ;;  %v459_v57 = vadd.f32 %v1722_v12, %v1720_v11  ;;  %v862_v11 = vsub.s32 %v1669_v19, %v861_v36  ;;  %v918_v12 = vshrl.u32 %v917_v22, 3 }
  0xbe   : > { %v1761_v13 = vpop.f32.mrf.mxu1  ;;  %v1981_v8 = vsel %vm1925_vm7, 1.0, %v1437_v16 }
  0xbf   : > { %v462_v44 = vadd.f32 %v1761_v13, %v1759_v7  ;;  %v630_v7 = vadd.f32 %v1674_v24, %v548_v18  ;;  %v1922_v13 = vadd.f32 %v1892_v23, %v631_v35  ;;  %v632_v55 = vadd.f32 %v1754_v59, %v550_v34  ;;  %v1053_v35 = vld [vmem:[%s2170_s6] sm:$0xf] }
  0xc0   : > { %v963_v24 = vsel %vm1915_vm6, %v954_v27, %v1852_v1  ;;  %vm929_vm10 = vcmp.ne.s32.totalorder %v862_v11, 0  ;;  %vm938_vm11 = vcmp.lt.s32.totalorder %v862_v11, 0  ;;  %v919_v59 = vmul.u32 9, %v918_v12 }
  0xc1   : > { %v1941_v48 = vadd.f32 %v1892_v23, %v630_v7  ;;  %v956_v21 = vadd.s32 9, %v862_v11  ;;  %vm972_vm15 = vcmp.lt.s32.totalorder %v963_v24, 8  ;;  %vm1965_vm0 = vmand %vm938_vm11, %vm929_vm10  ;;  %v966_v18 = vsel %vm1986_vm2, %v957_v54, %v1931_v56 }
  0xc2   : > { %v920_v0 = vsub.s32 %v1737_v17, %v919_v59  ;;  %v1994_v4 = vsel %vm972_vm15, 1.0, %v1437_v16  ;;  %vm1058_vm6 = vcmask 1043456   ;;  %v2027_v27 = vsel %vm2001_vm3, 1.0, %v1437_v16 }
  0xc3   : > { %v995_v1 = vmul.f32 %v1897_v5, %v1941_v48  ;;  %v965_v62 = vsel %vm1965_vm0, %v956_v21, %v862_v11  ;;  %1387 = vmatpush.msk.msrb.mxu1 %vm1058_vm6, %v1053_v35  ;;  %1390 = vmatpush.msk.msrb.mxu3 %vm1058_vm6, %v1053_v35  ;;  %vm975_vm8 = vcmp.lt.s32.totalorder %v966_v18, 8  ;;  %vm1054_vm11 = vcmask 31744  }
  0xc4   : > { %v1786_v38 = vpop.f32.mrf.mxu2  ;;  %vm931_vm4 = vcmp.ne.s32.totalorder %v920_v0, 0  ;;  %vm2018_vm7 = vcmp.lt.s32.totalorder %v965_v62, 8  ;;  %v958_v26 = vadd.s32 9, %v920_v0  ;;  %vm1238_vm15 = vcmask 64513  }
  0xc5   : > { %v1788_v37 = vpop.f32.mrf.mxu3  ;;  %v1791_v60 = vpop.f32.mrf.mxu0  ;;  %v551_v40 = vadd.f32 %v1786_v38, %v459_v57  ;;  %v1005_v57 = vsel %vm1004_vm1, %v995_v1, 0.0  ;;  %v2041_v53 = vsel %vm2018_vm7, 1.0, %v1437_v16  ;;  %vm1240_vm0 = vcmask 57344  }
  0xc6   : > { %v1793_v28 = vpop.f32.mrf.mxu1  ;;  %vm1243_vm2 = vcmask 64514   ;;  %vm1245_vm3 = vcmask 58368   ;;  %vm1253_vm6 = vcmask 64516   ;;  %vm1258_vm7 = vcmask 64517  }
  0xc7   : > { %v464_v38 = vadd.f32 %v1793_v28, %v1791_v60  ;;  %v633_v14 = vadd.f32 %v1788_v37, %v551_v40  ;;  %v1960_v37 = vsel %vm1909_vm5, 1.0, %v1437_v16  ;;  %vm940_vm5 = vcmp.lt.s32.totalorder %v920_v0, 0 }
  0xc8   : > { %vm2034_vm9 = vmand %vm940_vm5, %vm931_vm4  ;;  %vm1248_vm4 = vcmask 64515   ;;  %vm1250_vm5 = vcmask 59392  }
  0xc9   : > { %v967_v45 = vsel %vm2034_vm9, %v958_v26, %v920_v0  ;;  %vm1263_vm9 = vcmask 64518  }
  0xca   : > { %vm976_vm10 = vcmp.lt.s32.totalorder %v967_v45, 8 }
  0xcb   : > { %v1385_v29 = vsel %vm976_vm10, 1.0, %v1437_v16  ;;  %vm1265_vm10 = vcmask 62464  }
  0xcc   : > { %v1818_v51 = vpop.f32.mrf.mxu2 }
  0xcd   : > { %v1820_v52 = vpop.f32.mrf.mxu3  ;;  %v1823_v15 = vpop.f32.mrf.mxu0  ;;  %v552_v19 = vadd.f32 %v1818_v51, %v462_v44  ;;  %v996_v51 = vmul.f32 %v1907_v10, %v1922_v13 }
  0xce   : > { %v466_v39 = vpop.f32.mrf.mxu1 }
  0xcf   : > { %v467_v63 = vadd.f32 %v466_v39, %v1823_v15  ;;  %v1953_v39 = vadd.f32 %v1892_v23, %v632_v55  ;;  %v634_v3 = vadd.f32 %v1820_v52, %v552_v19  ;;  %v1976_v52 = vadd.f32 %v1892_v23, %v633_v14 }
  0xd0   : > { %v1006_v17 = vsel %vm1004_vm1, %v996_v51, 0.0 }
  0xd1   : > { %v997_v43 = vmul.f32 %v1960_v37, %v1953_v39  ;;  %v1999_v58 = vadd.f32 %v1892_v23, %v634_v3  ;;  %v998_v34 = vmul.f32 %v1981_v8, %v1976_v52  ;;  %v1007_v40 = vadd.f32 %v1006_v17, %v1005_v57 }
  0xd3   : > { %v1008_v44 = vsel %vm1004_vm1, %v997_v43, 0.0  ;;  %v999_v61 = vmul.f32 %v1994_v4, %v1999_v58  ;;  %v1010_v55 = vsel %vm1004_vm1, %v998_v34, 0.0 }
  0xd4   : > { %v536_v32 = vpop.f32.mrf.mxu2 }
  0xd5   : > { %v1874_v33 = vpop.f32.mrf.mxu3  ;;  %v1880_v2 = vpop.f32.mrf.mxu0  ;;  %v553_v20 = vadd.f32 %v536_v32, %v464_v38  ;;  %v1009_v38 = vadd.f32 %v1008_v44, %v1007_v40 }
  0xd6   : > { %v1882_v50 = vpop.f32.mrf.mxu1 }
  0xd7   : > { %v635_v6 = vadd.f32 %v1874_v33, %v553_v20  ;;  %v469_v33 = vadd.f32 %v1882_v50, %v1880_v2  ;;  %v1011_v59 = vadd.f32 %v1010_v55, %v1009_v38 }
  0xd9   : > { %v2016_v9 = vadd.f32 %v1892_v23, %v635_v6 }
  0xdb   : > { %v1000_v56 = vmul.f32 %v2027_v27, %v2016_v9 }
  0xdc   : > { %v539_v47 = vpop.f32.mrf.mxu2 }
  0xdd   : > { %v621_v46 = vpop.f32.mrf.mxu3  ;;  %v415_v28 = vpop.f32.mrf.mxu0  ;;  %v554_v49 = vadd.f32 %v539_v47, %v467_v63  ;;  %v2048_v63 = vsel %vm975_vm8, 1.0, %v1437_v16  ;;  %v1012_v47 = vsel %vm1004_vm1, %v999_v61, 0.0  ;;  %v1014_v20 = vsel %vm1004_vm1, %v1000_v56, 0.0 }
  0xde   : > { %v471_v15 = vpop.f32.mrf.mxu1  ;;  %vm1260_vm8 = vcmask 61440  }
  0xdf   : > { %v636_v32 = vadd.f32 %v621_v46, %v554_v49  ;;  %v472_v24 = vadd.f32 %v471_v15, %v415_v28  ;;  %v1013_v28 = vadd.f32 %v1012_v47, %v1011_v59 }
  0xe1   : > { %v649_v11 = vadd.f32 %v1892_v23, %v636_v32  ;;  %v1015_v49 = vadd.f32 %v1014_v20, %v1013_v28 }
  0xe3   : > { %v1001_v46 = vmul.f32 %v2041_v53, %v649_v11 }
  0xe4   : > { %v541_v36 = vpop.f32.mrf.mxu2 }
  0xe5   : > { %v623_v22 = vpop.f32.mrf.mxu3  ;;  %v555_v50 = vadd.f32 %v541_v36, %v469_v33  ;;  %v417_v41 = vpop.f32.mrf.mxu0  ;;  %v1016_v15 = vsel %vm1004_vm1, %v1001_v46, 0.0 }
  0xe6   : > { %v473_v25 = vpop.f32.mrf.mxu1  ;;  %v1017_v0 = vadd.f32 %v1016_v15, %v1015_v49 }
  0xe7   : > { %v637_v12 = vadd.f32 %v623_v22, %v555_v50 }
  0xe9   : > { %v650_v19 = vadd.f32 %v1892_v23, %v637_v12 }
  0xeb   : > { %v1002_v60 = vmul.f32 %v2048_v63, %v650_v19 }
  0xec   : > { %v544_v51 = vpop.f32.mrf.mxu2 }
  0xed   : > { %v626_v14 = vpop.f32.mrf.mxu3  ;;  %v556_v21 = vadd.f32 %v544_v51, %v472_v24  ;;  %v1018_v30 = vsel %vm1004_vm1, %v1002_v60, 0.0 }
  0xee   : > { %v1019_v6 = vadd.f32 %v1018_v30, %v1017_v0 }
  0xef   : > { %v638_v3 = vadd.f32 %v626_v14, %v556_v21 }
  0xf1   : > { %v651_v54 = vadd.f32 %v1892_v23, %v638_v3 }
  0xf3   : > { %v1003_v1 = vmul.f32 %v1385_v29, %v651_v54 }
  0xf4   : > { %v546_v42 = vpop.f32.mrf.mxu2 }
  0xf5   : > { %v628_v17 = vpop.f32.mrf.mxu3  ;;  %v1020_v43 = vsel %vm1004_vm1, %v1003_v1, 0.0 }
  0xf6   : > { %v1021_v62 = vadd.f32 %v1020_v43, %v1019_v6 }
  0xf8   : > { %v1022_v31 = vrot.slane %v1021_v62, 4 }
  0xfa   : > { %v1023_v32 = vadd.f32 %v1022_v31, %v1021_v62 }
  0xfc   : > { %v1024_v33 = vrot.slane %v1023_v32, 2 }
  0xfe   : > { %v1025_v36 = vadd.f32 %v1024_v33, %v1023_v32 }
 0x100   : > { %v1026_v22 = vrot.slane %v1025_v36, 1 }
 0x102   : > { %v1027_v18 = vadd.f32 %v1026_v22, %v1025_v36 }
 0x104   : > { %1386 = vmatmul.msk.f32.vlgmr.msrb.gmra.mxu0 %vm1004_vm1, %v1027_v18 }
 0x181   : > { %v1049_v16 = vpop.f32.mrf.mxu0 }
 0x182   : > { %v1052_v35 = vmul.f32 0.0078125, %v1049_v16 }
 0x184   : > { %1388 = vmatmul.msk.f32.vlgmr.msrb.gmra.mxu1 %vm1054_vm11, %v1052_v35 }
 0x201   : > { %v1079_v23 = vpop.f32.mrf.mxu1 }
 0x202   : > { %v1082_v34 = vperm.slane %v1079_v23, 0  ;;  %v1425_v23 = vld [vmem:[%s2167_s3] ss:$0 sm:$0xff] }
 0x204   : > { %v2064_v2 = vsub.f32 %v1941_v48, %v1082_v34  ;;  %v2067_v50 = vsub.f32 %v1922_v13, %v1082_v34  ;;  %v2070_v41 = vsub.f32 %v1953_v39, %v1082_v34  ;;  %v2073_v25 = vsub.f32 %v1976_v52, %v1082_v34 }
 0x205   : > { %v2076_v57 = vsub.f32 %v1999_v58, %v1082_v34  ;;  %v2085_v13 = vsub.f32 %v2016_v9, %v1082_v34  ;;  %v2091_v61 = vsub.f32 %v649_v11, %v1082_v34  ;;  %v2097_v55 = vsub.f32 %v650_v19, %v1082_v34 }
 0x206   : > { %v1092_v44 = vmul.f32 %v2064_v2, %v2064_v2  ;;  %v1093_v26 = vmul.f32 %v2067_v50, %v2067_v50  ;;  %v1094_v48 = vmul.f32 %v2070_v41, %v2070_v41  ;;  %v1095_v39 = vmul.f32 %v2073_v25, %v2073_v25 }
 0x207   : > { %v1096_v12 = vmul.f32 %v2076_v57, %v2076_v57  ;;  %v1097_v9 = vmul.f32 %v2085_v13, %v2085_v13  ;;  %v1098_v11 = vmul.f32 %v2091_v61, %v2091_v61  ;;  %v1099_v19 = vmul.f32 %v2097_v55, %v2097_v55 }
 0x208   : > { %v1101_v52 = vmul.f32 %v1897_v5, %v1092_v44  ;;  %v1102_v58 = vmul.f32 %v1907_v10, %v1093_v26  ;;  %v1103_v7 = vmul.f32 %v1960_v37, %v1094_v48  ;;  %v1104_v56 = vmul.f32 %v1981_v8, %v1095_v39  ;;  %v1426_v39 = vld [vmem:[%s2168_s4] ss:$0 sm:$0xff] }
 0x209   : > { %v2103_v10 = vsub.f32 %v651_v54, %v1082_v34  ;;  %v1105_v38 = vmul.f32 %v1994_v4, %v1096_v12  ;;  %v1106_v47 = vmul.f32 %v2027_v27, %v1097_v9  ;;  %v1107_v51 = vmul.f32 %v2041_v53, %v1098_v11 }
 0x20a   : > { %v1110_v40 = vsel %vm1004_vm1, %v1101_v52, 0.0  ;;  %v1111_v5 = vsel %vm1004_vm1, %v1102_v58, 0.0  ;;  %v1113_v37 = vsel %vm1004_vm1, %v1103_v7, 0.0  ;;  %v1115_v8 = vsel %vm1004_vm1, %v1104_v56, 0.0 }
 0x20b   : > { %v1112_v24 = vadd.f32 %v1111_v5, %v1110_v40  ;;  %v1100_v59 = vmul.f32 %v2103_v10, %v2103_v10  ;;  %v1117_v14 = vsel %vm1004_vm1, %v1105_v38, 0.0  ;;  %v1108_v4 = vmul.f32 %v2048_v63, %v1099_v19 }
 0x20c   : > { %v1119_v60 = vsel %vm1004_vm1, %v1106_v47, 0.0  ;;  %v1121_v15 = vsel %vm1004_vm1, %v1107_v51, 0.0 }
 0x20d   : > { %v1114_v45 = vadd.f32 %v1113_v37, %v1112_v24  ;;  %v1109_v28 = vmul.f32 %v1385_v29, %v1100_v59  ;;  %v1123_v3 = vsel %vm1004_vm1, %v1108_v4, 0.0 }
 0x20f   : > { %v1116_v46 = vadd.f32 %v1115_v8, %v1114_v45  ;;  %v1125_v30 = vsel %vm1004_vm1, %v1109_v28, 0.0 }
 0x211   : > { %v1118_v20 = vadd.f32 %v1117_v14, %v1116_v46 }
 0x213   : > { %v1120_v21 = vadd.f32 %v1119_v60, %v1118_v20 }
 0x215   : > { %v1122_v27 = vadd.f32 %v1121_v15, %v1120_v21 }
 0x217   : > { %v1124_v49 = vadd.f32 %v1123_v3, %v1122_v27 }
 0x219   : > { %v1126_v54 = vadd.f32 %v1125_v30, %v1124_v49 }
 0x21b   : > { %v1127_v0 = vrot.slane %v1126_v54, 4 }
 0x21d   : > { %v1128_v53 = vadd.f32 %v1127_v0, %v1126_v54 }
 0x21f   : > { %v1129_v1 = vrot.slane %v1128_v53, 2 }
 0x221   : > { %v1130_v6 = vadd.f32 %v1129_v1, %v1128_v53 }
 0x223   : > { %v1131_v42 = vrot.slane %v1130_v6, 1 }
 0x225   : > { %v1132_v17 = vadd.f32 %v1131_v42, %v1130_v6 }
 0x227   : > { %1389 = vmatmul.msk.f32.vlgmr.msrb.gmra.mxu2 %vm1004_vm1, %v1132_v17 }
 0x2aa   : > { %v1153_v63 = vpop.f32.mrf.mxu2 }
 0x2ab   : > { %v1156_v43 = vmul.f32 0.0078125, %v1153_v63 }
 0x2ad   : > { %v1157_v29 = vadd.f32 1e-05, %v1156_v43 }
 0x2af   : > { %1427 = vrsqrt.f32 %v1157_v29  ;;  %vm1164_vm13 = vweird.f32 %v1157_v29 }
 0x2b5   : > { %v1428_v62 = vpop.eup %1427 }
 0x2b6   : > { %v1159_v31 = vmul.f32 %v1428_v62, %v1157_v29  ;;  %vm1165_vm12 = vweird.f32 %v1428_v62 }
 0x2b7   : > { %vm1166_vm14 = vmor %vm1164_vm13, %vm1165_vm12  ;;  %vm1270_vm12 = vcmask 63488  }
 0x2b8   : > { %v1160_v32 = vmul.f32 %v1428_v62, %v1159_v31 }
 0x2ba   : > { %v1161_v33 = vmul.f32 0.5, %v1160_v32 }
 0x2bc   : > { %v1162_v36 = vsub.f32 1.5, %v1161_v33 }
 0x2be   : > { %v1163_v22 = vmul.f32 %v1428_v62, %v1162_v36 }
 0x2c0   : > { %v1167_v18 = vsel %vm1166_vm14, %v1428_v62, %v1163_v22 }
 0x2c1   : > { %1391 = vmatmul.msk.f32.vlgmr.msrb.gmra.mxu3 %vm1054_vm11, %v1167_v18  ;;  %vm1268_vm11 = vcmask 64519  }
 0x344   : > { %v1188_v16 = vpop.f32.mrf.mxu3 }
 0x345   : > { %v1191_v35 = vperm.slane %v1188_v16, 0 }
 0x347   : > { %v1192_v34 = vmul.f32 %v1191_v35, %v2064_v2  ;;  %v1193_v44 = vmul.f32 %v1191_v35, %v2067_v50  ;;  %v1194_v26 = vmul.f32 %v1191_v35, %v2070_v41  ;;  %v1195_v48 = vmul.f32 %v1191_v35, %v2073_v25 }
 0x348   : > { %v1196_v52 = vmul.f32 %v1191_v35, %v2076_v57  ;;  %v1197_v58 = vmul.f32 %v1191_v35, %v2085_v13  ;;  %v1198_v12 = vmul.f32 %v1191_v35, %v2091_v61  ;;  %v1199_v41 = vmul.f32 %v1191_v35, %v2097_v55 }
 0x349   : > { %v1205_v7 = vmul.f32 %v1425_v23, %v1192_v34  ;;  %v1206_v40 = vmul.f32 %v1425_v23, %v1193_v44  ;;  %v1207_v2 = vmul.f32 %v1425_v23, %v1194_v26  ;;  %v1208_v9 = vmul.f32 %v1425_v23, %v1195_v48 }
 0x34a   : > { %v1209_v50 = vmul.f32 %v1425_v23, %v1196_v52  ;;  %v1210_v56 = vmul.f32 %v1425_v23, %v1197_v58  ;;  %v1200_v61 = vmul.f32 %v1191_v35, %v2103_v10  ;;  %v1211_v24 = vmul.f32 %v1425_v23, %v1198_v12 }
 0x34b   : > { %v1218_v25 = vadd.f32 %v1426_v39, %v1205_v7  ;;  %v1219_v5 = vadd.f32 %v1426_v39, %v1206_v40  ;;  %v1220_v57 = vadd.f32 %v1426_v39, %v1207_v2  ;;  %v1221_v13 = vadd.f32 %v1426_v39, %v1208_v9 }
 0x34c   : > { %v1222_v11 = vadd.f32 %v1426_v39, %v1209_v50  ;;  %v1212_v45 = vmul.f32 %v1425_v23, %v1199_v41  ;;  %v1223_v19 = vadd.f32 %v1426_v39, %v1210_v56  ;;  %v1213_v10 = vmul.f32 %v1425_v23, %v1200_v61 }
 0x34d   : > { %v1227_v38 = vmax.f32 %v1218_v25, 0.0  ;;  %v1228_v55 = vmax.f32 %v1219_v5, 0.0  ;;  %v1229_v37 = vmax.f32 %v1220_v57, 0.0  ;;  %v1230_v47 = vmax.f32 %v1221_v13, 0.0 }
 0x34e   : > { %v1224_v8 = vadd.f32 %v1426_v39, %v1211_v24  ;;  %v1231_v46 = vmax.f32 %v1222_v11, 0.0  ;;  %v1225_v59 = vadd.f32 %v1426_v39, %v1212_v45  ;;  %v1232_v51 = vmax.f32 %v1223_v19, 0.0 }
 0x34f   : > { %1236 = vst.msk [vmem:[%s2142_s15] sm:$0xff] %vm1004_vm1, %v1227_v38  ;;  %vm1255_vm1 = vcmask 60416   ;;  %v1226_v14 = vadd.f32 %v1426_v39, %v1213_v10 }
 0x350   : > { %1392 = vst.msk [vmem:[%s2142_s15 + $0x7] sm:$0xfe] %vm1238_vm15, %v1228_v55  ;;  %v1233_v20 = vmax.f32 %v1224_v8, 0.0  ;;  %v1234_v4 = vmax.f32 %v1225_v59, 0.0 }
 0x351   : > { %1393 = vst.msk [vmem:[%s2142_s15 + $0xf] sm:$0x1] %vm1240_vm0, %v1229_v37  ;;  %v1235_v60 = vmax.f32 %v1226_v14, 0.0 }
 0x352   : > { %1394 = vst.msk [vmem:[%s2142_s15 + $0xe] sm:$0xfc] %vm1243_vm2, %v1229_v37 }
 0x353   : > { %1395 = vst.msk [vmem:[%s2142_s15 + $0x16] sm:$0x3] %vm1245_vm3, %v1230_v47 }
 0x354   : > { %1396 = vst.msk [vmem:[%s2142_s15 + $0x15] sm:$0xf8] %vm1248_vm4, %v1230_v47 }
 0x355   : > { %1397 = vst.msk [vmem:[%s2142_s15 + $0x1d] sm:$0x7] %vm1250_vm5, %v1231_v46 }
 0x356   : > { %1398 = vst.msk [vmem:[%s2142_s15 + $0x1c] sm:$0xf0] %vm1253_vm6, %v1231_v46 }
 0x357   : > { %1399 = vst.msk [vmem:[%s2142_s15 + $0x24] sm:$0xf] %vm1255_vm1, %v1232_v51 }
 0x358   : > { %1400 = vst.msk [vmem:[%s2142_s15 + $0x23] sm:$0xe0] %vm1258_vm7, %v1232_v51 }
 0x359   : > { %1401 = vst.msk [vmem:[%s2142_s15 + $0x2b] sm:$0x1f] %vm1260_vm8, %v1233_v20 }
 0x35a   : > { %1402 = vst.msk [vmem:[%s2142_s15 + $0x2a] sm:$0xc0] %vm1263_vm9, %v1233_v20 }
 0x35b   : > { %1403 = vst.msk [vmem:[%s2142_s15 + $0x32] sm:$0x3f] %vm1265_vm10, %v1234_v4 }
 0x35c   : > { %1404 = vst.msk [vmem:[%s2142_s15 + $0x31] sm:$0x80] %vm1268_vm11, %v1234_v4 }
 0x35d   : > { %1405 = vst.msk [vmem:[%s2142_s15 + $0x39] sm:$0x7f] %vm1270_vm12, %v1235_v60 }
 0x35e PF: > { %s17_s24 = sadd.s32 1, %s1435_s24  }
 0x35f   : > { %p14_p4 = scmp.ge.s32.totalorder %s17_s24, 4  }
 0x361   :  { %16 = sbr.rel (!%p14_p4) target bundleno = 1 (0x1), region = 88 }

// kernel: vqvae_forward.12
= control target key start
LH: loop header
LB: loop body
LE: loop exit
PB: predicated region body
PF: predicated region fallthrough
CT: control target
= control target key end

     0   :  { %s998_s24 = smov 0   ;;  %s1121_s0 = inlined_call_operand.vmem [shape: f32[2,5,5,32], index: 0, kind: input, shape index: {}]   ;;  %s1122_s1 = inlined_call_operand.vmem [shape: bf16[4,32,16], index: 1, kind: input, shape index: {}]   ;;  %s1123_s2 = inlined_call_operand.vmem [shape: f32[1,16], index: 2, kind: input, shape index: {}]   ;;  %s1124_s3 = inlined_call_operand.vmem [shape: f32[1,16], index: 3, kind: input, shape index: {}]   ;;  %s1125_s4 = inlined_call_operand.vmem [shape: f32[1,16], index: 4, kind: input, shape index: {}]   ;;  %s1126_s5 = inlined_call_operand.vmem [shape: f32[16,4], index: 5, kind: input, shape index: {}]   ;;  %s1127_s6 = inlined_call_operand.vmem [shape: f32[4,16], index: 6, kind: input, shape index: {}]   ;;  %s1128_s7 = inlined_call_operand.vmem [shape: f32[2,4,4,16], index: 7, kind: output, shape index: {}]  }
   0x1 LB: > { %s847_s25 = sadd.s32 4294967295, %s954_s24   ;;  %p851_p0 = scmp.ge.s32.totalorder %s954_s24, 1  ;;  %s954_s24 = sphi %s998_s24, %s17_s24  }
   0x2   : > { %p237_p1 = scmp.lt.s32.totalorder %s954_s24, 3 }
   0x4   : > { %p238_p2 = pnand %p851_p0, %p237_p1 }
   0x5   : > { %p269_p3 = scmp.lt.s32.totalorder (!%p238_p2), %s847_s25, 1 }
   0x6   : > { %241 = sbr.rel (%p238_p2) target bundleno = 785 (0x311), region = 48 }
   0xb   : > { %v927_v0 = vld [vmem:[%s1122_s1 + $0x18] sm:$0xff]  ;;  %v925_v1 = vld [vmem:[%s1122_s1 + $0x8] sm:$0xff]  ;;  %vm285_vm0 = vcmask 261120   ;;  %v926_v4 = vld [vmem:[%s1122_s1 + $0x10] sm:$0xff]  ;;  %v956_v5 = vmov 0.0   ;;  %s1134_s25 = smov (!%p269_p3, %s847_s25), 1  ;;  %v492_v34 = vlaneseq }
   0xc   : > { %v929_v2 = vld [vmem:[%s1122_s1 + $0x28] sm:$0xff]  ;;  %v931_v3 = vld [vmem:[%s1122_s1 + $0x38] sm:$0xff]  ;;  %286 = vst.msk [vmem:[#allocation2] sm:$0xff] %vm285_vm0, %v956_v5  ;;  %339 = vmatpush.bf16.msra.mxu0 %v927_v0  ;;  %375 = vmatpush.bf16.msra.mxu1 %v925_v1  ;;  %v924_v6 = vld [vmem:[%s1122_s1] sm:$0xff]  ;;  %s932_s19 = smul.u32 40, %s1134_s25  ;;  %vm290_vm1 = vcmask 258048  }
   0xd   : > { %v928_v7 = vld [vmem:[%s1122_s1 + $0x20] sm:$0xff]  ;;  %287 = vst.msk [vmem:[#allocation2 + $0x8] sm:$0xff] %vm285_vm0, %v956_v5  ;;  %421 = vmatpush.bf16.msra.mxu2 %v929_v2  ;;  %470 = vmatpush.bf16.msra.mxu3 %v931_v3  ;;  %v930_v8 = vld [vmem:[%s1122_s1 + $0x30] sm:$0xff]  ;;  %v1052_v35 = vshrl.u32 %v492_v34, 7  ;;  %v957_v61 = vmov 0   ;;  %s923_s14 = sshll.u32 %s1134_s25, 4 }
   0xe   : > { %288 = vst.msk [vmem:[#allocation2 + $0x10] sm:$0xff] %vm285_vm0, %v956_v5  ;;  %s273_s22 = scalar_lea.vmem %s1121_s0, %s932_s19  ;;  %s278_s17 = scalar_lea.vmem %s1128_s7, %s923_s14 }
   0xf   : > { %289 = vst.msk [vmem:[#allocation2 + $0x18] sm:$0xff] %vm285_vm0, %v956_v5  ;;  %v280_v9 = vld [vmem:[%s273_s22] sm:$0x1f]  ;;  %v281_v10 = vld [vmem:[%s273_s22 + $0x8] sm:$0x1f]  ;;  %v1055_v36 = vadd.s32 8, %v1052_v35 }
  0x10   : > { %340 = vmatpush.bf16.msra.mxu0 %v926_v4  ;;  %376 = vmatpush.bf16.msra.mxu1 %v924_v6  ;;  %v282_v11 = vld [vmem:[%s273_s22 + $0x10] sm:$0x1f]  ;;  %v283_v12 = vld [vmem:[%s273_s22 + $0x18] sm:$0x1f]  ;;  %291 = vst.msk [vmem:[#allocation2] sm:$0x1f] %vm290_vm1, %v280_v9 }
  0x11   : > { %422 = vmatpush.bf16.msra.mxu2 %v928_v7  ;;  %471 = vmatpush.bf16.msra.mxu3 %v930_v8  ;;  %292 = vst.msk [vmem:[#allocation2 + $0x5] sm:$0x1f] %vm290_vm1, %v281_v10  ;;  %v284_v13 = vld [vmem:[%s273_s22 + $0x20] sm:$0x1f]  ;;  %v499_v37 = vand.u32 65535, %v1052_v35  ;;  %v528_v38 = vand.u32 65535, %v1055_v36 }
  0x12   : > { %293 = vst.msk [vmem:[#allocation2 + $0xa] sm:$0x1f] %vm290_vm1, %v282_v11  ;;  %v529_v39 = vshrl.u32 %v1055_v36, 16  ;;  %v500_v41 = vshrl.u32 %v1052_v35, 16  ;;  %v1062_v43 = vadd.s32 16, %v1052_v35 }
  0x13   : > { %294 = vst.msk [vmem:[#allocation2 + $0xf] sm:$0x1f] %vm290_vm1, %v283_v12  ;;  %v532_v40 = vmul.u32 52428, %v528_v38  ;;  %v503_v42 = vmul.u32 52428, %v499_v37  ;;  %v531_v44 = vmul.u32 52429, %v528_v38  ;;  %v502_v48 = vmul.u32 52429, %v499_v37 }
  0x14   : > { %295 = vst.msk [vmem:[#allocation2 + $0x14] sm:$0x1f] %vm290_vm1, %v284_v13  ;;  %v533_v45 = vmul.u32 52429, %v529_v39  ;;  %v557_v47 = vand.u32 65535, %v1062_v43  ;;  %v504_v49 = vmul.u32 52429, %v500_v41  ;;  %v558_v51 = vshrl.u32 %v1062_v43, 16 }
  0x15   : > { %v535_v46 = vshll.u32 %v532_v40, 16  ;;  %v506_v50 = vshll.u32 %v503_v42, 16  ;;  %v534_v57 = vmul.u32 52428, %v529_v39  ;;  %v505_v63 = vmul.u32 52428, %v500_v41  ;;  %v623_v38 = vld [vmem:[%s1126_s5] sm:$0xff] }
  0x16   : > { %v561_v52 = vmul.u32 52428, %v557_v47  ;;  %v537_v53 = vshll.u32 %v533_v45, 16  ;;  %v508_v55 = vshll.u32 %v504_v49, 16  ;;  %v560_v58 = vmul.u32 52429, %v557_v47 }
  0x17   : > { %vm539_vm2 = vc.u32 %v531_v44, %v535_v46  ;;  %v541_v54 = vadd.s32 %v535_v46, %v531_v44  ;;  %vm510_vm3 = vc.u32 %v502_v48, %v506_v50  ;;  %v512_v56 = vadd.s32 %v506_v50, %v502_v48 }
  0x18   : > { %v305_v14 = vld [vmem:[#allocation2 + $0x1] sm:$0xff]  ;;  %v562_v59 = vmul.u32 52429, %v558_v51  ;;  %v564_v60 = vshll.u32 %v561_v52, 16  ;;  %v540_v62 = vsel %vm539_vm2, 1, %v957_v61  ;;  %v511_v0 = vsel %vm510_vm3, 1, %v957_v61 }
  0x19   : > { %v296_v15 = vld [vmem:[#allocation2] sm:$0xff]  ;;  %vm543_vm4 = vc.u32 %v541_v54, %v537_v53  ;;  %vm514_vm5 = vc.u32 %v512_v56, %v508_v55  ;;  %v542_v1 = vadd.s32 %v540_v62, %v534_v57  ;;  %v513_v6 = vadd.s32 %v511_v0, %v505_v63 }
  0x1a   : > { %v387_v16 = vld [vmem:[#allocation2 + $0x5] sm:$0xff]  ;;  %v298_v27 = vld [vmem:[#allocation2 + $0x10] sm:$0xf]  ;;  %v566_v2 = vshll.u32 %v562_v59, 16  ;;  %vm568_vm6 = vc.u32 %v560_v58, %v564_v60  ;;  %v570_v3 = vadd.s32 %v564_v60, %v560_v58  ;;  %v544_v4 = vsel %vm543_vm4, 1, %v957_v61 }
  0x1b   : > { %v436_v17 = vld [vmem:[#allocation2 + $0x6] sm:$0xff]  ;;  %v437_v23 = vld [vmem:[#allocation2 + $0xe] sm:$0xff]  ;;  %v438_v29 = vld [vmem:[#allocation2 + $0x16] sm:$0xf]  ;;  %v300_v31 = vpack.c.bf16 %v298_v27, %v298_v27  ;;  %v563_v7 = vmul.u32 52428, %v558_v51  ;;  %v515_v8 = vsel %vm514_vm5, 1, %v957_v61  ;;  %v546_v11 = vadd.s32 %v544_v4, %v542_v1 }
  0x1c   : > { %v306_v18 = vld [vmem:[#allocation2 + $0x9] sm:$0xff]  ;;  %v439_v25 = vpack.c.bf16 %v437_v23, %v436_v17  ;;  %v307_v26 = vld [vmem:[#allocation2 + $0x11] sm:$0xf]  ;;  %v389_v28 = vld [vmem:[#allocation2 + $0x15] sm:$0xf]  ;;  %v440_v33 = vpack.c.bf16 %v438_v29, %v438_v29  ;;  %v569_v9 = vsel %vm568_vm6, 1, %v957_v61  ;;  %vm572_vm7 = vc.u32 %v570_v3, %v566_v2 }
  0x1d   : > { %v297_v19 = vld [vmem:[#allocation2 + $0x8] sm:$0xff]  ;;  %v308_v20 = vpack.c.bf16 %v306_v18, %v305_v14  ;;  %v309_v30 = vpack.c.bf16 %v307_v26, %v307_v26  ;;  %v391_v32 = vpack.c.bf16 %v389_v28, %v389_v28  ;;  %v536_v10 = vshrl.u32 %v532_v40, 16 }
  0x1e   : > { %v299_v21 = vpack.c.bf16 %v297_v19, %v296_v15  ;;  %v388_v22 = vld [vmem:[#allocation2 + $0xd] sm:$0xff]  ;;  %905 = vmatmul.msk.bf16.vlgmr.msra.gmra.mxu3 %vm285_vm0, %v439_v25  ;;  %v507_v12 = vshrl.u32 %v503_v42, 16  ;;  %v517_v13 = vadd.s32 %v515_v8, %v513_v6  ;;  %v571_v14 = vadd.s32 %v569_v9, %v563_v7 }
  0x1f   : > { %v390_v24 = vpack.c.bf16 %v388_v22, %v387_v16  ;;  %867 = vmatmul.msk.bf16.vlgmr.msra.gmra.mxu0 %vm285_vm0, %v308_v20  ;;  %v573_v15 = vsel %vm572_vm7, 1, %v957_v61  ;;  %v538_v16 = vshrl.u32 %v533_v45, 16  ;;  %v547_v17 = vadd.s32 %v546_v11, %v536_v10  ;;  %v624_v23 = vld [vmem:[%s1126_s5 + $0x8] sm:$0xff]  ;;  %v943_v61 = vld [vmem:[%s1123_s2] ss:$0 sm:$0xff] }
  0x20   : > { %877 = vmatmul.msk.bf16.vlgmr.msra.gmra.mxu1 %vm285_vm0, %v299_v21  ;;  %v509_v18 = vshrl.u32 %v504_v49, 16  ;;  %v518_v19 = vadd.s32 %v517_v13, %v507_v12  ;;  %v565_v20 = vshrl.u32 %v561_v52, 16  ;;  %v575_v21 = vadd.s32 %v573_v15, %v571_v14  ;;  %642 = vmatpush.msrb.mxu0 %v624_v23 }
  0x21   : > { %891 = vmatmul.msk.bf16.vlgmr.msra.gmra.mxu2 %vm285_vm0, %v390_v24  ;;  %v548_v22 = vadd.s32 %v547_v17, %v538_v16  ;;  %v567_v25 = vshrl.u32 %v562_v59, 16  ;;  %vm610_vm5 = vcmask 130048   ;;  %vm614_vm6 = vcmask 125952  }
  0x22   : > { %716 = vmatpush.msrb.mxu2 %v624_v23  ;;  %v519_v24 = vadd.s32 %v518_v19, %v509_v18  ;;  %v576_v26 = vadd.s32 %v575_v21, %v565_v20  ;;  %643 = vmatpush.msrb.mxu0 %v623_v38  ;;  %vm650_vm7 = vcmask 31744  }
  0x23   : > { %v549_v27 = vshrl.u32 %v548_v22, 2 }
  0x24   : > { %v520_v28 = vshrl.u32 %v519_v24, 2  ;;  %v577_v29 = vadd.s32 %v576_v26, %v567_v25  ;;  %717 = vmatpush.msrb.mxu2 %v623_v38 }
  0x26   : > { %v578_v34 = vshrl.u32 %v577_v29, 2 }
  0x28   : > { %v579_v42 = vmul.u32 5, %v578_v34 }
  0x2e   : > { %906 = vmatmul.msk.bf16.gmra.mxu3 %vm285_vm0, %v440_v33  ;;  %v521_v33 = vmul.u32 5, %v520_v28 }
  0x2f   : > { %868 = vmatmul.msk.bf16.gmra.mxu0 %vm285_vm0, %v309_v30 }
  0x30   : > { %878 = vmatmul.msk.bf16.gmra.mxu1 %vm285_vm0, %v300_v31  ;;  %v522_v41 = vsub.s32 %v1052_v35, %v521_v33 }
  0x31   : > { %892 = vmatmul.msk.bf16.gmra.mxu2 %vm285_vm0, %v391_v32  ;;  %v550_v32 = vmul.u32 5, %v549_v27  ;;  %vm654_vm0 = vcmask 1043456  }
  0x32   : > { %vm583_vm10 = vcmp.ne.s32.totalorder %v522_v41, 0  ;;  %vm586_vm11 = vcmp.lt.s32.totalorder %v522_v41, 0  ;;  %v592_v49 = vadd.s32 5, %v522_v41 }
  0x33   : > { %v551_v37 = vsub.s32 %v1055_v36, %v550_v32  ;;  %v580_v36 = vsub.s32 %v1062_v43, %v579_v42  ;;  %vm1079_vm13 = vmand %vm586_vm11, %vm583_vm10  ;;  %v649_v43 = vld [vmem:[%s1127_s6] sm:$0xf]  ;;  %vm780_vm11 = vcmask 130053  }
  0x34   : > { %911 = vmatpush.msk.msrb.mxu1 %vm654_vm0, %v649_v43  ;;  %914 = vmatpush.msk.msrb.mxu3 %vm654_vm0, %v649_v43  ;;  %v595_v58 = vsel %vm1079_vm13, %v592_v49, %v522_v41  ;;  %vm785_vm13 = vcmask 128002  }
  0x35   : > { %vm584_vm8 = vcmp.ne.s32.totalorder %v551_v37, 0  ;;  %vm587_vm9 = vcmp.lt.s32.totalorder %v551_v37, 0  ;;  %v593_v47 = vadd.s32 5, %v551_v37  ;;  %vm585_vm14 = vcmp.ne.s32.totalorder %v580_v36, 0 }
  0x36   : > { %vm1075_vm12 = vmand %vm587_vm9, %vm584_vm8  ;;  %vm588_vm15 = vcmp.lt.s32.totalorder %v580_v36, 0  ;;  %v594_v59 = vadd.s32 5, %v580_v36  ;;  %vm598_vm3 = vcmp.lt.s32.totalorder %v595_v58, 4 }
  0x37   : > { %v596_v54 = vsel %vm1075_vm12, %v593_v47, %v551_v37  ;;  %vm591_vm2 = vmand %vm588_vm15, %vm585_vm14  ;;  %v907_v4 = vsel %vm598_vm3, 1.0, %v956_v5  ;;  %vm782_vm12 = vcmask 122880   ;;  %vm788_vm14 = vcmask 130055  }
  0x38   : > { %vm599_vm1 = vcmp.lt.s32.totalorder %v596_v54, 4  ;;  %v597_v2 = vsel %vm591_vm2, %v594_v59, %v580_v36  ;;  %vm790_vm15 = vcmask 124928  }
  0x39   : > { %v908_v1 = vsel %vm599_vm1, 1.0, %v956_v5  ;;  %vm600_vm4 = vcmp.lt.s32.totalorder %v597_v2, 4 }
  0x3a   : > { %v909_v14 = vsel %vm600_vm4, 1.0, %v956_v5 }
  0x9c   : > { %v342_v30 = vpop.f32.mrf.mxu0 }
  0x9d   : > { %v378_v31 = vpop.f32.mrf.mxu1 }
  0x9e   : > { %v379_v46 = vadd.f32 %v378_v31, %v342_v30 }
  0xa1   : > { %v473_v40 = vpop.f32.mrf.mxu3 }
  0xa4   : > { %v424_v39 = vpop.f32.mrf.mxu2  ;;  %v344_v44 = vpop.f32.mrf.mxu0 }
  0xa5   : > { %v380_v45 = vpop.f32.mrf.mxu1  ;;  %v433_v50 = vadd.f32 %v424_v39, %v379_v46 }
  0xa6   : > { %v381_v35 = vadd.f32 %v380_v45, %v344_v44 }
  0xa7   : > { %v482_v60 = vadd.f32 %v473_v40, %v433_v50 }
  0xa9   : > { %v475_v53 = vpop.f32.mrf.mxu3  ;;  %v489_v3 = vadd.f32 %v943_v61, %v482_v60 }
  0xab   : > { %v607_v12 = vmul.f32 %v907_v4, %v489_v3 }
  0xac   : > { %v426_v52 = vpop.f32.mrf.mxu2  ;;  %v347_v56 = vpop.f32.mrf.mxu0 }
  0xad   : > { %v434_v55 = vadd.f32 %v426_v52, %v381_v35  ;;  %v383_v57 = vpop.f32.mrf.mxu1  ;;  %v611_v17 = vsel %vm610_vm5, %v607_v12, 0.0 }
  0xae   : > { %v384_v0 = vadd.f32 %v383_v57, %v347_v56 }
  0xaf   : > { %v483_v62 = vadd.f32 %v475_v53, %v434_v55 }
  0xb1   : > { %v490_v63 = vadd.f32 %v943_v61, %v483_v62  ;;  %v478_v7 = vpop.f32.mrf.mxu3 }
  0xb3   : > { %v608_v8 = vmul.f32 %v908_v1, %v490_v63 }
  0xb4   : > { %v429_v6 = vpop.f32.mrf.mxu2  ;;  %v349_v10 = vpop.f32.mrf.mxu0 }
  0xb5   : > { %v435_v9 = vadd.f32 %v429_v6, %v384_v0  ;;  %v385_v11 = vpop.f32.mrf.mxu1  ;;  %v612_v15 = vsel %vm610_vm5, %v608_v8, 0.0  ;;  %v945_v6 = vld [vmem:[%s1125_s4] ss:$0 sm:$0xff] }
  0xb6   : > { %v613_v19 = vadd.f32 %v612_v15, %v611_v17 }
  0xb7   : > { %v484_v13 = vadd.f32 %v478_v7, %v435_v9 }
  0xb9   : > { %v491_v16 = vadd.f32 %v943_v61, %v484_v13  ;;  %v480_v21 = vpop.f32.mrf.mxu3 }
  0xbb   : > { %v609_v18 = vmul.f32 %v909_v14, %v491_v16 }
  0xbc   : > { %v431_v20 = vpop.f32.mrf.mxu2 }
  0xbd   : > { %v615_v22 = vsel %vm614_vm6, %v609_v18, 0.0 }
  0xbe   : > { %v616_v23 = vadd.f32 %v615_v22, %v613_v19 }
  0xc0   : > { %v617_v24 = vrot.slane %v616_v23, 4 }
  0xc2   : > { %v618_v25 = vadd.f32 %v617_v24, %v616_v23 }
  0xc4   : > { %v619_v26 = vrot.slane %v618_v25, 2 }
  0xc6   : > { %v620_v27 = vadd.f32 %v619_v26, %v618_v25 }
  0xc8   : > { %v621_v28 = vrot.slane %v620_v27, 1 }
  0xca   : > { %v622_v29 = vadd.f32 %v621_v28, %v620_v27 }
  0xcc   : > { %910 = vmatmul.msk.f32.vlgmr.msrb.gmra.mxu0 %vm610_vm5, %v622_v29 }
 0x149   : > { %v645_v5 = vpop.f32.mrf.mxu0 }
 0x14a   : > { %v648_v30 = vmul.f32 0.015625, %v645_v5 }
 0x14c   : > { %912 = vmatmul.msk.f32.vlgmr.msrb.gmra.mxu1 %vm650_vm7, %v648_v30 }
 0x1c9   : > { %v675_v31 = vpop.f32.mrf.mxu1 }
 0x1ca   : > { %v678_v32 = vperm.slane %v675_v31, 0 }
 0x1cc   : > { %v679_v33 = vsub.f32 %v489_v3, %v678_v32  ;;  %v680_v34 = vsub.f32 %v490_v63, %v678_v32  ;;  %v681_v37 = vsub.f32 %v491_v16, %v678_v32 }
 0x1ce   : > { %v682_v38 = vmul.f32 %v679_v33, %v679_v33  ;;  %v683_v39 = vmul.f32 %v680_v34, %v680_v34  ;;  %v684_v40 = vmul.f32 %v681_v37, %v681_v37 }
 0x1d0   : > { %v685_v41 = vmul.f32 %v907_v4, %v682_v38  ;;  %v686_v42 = vmul.f32 %v908_v1, %v683_v39  ;;  %v687_v44 = vmul.f32 %v909_v14, %v684_v40  ;;  %v944_v1 = vld [vmem:[%s1124_s3] ss:$0 sm:$0xff] }
 0x1d2   : > { %v688_v45 = vsel %vm610_vm5, %v685_v41, 0.0  ;;  %v689_v46 = vsel %vm610_vm5, %v686_v42, 0.0  ;;  %v691_v36 = vsel %vm614_vm6, %v687_v44, 0.0 }
 0x1d3   : > { %v690_v47 = vadd.f32 %v689_v46, %v688_v45 }
 0x1d5   : > { %v692_v48 = vadd.f32 %v691_v36, %v690_v47 }
 0x1d7   : > { %v693_v49 = vrot.slane %v692_v48, 4 }
 0x1d9   : > { %v694_v50 = vadd.f32 %v693_v49, %v692_v48 }
 0x1db   : > { %v695_v51 = vrot.slane %v694_v50, 2 }
 0x1dd   : > { %v696_v35 = vadd.f32 %v695_v51, %v694_v50 }
 0x1df   : > { %v697_v52 = vrot.slane %v696_v35, 1 }
 0x1e1   : > { %v698_v53 = vadd.f32 %v697_v52, %v696_v35 }
 0x1e3   : > { %913 = vmatmul.msk.f32.vlgmr.msrb.gmra.mxu2 %vm610_vm5, %v698_v53 }
 0x266   : > { %v719_v54 = vpop.f32.mrf.mxu2 }
 0x267   : > { %v722_v43 = vmul.f32 0.015625, %v719_v54 }
 0x269   : > { %v723_v55 = vadd.f32 1e-05, %v722_v43 }
 0x26b   : > { %946 = vrsqrt.f32 %v723_v55  ;;  %vm730_vm9 = vweird.f32 %v723_v55 }
 0x271   : > { %v947_v56 = vpop.eup %946 }
 0x272   : > { %v725_v57 = vmul.f32 %v947_v56, %v723_v55  ;;  %vm731_vm8 = vweird.f32 %v947_v56 }
 0x273   : > { %vm732_vm10 = vmor %vm730_vm9, %vm731_vm8 }
 0x274   : > { %v726_v58 = vmul.f32 %v947_v56, %v725_v57 }
 0x276   : > { %v727_v59 = vmul.f32 0.5, %v726_v58 }
 0x278   : > { %v728_v60 = vsub.f32 1.5, %v727_v59 }
 0x27a   : > { %v729_v61 = vmul.f32 %v947_v56, %v728_v60 }
 0x27c   : > { %v733_v62 = vsel %vm732_vm10, %v947_v56, %v729_v61 }
 0x27d   : > { %915 = vmatmul.msk.f32.vlgmr.msrb.gmra.mxu3 %vm650_vm7, %v733_v62 }
 0x300   : > { %v754_v63 = vpop.f32.mrf.mxu3 }
 0x301   : > { %v757_v0 = vperm.slane %v754_v63, 0 }
 0x303   : > { %v758_v2 = vmul.f32 %v757_v0, %v679_v33  ;;  %v759_v3 = vmul.f32 %v757_v0, %v680_v34  ;;  %v760_v4 = vmul.f32 %v757_v0, %v681_v37 }
 0x305   : > { %v765_v7 = vmul.f32 %v944_v1, %v758_v2  ;;  %v766_v8 = vmul.f32 %v944_v1, %v759_v3  ;;  %v767_v9 = vmul.f32 %v944_v1, %v760_v4 }
 0x307   : > { %v772_v10 = vadd.f32 %v945_v6, %v765_v7  ;;  %v773_v11 = vadd.f32 %v945_v6, %v766_v8  ;;  %v774_v12 = vadd.f32 %v945_v6, %v767_v9 }
 0x309   : > { %v775_v13 = vmax.f32 %v772_v10, 0.0  ;;  %v776_v14 = vmax.f32 %v773_v11, 0.0  ;;  %v777_v15 = vmax.f32 %v774_v12, 0.0 }
 0x30b   : > { %778 = vst.msk [vmem:[%s278_s17] sm:$0xf] %vm614_vm6, %v775_v13 }
 0x30c   : > { %916 = vst.msk [vmem:[%s278_s17 - $0x1] sm:$0xe0] %vm780_vm11, %v775_v13 }
 0x30d   : > { %917 = vst.msk [vmem:[%s278_s17 + $0x7] sm:$0x1] %vm782_vm12, %v776_v14 }
 0x30e   : > { %918 = vst.msk [vmem:[%s278_s17 + $0x6] sm:$0x3c] %vm785_vm13, %v776_v14 }
 0x30f   : > { %919 = vst.msk [vmem:[%s278_s17 + $0x5] sm:$0x80] %vm788_vm14, %v776_v14 }
 0x310   : > { %920 = vst.msk [vmem:[%s278_s17 + $0xd] sm:$0x7] %vm790_vm15, %v777_v15 }
 0x311 PF: > { %s17_s24 = sadd.s32 1, %s954_s24  }
 0x312   : > { %p14_p4 = scmp.ge.s32.totalorder %s17_s24, 4  }
 0x314   :  { %16 = sbr.rel (!%p14_p4) target bundleno = 1 (0x1), region = 84 }

// kernel: vqvae_forward.14
= control target key start
LH: loop header
LB: loop body
LE: loop exit
PB: predicated region body
PF: predicated region fallthrough
CT: control target
= control target key end

     0   :  { %s1163_s27 = smov 0   ;;  %s1288_s0 = inlined_call_operand.vmem [shape: f32[2,4,4,16], index: 0, kind: input, shape index: {}]   ;;  %s1289_s1 = inlined_call_operand.vmem [shape: bf16[9,16,16], index: 1, kind: input, shape index: {}]   ;;  %s1290_s2 = inlined_call_operand.vmem [shape: f32[1,16], index: 2, kind: input, shape index: {}]   ;;  %s1291_s3 = inlined_call_operand.vmem [shape: f32[1,16], index: 3, kind: input, shape index: {}]   ;;  %s1292_s4 = inlined_call_operand.vmem [shape: f32[1,16], index: 4, kind: input, shape index: {}]   ;;  %s1293_s5 = inlined_call_operand.vmem [shape: f32[16,4], index: 5, kind: input, shape index: {}]   ;;  %s1294_s6 = inlined_call_operand.vmem [shape: f32[4,16], index: 6, kind: input, shape index: {}]   ;;  %s1295_s7 = inlined_call_operand.vmem [shape: f32[2,4,4,16], index: 7, kind: input, shape index: {}]   ;;  %s1296_s8 = inlined_call_operand.vmem [shape: f32[2,4,4,16], index: 8, kind: output, shape index: {}]  }
   0x1 LB: > { %s986_s28 = sadd.s32 4294967295, %s1115_s27   ;;  %p990_p0 = scmp.ge.s32.totalorder %s1115_s27, 1  ;;  %s1115_s27 = sphi %s1163_s27, %s18_s27  }
   0x2   : > { %p272_p1 = scmp.lt.s32.totalorder %s1115_s27, 3 }
   0x4   : > { %p273_p2 = pnand %p990_p0, %p272_p1 }
   0x5   : > { %p311_p3 = scmp.lt.s32.totalorder (!%p273_p2), %s986_s28, 1 }
   0x6   : > { %276 = sbr.rel (%p273_p2) target bundleno = 832 (0x340), region = 52 }
   0xb   : > { %v347_v0 = vld [vmem:[%s1293_s5 + $0x8] sm:$0xff]  ;;  %v346_v1 = vld [vmem:[%s1293_s5] sm:$0xff]  ;;  %vm378_vm0 = vcmask 1043456   ;;  %s1298_s28 = smov (!%p311_p3, %s986_s28), 1  ;;  %vm331_vm1 = vcmask 125952   ;;  %vm348_vm2 = vcmask 130048  }
   0xc   : > { %366 = vmatpush.msra.mxu0 %v347_v0  ;;  %v373_v2 = vld [vmem:[%s1294_s6] sm:$0xf]  ;;  %442 = vmatpush.msra.mxu2 %v347_v0  ;;  %s1180_s13 = sshll.u32 %s1298_s28, 4  ;;  %vm374_vm3 = vcmask 31744   ;;  %v1117_v57 = vmov 0.0   ;;  %v1086_v58 = vld [vmem:[%s1289_s1 + $0x8] sm:$0xff] }
   0xd   : > { %s315_s16 = scalar_lea.vmem %s1288_s0, %s1180_s13  ;;  %508 = vst.msk [vmem:[#allocation2] sm:$0xff] %vm348_vm2, %v1117_v57  ;;  %v1087_v59 = vld [vmem:[%s1289_s1 + $0x10] sm:$0xff]  ;;  %v1088_v60 = vld [vmem:[%s1289_s1 + $0x18] sm:$0xff]  ;;  %551 = vmatpush.bf16.msra.mxu1 %v1086_v58  ;;  %1094 = vmatpush.bf16.msra.mxu3 %v1086_v58  ;;  %v1085_v61 = vld [vmem:[%s1289_s1] sm:$0xff]  ;;  %s1264_s21 = scalar_lea.vmem %s1295_s7, %s1180_s13  ;;  %vm897_vm7 = vcmask 130054   ;;  %vm899_vm8 = vcmask 123904  }
   0xe   : > { %367 = vmatpush.msra.mxu0 %v346_v1  ;;  %443 = vmatpush.msra.mxu2 %v346_v1  ;;  %v327_v3 = vld [vmem:[%s315_s16] sm:$0xf]  ;;  %v328_v4 = vld [vmem:[%s315_s16 + $0x4] sm:$0xf]  ;;  %v329_v5 = vld [vmem:[%s315_s16 + $0x8] sm:$0xf]  ;;  %s1275_s26 = scalar_lea.vmem %s1296_s8, %s1180_s13 }
   0xf   : > { %v330_v6 = vld [vmem:[%s315_s16 + $0xc] sm:$0xf]  ;;  %v332_v7 = vsel %vm331_vm1, %v327_v3, 0.0  ;;  %v333_v8 = vsel %vm331_vm1, %v328_v4, 0.0  ;;  %v335_v9 = vsel %vm331_vm1, %v329_v5, 0.0  ;;  %509 = vst.msk [vmem:[#allocation2 + $0x8] sm:$0xff] %vm348_vm2, %v1117_v57 }
  0x10   : > { %998 = vmatpush.msk.msrb.mxu0 %vm378_vm0, %v373_v2  ;;  %1001 = vmatpush.msk.msrb.mxu2 %vm378_vm0, %v373_v2  ;;  %v334_v10 = vadd.f32 %v333_v8, %v332_v7  ;;  %v337_v11 = vsel %vm331_vm1, %v330_v6, 0.0  ;;  %510 = vst.msk [vmem:[#allocation2 + $0x10] sm:$0xff] %vm348_vm2, %v1117_v57  ;;  %v1089_v62 = vld [vmem:[%s1289_s1 + $0x20] sm:$0xff]  ;;  %vm908_vm9 = vcmask 130052   ;;  %vm917_vm10 = vcmask 128002  }
  0x11   : > { %511 = vst.msk [vmem:[#allocation2 + $0x18] sm:$0xff] %vm348_vm2, %v1117_v57  ;;  %581 = vmatpush.bf16.msrb.mxu3 %v1085_v61  ;;  %701 = vmatpush.bf16.msrb.mxu1 %v1089_v62  ;;  %v1104_v1 = vld [vmem:[%s1291_s3] ss:$0 sm:$0xff] }
  0x12   : > { %v336_v12 = vadd.f32 %v335_v9, %v334_v10  ;;  %512 = vst.msk [vmem:[#allocation2 + $0x20] sm:$0xff] %vm348_vm2, %v1117_v57 }
  0x14   : > { %v338_v13 = vadd.f32 %v337_v11, %v336_v12 }
  0x16   : > { %v339_v14 = vsel %vm331_vm1, %v338_v13, 0.0 }
  0x17   : > { %v340_v15 = vrot.slane %v339_v14, 4 }
  0x19   : > { %v341_v16 = vadd.f32 %v340_v15, %v339_v14  ;;  %v1092_v15 = vld [vmem:[%s1289_s1 + $0x38] sm:$0xff] }
  0x1b   : > { %v342_v17 = vrot.slane %v341_v16, 2 }
  0x1d   : > { %v343_v18 = vadd.f32 %v342_v17, %v341_v16  ;;  %v1091_v16 = vld [vmem:[%s1289_s1 + $0x30] sm:$0xff] }
  0x1f   : > { %v344_v19 = vrot.slane %v343_v18, 1 }
  0x21   : > { %v345_v20 = vadd.f32 %v344_v19, %v343_v18 }
  0x23   : > { %997 = vmatmul.msk.f32.vlgmr.msra.gmra.mxu0 %vm348_vm2, %v345_v20 }
  0x24   : > { %619 = vmatpush.bf16.msra.mxu0 %v1087_v59 }
  0xa0   : > { %v369_v21 = vpop.f32.mrf.mxu0 }
  0xa1   : > { %v372_v22 = vmul.f32 0.015625, %v369_v21 }
  0xa3   : > { %999 = vmatmul.msk.f32.vlgmr.msrb.gmra.mxu0 %vm374_vm3, %v372_v22 }
  0xa4   : > { %783 = vmatpush.bf16.msrb.mxu0 %v1091_v16 }
 0x120   : > { %v399_v23 = vpop.f32.mrf.mxu0 }
 0x121   : > { %v402_v24 = vperm.slane %v399_v23, 0  ;;  %v1090_v23 = vld [vmem:[%s1289_s1 + $0x28] sm:$0xff] }
 0x123   : > { %v403_v25 = vsub.f32 %v327_v3, %v402_v24  ;;  %v404_v26 = vsub.f32 %v328_v4, %v402_v24  ;;  %v405_v27 = vsub.f32 %v329_v5, %v402_v24  ;;  %v406_v28 = vsub.f32 %v330_v6, %v402_v24  ;;  %v1105_v6 = vld [vmem:[%s1292_s4] ss:$0 sm:$0xff] }
 0x125   : > { %v407_v29 = vmul.f32 %v403_v25, %v403_v25  ;;  %v408_v30 = vmul.f32 %v404_v26, %v404_v26  ;;  %v409_v31 = vmul.f32 %v405_v27, %v405_v27  ;;  %v410_v32 = vmul.f32 %v406_v28, %v406_v28 }
 0x127   : > { %v411_v33 = vsel %vm331_vm1, %v407_v29, 0.0  ;;  %v412_v34 = vsel %vm331_vm1, %v408_v30, 0.0  ;;  %v414_v36 = vsel %vm331_vm1, %v409_v31, 0.0  ;;  %v416_v38 = vsel %vm331_vm1, %v410_v32, 0.0  ;;  %v1093_v31 = vld [vmem:[%s1289_s1 + $0x40] sm:$0xff] }
 0x128   : > { %v413_v35 = vadd.f32 %v412_v34, %v411_v33 }
 0x12a   : > { %v415_v37 = vadd.f32 %v414_v36, %v413_v35 }
 0x12c   : > { %v417_v39 = vadd.f32 %v416_v38, %v415_v37 }
 0x12e   : > { %v418_v40 = vsel %vm331_vm1, %v417_v39, 0.0 }
 0x12f   : > { %v419_v41 = vrot.slane %v418_v40, 4 }
 0x131   : > { %v420_v42 = vadd.f32 %v419_v41, %v418_v40 }
 0x133   : > { %v421_v43 = vrot.slane %v420_v42, 2 }
 0x135   : > { %v422_v44 = vadd.f32 %v421_v43, %v420_v42 }
 0x137   : > { %v423_v45 = vrot.slane %v422_v44, 1 }
 0x139   : > { %v424_v46 = vadd.f32 %v423_v45, %v422_v44 }
 0x13b   : > { %1000 = vmatmul.msk.f32.vlgmr.msra.gmra.mxu2 %vm348_vm2, %v424_v46 }
 0x13c   : > { %660 = vmatpush.bf16.msra.mxu2 %v1088_v60  ;;  %v840_v60 = vld [vmem:[#allocation2 + $0x1e] sm:$0xff] }
 0x13d   : > { %v842_v62 = vpack.c.bf16 %v840_v60, %v840_v60 }
 0x1be   : > { %v445_v47 = vpop.f32.mrf.mxu2 }
 0x1bf   : > { %v448_v48 = vmul.f32 0.015625, %v445_v47 }
 0x1c1   : > { %v449_v49 = vadd.f32 1e-05, %v448_v48 }
 0x1c3   : > { %1107 = vrsqrt.f32 %v449_v49  ;;  %vm456_vm5 = vweird.f32 %v449_v49 }
 0x1c9   : > { %v1108_v50 = vpop.eup %1107 }
 0x1ca   : > { %v451_v51 = vmul.f32 %v1108_v50, %v449_v49  ;;  %vm457_vm4 = vweird.f32 %v1108_v50 }
 0x1cb   : > { %vm458_vm6 = vmor %vm456_vm5, %vm457_vm4 }
 0x1cc   : > { %v452_v52 = vmul.f32 %v1108_v50, %v451_v51 }
 0x1ce   : > { %v453_v53 = vmul.f32 0.5, %v452_v52 }
 0x1d0   : > { %v454_v54 = vsub.f32 1.5, %v453_v53 }
 0x1d2   : > { %v455_v55 = vmul.f32 %v1108_v50, %v454_v54  ;;  %v799_v54 = vld [vmem:[#allocation2 + $0x1d] sm:$0xff] }
 0x1d4   : > { %v459_v56 = vsel %vm458_vm6, %v1108_v50, %v455_v55 }
 0x1d5   : > { %1002 = vmatmul.msk.f32.vlgmr.msrb.gmra.mxu2 %vm374_vm3, %v459_v56  ;;  %v801_v56 = vpack.c.bf16 %v799_v54, %v799_v54 }
 0x1d6   : > { %824 = vmatpush.bf16.msrb.mxu2 %v1092_v15 }
 0x258   : > { %v480_v63 = vpop.f32.mrf.mxu2 }
 0x259   : > { %v483_v0 = vperm.slane %v480_v63, 0 }
 0x25b   : > { %v484_v2 = vmul.f32 %v483_v0, %v403_v25  ;;  %v485_v3 = vmul.f32 %v483_v0, %v404_v26  ;;  %v486_v4 = vmul.f32 %v483_v0, %v405_v27  ;;  %v487_v5 = vmul.f32 %v483_v0, %v406_v28 }
 0x25d   : > { %v492_v7 = vmul.f32 %v1104_v1, %v484_v2  ;;  %v493_v8 = vmul.f32 %v1104_v1, %v485_v3  ;;  %v494_v9 = vmul.f32 %v1104_v1, %v486_v4  ;;  %v495_v10 = vmul.f32 %v1104_v1, %v487_v5 }
 0x25f   : > { %v500_v11 = vadd.f32 %v1105_v6, %v492_v7  ;;  %v501_v12 = vadd.f32 %v1105_v6, %v493_v8  ;;  %v502_v13 = vadd.f32 %v1105_v6, %v494_v9  ;;  %v503_v14 = vadd.f32 %v1105_v6, %v495_v10 }
 0x261   : > { %v504_v17 = vmax.f32 %v500_v11, 0.0  ;;  %v505_v18 = vmax.f32 %v501_v12, 0.0  ;;  %v506_v19 = vmax.f32 %v502_v13, 0.0  ;;  %v507_v20 = vmax.f32 %v503_v14, 0.0 }
 0x263   : > { %513 = vst.msk [vmem:[#allocation2 + $0x7] sm:$0xf] %vm331_vm1, %v504_v17 }
 0x264   : > { %514 = vst.msk [vmem:[#allocation2 + $0xd] sm:$0xf] %vm331_vm1, %v505_v18 }
 0x265   : > { %515 = vst.msk [vmem:[#allocation2 + $0x13] sm:$0xf] %vm331_vm1, %v506_v19 }
 0x266   : > { %516 = vst.msk [vmem:[#allocation2 + $0x19] sm:$0xf] %vm331_vm1, %v507_v20 }
 0x26a   : > { %v524_v21 = vld [vmem:[#allocation2 + $0x1] sm:$0xff] }
 0x26b   : > { %v592_v22 = vld [vmem:[#allocation2 + $0x2] sm:$0xff]  ;;  %v593_v25 = vld [vmem:[#allocation2 + $0xa] sm:$0xff] }
 0x26c   : > { %v525_v24 = vld [vmem:[#allocation2 + $0x9] sm:$0xff]  ;;  %v526_v28 = vld [vmem:[#allocation2 + $0x11] sm:$0xff]  ;;  %v595_v29 = vpack.c.bf16 %v593_v25, %v592_v22  ;;  %v517_v37 = vld [vmem:[#allocation2] sm:$0xff] }
 0x26d   : > { %v633_v26 = vld [vmem:[#allocation2 + $0x6] sm:$0xff]  ;;  %v527_v27 = vpack.c.bf16 %v525_v24, %v524_v21  ;;  %v634_v30 = vld [vmem:[#allocation2 + $0xe] sm:$0xff]  ;;  %v528_v32 = vpack.c.bf16 %v526_v28, %v526_v28  ;;  %v635_v39 = vld [vmem:[#allocation2 + $0x16] sm:$0xff] }
 0x26e   : > { %v636_v33 = vpack.c.bf16 %v634_v30, %v633_v26  ;;  %1023 = vmatmul.msk.bf16.vlgmr.msra.gmra.mxu0 %vm348_vm2, %v595_v29  ;;  %v594_v34 = vld [vmem:[#allocation2 + $0x12] sm:$0xff]  ;;  %v674_v35 = vld [vmem:[#allocation2 + $0x7] sm:$0xff]  ;;  %v637_v43 = vpack.c.bf16 %v635_v39, %v635_v39  ;;  %v758_v55 = vld [vmem:[#allocation2 + $0x1c] sm:$0xff]  ;;  %v841_v58 = vpack.c.bf16 %v635_v39, %v634_v30 }
 0x26f   : > { %1009 = vmatmul.msk.bf16.vlgmr.msra.gmra.mxu1 %vm348_vm2, %v527_v27  ;;  %1010 = vmatmul.msk.bf16.vlgmr.msra.gmra.mxu3 %vm348_vm2, %v528_v32  ;;  %v675_v36 = vld [vmem:[#allocation2 + $0xf] sm:$0xff]  ;;  %v596_v40 = vpack.c.bf16 %v594_v34, %v594_v34  ;;  %v676_v44 = vld [vmem:[#allocation2 + $0x17] sm:$0xff]  ;;  %v760_v57 = vpack.c.bf16 %v758_v55, %v758_v55 }
 0x270   : > { %1031 = vmatmul.msk.bf16.vlgmr.msra.gmra.mxu2 %vm348_vm2, %v636_v33  ;;  %742 = vmatpush.bf16.msra.mxu3 %v1090_v23  ;;  %v518_v38 = vld [vmem:[#allocation2 + $0x8] sm:$0xff]  ;;  %v677_v41 = vpack.c.bf16 %v675_v36, %v674_v35  ;;  %v757_v46 = vld [vmem:[#allocation2 + $0x14] sm:$0xff]  ;;  %v678_v50 = vpack.c.bf16 %v676_v44, %v676_v44 }
 0x271   : > { %865 = vmatpush.bf16.msra.mxu1 %v1093_v31  ;;  %v520_v42 = vpack.c.bf16 %v518_v38, %v517_v37  ;;  %v756_v45 = vld [vmem:[#allocation2 + $0xc] sm:$0xff]  ;;  %v798_v49 = vld [vmem:[#allocation2 + $0x15] sm:$0xff] }
 0x272   : > { %v519_v47 = vld [vmem:[#allocation2 + $0x10] sm:$0xff]  ;;  %v759_v51 = vpack.c.bf16 %v757_v46, %v756_v45  ;;  %v717_v61 = vld [vmem:[#allocation2 + $0x18] sm:$0xff] }
 0x273   : > { %v797_v48 = vld [vmem:[#allocation2 + $0xd] sm:$0xff]  ;;  %v521_v52 = vpack.c.bf16 %v519_v47, %v519_v47  ;;  %v718_v59 = vpack.c.bf16 %v519_v47, %v518_v38  ;;  %v719_v63 = vpack.c.bf16 %v717_v61, %v717_v61  ;;  %v886_v47 = vld [vmem:[%s1264_s21] sm:$0xf] }
 0x274   : > { %v800_v53 = vpack.c.bf16 %v798_v49, %v797_v48 }
 0x27e   : > { %1024 = vmatmul.msk.bf16.gmra.mxu0 %vm348_vm2, %v596_v40  ;;  %v1073_v40 = vld [vmem:[%s1264_s21 + $0x4] sm:$0xf] }
 0x27f   : > { %1039 = vmatmul.msk.bf16.vlgmr.msrb.gmra.mxu1 %vm348_vm2, %v677_v41  ;;  %1015 = vmatmul.msk.bf16.vlgmr.msrb.gmra.mxu3 %vm348_vm2, %v520_v42  ;;  %v1106_v42 = vld [vmem:[%s1290_s2] ss:$0 sm:$0xff]  ;;  %v892_v45 = vrot.slane %v1073_v40, 2 }
 0x280   : > { %1032 = vmatmul.msk.bf16.gmra.mxu2 %vm348_vm2, %v637_v43 }
 0x28e   : > { %1055 = vmatmul.msk.bf16.vlgmr.msrb.gmra.mxu0 %vm348_vm2, %v759_v51 }
 0x28f   : > { %1040 = vmatmul.msk.bf16.gmra.mxu1 %vm348_vm2, %v678_v50  ;;  %1016 = vmatmul.msk.bf16.gmra.mxu3 %vm348_vm2, %v521_v52 }
 0x290   : > { %1063 = vmatmul.msk.bf16.vlgmr.msrb.gmra.mxu2 %vm348_vm2, %v800_v53 }
 0x29e   : > { %1056 = vmatmul.msk.bf16.gmra.mxu0 %vm348_vm2, %v760_v57  ;;  %v1076_v57 = vld [vmem:[%s1264_s21 + $0x8] sm:$0xf] }
 0x29f   : > { %1071 = vmatmul.msk.bf16.vlgmr.msra.gmra.mxu1 %vm348_vm2, %v841_v58  ;;  %1047 = vmatmul.msk.bf16.vlgmr.msra.gmra.mxu3 %vm348_vm2, %v718_v59  ;;  %v904_v60 = vrot.slane %v1076_v57, 4 }
 0x2a0   : > { %1064 = vmatmul.msk.bf16.gmra.mxu2 %vm348_vm2, %v801_v56 }
 0x2af   : > { %1072 = vmatmul.msk.bf16.gmra.mxu1 %vm348_vm2, %v842_v62  ;;  %1048 = vmatmul.msk.bf16.gmra.mxu3 %vm348_vm2, %v719_v63 }
 0x2eb   : > { %v621_v1 = vpop.f32.mrf.mxu0 }
 0x2ec   : > { %v553_v0 = vpop.f32.mrf.mxu1 }
 0x2f2   : > { %v558_v2 = vpop.f32.mrf.mxu3 }
 0x2f3   : > { %v662_v3 = vpop.f32.mrf.mxu2  ;;  %v623_v5 = vpop.f32.mrf.mxu0 }
 0x2f4   : > { %v555_v4 = vpop.f32.mrf.mxu1 }
 0x2fa   : > { %v560_v6 = vpop.f32.mrf.mxu3 }
 0x2fb   : > { %v664_v7 = vpop.f32.mrf.mxu2  ;;  %v626_v8 = vpop.f32.mrf.mxu0 }
 0x2fc   : > { %v703_v9 = vpop.f32.mrf.mxu1 }
 0x302   : > { %v583_v10 = vpop.f32.mrf.mxu3 }
 0x303   : > { %v667_v11 = vpop.f32.mrf.mxu2  ;;  %v628_v12 = vpop.f32.mrf.mxu0  ;;  %v584_v22 = vadd.f32 %v583_v10, %v553_v0 }
 0x304   : > { %v705_v13 = vpop.f32.mrf.mxu1 }
 0x305   : > { %v630_v23 = vadd.f32 %v621_v1, %v584_v22 }
 0x307   : > { %v671_v29 = vadd.f32 %v662_v3, %v630_v23 }
 0x309   : > { %v712_v31 = vadd.f32 %v703_v9, %v671_v29 }
 0x30a   : > { %v585_v14 = vpop.f32.mrf.mxu3 }
 0x30b   : > { %v669_v15 = vpop.f32.mrf.mxu2  ;;  %v785_v17 = vpop.f32.mrf.mxu0  ;;  %v586_v28 = vadd.f32 %v585_v14, %v555_v4 }
 0x30c   : > { %v708_v16 = vpop.f32.mrf.mxu1 }
 0x30d   : > { %v631_v30 = vadd.f32 %v623_v5, %v586_v28  ;;  %v1078_v5 = vld [vmem:[%s1264_s21 + $0xc] sm:$0xf] }
 0x30f   : > { %v672_v39 = vadd.f32 %v664_v7, %v631_v30 }
 0x311   : > { %v713_v46 = vadd.f32 %v705_v13, %v672_v39 }
 0x312   : > { %v588_v18 = vpop.f32.mrf.mxu3 }
 0x313   : > { %v826_v19 = vpop.f32.mrf.mxu2  ;;  %v787_v21 = vpop.f32.mrf.mxu0  ;;  %v589_v37 = vadd.f32 %v588_v18, %v558_v2 }
 0x314   : > { %v710_v20 = vpop.f32.mrf.mxu1 }
 0x315   : > { %v632_v43 = vadd.f32 %v626_v8, %v589_v37  ;;  %v913_v8 = vrot.slane %v1078_v5, 6 }
 0x317   : > { %v673_v56 = vadd.f32 %v667_v11, %v632_v43 }
 0x319   : > { %v714_v61 = vadd.f32 %v708_v16, %v673_v56 }
 0x31a   : > { %v590_v24 = vpop.f32.mrf.mxu3 }
 0x31b   : > { %v828_v25 = vpop.f32.mrf.mxu2  ;;  %v790_v26 = vpop.f32.mrf.mxu0 }
 0x31c   : > { %v867_v27 = vpop.f32.mrf.mxu1 }
 0x322   : > { %v744_v32 = vpop.f32.mrf.mxu3 }
 0x323   : > { %v831_v33 = vpop.f32.mrf.mxu2  ;;  %v753_v34 = vadd.f32 %v744_v32, %v712_v31  ;;  %v792_v35 = vpop.f32.mrf.mxu0 }
 0x324   : > { %v869_v36 = vpop.f32.mrf.mxu1 }
 0x325   : > { %v794_v38 = vadd.f32 %v785_v17, %v753_v34 }
 0x327   : > { %v835_v41 = vadd.f32 %v826_v19, %v794_v38 }
 0x329   : > { %v876_v44 = vadd.f32 %v867_v27, %v835_v41 }
 0x32a   : > { %v746_v48 = vpop.f32.mrf.mxu3 }
 0x32b   : > { %v833_v49 = vpop.f32.mrf.mxu2  ;;  %v883_v50 = vadd.f32 %v1106_v42, %v876_v44  ;;  %v754_v51 = vadd.f32 %v746_v48, %v713_v46 }
 0x32c   : > { %v872_v52 = vpop.f32.mrf.mxu1 }
 0x32d   : > { %v887_v53 = vadd.f32 %v886_v47, %v883_v50  ;;  %v894_v54 = vadd.f32 %v892_v45, %v883_v50  ;;  %v795_v55 = vadd.f32 %v787_v21, %v754_v51 }
 0x32f   : > { %888 = vst.msk [vmem:[%s1275_s26] sm:$0xf] %vm331_vm1, %v887_v53  ;;  %v836_v58 = vadd.f32 %v828_v25, %v795_v55 }
 0x330   : > { %1074 = vst.msk [vmem:[%s1275_s26 - $0x2] sm:$0xc0] %vm897_vm7, %v894_v54 }
 0x331   : > { %v877_v59 = vadd.f32 %v869_v36, %v836_v58 }
 0x332   : > { %v749_v62 = vpop.f32.mrf.mxu3 }
 0x333   : > { %v884_v63 = vadd.f32 %v1106_v42, %v877_v59  ;;  %v755_v0 = vadd.f32 %v749_v62, %v714_v61 }
 0x334   : > { %v874_v1 = vpop.f32.mrf.mxu1 }
 0x335   : > { %v895_v2 = vadd.f32 %v892_v45, %v884_v63  ;;  %v906_v3 = vadd.f32 %v904_v60, %v884_v63  ;;  %v796_v4 = vadd.f32 %v790_v26, %v755_v0 }
 0x337   : > { %1075 = vst.msk [vmem:[%s1275_s26 + $0x6] sm:$0x3] %vm899_vm8, %v895_v2  ;;  %v837_v6 = vadd.f32 %v831_v33, %v796_v4 }
 0x338   : > { %1077 = vst.msk [vmem:[%s1275_s26 + $0x4] sm:$0xf0] %vm908_vm9, %v906_v3 }
 0x339   : > { %v878_v7 = vadd.f32 %v872_v52, %v837_v6 }
 0x33a   : > { %v751_v9 = vpop.f32.mrf.mxu3 }
 0x33b   : > { %v885_v10 = vadd.f32 %v1106_v42, %v878_v7 }
 0x33d   : > { %v915_v11 = vadd.f32 %v913_v8, %v885_v10 }
 0x33f   : > { %1079 = vst.msk [vmem:[%s1275_s26 + $0xa] sm:$0x3c] %vm917_vm10, %v915_v11 }
 0x340 PF: > { %s18_s27 = sadd.s32 1, %s1115_s27  }
 0x341   : > { %p15_p4 = scmp.ge.s32.totalorder %s18_s27, 4  }
 0x343   :  { %17 = sbr.rel (!%p15_p4) target bundleno = 1 (0x1), region = 99 }

// kernel: vqvae_forward.13
= control target key start
LH: loop header
LB: loop body
LE: loop exit
PB: predicated region body
PF: predicated region fallthrough
CT: control target
= control target key end

     0   :  { %s1072_s24 = smov 0   ;;  %s1183_s0 = inlined_call_operand.vmem [shape: f32[2,4,4,16], index: 0, kind: input, shape index: {}]   ;;  %s1184_s1 = inlined_call_operand.vmem [shape: bf16[9,16,16], index: 1, kind: input, shape index: {}]   ;;  %s1185_s2 = inlined_call_operand.vmem [shape: f32[1,16], index: 2, kind: input, shape index: {}]   ;;  %s1186_s3 = inlined_call_operand.vmem [shape: f32[1,16], index: 3, kind: input, shape index: {}]   ;;  %s1187_s4 = inlined_call_operand.vmem [shape: f32[1,16], index: 4, kind: input, shape index: {}]   ;;  %s1188_s5 = inlined_call_operand.vmem [shape: f32[16,4], index: 5, kind: input, shape index: {}]   ;;  %s1189_s6 = inlined_call_operand.vmem [shape: f32[4,16], index: 6, kind: input, shape index: {}]   ;;  %s1190_s7 = inlined_call_operand.vmem [shape: f32[2,4,4,16], index: 7, kind: output, shape index: {}]  }
   0x1 LB: > { %s906_s25 = sadd.s32 4294967295, %s1029_s24   ;;  %p910_p0 = scmp.ge.s32.totalorder %s1029_s24, 1  ;;  %s1029_s24 = sphi %s1072_s24, %s17_s24  }
   0x2   : > { %p237_p1 = scmp.lt.s32.totalorder %s1029_s24, 3 }
   0x4   : > { %p238_p2 = pnand %p910_p0, %p237_p1 }
   0x5   : > { %p269_p3 = scmp.lt.s32.totalorder (!%p238_p2), %s906_s25, 1 }
   0x6   : > { %241 = sbr.rel (%p238_p2) target bundleno = 830 (0x33e), region = 48 }
   0xb   : > { %v300_v0 = vld [vmem:[%s1188_s5 + $0x8] sm:$0xff]  ;;  %v299_v1 = vld [vmem:[%s1188_s5] sm:$0xff]  ;;  %vm331_vm0 = vcmask 1043456   ;;  %s1192_s25 = smov (!%p269_p3, %s906_s25), 1  ;;  %vm284_vm1 = vcmask 125952   ;;  %vm301_vm2 = vcmask 130048  }
   0xc   : > { %319 = vmatpush.msra.mxu0 %v300_v0  ;;  %v326_v2 = vld [vmem:[%s1189_s6] sm:$0xf]  ;;  %395 = vmatpush.msra.mxu2 %v300_v0  ;;  %s997_s9 = sshll.u32 %s1192_s25, 4  ;;  %vm327_vm3 = vcmask 31744   ;;  %v1031_v57 = vmov 0.0   ;;  %v1000_v58 = vld [vmem:[%s1184_s1 + $0x8] sm:$0xff] }
   0xd   : > { %s273_s12 = scalar_lea.vmem %s1183_s0, %s997_s9  ;;  %461 = vst.msk [vmem:[#allocation2] sm:$0xff] %vm301_vm2, %v1031_v57  ;;  %v1001_v59 = vld [vmem:[%s1184_s1 + $0x10] sm:$0xff]  ;;  %v1002_v60 = vld [vmem:[%s1184_s1 + $0x18] sm:$0xff]  ;;  %504 = vmatpush.bf16.msra.mxu1 %v1000_v58  ;;  %1008 = vmatpush.bf16.msra.mxu3 %v1000_v58  ;;  %v999_v61 = vld [vmem:[%s1184_s1] sm:$0xff]  ;;  %s278_s19 = scalar_lea.vmem %s1190_s7, %s997_s9  ;;  %vm841_vm7 = vcmask 130054   ;;  %vm843_vm8 = vcmask 123904  }
   0xe   : > { %320 = vmatpush.msra.mxu0 %v299_v1  ;;  %396 = vmatpush.msra.mxu2 %v299_v1  ;;  %v280_v3 = vld [vmem:[%s273_s12] sm:$0xf]  ;;  %v281_v4 = vld [vmem:[%s273_s12 + $0x4] sm:$0xf]  ;;  %v282_v5 = vld [vmem:[%s273_s12 + $0x8] sm:$0xf] }
   0xf   : > { %v283_v6 = vld [vmem:[%s273_s12 + $0xc] sm:$0xf]  ;;  %v285_v7 = vsel %vm284_vm1, %v280_v3, 0.0  ;;  %v286_v8 = vsel %vm284_vm1, %v281_v4, 0.0  ;;  %v288_v9 = vsel %vm284_vm1, %v282_v5, 0.0  ;;  %462 = vst.msk [vmem:[#allocation2 + $0x8] sm:$0xff] %vm301_vm2, %v1031_v57 }
  0x10   : > { %916 = vmatpush.msk.msrb.mxu0 %vm331_vm0, %v326_v2  ;;  %919 = vmatpush.msk.msrb.mxu2 %vm331_vm0, %v326_v2  ;;  %v287_v10 = vadd.f32 %v286_v8, %v285_v7  ;;  %v290_v11 = vsel %vm284_vm1, %v283_v6, 0.0  ;;  %463 = vst.msk [vmem:[#allocation2 + $0x10] sm:$0xff] %vm301_vm2, %v1031_v57  ;;  %v1003_v62 = vld [vmem:[%s1184_s1 + $0x20] sm:$0xff]  ;;  %vm846_vm9 = vcmask 130052   ;;  %vm849_vm10 = vcmask 128002  }
  0x11   : > { %464 = vst.msk [vmem:[#allocation2 + $0x18] sm:$0xff] %vm301_vm2, %v1031_v57  ;;  %534 = vmatpush.bf16.msrb.mxu3 %v999_v61  ;;  %654 = vmatpush.bf16.msrb.mxu1 %v1003_v62  ;;  %v1018_v1 = vld [vmem:[%s1186_s3] ss:$0 sm:$0xff] }
  0x12   : > { %v289_v12 = vadd.f32 %v288_v9, %v287_v10  ;;  %465 = vst.msk [vmem:[#allocation2 + $0x20] sm:$0xff] %vm301_vm2, %v1031_v57 }
  0x14   : > { %v291_v13 = vadd.f32 %v290_v11, %v289_v12 }
  0x16   : > { %v292_v14 = vsel %vm284_vm1, %v291_v13, 0.0 }
  0x17   : > { %v293_v15 = vrot.slane %v292_v14, 4 }
  0x19   : > { %v294_v16 = vadd.f32 %v293_v15, %v292_v14  ;;  %v1006_v15 = vld [vmem:[%s1184_s1 + $0x38] sm:$0xff] }
  0x1b   : > { %v295_v17 = vrot.slane %v294_v16, 2 }
  0x1d   : > { %v296_v18 = vadd.f32 %v295_v17, %v294_v16  ;;  %v1005_v16 = vld [vmem:[%s1184_s1 + $0x30] sm:$0xff] }
  0x1f   : > { %v297_v19 = vrot.slane %v296_v18, 1 }
  0x21   : > { %v298_v20 = vadd.f32 %v297_v19, %v296_v18 }
  0x23   : > { %915 = vmatmul.msk.f32.vlgmr.msra.gmra.mxu0 %vm301_vm2, %v298_v20 }
  0x24   : > { %572 = vmatpush.bf16.msra.mxu0 %v1001_v59 }
  0xa0   : > { %v322_v21 = vpop.f32.mrf.mxu0 }
  0xa1   : > { %v325_v22 = vmul.f32 0.015625, %v322_v21 }
  0xa3   : > { %917 = vmatmul.msk.f32.vlgmr.msrb.gmra.mxu0 %vm327_vm3, %v325_v22 }
  0xa4   : > { %736 = vmatpush.bf16.msrb.mxu0 %v1005_v16 }
 0x120   : > { %v352_v23 = vpop.f32.mrf.mxu0 }
 0x121   : > { %v355_v24 = vperm.slane %v352_v23, 0  ;;  %v1004_v23 = vld [vmem:[%s1184_s1 + $0x28] sm:$0xff] }
 0x123   : > { %v356_v25 = vsub.f32 %v280_v3, %v355_v24  ;;  %v357_v26 = vsub.f32 %v281_v4, %v355_v24  ;;  %v358_v27 = vsub.f32 %v282_v5, %v355_v24  ;;  %v359_v28 = vsub.f32 %v283_v6, %v355_v24  ;;  %v1019_v6 = vld [vmem:[%s1187_s4] ss:$0 sm:$0xff] }
 0x125   : > { %v360_v29 = vmul.f32 %v356_v25, %v356_v25  ;;  %v361_v30 = vmul.f32 %v357_v26, %v357_v26  ;;  %v362_v31 = vmul.f32 %v358_v27, %v358_v27  ;;  %v363_v32 = vmul.f32 %v359_v28, %v359_v28 }
 0x127   : > { %v364_v33 = vsel %vm284_vm1, %v360_v29, 0.0  ;;  %v365_v34 = vsel %vm284_vm1, %v361_v30, 0.0  ;;  %v367_v36 = vsel %vm284_vm1, %v362_v31, 0.0  ;;  %v369_v38 = vsel %vm284_vm1, %v363_v32, 0.0  ;;  %v1007_v31 = vld [vmem:[%s1184_s1 + $0x40] sm:$0xff] }
 0x128   : > { %v366_v35 = vadd.f32 %v365_v34, %v364_v33 }
 0x12a   : > { %v368_v37 = vadd.f32 %v367_v36, %v366_v35 }
 0x12c   : > { %v370_v39 = vadd.f32 %v369_v38, %v368_v37 }
 0x12e   : > { %v371_v40 = vsel %vm284_vm1, %v370_v39, 0.0 }
 0x12f   : > { %v372_v41 = vrot.slane %v371_v40, 4 }
 0x131   : > { %v373_v42 = vadd.f32 %v372_v41, %v371_v40 }
 0x133   : > { %v374_v43 = vrot.slane %v373_v42, 2 }
 0x135   : > { %v375_v44 = vadd.f32 %v374_v43, %v373_v42 }
 0x137   : > { %v376_v45 = vrot.slane %v375_v44, 1 }
 0x139   : > { %v377_v46 = vadd.f32 %v376_v45, %v375_v44 }
 0x13b   : > { %918 = vmatmul.msk.f32.vlgmr.msra.gmra.mxu2 %vm301_vm2, %v377_v46 }
 0x13c   : > { %613 = vmatpush.bf16.msra.mxu2 %v1002_v60  ;;  %v793_v60 = vld [vmem:[#allocation2 + $0x1e] sm:$0xff] }
 0x13d   : > { %v795_v62 = vpack.c.bf16 %v793_v60, %v793_v60 }
 0x1be   : > { %v398_v47 = vpop.f32.mrf.mxu2 }
 0x1bf   : > { %v401_v48 = vmul.f32 0.015625, %v398_v47 }
 0x1c1   : > { %v402_v49 = vadd.f32 1e-05, %v401_v48 }
 0x1c3   : > { %1021 = vrsqrt.f32 %v402_v49  ;;  %vm409_vm5 = vweird.f32 %v402_v49 }
 0x1c9   : > { %v1022_v50 = vpop.eup %1021 }
 0x1ca   : > { %v404_v51 = vmul.f32 %v1022_v50, %v402_v49  ;;  %vm410_vm4 = vweird.f32 %v1022_v50 }
 0x1cb   : > { %vm411_vm6 = vmor %vm409_vm5, %vm410_vm4 }
 0x1cc   : > { %v405_v52 = vmul.f32 %v1022_v50, %v404_v51 }
 0x1ce   : > { %v406_v53 = vmul.f32 0.5, %v405_v52 }
 0x1d0   : > { %v407_v54 = vsub.f32 1.5, %v406_v53 }
 0x1d2   : > { %v408_v55 = vmul.f32 %v1022_v50, %v407_v54  ;;  %v752_v54 = vld [vmem:[#allocation2 + $0x1d] sm:$0xff] }
 0x1d4   : > { %v412_v56 = vsel %vm411_vm6, %v1022_v50, %v408_v55 }
 0x1d5   : > { %920 = vmatmul.msk.f32.vlgmr.msrb.gmra.mxu2 %vm327_vm3, %v412_v56  ;;  %v754_v56 = vpack.c.bf16 %v752_v54, %v752_v54 }
 0x1d6   : > { %777 = vmatpush.bf16.msrb.mxu2 %v1006_v15 }
 0x258   : > { %v433_v63 = vpop.f32.mrf.mxu2 }
 0x259   : > { %v436_v0 = vperm.slane %v433_v63, 0 }
 0x25b   : > { %v437_v2 = vmul.f32 %v436_v0, %v356_v25  ;;  %v438_v3 = vmul.f32 %v436_v0, %v357_v26  ;;  %v439_v4 = vmul.f32 %v436_v0, %v358_v27  ;;  %v440_v5 = vmul.f32 %v436_v0, %v359_v28 }
 0x25d   : > { %v445_v7 = vmul.f32 %v1018_v1, %v437_v2  ;;  %v446_v8 = vmul.f32 %v1018_v1, %v438_v3  ;;  %v447_v9 = vmul.f32 %v1018_v1, %v439_v4  ;;  %v448_v10 = vmul.f32 %v1018_v1, %v440_v5 }
 0x25f   : > { %v453_v11 = vadd.f32 %v1019_v6, %v445_v7  ;;  %v454_v12 = vadd.f32 %v1019_v6, %v446_v8  ;;  %v455_v13 = vadd.f32 %v1019_v6, %v447_v9  ;;  %v456_v14 = vadd.f32 %v1019_v6, %v448_v10 }
 0x261   : > { %v457_v17 = vmax.f32 %v453_v11, 0.0  ;;  %v458_v18 = vmax.f32 %v454_v12, 0.0  ;;  %v459_v19 = vmax.f32 %v455_v13, 0.0  ;;  %v460_v20 = vmax.f32 %v456_v14, 0.0 }
 0x263   : > { %466 = vst.msk [vmem:[#allocation2 + $0x7] sm:$0xf] %vm284_vm1, %v457_v17 }
 0x264   : > { %467 = vst.msk [vmem:[#allocation2 + $0xd] sm:$0xf] %vm284_vm1, %v458_v18 }
 0x265   : > { %468 = vst.msk [vmem:[#allocation2 + $0x13] sm:$0xf] %vm284_vm1, %v459_v19 }
 0x266   : > { %469 = vst.msk [vmem:[#allocation2 + $0x19] sm:$0xf] %vm284_vm1, %v460_v20 }
 0x26a   : > { %v477_v21 = vld [vmem:[#allocation2 + $0x1] sm:$0xff] }
 0x26b   : > { %v545_v22 = vld [vmem:[#allocation2 + $0x2] sm:$0xff]  ;;  %v546_v25 = vld [vmem:[#allocation2 + $0xa] sm:$0xff] }
 0x26c   : > { %v478_v24 = vld [vmem:[#allocation2 + $0x9] sm:$0xff]  ;;  %v479_v28 = vld [vmem:[#allocation2 + $0x11] sm:$0xff]  ;;  %v548_v29 = vpack.c.bf16 %v546_v25, %v545_v22  ;;  %v470_v37 = vld [vmem:[#allocation2] sm:$0xff] }
 0x26d   : > { %v586_v26 = vld [vmem:[#allocation2 + $0x6] sm:$0xff]  ;;  %v480_v27 = vpack.c.bf16 %v478_v24, %v477_v21  ;;  %v587_v30 = vld [vmem:[#allocation2 + $0xe] sm:$0xff]  ;;  %v481_v32 = vpack.c.bf16 %v479_v28, %v479_v28  ;;  %v588_v39 = vld [vmem:[#allocation2 + $0x16] sm:$0xff] }
 0x26e   : > { %v589_v33 = vpack.c.bf16 %v587_v30, %v586_v26  ;;  %941 = vmatmul.msk.bf16.vlgmr.msra.gmra.mxu0 %vm301_vm2, %v548_v29  ;;  %v547_v34 = vld [vmem:[#allocation2 + $0x12] sm:$0xff]  ;;  %v627_v35 = vld [vmem:[#allocation2 + $0x7] sm:$0xff]  ;;  %v590_v43 = vpack.c.bf16 %v588_v39, %v588_v39  ;;  %v711_v55 = vld [vmem:[#allocation2 + $0x1c] sm:$0xff]  ;;  %v794_v58 = vpack.c.bf16 %v588_v39, %v587_v30 }
 0x26f   : > { %927 = vmatmul.msk.bf16.vlgmr.msra.gmra.mxu1 %vm301_vm2, %v480_v27  ;;  %928 = vmatmul.msk.bf16.vlgmr.msra.gmra.mxu3 %vm301_vm2, %v481_v32  ;;  %v628_v36 = vld [vmem:[#allocation2 + $0xf] sm:$0xff]  ;;  %v549_v40 = vpack.c.bf16 %v547_v34, %v547_v34  ;;  %v629_v44 = vld [vmem:[#allocation2 + $0x17] sm:$0xff]  ;;  %v713_v57 = vpack.c.bf16 %v711_v55, %v711_v55 }
 0x270   : > { %949 = vmatmul.msk.bf16.vlgmr.msra.gmra.mxu2 %vm301_vm2, %v589_v33  ;;  %695 = vmatpush.bf16.msra.mxu3 %v1004_v23  ;;  %v471_v38 = vld [vmem:[#allocation2 + $0x8] sm:$0xff]  ;;  %v630_v41 = vpack.c.bf16 %v628_v36, %v627_v35  ;;  %v710_v46 = vld [vmem:[#allocation2 + $0x14] sm:$0xff]  ;;  %v631_v50 = vpack.c.bf16 %v629_v44, %v629_v44 }
 0x271   : > { %818 = vmatpush.bf16.msra.mxu1 %v1007_v31  ;;  %v473_v42 = vpack.c.bf16 %v471_v38, %v470_v37  ;;  %v709_v45 = vld [vmem:[#allocation2 + $0xc] sm:$0xff]  ;;  %v751_v49 = vld [vmem:[#allocation2 + $0x15] sm:$0xff] }
 0x272   : > { %v472_v47 = vld [vmem:[#allocation2 + $0x10] sm:$0xff]  ;;  %v712_v51 = vpack.c.bf16 %v710_v46, %v709_v45  ;;  %v670_v61 = vld [vmem:[#allocation2 + $0x18] sm:$0xff] }
 0x273   : > { %v750_v48 = vld [vmem:[#allocation2 + $0xd] sm:$0xff]  ;;  %v474_v52 = vpack.c.bf16 %v472_v47, %v472_v47  ;;  %v671_v59 = vpack.c.bf16 %v472_v47, %v471_v38  ;;  %v672_v63 = vpack.c.bf16 %v670_v61, %v670_v61 }
 0x274   : > { %v753_v53 = vpack.c.bf16 %v751_v49, %v750_v48 }
 0x27e   : > { %942 = vmatmul.msk.bf16.gmra.mxu0 %vm301_vm2, %v549_v40 }
 0x27f   : > { %957 = vmatmul.msk.bf16.vlgmr.msrb.gmra.mxu1 %vm301_vm2, %v630_v41  ;;  %933 = vmatmul.msk.bf16.vlgmr.msrb.gmra.mxu3 %vm301_vm2, %v473_v42  ;;  %v1020_v41 = vld [vmem:[%s1185_s2] ss:$0 sm:$0xff] }
 0x280   : > { %950 = vmatmul.msk.bf16.gmra.mxu2 %vm301_vm2, %v590_v43 }
 0x28e   : > { %973 = vmatmul.msk.bf16.vlgmr.msrb.gmra.mxu0 %vm301_vm2, %v712_v51 }
 0x28f   : > { %958 = vmatmul.msk.bf16.gmra.mxu1 %vm301_vm2, %v631_v50  ;;  %934 = vmatmul.msk.bf16.gmra.mxu3 %vm301_vm2, %v474_v52 }
 0x290   : > { %981 = vmatmul.msk.bf16.vlgmr.msrb.gmra.mxu2 %vm301_vm2, %v753_v53 }
 0x29e   : > { %974 = vmatmul.msk.bf16.gmra.mxu0 %vm301_vm2, %v713_v57 }
 0x29f   : > { %989 = vmatmul.msk.bf16.vlgmr.msra.gmra.mxu1 %vm301_vm2, %v794_v58  ;;  %965 = vmatmul.msk.bf16.vlgmr.msra.gmra.mxu3 %vm301_vm2, %v671_v59 }
 0x2a0   : > { %982 = vmatmul.msk.bf16.gmra.mxu2 %vm301_vm2, %v754_v56 }
 0x2af   : > { %990 = vmatmul.msk.bf16.gmra.mxu1 %vm301_vm2, %v795_v62  ;;  %966 = vmatmul.msk.bf16.gmra.mxu3 %vm301_vm2, %v672_v63 }
 0x2eb   : > { %v574_v1 = vpop.f32.mrf.mxu0 }
 0x2ec   : > { %v506_v0 = vpop.f32.mrf.mxu1 }
 0x2f2   : > { %v511_v2 = vpop.f32.mrf.mxu3 }
 0x2f3   : > { %v615_v3 = vpop.f32.mrf.mxu2  ;;  %v576_v5 = vpop.f32.mrf.mxu0 }
 0x2f4   : > { %v508_v4 = vpop.f32.mrf.mxu1 }
 0x2fa   : > { %v513_v6 = vpop.f32.mrf.mxu3 }
 0x2fb   : > { %v617_v7 = vpop.f32.mrf.mxu2  ;;  %v579_v8 = vpop.f32.mrf.mxu0 }
 0x2fc   : > { %v656_v9 = vpop.f32.mrf.mxu1 }
 0x302   : > { %v536_v10 = vpop.f32.mrf.mxu3 }
 0x303   : > { %v620_v11 = vpop.f32.mrf.mxu2  ;;  %v581_v12 = vpop.f32.mrf.mxu0  ;;  %v537_v22 = vadd.f32 %v536_v10, %v506_v0 }
 0x304   : > { %v658_v13 = vpop.f32.mrf.mxu1 }
 0x305   : > { %v583_v23 = vadd.f32 %v574_v1, %v537_v22 }
 0x307   : > { %v624_v29 = vadd.f32 %v615_v3, %v583_v23 }
 0x309   : > { %v665_v31 = vadd.f32 %v656_v9, %v624_v29 }
 0x30a   : > { %v538_v14 = vpop.f32.mrf.mxu3 }
 0x30b   : > { %v622_v15 = vpop.f32.mrf.mxu2  ;;  %v738_v17 = vpop.f32.mrf.mxu0  ;;  %v539_v28 = vadd.f32 %v538_v14, %v508_v4 }
 0x30c   : > { %v661_v16 = vpop.f32.mrf.mxu1 }
 0x30d   : > { %v584_v30 = vadd.f32 %v576_v5, %v539_v28 }
 0x30f   : > { %v625_v39 = vadd.f32 %v617_v7, %v584_v30 }
 0x311   : > { %v666_v44 = vadd.f32 %v658_v13, %v625_v39 }
 0x312   : > { %v541_v18 = vpop.f32.mrf.mxu3 }
 0x313   : > { %v779_v19 = vpop.f32.mrf.mxu2  ;;  %v740_v21 = vpop.f32.mrf.mxu0  ;;  %v542_v37 = vadd.f32 %v541_v18, %v511_v2 }
 0x314   : > { %v663_v20 = vpop.f32.mrf.mxu1 }
 0x315   : > { %v585_v42 = vadd.f32 %v579_v8, %v542_v37 }
 0x317   : > { %v626_v51 = vadd.f32 %v620_v11, %v585_v42 }
 0x319   : > { %v667_v54 = vadd.f32 %v661_v16, %v626_v51 }
 0x31a   : > { %v543_v24 = vpop.f32.mrf.mxu3 }
 0x31b   : > { %v781_v25 = vpop.f32.mrf.mxu2  ;;  %v743_v26 = vpop.f32.mrf.mxu0 }
 0x31c   : > { %v820_v27 = vpop.f32.mrf.mxu1 }
 0x322   : > { %v697_v32 = vpop.f32.mrf.mxu3 }
 0x323   : > { %v784_v33 = vpop.f32.mrf.mxu2  ;;  %v706_v34 = vadd.f32 %v697_v32, %v665_v31  ;;  %v745_v35 = vpop.f32.mrf.mxu0 }
 0x324   : > { %v822_v36 = vpop.f32.mrf.mxu1 }
 0x325   : > { %v747_v38 = vadd.f32 %v738_v17, %v706_v34 }
 0x327   : > { %v788_v40 = vadd.f32 %v779_v19, %v747_v38 }
 0x329   : > { %v829_v43 = vadd.f32 %v820_v27, %v788_v40 }
 0x32a   : > { %v699_v45 = vpop.f32.mrf.mxu3 }
 0x32b   : > { %v786_v46 = vpop.f32.mrf.mxu2  ;;  %v836_v47 = vadd.f32 %v1020_v41, %v829_v43  ;;  %v707_v48 = vadd.f32 %v699_v45, %v666_v44 }
 0x32c   : > { %v825_v49 = vpop.f32.mrf.mxu1 }
 0x32d   : > { %839 = vst.msk [vmem:[%s278_s19] sm:$0xf] %vm284_vm1, %v836_v47  ;;  %v748_v50 = vadd.f32 %v740_v21, %v707_v48 }
 0x32e   : > { %991 = vst.msk [vmem:[%s278_s19 - $0x2] sm:$0xc0] %vm841_vm7, %v836_v47 }
 0x32f   : > { %v789_v52 = vadd.f32 %v781_v25, %v748_v50 }
 0x331   : > { %v830_v53 = vadd.f32 %v822_v36, %v789_v52 }
 0x332   : > { %v702_v55 = vpop.f32.mrf.mxu3 }
 0x333   : > { %v837_v56 = vadd.f32 %v1020_v41, %v830_v53  ;;  %v708_v57 = vadd.f32 %v702_v55, %v667_v54 }
 0x334   : > { %v827_v58 = vpop.f32.mrf.mxu1 }
 0x335   : > { %992 = vst.msk [vmem:[%s278_s19 + $0x6] sm:$0x3] %vm843_vm8, %v837_v56  ;;  %v749_v59 = vadd.f32 %v743_v26, %v708_v57 }
 0x336   : > { %993 = vst.msk [vmem:[%s278_s19 + $0x4] sm:$0xf0] %vm846_vm9, %v837_v56 }
 0x337   : > { %v790_v60 = vadd.f32 %v784_v33, %v749_v59 }
 0x339   : > { %v831_v61 = vadd.f32 %v825_v49, %v790_v60 }
 0x33a   : > { %v704_v62 = vpop.f32.mrf.mxu3 }
 0x33b   : > { %v838_v63 = vadd.f32 %v1020_v41, %v831_v61 }
 0x33d   : > { %994 = vst.msk [vmem:[%s278_s19 + $0xa] sm:$0x3c] %vm849_vm10, %v838_v63 }
 0x33e PF: > { %s17_s24 = sadd.s32 1, %s1029_s24  }
 0x33f   : > { %p14_p4 = scmp.ge.s32.totalorder %s17_s24, 4  }
 0x341   :  { %16 = sbr.rel (!%p14_p4) target bundleno = 1 (0x1), region = 89 }

// kernel: vqvae_forward.15
= control target key start
LH: loop header
LB: loop body
LE: loop exit
PB: predicated region body
PF: predicated region fallthrough
CT: control target
= control target key end

     0   :  { %s341_s12 = smov 0   ;;  %s373_s0 = inlined_call_operand.vmem [shape: f32[2,4,4,16], index: 0, kind: input, shape index: {}]   ;;  %s374_s1 = inlined_call_operand.vmem [shape: bf16[1,16,16], index: 1, kind: input, shape index: {}]   ;;  %s375_s2 = inlined_call_operand.vmem [shape: f32[1,16], index: 2, kind: input, shape index: {}]   ;;  %s376_s3 = inlined_call_operand.vmem [shape: f32[2,4,4,16], index: 3, kind: output, shape index: {}]  }
   0x1 LB: > { %s280_s13 = sadd.s32 4294967295, %s318_s12   ;;  %p284_p0 = scmp.ge.s32.totalorder %s318_s12, 1  ;;  %s318_s12 = sphi %s341_s12, %s13_s12  }
   0x2   : > { %p137_p1 = scmp.lt.s32.totalorder %s318_s12, 3 }
   0x4   : > { %p138_p2 = pnand %p284_p0, %p137_p1 }
   0x5   : > { %p161_p3 = scmp.lt.s32.totalorder (!%p138_p2), %s280_s13, 1 }
   0x6   : > { %141 = sbr.rel (%p138_p2) target bundleno = 166 (0xa6), region = 32 }
   0xb   : > { %v301_v0 = vld [vmem:[%s374_s1] sm:$0xff]  ;;  %vm176_vm0 = vcmask 130048   ;;  %v320_v1 = vmov 0.0   ;;  %s378_s13 = smov (!%p161_p3, %s280_s13), 1  ;;  %vm180_vm1 = vcmask 125952   ;;  %vm219_vm2 = vcmask 130052  }
   0xc   : > { %177 = vst.msk [vmem:[#allocation2] sm:$0xff] %vm176_vm0, %v320_v1  ;;  %210 = vmatpush.bf16.msra.mxu0 %v301_v0  ;;  %s299_s16 = sshll.u32 %s378_s13, 4  ;;  %v311_v9 = vld [vmem:[%s375_s2] ss:$0 sm:$0xff] }
   0xd   : > { %178 = vst.msk [vmem:[#allocation2 + $0x8] sm:$0xff] %vm176_vm0, %v320_v1  ;;  %s165_s19 = scalar_lea.vmem %s373_s0, %s299_s16  ;;  %s170_s24 = scalar_lea.vmem %s376_s3, %s299_s16 }
   0xe   : > { %v172_v2 = vld [vmem:[%s165_s19] sm:$0xf]  ;;  %v173_v3 = vld [vmem:[%s165_s19 + $0x4] sm:$0xf]  ;;  %v174_v4 = vld [vmem:[%s165_s19 + $0x8] sm:$0xf] }
   0xf   : > { %v175_v5 = vld [vmem:[%s165_s19 + $0xc] sm:$0xf]  ;;  %181 = vst.msk [vmem:[#allocation2] sm:$0xf] %vm180_vm1, %v172_v2 }
  0x10   : > { %182 = vst.msk [vmem:[#allocation2 + $0x4] sm:$0xf] %vm180_vm1, %v173_v3 }
  0x11   : > { %183 = vst.msk [vmem:[#allocation2 + $0x8] sm:$0xf] %vm180_vm1, %v174_v4 }
  0x12   : > { %184 = vst.msk [vmem:[#allocation2 + $0xc] sm:$0xf] %vm180_vm1, %v175_v5 }
  0x17   : > { %v185_v6 = vld [vmem:[#allocation2] sm:$0xff] }
  0x19   : > { %v186_v7 = vld [vmem:[#allocation2 + $0x8] sm:$0xff] }
  0x1a   : > { %v187_v8 = vpack.c.bf16 %v186_v7, %v185_v6 }
  0x1c   : > { %293 = vmatmul.msk.bf16.vlgmr.msra.gmra.mxu0 %vm176_vm0, %v187_v8 }
  0x99   : > { %v212_v10 = vpop.f32.mrf.mxu0 }
  0x9a   : > { %v213_v11 = vadd.f32 %v311_v9, %v212_v10 }
  0x9c   : > { %217 = vst.msk [vmem:[%s170_s24] sm:$0xf] %vm180_vm1, %v213_v11 }
  0x9d   : > { %294 = vst.msk [vmem:[%s170_s24] sm:$0xf0] %vm219_vm2, %v213_v11 }
  0xa1   : > { %v214_v12 = vpop.f32.mrf.mxu0 }
  0xa2   : > { %v215_v13 = vadd.f32 %v311_v9, %v214_v12 }
  0xa4   : > { %295 = vst.msk [vmem:[%s170_s24 + $0x8] sm:$0xf] %vm180_vm1, %v215_v13 }
  0xa5   : > { %296 = vst.msk [vmem:[%s170_s24 + $0x8] sm:$0xf0] %vm219_vm2, %v215_v13 }
  0xa6 PF: > { %s13_s12 = sadd.s32 1, %s318_s12  }
  0xa7   : > { %p10_p4 = scmp.ge.s32.totalorder %s13_s12, 4  }
  0xa9   :  { %12 = sbr.rel (!%p10_p4) target bundleno = 1 (0x1), region = 65 }

// kernel: tile.41
= control target key start
LH: loop header
LB: loop body
LE: loop exit
PB: predicated region body
PF: predicated region fallthrough
CT: control target
= control target key end

     0   :  { %s22_s0 = inlined_call_operand.vmem [shape: f32[8], index: 0, kind: input, shape index: {}]   ;;  %s23_s1 = inlined_call_operand.vmem [shape: f32[4,8], index: 1, kind: output, shape index: {}]  }
   0x1   :  { %v4_v0 = vld [vmem:[%s22_s0] ss:$0 sm:$0xff] }
   0x2   :  { %5 = vst [vmem:[%s23_s1] sm:$0xf] %v4_v0 }

// kernel: tile.42
= control target key start
LH: loop header
LB: loop body
LE: loop exit
PB: predicated region body
PF: predicated region fallthrough
CT: control target
= control target key end

     0   :  { %s37_s8 = smov 8   ;;  %s38_s9 = smov 16   ;;  %vm7_vm0 = vcmask 64512   ;;  %vm13_vm1 = vcmask 261312   ;;  %vm19_vm2 = vcmask 195712   ;;  %vm25_vm3 = vcmask 130112   ;;  %s55_s0 = inlined_call_operand.vmem [shape: f32[4,8], index: 0, kind: input, shape index: {}]   ;;  %s56_s1 = inlined_call_operand.vmem [shape: f32[1,32], index: 1, kind: output, shape index: {}]  }
   0x1   :  { %v4_v0 = vld [vmem:[%s55_s0] sm:$0xf]  ;;  %s36_s0 = smov 24  }
   0x2   :  { %5 = vst [vmem:[#allocation1] sm:$0xf] %v4_v0 }
   0x9   :  { %v10_v1 = vld [vmem:[#allocation1 + $0x3] sm:$0x1]   ;;  %v22_v2 = vld [vmem:[#allocation1 + $0x1] sm:$0x1]   ;;  %v16_v3 = vld [vmem:[#allocation1 + $0x2] sm:$0x1]  }
   0xa   :  { %11 = vrot.lane.b32.xlu0 %v10_v1, %s36_s0  ;;  %23 = vrot.lane.b32.xlu1 %v22_v2, %s37_s8  ;;  %v6_v4 = vld [vmem:[#allocation1] sm:$0x1]  }
   0xb   :  { %8 = vst.msk [vmem:[#allocation0] sm:$0x1] %vm7_vm0, %v6_v4  }
  0x12   :  { %17 = vrot.lane.b32.xlu0 %v16_v3, %s38_s9 }
  0x7c   :  { %v12_v5 = vpop.permute.xlu0 %11   ;;  %v24_v6 = vpop.permute.xlu1 %23  }
  0x7d   :  { %14 = vst.msk [vmem:[#allocation0] sm:$0x1] %vm13_vm1, %v12_v5  }
  0x84   :  { %v18_v7 = vpop.permute.xlu0 %17  }
  0x85   :  { %20 = vst.msk [vmem:[#allocation0] sm:$0x1] %vm19_vm2, %v18_v7  }
  0x86   :  { %26 = vst.msk [vmem:[#allocation0] sm:$0x1] %vm25_vm3, %v24_v6  }
  0x8d   :  { %v29_v8 = vld [vmem:[#allocation0] sm:$0x1] }
  0x8e   :  { %32 = vst [vmem:[%s56_s1] sm:$0x1] %v29_v8 }

// kernel: tile.29
= control target key start
LH: loop header
LB: loop body
LE: loop exit
PB: predicated region body
PF: predicated region fallthrough
CT: control target
= control target key end

     0   :  { %s52_s14 = smov 8   ;;  %s53_s15 = smov 16   ;;  %vm19_vm0 = vcmask 64512   ;;  %vm25_vm1 = vcmask 261312   ;;  %vm31_vm2 = vcmask 195712   ;;  %vm37_vm3 = vcmask 130112   ;;  %s79_s0 = inlined_call_operand.vmem [shape: f32[4,8,4], index: 0, kind: input, shape index: {}]   ;;  %s80_s1 = inlined_call_operand.vmem [shape: f32[32,4], index: 1, kind: output, shape index: {}]  }
   0x1   :  { %v45_v0 = vld [vmem:[%s79_s0 + $0xc] sm:$0xf]  ;;  %v46_v1 = vld [vmem:[%s79_s0 + $0x8] sm:$0xf]  ;;  %v47_v2 = vld [vmem:[%s79_s0 + $0x4] sm:$0xf] }
   0x2   :  { %7 = vst [vmem:[#allocation1 + $0x18] sm:$0xf] %v45_v0  ;;  %v16_v3 = vld [vmem:[%s79_s0] sm:$0xf]  ;;  %s51_s0 = smov 24  }
   0x3   :  { %11 = vst [vmem:[#allocation1 + $0x10] sm:$0xf] %v46_v1 }
   0x4   :  { %15 = vst [vmem:[#allocation1 + $0x8] sm:$0xf] %v47_v2 }
   0x5   :  { %17 = vst [vmem:[#allocation1] sm:$0xf] %v16_v3 }
   0xc   :  { %v22_v4 = vld [vmem:[#allocation1 + $0x3] ss:$8 sm:$0xf]   ;;  %v34_v5 = vld [vmem:[#allocation1 + $0x1] ss:$8 sm:$0xf]  }
   0xd   :  { %23 = vrot.lane.b32.xlu0 %v22_v4, %s51_s0  ;;  %35 = vrot.lane.b32.xlu1 %v34_v5, %s52_s14  ;;  %v28_v6 = vld [vmem:[#allocation1 + $0x2] ss:$8 sm:$0xf]   ;;  %v18_v7 = vld [vmem:[#allocation1] ss:$8 sm:$0xf]  }
   0xe   :  { %20 = vst.msk [vmem:[#allocation0] sm:$0xf] %vm19_vm0, %v18_v7  }
  0x15   :  { %29 = vrot.lane.b32.xlu0 %v28_v6, %s53_s15 }
  0x7f   :  { %v24_v8 = vpop.permute.xlu0 %23   ;;  %v36_v9 = vpop.permute.xlu1 %35  }
  0x80   :  { %26 = vst.msk [vmem:[#allocation0] sm:$0xf] %vm25_vm1, %v24_v8  }
  0x87   :  { %v30_v10 = vpop.permute.xlu0 %29  }
  0x88   :  { %32 = vst.msk [vmem:[#allocation0] sm:$0xf] %vm31_vm2, %v30_v10  }
  0x89   :  { %38 = vst.msk [vmem:[#allocation0] sm:$0xf] %vm37_vm3, %v36_v9  }
  0x90   :  { %v41_v11 = vld [vmem:[#allocation0] sm:$0xf] }
  0x91   :  { %44 = vst [vmem:[%s80_s1] sm:$0xf] %v41_v11 }

// kernel: vqvae_forward.16
= control target key start
LH: loop header
LB: loop body
LE: loop exit
PB: predicated region body
PF: predicated region fallthrough
CT: control target
= control target key end

     0   :  { %11 = vsyncpa [#allocation4], 0  ;;  %s819_s18 = smov 0   ;;  %s1018_s0 = inlined_call_operand.vmem [shape: f32[32,16], index: 0, kind: input, shape index: {}]   ;;  %s1019_s1 = inlined_call_operand.vmem [shape: f32[128,16], index: 1, kind: input, shape index: {}]   ;;  %s1020_s2 = inlined_call_operand.vmem [shape: f32[32,16], index: 2, kind: output, shape index: {0}]   ;;  %s1021_s3 = inlined_call_operand.vmem [shape: s32[32,1], index: 3, kind: output, shape index: {1}]   ;;  %s1022_s4 = inlined_call_operand.hbm [shape: f32[1,1], index: 4, kind: output, shape index: {2}]   ;;  %s1023_s5 = inlined_call_operand.vmem [shape: f32[1,128], index: 5, kind: output, shape index: {3}]  }
   0x1 LB: > { %s825_s19 = sadd.s32 4294967295, %s782_s18   ;;  %p685_p0 = scmp.ge.s32.totalorder %s782_s18, 1  ;;  %s782_s18 = sphi %s819_s18, %s17_s18  }
   0x2   : > { %p186_p1 = scmp.lt.s32.totalorder %s782_s18, 3 }
   0x4   : > { %p187_p2 = pnand %p685_p0, %p186_p1 }
   0x5   : > { %s686_s20 = sshll.u32 (!%p187_p2), %s825_s19, 1  ;;  %p692_p4 = scmp.ne.s32.totalorder (!%p187_p2), %s825_s19, 0 }
   0x6   : > { %190 = sbr.rel (%p187_p2) target bundleno = 1098 (0x44a), region = 28  ;;  %p220_p3 = scmp.lt.s32.totalorder (!%p187_p2), %s686_s20, 3 }
   0xb   : > { %s1025_s20 = smov (!%p220_p3, %s686_s20), 3  ;;  %240 = sbr.rel (%p692_p4) target bundleno = 209 (0xd1), region = 32 }
   0xc   : > { %s687_s21 = sshll.u32 %s1025_s20, 3 }
   0xd   : > { %s833_s24 = scalar_lea.vmem %s1018_s0, %s687_s21  ;;  %s838_s27 = scalar_lea.vmem %s1020_s2, %s687_s21 }
   0xe   : > { %s843_s30 = scalar_lea.vmem %s1021_s3, %s687_s21 }
  0x10   : > { %vm241_vm0 = vcmask 0   ;;  %v259_v0 = vld [vmem:[%s1019_s1 + $0x78] sm:$0xff]  ;;  %vm276_vm1 = vcmask 130048   ;;  %v258_v1 = vld [vmem:[%s1019_s1 + $0x70] sm:$0xff]  ;;  %v784_v2 = vmov 0.0   ;;  %v257_v5 = vld [vmem:[%s1019_s1 + $0x68] sm:$0xff] }
  0x11   : > { %242 = vst.msk [vmem:[#allocation3] sm:$0x1] %vm241_vm0, %v784_v2  ;;  %v275_v3 = vmul.f32 %v259_v0, %v259_v0  ;;  %v274_v4 = vmul.f32 %v258_v1, %v258_v1  ;;  %v273_v6 = vmul.f32 %v257_v5, %v257_v5  ;;  %v256_v7 = vld [vmem:[%s1019_s1 + $0x60] sm:$0xff]  ;;  %v255_v9 = vld [vmem:[%s1019_s1 + $0x58] sm:$0xff]  ;;  %v254_v11 = vld [vmem:[%s1019_s1 + $0x50] sm:$0xff]  ;;  %v785_v33 = vmov 1.0  }
  0x12   : > { %243 = vst [vmem:[%s1023_s5] sm:$0x1] %v784_v2  ;;  %v272_v8 = vmul.f32 %v256_v7, %v256_v7  ;;  %v271_v10 = vmul.f32 %v255_v9, %v255_v9  ;;  %v270_v12 = vmul.f32 %v254_v11, %v254_v11  ;;  %v253_v13 = vld [vmem:[%s1019_s1 + $0x48] sm:$0xff]  ;;  %v252_v15 = vld [vmem:[%s1019_s1 + $0x40] sm:$0xff]  ;;  %v251_v17 = vld [vmem:[%s1019_s1 + $0x38] sm:$0xff] }
  0x13   : > { %693 = vmatpush.xpose.msk.msra.mxu0 %vm276_vm1, %v275_v3  ;;  %v269_v14 = vmul.f32 %v253_v13, %v253_v13  ;;  %v268_v16 = vmul.f32 %v252_v15, %v252_v15  ;;  %v267_v18 = vmul.f32 %v251_v17, %v251_v17  ;;  %v250_v19 = vld [vmem:[%s1019_s1 + $0x30] sm:$0xff]  ;;  %v249_v21 = vld [vmem:[%s1019_s1 + $0x28] sm:$0xff]  ;;  %v248_v23 = vld [vmem:[%s1019_s1 + $0x20] sm:$0xff] }
  0x14   : > { %v266_v20 = vmul.f32 %v250_v19, %v250_v19  ;;  %v265_v22 = vmul.f32 %v249_v21, %v249_v21  ;;  %v264_v24 = vmul.f32 %v248_v23, %v248_v23  ;;  %v247_v25 = vld [vmem:[%s1019_s1 + $0x18] sm:$0xff]  ;;  %v246_v27 = vld [vmem:[%s1019_s1 + $0x10] sm:$0xff]  ;;  %v245_v29 = vld [vmem:[%s1019_s1 + $0x8] sm:$0xff] }
  0x15   : > { %v263_v26 = vmul.f32 %v247_v25, %v247_v25  ;;  %v262_v28 = vmul.f32 %v246_v27, %v246_v27  ;;  %v261_v30 = vmul.f32 %v245_v29, %v245_v29  ;;  %v244_v31 = vld [vmem:[%s1019_s1] sm:$0xff] }
  0x16   : > { %v260_v32 = vmul.f32 %v244_v31, %v244_v31 }
  0x17   : > { %694 = vmatpush.xpose.msk.msra.mxu0 %vm276_vm1, %v274_v4 }
  0x1b   : > { %695 = vmatpush.xpose.msk.msra.mxu0 %vm276_vm1, %v273_v6 }
  0x1f   : > { %696 = vmatpush.xpose.msk.msra.mxu0 %vm276_vm1, %v272_v8 }
  0x23   : > { %697 = vmatpush.xpose.msk.msra.mxu0 %vm276_vm1, %v271_v10 }
  0x27   : > { %698 = vmatpush.xpose.msk.msra.mxu0 %vm276_vm1, %v270_v12 }
  0x2b   : > { %699 = vmatpush.xpose.msk.msra.mxu0 %vm276_vm1, %v269_v14 }
  0x2f   : > { %700 = vmatpush.xpose.msk.msra.mxu0 %vm276_vm1, %v268_v16 }
  0x33   : > { %701 = vmatpush.xpose.msk.msra.mxu0 %vm276_vm1, %v267_v18 }
  0x37   : > { %702 = vmatpush.xpose.msk.msra.mxu0 %vm276_vm1, %v266_v20 }
  0x3b   : > { %703 = vmatpush.xpose.msk.msra.mxu0 %vm276_vm1, %v265_v22 }
  0x3f   : > { %704 = vmatpush.xpose.msk.msra.mxu0 %vm276_vm1, %v264_v24 }
  0x43   : > { %705 = vmatpush.xpose.msk.msra.mxu0 %vm276_vm1, %v263_v26 }
  0x47   : > { %706 = vmatpush.xpose.msk.msra.mxu0 %vm276_vm1, %v262_v28 }
  0x4b   : > { %707 = vmatpush.xpose.msk.msra.mxu0 %vm276_vm1, %v261_v30 }
  0x4f   : > { %708 = vmatpush.xpose.msk.msra.mxu0 %vm276_vm1, %v260_v32 }
  0x52   : > { %709 = vmatmul.msk.f32.vlgmr.msra.gmra.mxu0 %vm276_vm1, %v785_v33 }
  0xcf   : > { %v345_v34 = vpop.f32.mrf.mxu0 }
  0xd0   : > { %348 = vst [vmem:[#allocation2] sm:$0x1] %v345_v34 }
  0xd1 PF: > { %v365_v35 = vld [vmem:[%s1019_s1 + $0x70] sm:$0xff]  ;;  %v366_v36 = vld [vmem:[%s1019_s1 + $0x78] sm:$0xff]  ;;  %vm376_vm2 = vcmask 130048   ;;  %v363_v38 = vld [vmem:[%s1019_s1 + $0x60] sm:$0xff]  ;;  %v436_v10 = vlaneseq  ;;  %vm508_vm8 = vcmask 7168   ;;  %s585_s20 = sshll.u32 %s1022_s4, 4  ;;  %s586_s20 = int_to_ptr.hbm [resolvable:$true] %s585_s20 }
  0xd2   : > { %v375_v37 = vpack.c.bf16 %v366_v36, %v365_v35  ;;  %483 = vmatpush.msra.mxu1 %v366_v36  ;;  %v364_v39 = vld [vmem:[%s1019_s1 + $0x68] sm:$0xff]  ;;  %v362_v42 = vld [vmem:[%s1019_s1 + $0x58] sm:$0xff]  ;;  %v361_v44 = vld [vmem:[%s1019_s1 + $0x50] sm:$0xff]  ;;  %vm545_vm13 = vcmask 0   ;;  %p728_p5 = scmp.eq.s32.totalorder %s825_s19, 1 }
  0xd3   : > { %v374_v41 = vpack.c.bf16 %v364_v39, %v363_v38  ;;  %v360_v45 = vld [vmem:[%s1019_s1 + $0x48] sm:$0xff]  ;;  %v373_v46 = vpack.c.bf16 %v362_v42, %v361_v44  ;;  %v359_v47 = vld [vmem:[%s1019_s1 + $0x40] sm:$0xff]  ;;  %v358_v48 = vld [vmem:[%s1019_s1 + $0x38] sm:$0xff]  ;;  %v985_v13 = vand.u32 127, %v436_v10 }
  0xd4   : > { %v402_v40 = vsel %vm376_vm2, %v375_v37, 0  ;;  %484 = vmatpush.msra.mxu1 %v365_v35  ;;  %v357_v50 = vld [vmem:[%s1019_s1 + $0x30] sm:$0xff]  ;;  %v356_v51 = vld [vmem:[%s1019_s1 + $0x28] sm:$0xff]  ;;  %v372_v52 = vpack.c.bf16 %v360_v45, %v359_v47  ;;  %v355_v53 = vld [vmem:[%s1019_s1 + $0x20] sm:$0xff] }
  0xd5   : > { %404 = vmatpush.bf16.xpose.msra.mxu0 %v402_v40  ;;  %v399_v43 = vsel %vm376_vm2, %v374_v41, 0  ;;  %v396_v49 = vsel %vm376_vm2, %v373_v46, 0  ;;  %v354_v54 = vld [vmem:[%s1019_s1 + $0x18] sm:$0xff]  ;;  %v353_v56 = vld [vmem:[%s1019_s1 + $0x10] sm:$0xff]  ;;  %v352_v57 = vld [vmem:[%s1019_s1 + $0x8] sm:$0xff]  ;;  %v371_v58 = vpack.c.bf16 %v358_v48, %v357_v50  ;;  %v370_v63 = vpack.c.bf16 %v356_v51, %v355_v53 }
  0xd6   : > { %485 = vmatpush.msra.mxu1 %v364_v39  ;;  %v393_v55 = vsel %vm376_vm2, %v372_v52, 0  ;;  %v351_v59 = vld [vmem:[%s1019_s1] sm:$0xff]  ;;  %v974_v1 = vld [vmem:[%s833_s24 + $0x8] sm:$0xff]  ;;  %v369_v5 = vpack.c.bf16 %v354_v54, %v353_v56  ;;  %vm438_vm3 = vcmp.lt.s32.totalorder %v985_v13, 32  ;;  %v786_v52 = vmov 1.0  }
  0xd7   : > { %v390_v60 = vsel %vm376_vm2, %v371_v58, 0  ;;  %v968_v61 = vld [vmem:[%s833_s24] sm:$0xff]  ;;  %v419_v2 = vmul.f32 %v974_v1, %v974_v1  ;;  %v387_v3 = vsel %vm376_vm2, %v370_v63, 0  ;;  %v368_v7 = vpack.c.bf16 %v352_v57, %v351_v59  ;;  %s715_s24 = sshll.u32 %s825_s19, 4 }
  0xd8   : > { %486 = vmatpush.msra.mxu1 %v363_v38  ;;  %v418_v62 = vmul.f32 %v968_v61, %v968_v61  ;;  %v384_v6 = vsel %vm376_vm2, %v369_v5, 0  ;;  %v367_v9 = vpack.c.bf16 %v974_v1, %v968_v61  ;;  %v743_v15 = vld [vmem:[#allocation2] ss:$0 sm:$0xff] }
  0xd9   : > { %v423_v4 = vsel %vm376_vm2, %v419_v2, 0.0  ;;  %v381_v8 = vsel %vm376_vm2, %v368_v7, 0 }
  0xda   : > { %487 = vmatpush.msra.mxu1 %v362_v42  ;;  %v420_v0 = vsel %vm376_vm2, %v418_v62, 0.0  ;;  %v512_v42 = vshrl.u32 %v436_v10, 7 }
  0xdb   : > { %421 = vadd.xlane.f32.xlu0 %v420_v0 }
  0xdc   : > { %488 = vmatpush.msra.mxu1 %v361_v44  ;;  %v513_v46 = vadd.s32 8, %v512_v42 }
  0xdd   : > { %405 = vmatpush.bf16.xpose.msra.mxu0 %v399_v43 }
  0xde   : > { %489 = vmatpush.msra.mxu1 %v360_v45 }
  0xe0   : > { %490 = vmatpush.msra.mxu1 %v359_v47  ;;  %v515_v47 = vstv %s715_s24 }
  0xe2   : > { %491 = vmatpush.msra.mxu1 %v358_v48 }
  0xe3   : > { %424 = vadd.xlane.f32.xlu0 %v423_v4 }
  0xe4   : > { %492 = vmatpush.msra.mxu1 %v357_v50  ;;  %v516_v50 = vadd.s32 %v515_v47, %v512_v42 }
  0xe5   : > { %406 = vmatpush.bf16.xpose.msra.mxu0 %v396_v49 }
  0xe6   : > { %493 = vmatpush.msra.mxu1 %v356_v51  ;;  %v517_v51 = vadd.s32 %v515_v47, %v513_v46  ;;  %vm518_vm10 = vcmp.lt.s32.totalorder %v516_v50, 32 }
  0xe8   : > { %494 = vmatpush.msra.mxu1 %v355_v53  ;;  %vm519_vm11 = vcmp.lt.s32.totalorder %v517_v51, 32 }
  0xea   : > { %495 = vmatpush.msra.mxu1 %v354_v54 }
  0xec   : > { %496 = vmatpush.msra.mxu1 %v353_v56 }
  0xed   : > { %407 = vmatpush.bf16.xpose.msra.mxu0 %v393_v55 }
  0xee   : > { %497 = vmatpush.msra.mxu1 %v352_v57  ;;  %v787_v57 = vmov 0.0  }
  0xf0   : > { %498 = vmatpush.msra.mxu1 %v351_v59  ;;  %v716_v59 = vsel %vm518_vm10, 1.0, %v787_v57 }
  0xf5   : > { %408 = vmatpush.bf16.xpose.msra.mxu0 %v390_v60  ;;  %v717_v60 = vsel %vm519_vm11, 1.0, %v787_v57 }
  0xfd   : > { %409 = vmatpush.bf16.xpose.msra.mxu0 %v387_v3 }
 0x105   : > { %410 = vmatpush.bf16.xpose.msra.mxu0 %v384_v6 }
 0x10d   : > { %411 = vmatpush.bf16.xpose.msra.mxu0 %v381_v8  ;;  %v547_v8 = vld [vmem:[%s1023_s5] sm:$0x1] }
 0x114   : > { %710 = vmatmul.msk.bf16.vlgmr.msra.gmra.mxu0 %vm376_vm2, %v367_v9 }
 0x14e   : > { %v422_v11 = vpop.xlane.xlu0 %421 }
 0x156   : > { %v425_v20 = vpop.xlane.xlu0 %424 }
 0x191   : > { %v413_v12 = vpop.f32.mrf.mxu0 }
 0x192   : > { %v426_v14 = vmul.f32 2.0, %v413_v12 }
 0x194   : > { %v428_v16 = vsub.f32 %v422_v11, %v426_v14 }
 0x196   : > { %v434_v17 = vadd.f32 %v743_v15, %v428_v16 }
 0x198   : > { %v439_v18 = vsel %vm438_vm3, %v434_v17, inf }
 0x199   : > { %441 = vmin.xlane.f32.xlu1 %v439_v18  ;;  %v415_v19 = vpop.f32.mrf.mxu0 }
 0x19a   : > { %v427_v21 = vmul.f32 2.0, %v415_v19 }
 0x19c   : > { %v429_v22 = vsub.f32 %v425_v20, %v427_v21 }
 0x19e   : > { %v435_v23 = vadd.f32 %v743_v15, %v429_v22 }
 0x1a0   : > { %v440_v24 = vsel %vm438_vm3, %v435_v23, inf }
 0x1a1   : > { %443 = vmin.xlane.f32.xlu1 %v440_v24 }
 0x20c   : > { %v442_v25 = vpop.xlane.xlu1 %441 }
 0x20d   : > { %vm445_vm4 = vcmp.le.f32.partialorder %v439_v18, %v442_v25 }
 0x20e   : > { %v447_v26 = vsel %vm445_vm4, %v985_v13, 128 }
 0x20f   : > { %v450_v27 = vshra.s32 %v447_v26, 16  ;;  %v449_v33 = vand.u32 65535, %v447_v26 }
 0x211   : > { %v452_v28 = vcvt.s32.f32 %v450_v27  ;;  %v451_v35 = vcvt.s32.f32 %v449_v33 }
 0x213   : > { %453 = vmin.xlane.f32.xlu2 %v452_v28 }
 0x214   : > { %v444_v29 = vpop.xlane.xlu1 %443 }
 0x215   : > { %vm446_vm5 = vcmp.le.f32.partialorder %v440_v24, %v444_v29 }
 0x216   : > { %v448_v30 = vsel %vm446_vm5, %v985_v13, 128 }
 0x217   : > { %v464_v31 = vshra.s32 %v448_v30, 16  ;;  %v463_v37 = vand.u32 65535, %v448_v30 }
 0x219   : > { %v466_v32 = vcvt.s32.f32 %v464_v31  ;;  %v465_v39 = vcvt.s32.f32 %v463_v37 }
 0x21b   : > { %467 = vmin.xlane.f32.xlu2 %v466_v32 }
 0x286   : > { %v454_v34 = vpop.xlane.xlu2 %453 }
 0x287   : > { %vm455_vm6 = vcmp.eq.f32.partialorder %v452_v28, %v454_v34  ;;  %v460_v41 = vcvt.f32.s32 %v454_v34  ;;  %v528_v28 = vld [vmem:[#allocation3] sm:$0x1] }
 0x288   : > { %v456_v36 = vsel %vm455_vm6, %v451_v35, inf }
 0x289   : > { %457 = vmin.xlane.f32.xlu0 %v456_v36  ;;  %v461_v44 = vshll.u32 %v460_v41, 16 }
 0x28e   : > { %v468_v38 = vpop.xlane.xlu2 %467 }
 0x28f   : > { %vm469_vm7 = vcmp.eq.f32.partialorder %v466_v32, %v468_v38  ;;  %v474_v49 = vcvt.f32.s32 %v468_v38 }
 0x290   : > { %v470_v40 = vsel %vm469_vm7, %v465_v39, inf }
 0x291   : > { %471 = vmin.xlane.f32.xlu1 %v470_v40  ;;  %v475_v53 = vshll.u32 %v474_v49, 16 }
 0x2fc   : > { %v458_v43 = vpop.xlane.xlu0 %457 }
 0x2fd   : > { %v459_v45 = vcvt.f32.s32 %v458_v43 }
 0x2ff   : > { %v462_v48 = vadd.s32 %v461_v44, %v459_v45 }
 0x301   : > { %509 = vst.msk [vmem:[%s843_s30] sm:$0xff] %vm508_vm8, %v462_v48  ;;  %vm477_vm9 = vcmp.eq.s32.totalorder %v985_v13, %v462_v48 }
 0x302   : > { %713 = vmatmul.msk.f32.vlgmr.msra.gmra.mxu1 %vm477_vm9, %v786_v52  ;;  %v711_v58 = vsel %vm477_vm9, 1.0, %v787_v57 }
 0x303   : > { %v548_v63 = vmul.f32 %v716_v59, %v711_v58 }
 0x304   : > { %v472_v54 = vpop.xlane.xlu1 %471 }
 0x305   : > { %v473_v55 = vcvt.f32.s32 %v472_v54 }
 0x307   : > { %v476_v56 = vadd.s32 %v475_v53, %v473_v55 }
 0x309   : > { %510 = vst.msk [vmem:[%s843_s30 + $0x8] sm:$0xff] %vm508_vm8, %v476_v56  ;;  %vm478_vm12 = vcmp.eq.s32.totalorder %v985_v13, %v476_v56 }
 0x30a   : > { %v712_v62 = vsel %vm478_vm12, 1.0, %v787_v57  ;;  %714 = vmatmul.msk.f32.gmra.mxu1 %vm478_vm12, %v786_v52 }
 0x30b   : > { %v549_v0 = vmul.f32 %v717_v60, %v712_v62 }
 0x30d   : > { %v550_v2 = vadd.f32 %v549_v0, %v548_v63 }
 0x30f   : > { %v551_v3 = vrot.slane %v550_v2, 4 }
 0x311   : > { %v552_v4 = vadd.f32 %v551_v3, %v550_v2 }
 0x313   : > { %v553_v5 = vrot.slane %v552_v4, 2 }
 0x315   : > { %v554_v6 = vadd.f32 %v553_v5, %v552_v4 }
 0x317   : > { %v555_v7 = vrot.slane %v554_v6, 1 }
 0x319   : > { %v556_v9 = vadd.f32 %v555_v7, %v554_v6 }
 0x31b   : > { %v557_v10 = vadd.f32 %v556_v9, %v547_v8 }
 0x31d   : > { %558 = vst [vmem:[%s1023_s5] sm:$0x1] %v557_v10 }
 0x37f   : > { %v500_v11 = vpop.f32.mrf.mxu1 }
 0x380   : > { %506 = vst.msk [vmem:[%s838_s27] sm:$0xff] %vm376_vm2, %v500_v11  ;;  %v524_v12 = vsub.f32 %v500_v11, %v968_v61 }
 0x382   : > { %v526_v13 = vmul.f32 %v716_v59, %v524_v12 }
 0x384   : > { %v529_v16 = vmul.f32 %v526_v13, %v526_v13 }
 0x386   : > { %v531_v19 = vsel %vm376_vm2, %v529_v16, 0.0 }
 0x387   : > { %v503_v14 = vpop.f32.mrf.mxu1 }
 0x388   : > { %507 = vst.msk [vmem:[%s838_s27 + $0x8] sm:$0xff] %vm376_vm2, %v503_v14  ;;  %v525_v15 = vsub.f32 %v503_v14, %v974_v1  ;;  %s788_s27 = smov [#allocation3]  }
 0x389   : > { %s583_s15 = sshll.u32 %s788_s27, 4  ;;  %s584_s15 = int_to_ptr.vmem [resolvable:$true] %s583_s15 }
 0x38a   : > { %v527_v17 = vmul.f32 %v717_v60, %v525_v15 }
 0x38c   : > { %v530_v18 = vmul.f32 %v527_v17, %v527_v17 }
 0x38e   : > { %v532_v20 = vsel %vm376_vm2, %v530_v18, 0.0 }
 0x38f   : > { %v533_v21 = vadd.f32 %v532_v20, %v531_v19 }
 0x391   : > { %534 = vadd.xlane.f32.xlu2 %v533_v21 }
 0x404   : > { %v535_v22 = vpop.xlane.xlu2 %534 }
 0x405   : > { %v536_v23 = vrot.slane %v535_v22, 4 }
 0x407   : > { %v537_v24 = vadd.f32 %v536_v23, %v535_v22 }
 0x409   : > { %v538_v61 = vrot.slane %v537_v24, 2 }
 0x40b   : > { %v539_v25 = vadd.f32 %v538_v61, %v537_v24 }
 0x40d   : > { %v540_v26 = vrot.slane %v539_v25, 1 }
 0x40f   : > { %v541_v27 = vadd.f32 %v540_v26, %v539_v25 }
 0x411   : > { %722 = vpush %v541_v27 }
 0x442   : > { %s723_s21 = spop %722 }
 0x443   : > { %v543_v1 = vstv %s723_s21 }
 0x444   : > { %v544_v29 = vadd.f32 %v543_v1, %v528_v28 }
 0x446   : > { %546 = vst.msk [vmem:[#allocation3] sm:$0x1] %vm545_vm13, %v544_v29 }
 0x447   : > { %725 = dma.vmem_to_hbm [thread:$0]  (%p728_p5), %s584_s15, 16, %s586_s20, [#allocation4]  }
 0x448   : > { %777 = dma.done.wait (%p728_p5), [#allocation4], 16  }
 0x449   : > { %779 = vsyncadd (%p728_p5), [#allocation4], 4294967280 }
 0x44a PF: > { %s17_s18 = sadd.s32 1, %s782_s18  }
 0x44b   : > { %p14_p6 = scmp.ge.s32.totalorder %s17_s18, 4  }
 0x44d   :  { %16 = sbr.rel (!%p14_p6) target bundleno = 1 (0x1), region = 91 }
 0x452   :  { %621 = vsyncpa [#allocation4], 1 }
 0x453   :  { %623 = vsyncpa [#allocation4 + $0x1], 1 }

// kernel: tile.48
= control target key start
LH: loop header
LB: loop body
LE: loop exit
PB: predicated region body
PF: predicated region fallthrough
CT: control target
= control target key end

     0   :  { %s22_s0 = inlined_call_operand.vmem [shape: f32[3], index: 0, kind: input, shape index: {}]   ;;  %s23_s1 = inlined_call_operand.vmem [shape: f32[4,3], index: 1, kind: output, shape index: {}]  }
   0x1   :  { %v4_v0 = vld [vmem:[%s22_s0] ss:$0 sm:$0xff] }
   0x2   :  { %5 = vst [vmem:[%s23_s1] sm:$0xf] %v4_v0 }

// kernel: tile.49
= control target key start
LH: loop header
LB: loop body
LE: loop exit
PB: predicated region body
PF: predicated region fallthrough
CT: control target
= control target key end

     0   :  { %s37_s8 = smov 3   ;;  %s38_s9 = smov 6   ;;  %vm7_vm0 = vcmask 23552   ;;  %vm13_vm1 = vcmask 97352   ;;  %vm19_vm2 = vcmask 72752   ;;  %vm25_vm3 = vcmask 48152   ;;  %s55_s0 = inlined_call_operand.vmem [shape: f32[4,3], index: 0, kind: input, shape index: {}]   ;;  %s56_s1 = inlined_call_operand.vmem [shape: f32[1,12], index: 1, kind: output, shape index: {}]  }
   0x1   :  { %v4_v0 = vld [vmem:[%s55_s0] sm:$0xf]  ;;  %s36_s0 = smov 9  }
   0x2   :  { %5 = vst [vmem:[#allocation1] sm:$0xf] %v4_v0 }
   0x9   :  { %v10_v1 = vld [vmem:[#allocation1 + $0x3] sm:$0x1]   ;;  %v22_v2 = vld [vmem:[#allocation1 + $0x1] sm:$0x1]   ;;  %v16_v3 = vld [vmem:[#allocation1 + $0x2] sm:$0x1]  }
   0xa   :  { %11 = vrot.lane.b32.xlu0 %v10_v1, %s36_s0  ;;  %23 = vrot.lane.b32.xlu1 %v22_v2, %s37_s8  ;;  %v6_v4 = vld [vmem:[#allocation1] sm:$0x1]  }
   0xb   :  { %8 = vst.msk [vmem:[#allocation0] sm:$0x1] %vm7_vm0, %v6_v4  }
  0x12   :  { %17 = vrot.lane.b32.xlu0 %v16_v3, %s38_s9 }
  0x7c   :  { %v12_v5 = vpop.permute.xlu0 %11   ;;  %v24_v6 = vpop.permute.xlu1 %23  }
  0x7d   :  { %14 = vst.msk [vmem:[#allocation0] sm:$0x1] %vm13_vm1, %v12_v5  }
  0x84   :  { %v18_v7 = vpop.permute.xlu0 %17  }
  0x85   :  { %20 = vst.msk [vmem:[#allocation0] sm:$0x1] %vm19_vm2, %v18_v7  }
  0x86   :  { %26 = vst.msk [vmem:[#allocation0] sm:$0x1] %vm25_vm3, %v24_v6  }
  0x8d   :  { %v29_v8 = vld [vmem:[#allocation0] sm:$0x1] }
  0x8e   :  { %32 = vst [vmem:[%s56_s1] sm:$0x1] %v29_v8 }

// kernel: vqvae_forward.20
= control target key start
LH: loop header
LB: loop body
LE: loop exit
PB: predicated region body
PF: predicated region fallthrough
CT: control target
= control target key end

     0   :  { %s1190_s24 = smov 0   ;;  %s1377_s0 = inlined_call_operand.vmem [shape: f32[2,4,4,16], index: 0, kind: input, shape index: {}]   ;;  %s1378_s1 = inlined_call_operand.vmem [shape: bf16[9,16,32], index: 1, kind: input, shape index: {}]   ;;  %s1379_s2 = inlined_call_operand.vmem [shape: f32[1,32], index: 2, kind: input, shape index: {}]   ;;  %s1380_s3 = inlined_call_operand.vmem [shape: f32[1,32], index: 3, kind: input, shape index: {}]   ;;  %s1381_s4 = inlined_call_operand.vmem [shape: f32[1,32], index: 4, kind: input, shape index: {}]   ;;  %s1382_s5 = inlined_call_operand.vmem [shape: f32[32,4], index: 5, kind: input, shape index: {}]   ;;  %s1383_s6 = inlined_call_operand.vmem [shape: f32[4,32], index: 6, kind: input, shape index: {}]   ;;  %s1384_s7 = inlined_call_operand.vmem [shape: f32[2,4,4,32], index: 7, kind: output, shape index: {}]  }
   0x1 LB: > { %s1019_s25 = sadd.s32 4294967295, %s1146_s24   ;;  %p1023_p0 = scmp.ge.s32.totalorder %s1146_s24, 1  ;;  %s1146_s24 = sphi %s1190_s24, %s17_s24  }
   0x2   : > { %p237_p1 = scmp.lt.s32.totalorder %s1146_s24, 3 }
   0x4   : > { %p238_p2 = pnand %p1023_p0, %p237_p1 }
   0x5   : > { %p269_p3 = scmp.lt.s32.totalorder (!%p238_p2), %s1019_s25, 1 }
   0x6   : > { %241 = sbr.rel (%p238_p2) target bundleno = 828 (0x33c), region = 48 }
   0xb   : > { %v1116_v0 = vld [vmem:[%s1378_s1 + $0x8] sm:$0xff]  ;;  %v1115_v1 = vld [vmem:[%s1378_s1] sm:$0xff]  ;;  %vm284_vm0 = vcmask 130048   ;;  %v1148_v2 = vmov 0.0   ;;  %v1117_v3 = vld [vmem:[%s1378_s1 + $0x10] sm:$0xff]  ;;  %s1390_s25 = smov (!%p269_p3, %s1019_s25), 1  ;;  %v664_v57 = vlaneseq }
   0xc   : > { %287 = vst.msk [vmem:[#allocation2 + $0x10] sm:$0xff] %vm284_vm0, %v1148_v2  ;;  %v1118_v4 = vld [vmem:[%s1378_s1 + $0x18] sm:$0xff]  ;;  %v1119_v5 = vld [vmem:[%s1378_s1 + $0x20] sm:$0xff]  ;;  %1124 = vmatpush.bf16.msra.mxu2 %v1116_v0  ;;  %359 = vmatpush.bf16.msra.mxu1 %v1115_v1  ;;  %v1120_v7 = vld [vmem:[%s1378_s1 + $0x28] sm:$0xff]  ;;  %s1113_s17 = sshll.u32 %s1390_s25, 4  ;;  %vm290_vm1 = vcmask 125952  }
   0xd   : > { %288 = vst.msk [vmem:[#allocation2 + $0x18] sm:$0xff] %vm284_vm0, %v1148_v2  ;;  %329 = vmatpush.bf16.msra.mxu0 %v1116_v0  ;;  %v1122_v6 = vld [vmem:[%s1378_s1 + $0x38] sm:$0xff]  ;;  %438 = vmatpush.bf16.msra.mxu3 %v1118_v4  ;;  %s273_s20 = scalar_lea.vmem %s1377_s0, %s1113_s17  ;;  %v1121_v13 = vld [vmem:[%s1378_s1 + $0x30] sm:$0xff]  ;;  %v1123_v17 = vld [vmem:[%s1378_s1 + $0x40] sm:$0xff]  ;;  %v1269_v60 = vshrl.u32 %v664_v57, 7  ;;  %s278_s23 = scalar_lea.vmem %s1384_s7, %s1113_s17 }
   0xe   : > { %285 = vst.msk [vmem:[#allocation2] sm:$0xff] %vm284_vm0, %v1148_v2  ;;  %v282_v8 = vld [vmem:[%s273_s20 + $0x8] sm:$0xf]  ;;  %v280_v9 = vld [vmem:[%s273_s20] sm:$0xf] }
   0xf   : > { %286 = vst.msk [vmem:[#allocation2 + $0x8] sm:$0xff] %vm284_vm0, %v1148_v2  ;;  %v281_v10 = vld [vmem:[%s273_s20 + $0x4] sm:$0xf]  ;;  %v283_v11 = vld [vmem:[%s273_s20 + $0xc] sm:$0xf]  ;;  %v671_v63 = vand.u32 65535, %v1269_v60 }
  0x10   : > { %397 = vmatpush.bf16.msrb.mxu2 %v1117_v3  ;;  %289 = vst.msk [vmem:[#allocation2 + $0x20] sm:$0xff] %vm284_vm0, %v1148_v2  ;;  %520 = vmatpush.bf16.msrb.mxu1 %v1120_v7  ;;  %v1277_v0 = vadd.s32 8, %v1269_v60 }
  0x11   : > { %479 = vmatpush.bf16.msrb.mxu0 %v1119_v5  ;;  %602 = vmatpush.bf16.msrb.mxu3 %v1122_v6  ;;  %293 = vst.msk [vmem:[#allocation2 + $0x13] sm:$0xf] %vm290_vm1, %v282_v8  ;;  %v672_v6 = vshrl.u32 %v1269_v60, 16  ;;  %v675_v7 = vmul.u32 43690, %v671_v63 }
  0x12   : > { %291 = vst.msk [vmem:[#allocation2 + $0x7] sm:$0xf] %vm290_vm1, %v280_v9  ;;  %v700_v3 = vand.u32 65535, %v1277_v0  ;;  %v701_v4 = vshrl.u32 %v1277_v0, 16 }
  0x13   : > { %292 = vst.msk [vmem:[#allocation2 + $0xd] sm:$0xf] %vm290_vm1, %v281_v10 }
  0x14   : > { %294 = vst.msk [vmem:[#allocation2 + $0x19] sm:$0xf] %vm290_vm1, %v283_v11  ;;  %v704_v8 = vmul.u32 43690, %v700_v3  ;;  %v705_v11 = vmul.u32 43691, %v701_v4 }
  0x17   : > { %v577_v47 = vld [vmem:[#allocation2 + $0x1d] sm:$0xff] }
  0x18   : > { %v304_v12 = vld [vmem:[#allocation2 + $0x11] sm:$0xff]  ;;  %v579_v50 = vpack.c.bf16 %v577_v47, %v577_v47  ;;  %v618_v52 = vld [vmem:[#allocation2 + $0x1e] sm:$0xff] }
  0x19   : > { %v306_v14 = vpack.c.bf16 %v304_v12, %v304_v12  ;;  %v295_v15 = vld [vmem:[#allocation2] sm:$0xff]  ;;  %v620_v54 = vpack.c.bf16 %v618_v52, %v618_v52  ;;  %v703_v12 = vmul.u32 43691, %v700_v3 }
  0x1a   : > { %v302_v16 = vld [vmem:[#allocation2 + $0x1] sm:$0xff]  ;;  %v303_v19 = vld [vmem:[#allocation2 + $0x9] sm:$0xff] }
  0x1b   : > { %v296_v18 = vld [vmem:[#allocation2 + $0x8] sm:$0xff]  ;;  %1035 = vmatmul.msk.bf16.vlgmr.msra.gmra.mxu2 %vm284_vm0, %v306_v14  ;;  %v305_v22 = vpack.c.bf16 %v303_v19, %v302_v16  ;;  %v297_v27 = vld [vmem:[#allocation2 + $0x10] sm:$0xff]  ;;  %v495_v45 = vld [vmem:[#allocation2 + $0x18] sm:$0xff]  ;;  %v1289_v14 = vadd.s32 16, %v1269_v60  ;;  %v676_v16 = vmul.u32 43691, %v672_v6 }
  0x1c   : > { %v411_v20 = vld [vmem:[#allocation2 + $0x6] sm:$0xff]  ;;  %v298_v21 = vpack.c.bf16 %v296_v18, %v295_v15  ;;  %v412_v23 = vld [vmem:[#allocation2 + $0xe] sm:$0xff]  ;;  %561 = vmatpush.bf16.msra.mxu2 %v1121_v13  ;;  %v413_v31 = vld [vmem:[#allocation2 + $0x16] sm:$0xff]  ;;  %v299_v32 = vpack.c.bf16 %v297_v27, %v297_v27  ;;  %v496_v40 = vpack.c.bf16 %v297_v27, %v296_v18  ;;  %v497_v48 = vpack.c.bf16 %v495_v45, %v495_v45 }
  0x1d   : > { %v414_v24 = vpack.c.bf16 %v412_v23, %v411_v20  ;;  %1034 = vmatmul.msk.bf16.vlgmr.msra.gmra.mxu0 %vm284_vm0, %v305_v22  ;;  %v370_v25 = vld [vmem:[#allocation2 + $0x2] sm:$0xff]  ;;  %v371_v26 = vld [vmem:[#allocation2 + $0xa] sm:$0xff]  ;;  %v415_v34 = vpack.c.bf16 %v413_v31, %v413_v31  ;;  %v372_v35 = vld [vmem:[#allocation2 + $0x12] sm:$0xff]  ;;  %v619_v49 = vpack.c.bf16 %v413_v31, %v412_v23  ;;  %v707_v13 = vshll.u32 %v704_v8, 16 }
  0x1e   : > { %1040 = vmatmul.msk.bf16.vlgmr.msra.gmra.mxu1 %vm284_vm0, %v298_v21  ;;  %643 = vmatpush.bf16.msra.mxu0 %v1123_v17  ;;  %v452_v28 = vld [vmem:[#allocation2 + $0x7] sm:$0xff]  ;;  %v453_v29 = vld [vmem:[#allocation2 + $0xf] sm:$0xff]  ;;  %v373_v30 = vpack.c.bf16 %v371_v26, %v370_v25  ;;  %v454_v36 = vld [vmem:[#allocation2 + $0x17] sm:$0xff]  ;;  %v374_v37 = vpack.c.bf16 %v372_v35, %v372_v35  ;;  %v674_v15 = vmul.u32 43691, %v671_v63  ;;  %v678_v17 = vshll.u32 %v675_v7, 16 }
  0x1f   : > { %1056 = vmatmul.msk.bf16.vlgmr.msra.gmra.mxu3 %vm284_vm0, %v414_v24  ;;  %v455_v33 = vpack.c.bf16 %v453_v29, %v452_v28  ;;  %v575_v38 = vld [vmem:[#allocation2 + $0xd] sm:$0xff]  ;;  %v576_v39 = vld [vmem:[#allocation2 + $0x15] sm:$0xff]  ;;  %v456_v41 = vpack.c.bf16 %v454_v36, %v454_v36  ;;  %v729_v19 = vand.u32 65535, %v1289_v14  ;;  %v709_v20 = vshll.u32 %v705_v11, 16 }
  0x20   : > { %v578_v42 = vpack.c.bf16 %v576_v39, %v575_v38  ;;  %v534_v43 = vld [vmem:[#allocation2 + $0xc] sm:$0xff]  ;;  %v535_v44 = vld [vmem:[#allocation2 + $0x14] sm:$0xff]  ;;  %v536_v51 = vld [vmem:[#allocation2 + $0x1c] sm:$0xff]  ;;  %vm711_vm2 = vc.u32 %v703_v12, %v707_v13  ;;  %v713_v21 = vadd.s32 %v707_v13, %v703_v12  ;;  %v730_v22 = vshrl.u32 %v1289_v14, 16 }
  0x21   : > { %v537_v46 = vpack.c.bf16 %v535_v44, %v534_v43  ;;  %v538_v53 = vpack.c.bf16 %v536_v51, %v536_v51  ;;  %v733_v23 = vmul.u32 43690, %v729_v19  ;;  %v680_v25 = vshll.u32 %v676_v16, 16 }
  0x22   : > { %vm682_vm3 = vc.u32 %v674_v15, %v678_v17  ;;  %v684_v26 = vadd.s32 %v678_v17, %v674_v15  ;;  %v706_v29 = vmul.u32 43690, %v701_v4  ;;  %v734_v31 = vmul.u32 43691, %v730_v22 }
  0x23   : > { %v677_v35 = vmul.u32 43690, %v672_v6  ;;  %vm715_vm4 = vc.u32 %v713_v21, %v709_v20  ;;  %v735_v43 = vmul.u32 43690, %v730_v22  ;;  %v679_v51 = vshrl.u32 %v675_v7, 16 }
  0x24   : > { %vm686_vm5 = vc.u32 %v684_v26, %v680_v25  ;;  %v738_v39 = vshll.u32 %v734_v31, 16  ;;  %v710_v63 = vshrl.u32 %v705_v11, 16  ;;  %v681_v3 = vshrl.u32 %v676_v16, 16 }
  0x25   : > { %v737_v6 = vshrl.u32 %v733_v23, 16  ;;  %v739_v20 = vshrl.u32 %v734_v31, 16 }
  0x2b   : > { %1048 = vmatmul.msk.bf16.vlgmr.msrb.gmra.mxu2 %vm284_vm0, %v373_v30  ;;  %v732_v30 = vmul.u32 43691, %v729_v19 }
  0x2d   : > { %1064 = vmatmul.msk.bf16.vlgmr.msrb.gmra.mxu0 %vm284_vm0, %v455_v33  ;;  %v1149_v33 = vmov 0  }
  0x2e   : > { %1041 = vmatmul.msk.bf16.gmra.mxu1 %vm284_vm0, %v299_v32  ;;  %v736_v32 = vshll.u32 %v733_v23, 16  ;;  %v683_v36 = vsel %vm682_vm3, 1, %v1149_v33  ;;  %v687_v45 = vsel %vm686_vm5, 1, %v1149_v33  ;;  %vm782_vm5 = vcmask 261120  }
  0x2f   : > { %1057 = vmatmul.msk.bf16.gmra.mxu3 %vm284_vm0, %v415_v34  ;;  %v712_v34 = vsel %vm711_vm2, 1, %v1149_v33 }
  0x30   : > { %v714_v38 = vadd.s32 %v712_v34, %v706_v29  ;;  %vm740_vm6 = vc.u32 %v732_v30, %v736_v32 }
  0x3b   : > { %1049 = vmatmul.msk.bf16.gmra.mxu2 %vm284_vm0, %v374_v37 }
  0x3d   : > { %1065 = vmatmul.msk.bf16.gmra.mxu0 %vm284_vm0, %v456_v41  ;;  %v716_v41 = vsel %vm715_vm4, 1, %v1149_v33 }
  0x3e   : > { %1072 = vmatmul.msk.bf16.vlgmr.msrb.gmra.mxu1 %vm284_vm0, %v496_v40  ;;  %v742_v40 = vadd.s32 %v736_v32, %v732_v30 }
  0x3f   : > { %1088 = vmatmul.msk.bf16.vlgmr.msrb.gmra.mxu3 %vm284_vm0, %v578_v42  ;;  %v685_v42 = vadd.s32 %v683_v36, %v677_v35 }
  0x40   : > { %vm744_vm7 = vc.u32 %v742_v40, %v738_v39 }
  0x41   : > { %v689_v52 = vadd.s32 %v687_v45, %v685_v42 }
  0x43   : > { %v690_v4 = vadd.s32 %v689_v52, %v679_v51 }
  0x45   : > { %v691_v7 = vadd.s32 %v690_v4, %v681_v3  ;;  %v1135_v4 = vld [vmem:[%s1379_s2] ss:$0 sm:$0xff] }
  0x47   : > { %v692_v25 = vshrl.u32 %v691_v7, 2 }
  0x49   : > { %v693_v31 = vmul.u32 6, %v692_v25 }
  0x4b   : > { %1080 = vmatmul.msk.bf16.vlgmr.msra.gmra.mxu2 %vm284_vm0, %v537_v46  ;;  %v741_v46 = vsel %vm740_vm6, 1, %v1149_v33  ;;  %v694_v39 = vsub.s32 %v1269_v60, %v693_v31  ;;  %v794_v60 = vld [vmem:[%s1382_s5] sm:$0xff]  ;;  %vm823_vm6 = vcmask 31744  }
  0x4d   : > { %1096 = vmatmul.msk.bf16.vlgmr.msra.gmra.mxu0 %vm284_vm0, %v619_v49  ;;  %v708_v49 = vshrl.u32 %v704_v8, 16  ;;  %v1302_v8 = vld [vmem:[%s1382_s5 + $0x18] sm:$0xff]  ;;  %vm755_vm10 = vcmp.ne.s32.totalorder %v694_v39, 0  ;;  %vm758_vm11 = vcmp.lt.s32.totalorder %v694_v39, 0 }
  0x4e   : > { %1073 = vmatmul.msk.bf16.gmra.mxu1 %vm284_vm0, %v497_v48  ;;  %vm1332_vm13 = vmand %vm758_vm11, %vm755_vm10  ;;  %vm951_vm10 = vcmask 257024   ;;  %vm954_vm11 = vcmask 261126  }
  0x4f   : > { %1089 = vmatmul.msk.bf16.gmra.mxu3 %vm284_vm0, %v579_v50  ;;  %v718_v50 = vadd.s32 %v716_v41, %v714_v38  ;;  %813 = vmatpush.msra.mxu1 %v1302_v8 }
  0x5b   : > { %1081 = vmatmul.msk.bf16.gmra.mxu2 %vm284_vm0, %v538_v53  ;;  %v743_v53 = vadd.s32 %v741_v46, %v735_v43  ;;  %v764_v46 = vadd.s32 6, %v694_v39 }
  0x5d   : > { %1097 = vmatmul.msk.bf16.gmra.mxu0 %vm284_vm0, %v620_v54  ;;  %v745_v54 = vsel %vm744_vm7, 1, %v1149_v33  ;;  %vm827_vm0 = vcmask 1043456  }
  0x5e   : > { %v747_v12 = vadd.s32 %v745_v54, %v743_v53 }
  0x60   : > { %v748_v21 = vadd.s32 %v747_v12, %v737_v6 }
  0x62   : > { %v749_v26 = vadd.s32 %v748_v21, %v739_v20 }
  0x64   : > { %v750_v36 = vshrl.u32 %v749_v26, 2 }
  0x66   : > { %v751_v40 = vmul.u32 6, %v750_v36 }
  0x9a   : > { %v1263_v56 = vpop.f32.mrf.mxu0 }
  0x9b   : > { %v1261_v55 = vpop.f32.mrf.mxu1 }
  0x9c   : > { %v362_v11 = vadd.f32 %v1261_v55, %v1263_v56 }
  0x9e   : > { %v1265_v58 = vpop.f32.mrf.mxu2 }
  0xa2   : > { %v1267_v59 = vpop.f32.mrf.mxu3  ;;  %v1273_v62 = vpop.f32.mrf.mxu0 }
  0xa3   : > { %v1271_v61 = vpop.f32.mrf.mxu1 }
  0xa6   : > { %v338_v1 = vpop.f32.mrf.mxu2 }
  0xa7   : > { %v719_v1 = vadd.s32 %v718_v50, %v708_v49 }
  0xa9   : > { %v720_v19 = vadd.s32 %v719_v1, %v710_v63 }
  0xaa   : > { %v1281_v5 = vpop.f32.mrf.mxu3  ;;  %v1286_v10 = vpop.f32.mrf.mxu0 }
  0xab   : > { %v1284_v9 = vpop.f32.mrf.mxu1  ;;  %v721_v22 = vshrl.u32 %v720_v19, 2 }
  0xad   : > { %v722_v33 = vmul.u32 6, %v721_v22 }
  0xae   : > { %v399_v18 = vpop.f32.mrf.mxu2 }
  0xaf   : > { %v408_v23 = vadd.f32 %v399_v18, %v362_v11  ;;  %v723_v55 = vsub.s32 %v1277_v0, %v722_v33 }
  0xb1   : > { %v449_v34 = vadd.f32 %v1267_v59, %v408_v23  ;;  %v795_v59 = vld [vmem:[%s1382_s5 + $0x8] sm:$0xff]  ;;  %vm756_vm8 = vcmp.ne.s32.totalorder %v723_v55, 0  ;;  %vm759_vm9 = vcmp.lt.s32.totalorder %v723_v55, 0 }
  0xb2   : > { %v1293_v24 = vpop.f32.mrf.mxu3  ;;  %v1295_v28 = vpop.f32.mrf.mxu0  ;;  %vm1327_vm12 = vmand %vm759_vm9, %vm756_vm8 }
  0xb3   : > { %v368_v27 = vpop.f32.mrf.mxu1  ;;  %v490_v18 = vadd.f32 %v1286_v10, %v449_v34 }
  0xb4   : > { %v364_v27 = vadd.f32 %v1271_v61, %v1273_v62  ;;  %v796_v61 = vld [vmem:[%s1382_s5 + $0x10] sm:$0xff]  ;;  %v367_v62 = vadd.f32 %v1284_v9, %v1265_v58  ;;  %v752_v58 = vsub.s32 %v1289_v14, %v751_v40  ;;  %v822_v14 = vld [vmem:[%s1383_s6] sm:$0xf] }
  0xb5   : > { %814 = vmatpush.msra.mxu1 %v796_v61  ;;  %1102 = vmatpush.msk.msra.mxu3 %vm827_vm0, %v822_v14 }
  0xb6   : > { %v401_v37 = vpop.f32.mrf.mxu2  ;;  %vm757_vm14 = vcmp.ne.s32.totalorder %v752_v58, 0  ;;  %vm760_vm15 = vcmp.lt.s32.totalorder %v752_v58, 0  ;;  %v766_v63 = vadd.s32 6, %v752_v58 }
  0xb7   : > { %v409_v35 = vadd.f32 %v401_v37, %v364_v27  ;;  %815 = vmatpush.msra.mxu1 %v795_v59  ;;  %887 = vmatpush.msrb.mxu3 %v1302_v8  ;;  %vm763_vm2 = vmand %vm760_vm15, %vm757_vm14  ;;  %vm962_vm14 = vcmask 259074  }
  0xb8   : > { %v769_v19 = vsel %vm763_vm2, %v766_v63, %v752_v58 }
  0xb9   : > { %v450_v56 = vadd.f32 %v1281_v5, %v409_v35  ;;  %816 = vmatpush.msra.mxu1 %v794_v60  ;;  %888 = vmatpush.msrb.mxu3 %v796_v61  ;;  %vm772_vm4 = vcmp.lt.s32.totalorder %v769_v19, 4  ;;  %v1137_v19 = vld [vmem:[%s1381_s4] ss:$0 sm:$0xff] }
  0xba   : > { %v447_v44 = vpop.f32.mrf.mxu3  ;;  %v1297_v48 = vpop.f32.mrf.mxu0  ;;  %v1100_v23 = vsel %vm772_vm4, 1.0, %v1148_v2 }
  0xbb   : > { %v522_v47 = vpop.f32.mrf.mxu1  ;;  %v491_v42 = vadd.f32 %v1295_v28, %v450_v56  ;;  %v765_v44 = vadd.s32 6, %v723_v55  ;;  %1105 = vmatpush.msk.msrb.mxu1 %vm827_vm0, %v822_v14  ;;  %889 = vmatpush.msrb.mxu3 %v795_v59 }
  0xbc   : > { %v531_v37 = vadd.f32 %v522_v47, %v490_v18 }
  0xbd   : > { %v768_v52 = vsel %vm1327_vm12, %v765_v44, %v723_v55  ;;  %890 = vmatpush.msrb.mxu3 %v794_v60  ;;  %vm956_vm12 = vcmask 254976  }
  0xbe   : > { %v404_v57 = vpop.f32.mrf.mxu2  ;;  %vm771_vm1 = vcmp.lt.s32.totalorder %v768_v52, 4 }
  0xbf   : > { %v410_v41 = vadd.f32 %v404_v57, %v367_v62 }
  0xc1   : > { %v451_v49 = vadd.f32 %v1293_v24, %v410_v41  ;;  %v767_v24 = vsel %vm1332_vm13, %v764_v46, %v694_v39  ;;  %vm959_vm13 = vcmask 261124  }
  0xc2   : > { %v604_v13 = vpop.f32.mrf.mxu3  ;;  %v488_v17 = vpop.f32.mrf.mxu0  ;;  %vm770_vm3 = vcmp.lt.s32.totalorder %v767_v24, 4 }
  0xc3   : > { %v524_v15 = vpop.f32.mrf.mxu1  ;;  %v492_v1 = vadd.f32 %v1297_v48, %v451_v49  ;;  %v1098_v7 = vsel %vm770_vm3, 1.0, %v1148_v2 }
  0xc4   : > { %v532_v9 = vadd.f32 %v524_v15, %v491_v42  ;;  %v1099_v15 = vsel %vm771_vm1, 1.0, %v1148_v2 }
  0xc6   : > { %v406_v16 = vpop.f32.mrf.mxu2 }
  0xca   : > { %v606_v29 = vpop.f32.mrf.mxu3  ;;  %v645_v32 = vpop.f32.mrf.mxu0 }
  0xcb   : > { %v527_v30 = vpop.f32.mrf.mxu1 }
  0xcc   : > { %v533_v12 = vadd.f32 %v527_v30, %v492_v1 }
  0xce   : > { %v563_v38 = vpop.f32.mrf.mxu2 }
  0xcf   : > { %v572_v43 = vadd.f32 %v563_v38, %v531_v37 }
  0xd1   : > { %v613_v50 = vadd.f32 %v604_v13, %v572_v43 }
  0xd2   : > { %v609_v0 = vpop.f32.mrf.mxu3  ;;  %v647_v5 = vpop.f32.mrf.mxu0 }
  0xd3   : > { %v529_v10 = vpop.f32.mrf.mxu1  ;;  %v654_v3 = vadd.f32 %v645_v32, %v613_v50 }
  0xd5   : > { %v661_v48 = vadd.f32 %v1135_v4, %v654_v3 }
  0xd6   : > { %v565_v47 = vpop.f32.mrf.mxu2 }
  0xd7   : > { %v573_v51 = vadd.f32 %v565_v47, %v532_v9  ;;  %v779_v16 = vmul.f32 %v1098_v7, %v661_v48 }
  0xd9   : > { %v614_v53 = vadd.f32 %v606_v29, %v573_v51  ;;  %v783_v29 = vsel %vm782_vm5, %v779_v16, 0.0 }
  0xda   : > { %v611_v54 = vpop.f32.mrf.mxu3  ;;  %v650_v57 = vpop.f32.mrf.mxu0 }
  0xdb   : > { %v655_v6 = vadd.f32 %v647_v5, %v614_v53 }
  0xdd   : > { %v662_v13 = vadd.f32 %v1135_v4, %v655_v6 }
  0xde   : > { %v568_v17 = vpop.f32.mrf.mxu2 }
  0xdf   : > { %v574_v8 = vadd.f32 %v568_v17, %v533_v12  ;;  %v780_v20 = vmul.f32 %v1099_v15, %v662_v13  ;;  %v1136_v12 = vld [vmem:[%s1380_s3] ss:$0 sm:$0xff] }
  0xe1   : > { %v615_v21 = vadd.f32 %v609_v0, %v574_v8  ;;  %v784_v25 = vsel %vm782_vm5, %v780_v20, 0.0 }
  0xe2   : > { %v652_v11 = vpop.f32.mrf.mxu0  ;;  %v785_v32 = vadd.f32 %v784_v25, %v783_v29 }
  0xe3   : > { %v656_v22 = vadd.f32 %v650_v57, %v615_v21 }
  0xe5   : > { %v663_v26 = vadd.f32 %v1135_v4, %v656_v22 }
  0xe6   : > { %v570_v27 = vpop.f32.mrf.mxu2 }
  0xe7   : > { %v781_v30 = vmul.f32 %v1100_v23, %v663_v26 }
  0xe9   : > { %v786_v33 = vsel %vm782_vm5, %v781_v30, 0.0 }
  0xea   : > { %v787_v34 = vadd.f32 %v786_v33, %v785_v32 }
  0xec   : > { %v788_v35 = vrot.slane %v787_v34, 4 }
  0xee   : > { %v789_v31 = vadd.f32 %v788_v35, %v787_v34 }
  0xf0   : > { %v790_v36 = vrot.slane %v789_v31, 2 }
  0xf2   : > { %v791_v38 = vadd.f32 %v790_v36, %v789_v31 }
  0xf4   : > { %v792_v55 = vrot.slane %v791_v38, 1 }
  0xf6   : > { %v793_v56 = vadd.f32 %v792_v55, %v791_v38 }
  0xf8   : > { %1101 = vmatmul.msk.f32.vlgmr.msra.gmra.mxu1 %vm782_vm5, %v793_v56 }
 0x175   : > { %v818_v2 = vpop.f32.mrf.mxu1 }
 0x176   : > { %v821_v18 = vmul.f32 0.0078125, %v818_v2 }
 0x178   : > { %1103 = vmatmul.msk.f32.vlgmr.msra.gmra.mxu3 %vm823_vm6, %v821_v18 }
 0x1fb   : > { %v848_v39 = vpop.f32.mrf.mxu3 }
 0x1fc   : > { %v851_v40 = vperm.slane %v848_v39, 0 }
 0x1fe   : > { %v852_v61 = vsub.f32 %v661_v48, %v851_v40  ;;  %v853_v59 = vsub.f32 %v662_v13, %v851_v40  ;;  %v854_v62 = vsub.f32 %v663_v26, %v851_v40 }
 0x200   : > { %v855_v37 = vmul.f32 %v852_v61, %v852_v61  ;;  %v856_v0 = vmul.f32 %v853_v59, %v853_v59  ;;  %v857_v5 = vmul.f32 %v854_v62, %v854_v62 }
 0x202   : > { %v858_v10 = vmul.f32 %v1098_v7, %v855_v37  ;;  %v859_v60 = vmul.f32 %v1099_v15, %v856_v0  ;;  %v860_v41 = vmul.f32 %v1100_v23, %v857_v5 }
 0x204   : > { %v861_v42 = vsel %vm782_vm5, %v858_v10, 0.0  ;;  %v862_v43 = vsel %vm782_vm5, %v859_v60, 0.0  ;;  %v864_v58 = vsel %vm782_vm5, %v860_v41, 0.0 }
 0x205   : > { %v863_v44 = vadd.f32 %v862_v43, %v861_v42 }
 0x207   : > { %v865_v9 = vadd.f32 %v864_v58, %v863_v44 }
 0x209   : > { %v866_v45 = vrot.slane %v865_v9, 4 }
 0x20b   : > { %v867_v46 = vadd.f32 %v866_v45, %v865_v9 }
 0x20d   : > { %v868_v47 = vrot.slane %v867_v46, 2 }
 0x20f   : > { %v869_v49 = vadd.f32 %v868_v47, %v867_v46 }
 0x211   : > { %v870_v50 = vrot.slane %v869_v49, 1 }
 0x213   : > { %v871_v28 = vadd.f32 %v870_v50, %v869_v49 }
 0x215   : > { %1104 = vmatmul.msk.f32.vlgmr.msrb.gmra.mxu3 %vm782_vm5, %v871_v28 }
 0x298   : > { %v892_v51 = vpop.f32.mrf.mxu3 }
 0x299   : > { %v895_v52 = vmul.f32 0.0078125, %v892_v51 }
 0x29b   : > { %v896_v14 = vadd.f32 1e-05, %v895_v52 }
 0x29d   : > { %1138 = vrsqrt.f32 %v896_v14  ;;  %vm903_vm8 = vweird.f32 %v896_v14 }
 0x2a3   : > { %v1139_v53 = vpop.eup %1138 }
 0x2a4   : > { %v898_v54 = vmul.f32 %v1139_v53, %v896_v14  ;;  %vm904_vm7 = vweird.f32 %v1139_v53 }
 0x2a5   : > { %vm905_vm9 = vmor %vm903_vm8, %vm904_vm7 }
 0x2a6   : > { %v899_v24 = vmul.f32 %v1139_v53, %v898_v54 }
 0x2a8   : > { %v900_v57 = vmul.f32 0.5, %v899_v24 }
 0x2aa   : > { %v901_v63 = vsub.f32 1.5, %v900_v57 }
 0x2ac   : > { %v902_v1 = vmul.f32 %v1139_v53, %v901_v63 }
 0x2ae   : > { %v906_v3 = vsel %vm905_vm9, %v1139_v53, %v902_v1 }
 0x2af   : > { %1106 = vmatmul.msk.f32.vlgmr.msrb.gmra.mxu1 %vm823_vm6, %v906_v3 }
 0x32c   : > { %v927_v4 = vpop.f32.mrf.mxu1 }
 0x32d   : > { %v930_v6 = vperm.slane %v927_v4, 0 }
 0x32f   : > { %v931_v13 = vmul.f32 %v930_v6, %v852_v61  ;;  %v932_v15 = vmul.f32 %v930_v6, %v853_v59  ;;  %v933_v17 = vmul.f32 %v930_v6, %v854_v62 }
 0x331   : > { %v938_v48 = vmul.f32 %v1136_v12, %v931_v13  ;;  %v939_v8 = vmul.f32 %v1136_v12, %v932_v15  ;;  %v940_v7 = vmul.f32 %v1136_v12, %v933_v17 }
 0x333   : > { %v945_v20 = vadd.f32 %v1137_v19, %v938_v48  ;;  %v946_v21 = vadd.f32 %v1137_v19, %v939_v8  ;;  %v947_v11 = vadd.f32 %v1137_v19, %v940_v7 }
 0x335   : > { %v948_v16 = vmax.f32 %v945_v20, 0.0  ;;  %v949_v22 = vmax.f32 %v946_v21, 0.0  ;;  %v950_v23 = vmax.f32 %v947_v11, 0.0 }
 0x337   : > { %952 = vst.msk [vmem:[%s278_s23] sm:$0xf] %vm951_vm10, %v948_v16 }
 0x338   : > { %1107 = vst.msk [vmem:[%s278_s23 - $0x2] sm:$0xc0] %vm954_vm11, %v948_v16 }
 0x339   : > { %1108 = vst.msk [vmem:[%s278_s23 + $0x6] sm:$0x3] %vm956_vm12, %v949_v22 }
 0x33a   : > { %1109 = vst.msk [vmem:[%s278_s23 + $0x4] sm:$0xf0] %vm959_vm13, %v949_v22 }
 0x33b   : > { %1110 = vst.msk [vmem:[%s278_s23 + $0xa] sm:$0x3c] %vm962_vm14, %v950_v23 }
 0x33c PF: > { %s17_s24 = sadd.s32 1, %s1146_s24  }
 0x33d   : > { %p14_p4 = scmp.ge.s32.totalorder %s17_s24, 4  }
 0x33f   :  { %16 = sbr.rel (!%p14_p4) target bundleno = 1 (0x1), region = 89 }

// kernel: vqvae_forward.21
= control target key start
LH: loop header
LB: loop body
LE: loop exit
PB: predicated region body
PF: predicated region fallthrough
CT: control target
= control target key end

     0   :  { %s1111_s12 = smov 0   ;;  %s1328_s0 = inlined_call_operand.vmem [shape: f32[2,8,8,8], index: 0, kind: input, shape index: {}]   ;;  %s1329_s1 = inlined_call_operand.vmem [shape: bf16[9,8,12], index: 1, kind: input, shape index: {}]   ;;  %s1330_s2 = inlined_call_operand.vmem [shape: f32[1,12], index: 2, kind: input, shape index: {}]   ;;  %s1331_s3 = inlined_call_operand.vmem [shape: f32[2,8,8,12], index: 3, kind: output, shape index: {}]  }
   0x1 LB: > { %s990_s13 = sadd.s32 4294967295, %s1088_s12   ;;  %p994_p0 = scmp.ge.s32.totalorder %s1088_s12, 1  ;;  %s1088_s12 = sphi %s1111_s12, %s13_s12  }
   0x2   : > { %p137_p1 = scmp.lt.s32.totalorder %s1088_s12, 3 }
   0x4   : > { %p138_p2 = pnand %p994_p0, %p137_p1 }
   0x5   : > { %p161_p3 = scmp.lt.s32.totalorder (!%p138_p2), %s990_s13, 1 }
   0x6   : > { %141 = sbr.rel (%p138_p2) target bundleno = 363 (0x16b), region = 32 }
   0xb   : > { %v999_v0 = vld [vmem:[%s1329_s1 + $0x4] sm:$0xf]  ;;  %vm250_vm0 = vcmask 1043456   ;;  %vm180_vm1 = vcmask 64512   ;;  %v1090_v2 = vmov 0.0   ;;  %s1333_s13 = smov (!%p161_p3, %s990_s13), 1 }
   0xc   : > { %v252_v1 = vsel %vm250_vm0, %v999_v0, 0  ;;  %182 = vst.msk [vmem:[#allocation2 + $0x8] sm:$0xff] %vm180_vm1, %v1090_v2  ;;  %v1010_v3 = vld [vmem:[%s1329_s1 + $0x8] sm:$0xf]  ;;  %v217_v4 = vld [vmem:[%s1329_s1] sm:$0xf] }
   0xd   : > { %1069 = vmatpush.bf16.msra.mxu1 %v252_v1  ;;  %1070 = vmatpush.bf16.msra.mxu2 %v252_v1  ;;  %183 = vst.msk [vmem:[#allocation2 + $0x10] sm:$0xff] %vm180_vm1, %v1090_v2  ;;  %v373_v5 = vsel %vm250_vm0, %v1010_v3, 0  ;;  %v304_v6 = vsel %vm250_vm0, %v217_v4, 0  ;;  %s1067_s20 = sshll.u32 %s1333_s13, 6  ;;  %v1016_v10 = vld [vmem:[%s1329_s1 + $0xc] sm:$0xf] }
   0xe   : > { %184 = vst.msk [vmem:[#allocation2 + $0x18] sm:$0xff] %vm180_vm1, %v1090_v2  ;;  %1071 = vmatpush.bf16.msra.mxu3 %v252_v1  ;;  %261 = vmatpush.bf16.msra.mxu0 %v252_v1  ;;  %s1143_s23 = scalar_lea.vmem %s1328_s0, %s1067_s20  ;;  %v452_v12 = vsel %vm250_vm0, %v1016_v10, 0  ;;  %v1022_v13 = vld [vmem:[%s1329_s1 + $0x10] sm:$0xf]  ;;  %v1034_v33 = vld [vmem:[%s1329_s1 + $0x18] sm:$0xf]  ;;  %s1276_s15 = scalar_lea.vmem %s1331_s3, %s1067_s20 }
   0xf   : > { %185 = vst.msk [vmem:[#allocation2 + $0x20] sm:$0xff] %vm180_vm1, %v1090_v2  ;;  %v172_v7 = vld [vmem:[%s1143_s23] sm:$0xff]  ;;  %v173_v8 = vld [vmem:[%s1143_s23 + $0x8] sm:$0xff]  ;;  %v174_v9 = vld [vmem:[%s1143_s23 + $0x10] sm:$0xff]  ;;  %v531_v16 = vsel %vm250_vm0, %v1022_v13, 0  ;;  %v689_v34 = vsel %vm250_vm0, %v1034_v33, 0 }
  0x10   : > { %181 = vst.msk [vmem:[#allocation2] sm:$0xff] %vm180_vm1, %v1090_v2  ;;  %v175_v14 = vld [vmem:[%s1143_s23 + $0x18] sm:$0xff]  ;;  %v177_v18 = vld [vmem:[%s1143_s23 + $0x28] sm:$0xff]  ;;  %v178_v21 = vld [vmem:[%s1143_s23 + $0x30] sm:$0xff]  ;;  %vm907_vm2 = vcmask 97280   ;;  %vm910_vm3 = vcmask 97282  }
  0x11   : > { %382 = vmatpush.bf16.msrb.mxu2 %v373_v5  ;;  %313 = vmatpush.bf16.msrb.mxu1 %v304_v6  ;;  %186 = vst.msk [vmem:[#allocation2 + $0x28] sm:$0xff] %vm180_vm1, %v1090_v2  ;;  %v176_v23 = vld [vmem:[%s1143_s23 + $0x20] sm:$0xff]  ;;  %v1040_v36 = vld [vmem:[%s1329_s1 + $0x1c] sm:$0xf]  ;;  %v1028_v37 = vld [vmem:[%s1329_s1 + $0x14] sm:$0xf] }
  0x12   : > { %194 = vst.msk [vmem:[#allocation2 + $0xb] sm:$0xff] %vm180_vm1, %v172_v7  ;;  %461 = vmatpush.bf16.msrb.mxu3 %v452_v12  ;;  %540 = vmatpush.bf16.msrb.mxu0 %v531_v16  ;;  %v768_v39 = vsel %vm250_vm0, %v1040_v36, 0  ;;  %v610_v40 = vsel %vm250_vm0, %v1028_v37, 0  ;;  %v1046_v41 = vld [vmem:[%s1329_s1 + $0x20] sm:$0xf]  ;;  %vm912_vm4 = vcmask 91136  }
  0x13   : > { %195 = vst.msk [vmem:[#allocation2 + $0x15] sm:$0xff] %vm180_vm1, %v173_v8  ;;  %v847_v42 = vsel %vm250_vm0, %v1046_v41, 0  ;;  %vm915_vm5 = vcmask 97284   ;;  %vm917_vm6 = vcmask 93184   ;;  %vm920_vm7 = vcmask 97286  }
  0x14   : > { %196 = vst.msk [vmem:[#allocation2 + $0x1f] sm:$0xff] %vm180_vm1, %v174_v9  ;;  %v179_v9 = vld [vmem:[%s1143_s23 + $0x38] sm:$0xff]  ;;  %vm922_vm8 = vcmask 95232  }
  0x15   : > { %187 = vst.msk [vmem:[#allocation2 + $0x30] sm:$0xff] %vm180_vm1, %v1090_v2 }
  0x16   : > { %188 = vst.msk [vmem:[#allocation2 + $0x38] sm:$0xff] %vm180_vm1, %v1090_v2 }
  0x17   : > { %189 = vst.msk [vmem:[#allocation2 + $0x40] sm:$0xff] %vm180_vm1, %v1090_v2  ;;  %v218_v11 = vld [vmem:[#allocation2 + $0x1] sm:$0xff] }
  0x18   : > { %190 = vst.msk [vmem:[#allocation2 + $0x48] sm:$0xff] %vm180_vm1, %v1090_v2  ;;  %v202_v31 = vld [vmem:[#allocation2] sm:$0xff] }
  0x19   : > { %191 = vst.msk [vmem:[#allocation2 + $0x50] sm:$0xff] %vm180_vm1, %v1090_v2  ;;  %v219_v15 = vld [vmem:[#allocation2 + $0x9] sm:$0xff] }
  0x1a   : > { %v220_v17 = vld [vmem:[#allocation2 + $0x11] sm:$0xff]  ;;  %192 = vst.msk [vmem:[#allocation2 + $0x58] sm:$0xff] %vm180_vm1, %v1090_v2  ;;  %v228_v19 = vpack.c.bf16 %v219_v15, %v218_v11  ;;  %v203_v32 = vld [vmem:[#allocation2 + $0x8] sm:$0xff] }
  0x1b   : > { %v221_v20 = vld [vmem:[#allocation2 + $0x19] sm:$0xff]  ;;  %193 = vst.msk [vmem:[#allocation2 + $0x60] sm:$0xff] %vm180_vm1, %v1090_v2  ;;  %v222_v24 = vld [vmem:[#allocation2 + $0x21] sm:$0xff]  ;;  %v498_v29 = vld [vmem:[#allocation2 + $0xb] sm:$0xff]  ;;  %v212_v43 = vpack.c.bf16 %v203_v32, %v202_v31 }
  0x1c   : > { %v229_v22 = vpack.c.bf16 %v221_v20, %v220_v17  ;;  %197 = vst.msk [vmem:[#allocation2 + $0x29] sm:$0xff] %vm180_vm1, %v175_v14  ;;  %1000 = vmatmul.msk.bf16.vlgmr.msra.gmra.mxu0 %vm180_vm1, %v228_v19  ;;  %v499_v35 = vld [vmem:[#allocation2 + $0x13] sm:$0xff]  ;;  %v419_v46 = vld [vmem:[#allocation2 + $0xa] sm:$0xff]  ;;  %v500_v50 = vld [vmem:[#allocation2 + $0x1b] sm:$0xff] }
  0x1d   : > { %199 = vst.msk [vmem:[#allocation2 + $0x3d] sm:$0xff] %vm180_vm1, %v177_v18  ;;  %v508_v38 = vpack.c.bf16 %v499_v35, %v498_v29  ;;  %856 = vmatpush.bf16.msra.mxu0 %v847_v42  ;;  %v420_v47 = vld [vmem:[#allocation2 + $0x12] sm:$0xff]  ;;  %v340_v56 = vld [vmem:[#allocation2 + $0x2] sm:$0xff]  ;;  %v421_v57 = vld [vmem:[#allocation2 + $0x1a] sm:$0xff] }
  0x1e   : > { %1001 = vmatmul.msk.bf16.vlgmr.msra.gmra.mxu1 %vm180_vm1, %v229_v22  ;;  %200 = vst.msk [vmem:[#allocation2 + $0x47] sm:$0xff] %vm180_vm1, %v178_v21  ;;  %v429_v49 = vpack.c.bf16 %v420_v47, %v419_v46  ;;  %v204_v52 = vld [vmem:[#allocation2 + $0x10] sm:$0xff]  ;;  %v205_v53 = vld [vmem:[#allocation2 + $0x18] sm:$0xff]  ;;  %v350_v59 = vpack.c.bf16 %v419_v46, %v340_v56  ;;  %v206_v63 = vld [vmem:[#allocation2 + $0x20] sm:$0xff]  ;;  %v351_v5 = vpack.c.bf16 %v421_v57, %v420_v47 }
  0x1f   : > { %198 = vst.msk [vmem:[#allocation2 + $0x33] sm:$0xff] %vm180_vm1, %v176_v23  ;;  %619 = vmatpush.bf16.msra.mxu1 %v610_v40  ;;  %v213_v55 = vpack.c.bf16 %v205_v53, %v204_v52  ;;  %v815_v29 = vld [vmem:[#allocation2 + $0x1e] sm:$0xff]  ;;  %v578_v31 = vld [vmem:[#allocation2 + $0x14] sm:$0xff] }
  0x20   : > { %201 = vst.msk [vmem:[#allocation2 + $0x51] sm:$0xff] %vm180_vm1, %v179_v9  ;;  %v736_v35 = vld [vmem:[#allocation2 + $0x1d] sm:$0xff] }
  0x21   : > { %v579_v40 = vld [vmem:[#allocation2 + $0x1c] sm:$0xff] }
  0x22   : > { %v666_v46 = vpack.c.bf16 %v579_v40, %v578_v31 }
  0x23   : > { %v223_v25 = vld [vmem:[#allocation2 + $0x29] sm:$0xff] }
  0x24   : > { %v230_v26 = vpack.c.bf16 %v223_v25, %v222_v24  ;;  %v501_v51 = vld [vmem:[#allocation2 + $0x23] sm:$0xff]  ;;  %v502_v61 = vld [vmem:[#allocation2 + $0x2b] sm:$0xff]  ;;  %v504_v7 = vld [vmem:[#allocation2 + $0x3b] sm:$0xff] }
  0x25   : > { %v226_v27 = vld [vmem:[#allocation2 + $0x41] sm:$0xff]  ;;  %v227_v28 = vld [vmem:[#allocation2 + $0x49] sm:$0xff]  ;;  %v509_v54 = vpack.c.bf16 %v501_v51, %v500_v50 }
  0x26   : > { %1002 = vmatmul.msk.bf16.vlgmr.msra.gmra.mxu2 %vm180_vm1, %v230_v26  ;;  %v232_v30 = vpack.c.bf16 %v227_v28, %v226_v27  ;;  %v224_v44 = vld [vmem:[#allocation2 + $0x31] sm:$0xff]  ;;  %v225_v45 = vld [vmem:[#allocation2 + $0x39] sm:$0xff]  ;;  %v422_v58 = vld [vmem:[#allocation2 + $0x22] sm:$0xff] }
  0x27   : > { %698 = vmatpush.bf16.msra.mxu2 %v689_v34  ;;  %v231_v48 = vpack.c.bf16 %v225_v45, %v224_v44  ;;  %v430_v60 = vpack.c.bf16 %v422_v58, %v421_v57  ;;  %v503_v62 = vld [vmem:[#allocation2 + $0x33] sm:$0xff]  ;;  %v207_v0 = vld [vmem:[#allocation2 + $0x28] sm:$0xff]  ;;  %v210_v20 = vld [vmem:[#allocation2 + $0x40] sm:$0xff] }
  0x28   : > { %1004 = vmatmul.msk.bf16.vlgmr.msra.gmra.mxu3 %vm180_vm1, %v232_v30  ;;  %v510_v1 = vpack.c.bf16 %v503_v62, %v502_v61  ;;  %v214_v2 = vpack.c.bf16 %v207_v0, %v206_v63  ;;  %v423_v3 = vld [vmem:[#allocation2 + $0x2a] sm:$0xff]  ;;  %v424_v4 = vld [vmem:[#allocation2 + $0x32] sm:$0xff]  ;;  %v425_v14 = vld [vmem:[#allocation2 + $0x3a] sm:$0xff] }
  0x29   : > { %777 = vmatpush.bf16.msra.mxu3 %v768_v39  ;;  %v431_v6 = vpack.c.bf16 %v424_v4, %v423_v3  ;;  %v505_v8 = vld [vmem:[#allocation2 + $0x43] sm:$0xff]  ;;  %v208_v10 = vld [vmem:[#allocation2 + $0x30] sm:$0xff]  ;;  %v209_v11 = vld [vmem:[#allocation2 + $0x38] sm:$0xff]  ;;  %v352_v16 = vpack.c.bf16 %v423_v3, %v422_v58  ;;  %v353_v26 = vpack.c.bf16 %v425_v14, %v424_v4 }
  0x2a   : > { %v511_v12 = vpack.c.bf16 %v505_v8, %v504_v7  ;;  %v215_v13 = vpack.c.bf16 %v209_v11, %v208_v10  ;;  %v426_v15 = vld [vmem:[#allocation2 + $0x42] sm:$0xff]  ;;  %v506_v18 = vld [vmem:[#allocation2 + $0x4b] sm:$0xff]  ;;  %v507_v19 = vld [vmem:[#allocation2 + $0x53] sm:$0xff] }
  0x2b   : > { %v432_v17 = vpack.c.bf16 %v426_v15, %v425_v14  ;;  %v211_v21 = vld [vmem:[#allocation2 + $0x48] sm:$0xff]  ;;  %v512_v22 = vpack.c.bf16 %v507_v19, %v506_v18  ;;  %v428_v25 = vld [vmem:[#allocation2 + $0x52] sm:$0xff]  ;;  %v740_v57 = vld [vmem:[#allocation2 + $0x3d] sm:$0xff] }
  0x2c   : > { %1023 = vmatmul.msk.bf16.vlgmr.msrb.gmra.mxu0 %vm180_vm1, %v508_v38  ;;  %v216_v23 = vpack.c.bf16 %v211_v21, %v210_v20  ;;  %v427_v24 = vld [vmem:[#allocation2 + $0x4a] sm:$0xff]  ;;  %v814_v28 = vld [vmem:[#allocation2 + $0x16] sm:$0xff]  ;;  %v823_v19 = vld [vmem:[#allocation2 + $0x5e] sm:$0xff] }
  0x2d   : > { %v433_v27 = vpack.c.bf16 %v428_v25, %v427_v24  ;;  %v577_v30 = vld [vmem:[#allocation2 + $0xc] sm:$0xff]  ;;  %v824_v32 = vpack.c.bf16 %v815_v29, %v814_v28  ;;  %v735_v34 = vld [vmem:[#allocation2 + $0x15] sm:$0xff]  ;;  %v354_v36 = vpack.c.bf16 %v427_v24, %v426_v15  ;;  %v580_v41 = vld [vmem:[#allocation2 + $0x24] sm:$0xff] }
  0x2e   : > { %1005 = vmatmul.msk.bf16.vlgmr.msrb.gmra.mxu1 %vm180_vm1, %v212_v43  ;;  %v587_v33 = vpack.c.bf16 %v578_v31, %v577_v30  ;;  %v745_v37 = vpack.c.bf16 %v736_v35, %v735_v34  ;;  %v816_v38 = vld [vmem:[#allocation2 + $0x26] sm:$0xff]  ;;  %v817_v39 = vld [vmem:[#allocation2 + $0x2e] sm:$0xff]  ;;  %v588_v43 = vpack.c.bf16 %v580_v41, %v579_v40  ;;  %v583_v0 = vld [vmem:[#allocation2 + $0x3c] sm:$0xff] }
  0x2f   : > { %v825_v42 = vpack.c.bf16 %v817_v39, %v816_v38  ;;  %v737_v44 = vld [vmem:[#allocation2 + $0x25] sm:$0xff]  ;;  %v738_v45 = vld [vmem:[#allocation2 + $0x2d] sm:$0xff]  ;;  %v739_v56 = vld [vmem:[#allocation2 + $0x35] sm:$0xff] }
  0x30   : > { %v746_v47 = vpack.c.bf16 %v738_v45, %v737_v44  ;;  %v581_v50 = vld [vmem:[#allocation2 + $0x2c] sm:$0xff]  ;;  %v582_v51 = vld [vmem:[#allocation2 + $0x34] sm:$0xff]  ;;  %v747_v61 = vpack.c.bf16 %v740_v57, %v739_v56  ;;  %v744_v31 = vld [vmem:[#allocation2 + $0x5d] sm:$0xff] }
  0x31   : > { %v820_v62 = vld [vmem:[#allocation2 + $0x46] sm:$0xff]  ;;  %v821_v63 = vld [vmem:[#allocation2 + $0x4e] sm:$0xff]  ;;  %v822_v18 = vld [vmem:[#allocation2 + $0x56] sm:$0xff] }
  0x32   : > { %v741_v10 = vld [vmem:[#allocation2 + $0x45] sm:$0xff]  ;;  %v742_v11 = vld [vmem:[#allocation2 + $0x4d] sm:$0xff]  ;;  %v743_v30 = vld [vmem:[#allocation2 + $0x55] sm:$0xff] }
  0x33   : > { %v585_v20 = vld [vmem:[#allocation2 + $0x4c] sm:$0xff]  ;;  %v586_v21 = vld [vmem:[#allocation2 + $0x54] sm:$0xff] }
  0x34   : > { %v591_v24 = vpack.c.bf16 %v586_v21, %v585_v20 }
  0x36   : > { %1003 = vmatmul.msk.bf16.gmra.mxu2 %vm180_vm1, %v231_v48  ;;  %v818_v48 = vld [vmem:[#allocation2 + $0x36] sm:$0xff] }
  0x38   : > { %1017 = vmatmul.msk.bf16.vlgmr.msrb.gmra.mxu3 %vm180_vm1, %v429_v49  ;;  %v819_v49 = vld [vmem:[#allocation2 + $0x3e] sm:$0xff] }
  0x39   : > { %v826_v52 = vpack.c.bf16 %v819_v49, %v818_v48 }
  0x3c   : > { %1024 = vmatmul.msk.bf16.gmra.mxu0 %vm180_vm1, %v509_v54  ;;  %v589_v54 = vpack.c.bf16 %v582_v51, %v581_v50 }
  0x3e   : > { %1006 = vmatmul.msk.bf16.gmra.mxu1 %vm180_vm1, %v213_v55 }
  0x46   : > { %1011 = vmatmul.msk.bf16.vlgmr.msrb.gmra.mxu2 %vm180_vm1, %v350_v59  ;;  %v667_v59 = vpack.c.bf16 %v581_v50, %v580_v41 }
  0x48   : > { %1018 = vmatmul.msk.bf16.gmra.mxu3 %vm180_vm1, %v430_v60 }
  0x4c   : > { %1025 = vmatmul.msk.bf16.gmra.mxu0 %vm180_vm1, %v510_v1  ;;  %v584_v1 = vld [vmem:[#allocation2 + $0x44] sm:$0xff] }
  0x4e   : > { %1007 = vmatmul.msk.bf16.gmra.mxu1 %vm180_vm1, %v214_v2  ;;  %v827_v2 = vpack.c.bf16 %v821_v63, %v820_v62 }
  0x56   : > { %1012 = vmatmul.msk.bf16.gmra.mxu2 %vm180_vm1, %v351_v5  ;;  %v590_v5 = vpack.c.bf16 %v584_v1, %v583_v0 }
  0x58   : > { %1019 = vmatmul.msk.bf16.gmra.mxu3 %vm180_vm1, %v431_v6 }
  0x5c   : > { %1026 = vmatmul.msk.bf16.gmra.mxu0 %vm180_vm1, %v511_v12 }
  0x5e   : > { %1008 = vmatmul.msk.bf16.gmra.mxu1 %vm180_vm1, %v215_v13  ;;  %v668_v13 = vpack.c.bf16 %v583_v0, %v582_v51 }
  0x66   : > { %1013 = vmatmul.msk.bf16.gmra.mxu2 %vm180_vm1, %v352_v16 }
  0x68   : > { %1020 = vmatmul.msk.bf16.gmra.mxu3 %vm180_vm1, %v432_v17  ;;  %v748_v17 = vpack.c.bf16 %v742_v11, %v741_v10 }
  0x6c   : > { %1027 = vmatmul.msk.bf16.gmra.mxu0 %vm180_vm1, %v512_v22  ;;  %v828_v22 = vpack.c.bf16 %v823_v19, %v822_v18 }
  0x6e   : > { %1009 = vmatmul.msk.bf16.gmra.mxu1 %vm180_vm1, %v216_v23 }
  0x76   : > { %1014 = vmatmul.msk.bf16.gmra.mxu2 %vm180_vm1, %v353_v26 }
  0x78   : > { %1021 = vmatmul.msk.bf16.gmra.mxu3 %vm180_vm1, %v433_v27 }
  0x7c   : > { %1047 = vmatmul.msk.bf16.vlgmr.msra.gmra.mxu0 %vm180_vm1, %v824_v32  ;;  %v669_v32 = vpack.c.bf16 %v585_v20, %v584_v1 }
  0x7e   : > { %1029 = vmatmul.msk.bf16.vlgmr.msra.gmra.mxu1 %vm180_vm1, %v587_v33 }
  0x86   : > { %1015 = vmatmul.msk.bf16.gmra.mxu2 %vm180_vm1, %v354_v36  ;;  %v749_v36 = vpack.c.bf16 %v744_v31, %v743_v30 }
  0x88   : > { %1041 = vmatmul.msk.bf16.vlgmr.msra.gmra.mxu3 %vm180_vm1, %v745_v37 }
  0x8c   : > { %1048 = vmatmul.msk.bf16.gmra.mxu0 %vm180_vm1, %v825_v42 }
  0x8e   : > { %1030 = vmatmul.msk.bf16.gmra.mxu1 %vm180_vm1, %v588_v43 }
  0x96   : > { %1035 = vmatmul.msk.bf16.vlgmr.msra.gmra.mxu2 %vm180_vm1, %v666_v46  ;;  %v665_v46 = vld [vmem:[#allocation2 + $0x5c] sm:$0xff] }
  0x97   : > { %v670_v49 = vpack.c.bf16 %v665_v46, %v586_v21 }
  0x98   : > { %1042 = vmatmul.msk.bf16.gmra.mxu3 %vm180_vm1, %v746_v47 }
  0x99   : > { %v263_v53 = vpop.f32.mrf.mxu0 }
  0x9b   : > { %v268_v55 = vpop.f32.mrf.mxu1 }
  0x9c   : > { %1049 = vmatmul.msk.bf16.gmra.mxu0 %vm180_vm1, %v826_v52 }
  0x9e   : > { %1031 = vmatmul.msk.bf16.gmra.mxu1 %vm180_vm1, %v589_v54 }
  0xa1   : > { %v265_v58 = vpop.f32.mrf.mxu0 }
  0xa3   : > { %v270_v60 = vpop.f32.mrf.mxu1 }
  0xa6   : > { %1036 = vmatmul.msk.bf16.gmra.mxu2 %vm180_vm1, %v667_v59 }
  0xa8   : > { %1043 = vmatmul.msk.bf16.gmra.mxu3 %vm180_vm1, %v747_v61 }
  0xa9   : > { %v273_v3 = vpop.f32.mrf.mxu2  ;;  %v542_v4 = vpop.f32.mrf.mxu0 }
  0xab   : > { %v1230_v6 = vpop.f32.mrf.mxu3  ;;  %v315_v7 = vpop.f32.mrf.mxu1 }
  0xac   : > { %v316_v8 = vadd.f32 %v315_v7, %v263_v53  ;;  %1050 = vmatmul.msk.bf16.gmra.mxu0 %vm180_vm1, %v827_v2 }
  0xae   : > { %1032 = vmatmul.msk.bf16.gmra.mxu1 %vm180_vm1, %v590_v5 }
  0xb1   : > { %v275_v9 = vpop.f32.mrf.mxu2  ;;  %v544_v12 = vpop.f32.mrf.mxu0 }
  0xb3   : > { %v1234_v14 = vpop.f32.mrf.mxu3  ;;  %v317_v15 = vpop.f32.mrf.mxu1 }
  0xb4   : > { %v318_v16 = vadd.f32 %v317_v15, %v265_v58 }
  0xb6   : > { %1037 = vmatmul.msk.bf16.gmra.mxu2 %vm180_vm1, %v668_v13 }
  0xb8   : > { %1044 = vmatmul.msk.bf16.gmra.mxu3 %vm180_vm1, %v748_v17 }
  0xb9   : > { %v278_v23 = vpop.f32.mrf.mxu2  ;;  %v547_v25 = vpop.f32.mrf.mxu0 }
  0xbb   : > { %v320_v26 = vpop.f32.mrf.mxu1  ;;  %v463_v27 = vpop.f32.mrf.mxu3 }
  0xbc   : > { %v321_v28 = vadd.f32 %v320_v26, %v268_v55  ;;  %1051 = vmatmul.msk.bf16.gmra.mxu0 %vm180_vm1, %v828_v22 }
  0xbe   : > { %1033 = vmatmul.msk.bf16.gmra.mxu1 %vm180_vm1, %v591_v24 }
  0xc1   : > { %v280_v29 = vpop.f32.mrf.mxu2  ;;  %v549_v37 = vpop.f32.mrf.mxu0 }
  0xc3   : > { %v322_v33 = vpop.f32.mrf.mxu1  ;;  %v465_v34 = vpop.f32.mrf.mxu3 }
  0xc4   : > { %v323_v35 = vadd.f32 %v322_v33, %v270_v60 }
  0xc6   : > { %1038 = vmatmul.msk.bf16.gmra.mxu2 %vm180_vm1, %v669_v32 }
  0xc8   : > { %1045 = vmatmul.msk.bf16.gmra.mxu3 %vm180_vm1, %v749_v36 }
  0xc9   : > { %v384_v38 = vpop.f32.mrf.mxu2  ;;  %v552_v44 = vpop.f32.mrf.mxu0 }
  0xca   : > { %v409_v39 = vadd.f32 %v384_v38, %v316_v8 }
  0xcb   : > { %v325_v40 = vpop.f32.mrf.mxu1  ;;  %v468_v41 = vpop.f32.mrf.mxu3 }
  0xcc   : > { %v488_v42 = vadd.f32 %v463_v27, %v409_v39  ;;  %v326_v43 = vadd.f32 %v325_v40, %v273_v3 }
  0xce   : > { %v1242_v45 = vadd.f32 %v542_v4, %v488_v42 }
  0xd1   : > { %v386_v47 = vpop.f32.mrf.mxu2  ;;  %v554_v55 = vpop.f32.mrf.mxu0 }
  0xd2   : > { %v410_v48 = vadd.f32 %v386_v47, %v318_v16 }
  0xd3   : > { %v327_v50 = vpop.f32.mrf.mxu1  ;;  %v470_v51 = vpop.f32.mrf.mxu3 }
  0xd4   : > { %v489_v52 = vadd.f32 %v465_v34, %v410_v48  ;;  %v328_v53 = vadd.f32 %v327_v50, %v275_v9 }
  0xd6   : > { %1039 = vmatmul.msk.bf16.gmra.mxu2 %vm180_vm1, %v670_v49  ;;  %v1245_v54 = vadd.f32 %v544_v12, %v489_v52 }
  0xd9   : > { %v389_v56 = vpop.f32.mrf.mxu2  ;;  %v557_v1 = vpop.f32.mrf.mxu0 }
  0xda   : > { %v411_v57 = vadd.f32 %v389_v56, %v321_v28 }
  0xdb   : > { %v330_v58 = vpop.f32.mrf.mxu1  ;;  %v473_v59 = vpop.f32.mrf.mxu3 }
  0xdc   : > { %v490_v60 = vadd.f32 %v468_v41, %v411_v57  ;;  %v331_v61 = vadd.f32 %v330_v58, %v278_v23 }
  0xde   : > { %v1247_v62 = vadd.f32 %v547_v25, %v490_v60 }
  0xe1   : > { %v391_v63 = vpop.f32.mrf.mxu2  ;;  %v559_v15 = vpop.f32.mrf.mxu0 }
  0xe2   : > { %v412_v0 = vadd.f32 %v391_v63, %v323_v35 }
  0xe3   : > { %v332_v2 = vpop.f32.mrf.mxu1  ;;  %v475_v3 = vpop.f32.mrf.mxu3 }
  0xe4   : > { %v491_v4 = vadd.f32 %v470_v51, %v412_v0  ;;  %v333_v5 = vadd.f32 %v332_v2, %v280_v29 }
  0xe6   : > { %v1249_v7 = vadd.f32 %v549_v37, %v491_v4 }
  0xe9   : > { %v394_v8 = vpop.f32.mrf.mxu2  ;;  %v562_v24 = vpop.f32.mrf.mxu0 }
  0xea   : > { %v413_v9 = vadd.f32 %v394_v8, %v326_v43 }
  0xeb   : > { %v335_v10 = vpop.f32.mrf.mxu1  ;;  %v478_v11 = vpop.f32.mrf.mxu3 }
  0xec   : > { %v492_v12 = vadd.f32 %v473_v59, %v413_v9  ;;  %v336_v13 = vadd.f32 %v335_v10, %v1230_v6 }
  0xee   : > { %v1252_v16 = vadd.f32 %v552_v44, %v492_v12 }
  0xf1   : > { %v396_v17 = vpop.f32.mrf.mxu2  ;;  %v564_v30 = vpop.f32.mrf.mxu0 }
  0xf2   : > { %v414_v18 = vadd.f32 %v396_v17, %v328_v53 }
  0xf3   : > { %v337_v19 = vpop.f32.mrf.mxu1  ;;  %v480_v20 = vpop.f32.mrf.mxu3 }
  0xf4   : > { %v493_v21 = vadd.f32 %v475_v3, %v414_v18  ;;  %v338_v22 = vadd.f32 %v337_v19, %v1234_v14 }
  0xf6   : > { %v1255_v23 = vadd.f32 %v554_v55, %v493_v21  ;;  %v1269_v55 = vld [vmem:[%s1330_s2] ss:$0 sm:$0xff] }
  0xf9   : > { %v399_v25 = vpop.f32.mrf.mxu2  ;;  %v858_v38 = vpop.f32.mrf.mxu0 }
  0xfa   : > { %v415_v26 = vadd.f32 %v399_v25, %v331_v61 }
  0xfb   : > { %v483_v27 = vpop.f32.mrf.mxu3  ;;  %v621_v32 = vpop.f32.mrf.mxu1 }
  0xfc   : > { %v494_v28 = vadd.f32 %v478_v11, %v415_v26  ;;  %v646_v50 = vadd.f32 %v621_v32, %v1242_v45 }
  0xfe   : > { %v1257_v29 = vadd.f32 %v557_v1, %v494_v28 }
 0x101   : > { %v401_v6 = vpop.f32.mrf.mxu2  ;;  %v860_v47 = vpop.f32.mrf.mxu0 }
 0x102   : > { %v416_v31 = vadd.f32 %v401_v6, %v333_v5 }
 0x103   : > { %v485_v33 = vpop.f32.mrf.mxu3  ;;  %v623_v40 = vpop.f32.mrf.mxu1 }
 0x104   : > { %v495_v34 = vadd.f32 %v480_v20, %v416_v31  ;;  %v647_v58 = vadd.f32 %v623_v40, %v1245_v54 }
 0x106   : > { %v1259_v35 = vadd.f32 %v559_v15, %v495_v34 }
 0x109   : > { %v404_v36 = vpop.f32.mrf.mxu2  ;;  %v863_v45 = vpop.f32.mrf.mxu0 }
 0x10a   : > { %v417_v37 = vadd.f32 %v404_v36, %v336_v13 }
 0x10b   : > { %v779_v14 = vpop.f32.mrf.mxu3  ;;  %v626_v49 = vpop.f32.mrf.mxu1 }
 0x10c   : > { %v496_v39 = vadd.f32 %v483_v27, %v417_v37  ;;  %v648_v3 = vadd.f32 %v626_v49, %v1247_v62 }
 0x10e   : > { %v1261_v41 = vadd.f32 %v562_v24, %v496_v39 }
 0x111   : > { %v406_v42 = vpop.f32.mrf.mxu2  ;;  %v865_v8 = vpop.f32.mrf.mxu0 }
 0x112   : > { %v418_v43 = vadd.f32 %v406_v42, %v338_v22 }
 0x113   : > { %v781_v44 = vpop.f32.mrf.mxu3  ;;  %v628_v60 = vpop.f32.mrf.mxu1 }
 0x114   : > { %v497_v46 = vadd.f32 %v485_v33, %v418_v43  ;;  %v649_v12 = vadd.f32 %v628_v60, %v1249_v7 }
 0x116   : > { %v1263_v48 = vadd.f32 %v564_v30, %v497_v46 }
 0x119   : > { %v700_v51 = vpop.f32.mrf.mxu2  ;;  %v868_v18 = vpop.f32.mrf.mxu0 }
 0x11a   : > { %v725_v52 = vadd.f32 %v700_v51, %v646_v50 }
 0x11b   : > { %v784_v56 = vpop.f32.mrf.mxu3  ;;  %v631_v9 = vpop.f32.mrf.mxu1 }
 0x11c   : > { %v804_v53 = vadd.f32 %v779_v14, %v725_v52  ;;  %v650_v22 = vadd.f32 %v631_v9, %v1252_v16 }
 0x11e   : > { %v883_v57 = vadd.f32 %v858_v38, %v804_v53 }
 0x120   : > { %v897_v59 = vadd.f32 %v1269_v55, %v883_v57 }
 0x121   : > { %v702_v61 = vpop.f32.mrf.mxu2  ;;  %v870_v28 = vpop.f32.mrf.mxu0 }
 0x122   : > { %908 = vst.msk [vmem:[%s1276_s15] sm:$0xff] %vm907_vm2, %v897_v59  ;;  %v726_v63 = vadd.f32 %v702_v61, %v647_v58 }
 0x123   : > { %v786_v2 = vpop.f32.mrf.mxu3  ;;  %v633_v20 = vpop.f32.mrf.mxu1 }
 0x124   : > { %v805_v0 = vadd.f32 %v781_v44, %v726_v63  ;;  %v651_v31 = vadd.f32 %v633_v20, %v1255_v23 }
 0x126   : > { %v884_v1 = vadd.f32 %v860_v47, %v805_v0 }
 0x128   : > { %v898_v4 = vadd.f32 %v1269_v55, %v884_v1 }
 0x129   : > { %v705_v5 = vpop.f32.mrf.mxu2  ;;  %v873_v14 = vpop.f32.mrf.mxu0 }
 0x12a   : > { %1052 = vst.msk [vmem:[%s1276_s15 + $0x6] sm:$0xfc] %vm910_vm3, %v898_v4  ;;  %v727_v54 = vadd.f32 %v705_v5, %v648_v3 }
 0x12b   : > { %v789_v62 = vpop.f32.mrf.mxu3  ;;  %v636_v30 = vpop.f32.mrf.mxu1 }
 0x12c   : > { %v806_v10 = vadd.f32 %v784_v56, %v727_v54  ;;  %v652_v38 = vadd.f32 %v636_v30, %v1257_v29 }
 0x12e   : > { %v885_v11 = vadd.f32 %v863_v45, %v806_v10 }
 0x130   : > { %v899_v13 = vadd.f32 %v1269_v55, %v885_v11 }
 0x131   : > { %v707_v15 = vpop.f32.mrf.mxu2  ;;  %v875_v50 = vpop.f32.mrf.mxu0 }
 0x132   : > { %1053 = vst.msk [vmem:[%s1276_s15 + $0xe] sm:$0x3] %vm912_vm4, %v899_v13  ;;  %v728_v17 = vadd.f32 %v707_v15, %v649_v12 }
 0x133   : > { %1054 = vst.msk [vmem:[%s1276_s15 + $0xc] sm:$0xf0] %vm915_vm5, %v899_v13  ;;  %v791_v26 = vpop.f32.mrf.mxu3  ;;  %v638_v40 = vpop.f32.mrf.mxu1 }
 0x134   : > { %v807_v19 = vadd.f32 %v786_v2, %v728_v17  ;;  %v653_v47 = vadd.f32 %v638_v40, %v1259_v35 }
 0x136   : > { %v886_v21 = vadd.f32 %v865_v8, %v807_v19 }
 0x138   : > { %v900_v7 = vadd.f32 %v1269_v55, %v886_v21 }
 0x139   : > { %v710_v24 = vpop.f32.mrf.mxu2  ;;  %v878_v60 = vpop.f32.mrf.mxu0 }
 0x13a   : > { %1055 = vst.msk [vmem:[%s1276_s15 + $0x14] sm:$0xf] %vm917_vm6, %v900_v7  ;;  %v729_v25 = vadd.f32 %v710_v24, %v650_v22 }
 0x13b   : > { %1056 = vst.msk [vmem:[%s1276_s15 + $0x12] sm:$0xc0] %vm920_vm7, %v900_v7  ;;  %v794_v36 = vpop.f32.mrf.mxu3  ;;  %v641_v52 = vpop.f32.mrf.mxu1 }
 0x13c   : > { %v808_v27 = vadd.f32 %v789_v62, %v729_v25  ;;  %v654_v57 = vadd.f32 %v641_v52, %v1261_v41 }
 0x13e   : > { %v887_v6 = vadd.f32 %v868_v18, %v808_v27 }
 0x140   : > { %v901_v16 = vadd.f32 %v1269_v55, %v887_v6 }
 0x141   : > { %v712_v32 = vpop.f32.mrf.mxu2  ;;  %v880_v8 = vpop.f32.mrf.mxu0 }
 0x142   : > { %1057 = vst.msk [vmem:[%s1276_s15 + $0x1a] sm:$0x3f] %vm922_vm8, %v901_v16  ;;  %v730_v33 = vadd.f32 %v712_v32, %v651_v31 }
 0x143   : > { %v796_v46 = vpop.f32.mrf.mxu3  ;;  %v643_v63 = vpop.f32.mrf.mxu1 }
 0x144   : > { %v809_v34 = vadd.f32 %v791_v26, %v730_v33  ;;  %v655_v1 = vadd.f32 %v643_v63, %v1263_v48 }
 0x146   : > { %v888_v37 = vadd.f32 %v870_v28, %v809_v34 }
 0x148   : > { %v902_v39 = vadd.f32 %v1269_v55, %v888_v37 }
 0x149   : > { %v715_v42 = vpop.f32.mrf.mxu2 }
 0x14a   : > { %1058 = vst.msk [vmem:[%s1276_s15 + $0x20] sm:$0xff] %vm907_vm2, %v902_v39  ;;  %v731_v23 = vadd.f32 %v715_v42, %v652_v38 }
 0x14b   : > { %v799_v58 = vpop.f32.mrf.mxu3 }
 0x14c   : > { %v810_v43 = vadd.f32 %v794_v36, %v731_v23 }
 0x14e   : > { %v889_v44 = vadd.f32 %v873_v14, %v810_v43 }
 0x150   : > { %v903_v49 = vadd.f32 %v1269_v55, %v889_v44 }
 0x151   : > { %v717_v51 = vpop.f32.mrf.mxu2 }
 0x152   : > { %1059 = vst.msk [vmem:[%s1276_s15 + $0x26] sm:$0xfc] %vm910_vm3, %v903_v49  ;;  %v732_v29 = vadd.f32 %v717_v51, %v653_v47 }
 0x153   : > { %v801_v4 = vpop.f32.mrf.mxu3 }
 0x154   : > { %v811_v53 = vadd.f32 %v796_v46, %v732_v29 }
 0x156   : > { %v890_v56 = vadd.f32 %v875_v50, %v811_v53 }
 0x158   : > { %v904_v45 = vadd.f32 %v1269_v55, %v890_v56 }
 0x159   : > { %v720_v59 = vpop.f32.mrf.mxu2 }
 0x15a   : > { %1060 = vst.msk [vmem:[%s1276_s15 + $0x2e] sm:$0x3] %vm912_vm4, %v904_v45  ;;  %v733_v35 = vadd.f32 %v720_v59, %v654_v57 }
 0x15b   : > { %1061 = vst.msk [vmem:[%s1276_s15 + $0x2c] sm:$0xf0] %vm915_vm5, %v904_v45 }
 0x15c   : > { %v812_v61 = vadd.f32 %v799_v58, %v733_v35 }
 0x15e   : > { %v891_v0 = vadd.f32 %v878_v60, %v812_v61 }
 0x160   : > { %v905_v2 = vadd.f32 %v1269_v55, %v891_v0 }
 0x161   : > { %v722_v41 = vpop.f32.mrf.mxu2 }
 0x162   : > { %1062 = vst.msk [vmem:[%s1276_s15 + $0x34] sm:$0xf] %vm917_vm6, %v905_v2  ;;  %v734_v3 = vadd.f32 %v722_v41, %v655_v1 }
 0x163   : > { %1063 = vst.msk [vmem:[%s1276_s15 + $0x32] sm:$0xc0] %vm920_vm7, %v905_v2 }
 0x164   : > { %v813_v5 = vadd.f32 %v801_v4, %v734_v3 }
 0x166   : > { %v892_v54 = vadd.f32 %v880_v8, %v813_v5 }
 0x168   : > { %v906_v9 = vadd.f32 %v1269_v55, %v892_v54 }
 0x16a   : > { %1064 = vst.msk [vmem:[%s1276_s15 + $0x3a] sm:$0x3f] %vm922_vm8, %v906_v9 }
 0x16b PF: > { %s13_s12 = sadd.s32 1, %s1088_s12  }
 0x16c   : > { %p10_p4 = scmp.ge.s32.totalorder %s13_s12, 4  }
 0x16e   :  { %12 = sbr.rel (!%p10_p4) target bundleno = 1 (0x1), region = 77 }

</bundles_post_ra>
